<compile_context>
chip_gen: v5e
topology: v5e:2x2
jax: 0.10.0
libtpu: 0.0.40
codegen_flags: <defaults>
</compile_context>

<pallas_src>
import functools

import jax
import jax.numpy as jnp
from jax.experimental import pallas as pl
from jax.experimental.pallas import tpu as pltpu


def _round_up(x, m):
    return (x + m - 1) // m * m


# -----------------------------------------------------------------------------
# Pallas matmul (conv hot path): bf16 MXU operands, f32 math, fused bias +
# optional activation, lane-dense (128-multiple) output columns.
# -----------------------------------------------------------------------------
def _mm_kernel_single(a_ref, b_ref, bias_ref, o_ref, *, activation):
    y = jnp.dot(a_ref[...], b_ref[...], preferred_element_type=jnp.float32)
    y = y + bias_ref[...]
    if activation == "relu":
        y = jnp.maximum(y, 0.0)
    elif activation == "tanh":
        y = jnp.tanh(y)
    o_ref[...] = y.astype(o_ref.dtype)


def _mm_kernel_multi(a_ref, b_ref, bias_ref, o_ref, acc_ref, *, k_steps, activation):
    k = pl.program_id(2)

    @pl.when(k == 0)
    def _():
        acc_ref[...] = jnp.zeros_like(acc_ref)

    acc_ref[...] += jnp.dot(a_ref[...], b_ref[...],
                            preferred_element_type=jnp.float32)

    @pl.when(k == k_steps - 1)
    def _():
        y = acc_ref[...] + bias_ref[...]
        if activation == "relu":
            y = jnp.maximum(y, 0.0)
        elif activation == "tanh":
            y = jnp.tanh(y)
        o_ref[...] = y.astype(o_ref.dtype)


def pallas_matmul(a, b, bias=None, activation=None, out_dtype=jnp.bfloat16):
    """(M,K) @ (K,N) + bias [+ relu/tanh].  bf16 operands, f32 accumulation."""
    M, K = a.shape
    K2, N = b.shape
    assert K == K2
    if bias is None:       # not hit in this network (all convs carry a bias)
        bias = jnp.zeros((N,), jnp.float32)

    a = a.astype(jnp.bfloat16)
    b = b.astype(jnp.bfloat16)

    Mp = _round_up(M, 128)
    # >=2 blocks on the parallel M axis when possible (v7x dual-TC), else 256 tiles.
    tm = 256 if (Mp % 256 == 0 and Mp // 256 >= 2) else 128
    Mp = _round_up(M, tm)

    Np = _round_up(N, 128)            # lane-dense output columns
    tn = 256 if Np % 256 == 0 else 128

    bias_p = jnp.pad(bias.astype(jnp.float32), (0, Np - N)).reshape(1, Np)

    if K <= 1024:
        # Fast path: single full-K block, no accumulator scratch, 2-D grid.
        a_p = jnp.pad(a, ((0, Mp - M), (0, 0)))
        b_p = jnp.pad(b, ((0, 0), (0, Np - N)))
        out = pl.pallas_call(
            functools.partial(_mm_kernel_single, activation=activation),
            out_shape=jax.ShapeDtypeStruct((Mp, Np), out_dtype),
            grid=(Mp // tm, Np // tn),
            in_specs=[
                pl.BlockSpec((tm, K), lambda i, j: (i, 0)),
                pl.BlockSpec((K, tn), lambda i, j: (0, j)),
                pl.BlockSpec((1, tn), lambda i, j: (0, j)),
            ],
            out_specs=pl.BlockSpec((tm, tn), lambda i, j: (i, j)),
            compiler_params=pltpu.CompilerParams(
                dimension_semantics=("parallel", "parallel")),
        )(a_p, b_p, bias_p)
    else:
        tk = 512
        Kp = _round_up(K, tk)
        a_p = jnp.pad(a, ((0, Mp - M), (0, Kp - K)))
        b_p = jnp.pad(b, ((0, Kp - K), (0, Np - N)))
        grid = (Mp // tm, Np // tn, Kp // tk)
        out = pl.pallas_call(
            functools.partial(_mm_kernel_multi, k_steps=grid[2],
                              activation=activation),
            out_shape=jax.ShapeDtypeStruct((Mp, Np), out_dtype),
            grid=grid,
            in_specs=[
                pl.BlockSpec((tm, tk), lambda i, j, k: (i, k)),
                pl.BlockSpec((tk, tn), lambda i, j, k: (k, j)),
                pl.BlockSpec((1, tn), lambda i, j, k: (0, j)),
            ],
            out_specs=pl.BlockSpec((tm, tn), lambda i, j, k: (i, j)),
            scratch_shapes=[pltpu.VMEM((tm, tn), jnp.float32)],
            compiler_params=pltpu.CompilerParams(
                dimension_semantics=("parallel", "parallel", "arbitrary")),
        )(a_p, b_p, bias_p)
    return out[:M, :N]


# -----------------------------------------------------------------------------
# InstanceNorm (+ optional ReLU), per-sample blocks, bf16 I/O, f32 stats.
# -----------------------------------------------------------------------------
def _in_kernel(x_ref, o_ref, *, eps, relu):
    x = x_ref[...].astype(jnp.float32)                       # (1, HW, C)
    mean = jnp.mean(x, axis=1, keepdims=True)
    var = jnp.mean((x - mean) ** 2, axis=1, keepdims=True)   # biased, like PyTorch
    y = (x - mean) * jax.lax.rsqrt(var + eps)
    if relu:
        y = jnp.maximum(y, 0.0)
    o_ref[...] = y.astype(o_ref.dtype)


def instance_norm_nhwc(x, relu=False, eps=1e-5):
    """nn.InstanceNorm2d(affine=False) [+ ReLU], NHWC bf16 in/out."""
    # TODO(synk): tile HW (two-pass stats) so per-sample blocks stay under the
    # scoped-VMEM limit (16/32/32 MiB on v5e/v6e/v7x) at realistic resolutions.
    N, H, W, C = x.shape
    HW = H * W
    y = pl.pallas_call(
        functools.partial(_in_kernel, eps=eps, relu=relu),
        out_shape=jax.ShapeDtypeStruct((N, HW, C), jnp.bfloat16),
        grid=(N,),
        in_specs=[pl.BlockSpec((1, HW, C), lambda n: (n, 0, 0))],
        out_specs=pl.BlockSpec((1, HW, C), lambda n: (n, 0, 0)),
        compiler_params=pltpu.CompilerParams(dimension_semantics=("parallel",)),
    )(x.reshape(N, HW, C).astype(jnp.bfloat16))
    return y.reshape(N, H, W, C)


# -----------------------------------------------------------------------------
# Fully fused CBAM tail: IN -> channel attention (pool + shared MLP + gate)
# -> spatial attention (mean/max over C + 7x7 stencil + gate) -> residual add.
# One kernel launch per ResNet-CBAM block, grid over batch.
# -----------------------------------------------------------------------------
def _cbam_tail_kernel(x_ref, xin_ref, w1_ref, w2_ref, saw_ref, o_ref, *, eps):
    x = x_ref[0].astype(jnp.float32)                         # (H, W, C) conv2 output
    H, W, C = x.shape

    # InstanceNorm (affine=False)
    mean = jnp.mean(x, axis=(0, 1), keepdims=True)
    var = jnp.mean((x - mean) ** 2, axis=(0, 1), keepdims=True)
    y = (x - mean) * jax.lax.rsqrt(var + eps)

    # Channel attention: global avg/max pool + shared MLP (no bias) + sigmoid.
    avg = jnp.mean(y, axis=(0, 1))[None, :]                  # (1, C)
    mx = jnp.max(y, axis=(0, 1))[None, :]                    # (1, C)
    pooled = jnp.concatenate([avg, mx], axis=0)              # (2, C)
    h = jnp.maximum(jnp.dot(pooled, w1_ref[...],
                            preferred_element_type=jnp.float32), 0.0)
    z = jnp.dot(h, w2_ref[...], preferred_element_type=jnp.float32)   # (2, C)
    ca = jax.nn.sigmoid(z[0:1] + z[1:2])                     # (1, C)
    yg = y * ca[None, :, :]                                  # channel-gated (H, W, C)

    # Spatial attention: [mean, max] over C -> 7x7 conv stencil -> sigmoid.
    s_avg = jnp.mean(yg, axis=2)                             # (H, W)
    s_max = jnp.max(yg, axis=2)                              # (H, W)

    def pad3(m):
        zr = jnp.zeros((3, W), jnp.float32)
        m = jnp.concatenate([zr, m, zr], axis=0)             # (H+6, W)
        zc = jnp.zeros((H + 6, 3), jnp.float32)
        return jnp.concatenate([zc, m, zc], axis=1)          # (H+6, W+6)

    pa = pad3(s_avg)
    pm = pad3(s_max)
    sa = jnp.zeros((H, W), jnp.float32)
    for di in range(7):
        for dj in range(7):
            idx = di * 7 + dj
            sa = (sa
                  + pa[di:di + H, dj:dj + W] * saw_ref[0, idx]
                  + pm[di:di + H, dj:dj + W] * saw_ref[1, idx])
    gate = jax.nn.sigmoid(sa)[:, :, None]                    # (H, W, 1)

    out = xin_ref[0].astype(jnp.float32) + yg * gate         # residual add
    o_ref[...] = out[None].astype(o_ref.dtype)


def cbam_tail(conv2_out, x_in, ca_w1, ca_w2, sa_w, eps=1e-5):
    N, H, W, C = conv2_out.shape
    Cr = ca_w1.shape[1]
    saw = sa_w.reshape(2, 49).astype(jnp.float32)            # (cin, ki*7+kj) in SMEM
    out = pl.pallas_call(
        functools.partial(_cbam_tail_kernel, eps=eps),
        out_shape=jax.ShapeDtypeStruct((N, H, W, C), jnp.bfloat16),
        grid=(N,),
        in_specs=[
            pl.BlockSpec((1, H, W, C), lambda n: (n, 0, 0, 0)),
            pl.BlockSpec((1, H, W, C), lambda n: (n, 0, 0, 0)),
            pl.BlockSpec((C, Cr), lambda n: (0, 0)),
            pl.BlockSpec((Cr, C), lambda n: (0, 0)),
            pl.BlockSpec(memory_space=pltpu.MemorySpace.SMEM),
        ],
        out_specs=pl.BlockSpec((1, H, W, C), lambda n: (n, 0, 0, 0)),
        compiler_params=pltpu.CompilerParams(dimension_semantics=("parallel",)),
    )(conv2_out.astype(jnp.bfloat16), x_in.astype(jnp.bfloat16),
      ca_w1.astype(jnp.float32), ca_w2.astype(jnp.float32), saw)
    return out


# -----------------------------------------------------------------------------
# Conv layers: host-side im2col (bf16) + the Pallas matmul hot path.
# -----------------------------------------------------------------------------
def _im2col_nhwc(x, kh, kw, stride):
    N, H, W, C = x.shape
    Ho = (H - kh) // stride + 1
    Wo = (W - kw) // stride + 1
    patches = []
    for i in range(kh):
        for j in range(kw):
            patches.append(x[:, i:i + stride * Ho:stride, j:j + stride * Wo:stride, :])
    p = jnp.stack(patches, axis=3)                           # (N, Ho, Wo, kh*kw, C)
    return p.reshape(N * Ho * Wo, kh * kw * C), Ho, Wo


def conv2d_nhwc(x, w, b=None, stride=1, padding=0, activation=None,
                out_dtype=jnp.bfloat16):
    """x: (N,H,W,Cin) bf16; w: (Cout,Cin,kh,kw) — PyTorch Conv2d (zero padding)."""
    # TODO(synk): replace host-side im2col with an in-kernel tap-loop conv
    # (per-tap shifted input windows) to remove the kh*kw HBM amplification.
    O, Cin, kh, kw = w.shape
    x = x.astype(jnp.bfloat16)
    if padding > 0:
        x = jnp.pad(x, ((0, 0), (padding, padding), (padding, padding), (0, 0)))
    N = x.shape[0]
    cols, Ho, Wo = _im2col_nhwc(x, kh, kw, stride)
    wmat = w.transpose(2, 3, 1, 0).reshape(kh * kw * Cin, O)
    out = pallas_matmul(cols, wmat, bias=b, activation=activation,
                        out_dtype=out_dtype)
    return out.reshape(N, Ho, Wo, O)


def conv_transpose2d_nhwc(x, w, b):
    """PyTorch ConvTranspose2d(k=3, stride=2, padding=1, output_padding=1).

    4-subkernel output-parity decomposition: the MXU only sees the real
    (non-zero) taps, ~4x fewer FLOPs / im2col bytes than zero-insertion.
      out[2i  ,2j  ] = x[i,j]                              . W[1,1]
      out[2i  ,2j+1] = x[i,j].W[1,2] + x[i,j+1].W[1,0]
      out[2i+1,2j  ] = x[i,j].W[2,1] + x[i+1,j].W[0,1]
      out[2i+1,2j+1] = x[i,j].W[2,2] + x[i,j+1].W[2,0] + x[i+1,j].W[0,2] + x[i+1,j+1].W[0,0]
    """
    Cin, Cout, kh, kw = w.shape
    assert (kh, kw) == (3, 3)
    N, H, W, _ = x.shape
    x = x.astype(jnp.bfloat16)
    xp = jnp.pad(x, ((0, 0), (0, 1), (0, 1), (0, 0)))        # zero row/col for "+1" taps

    wt = jnp.transpose(w, (1, 0, 2, 3))                      # (Cout, Cin, 3, 3)
    wf = jnp.flip(wt, axis=(2, 3))                           # wf[ki,kj] = wt[2-ki,2-kj]
    w_ee = wf[:, :, 1:2, 1:2]                                # 1x1 taps
    w_eo = wf[:, :, 1:2, 0::2]                               # 1x2 taps
    w_oe = wf[:, :, 0::2, 1:2]                               # 2x1 taps
    w_oo = wf[:, :, 0::2, 0::2]                              # 2x2 taps

    y_ee = conv2d_nhwc(x, w_ee, b)                           # (N, H, W, Cout)
    y_eo = conv2d_nhwc(xp[:, :H, :, :], w_eo, b)
    y_oe = conv2d_nhwc(xp[:, :, :W, :], w_oe, b)
    y_oo = conv2d_nhwc(xp, w_oo, b)

    top = jnp.stack([y_ee, y_eo], axis=3)                    # (N, H, W, 2, Cout)
    bot = jnp.stack([y_oe, y_oo], axis=3)
    y = jnp.stack([top, bot], axis=2)                        # (N, H, 2, W, 2, Cout)
    return y.reshape(N, 2 * H, 2 * W, Cout)


def reflect_pad_nhwc(x, p):
    return jnp.pad(x, ((0, 0), (p, p), (p, p), (0, 0)), mode="reflect")


# -----------------------------------------------------------------------------
# ResNet-CBAM block & generator
# -----------------------------------------------------------------------------
def resnet_cbam_block(x, p):
    y = reflect_pad_nhwc(x, 1)
    y = conv2d_nhwc(y, p["conv1_w"], p["conv1_b"])           # bias fused
    y = instance_norm_nhwc(y, relu=True)                     # IN + ReLU fused
    y = reflect_pad_nhwc(y, 1)
    y = conv2d_nhwc(y, p["conv2_w"], p["conv2_b"])
    # One fused kernel: IN + channel attn (pool/MLP/gate) + spatial attn
    # (pool/7x7 stencil/gate) + residual add.
    return cbam_tail(y, x, p["ca_w1"], p["ca_w2"], p["sa_w"])


def generator_forward(params, x, heatmap):
    x = jnp.concatenate([x, heatmap], axis=1)                # NCHW channel concat
    y = jnp.transpose(x, (0, 2, 3, 1)).astype(jnp.bfloat16)  # -> NHWC bf16 (once)
    # initial 7x7 block
    y = reflect_pad_nhwc(y, 3)
    y = conv2d_nhwc(y, params["init_w"], params["init_b"])
    y = instance_norm_nhwc(y, relu=True)
    # downsampling
    for p in params["down"]:
        y = conv2d_nhwc(y, p["w"], p["b"], stride=2, padding=1)
        y = instance_norm_nhwc(y, relu=True)
    # ResNet-CBAM blocks
    for p in params["blocks"]:
        y = resnet_cbam_block(y, p)
    # upsampling (parity-decomposed transposed conv)
    for p in params["up"]:
        y = conv_transpose2d_nhwc(y, p["w"], p["b"])
        y = instance_norm_nhwc(y, relu=True)
    # final 7x7 + tanh (tanh fused into the matmul epilogue)
    y = reflect_pad_nhwc(y, 3)
    y = conv2d_nhwc(y, params["final_w"], params["final_b"], activation="tanh",
                    out_dtype=jnp.float32)
    return jnp.transpose(y, (0, 3, 1, 2))                    # -> NCHW


def init_params(key, input_nc=1, heatmap_nc=1, output_nc=3, ngf=8,
                n_downsampling=2, n_blocks=2, ratio=16):
    keys = iter(jax.random.split(key, 256))

    def nrm(shape, scale=0.05):
        return scale * jax.random.normal(next(keys), shape, jnp.float32)

    in_total = input_nc + heatmap_nc
    params = {
        "init_w": nrm((ngf, in_total, 7, 7)),
        "init_b": nrm((ngf,)),
        "down": [],
        "blocks": [],
        "up": [],
    }
    for i in range(n_downsampling):
        ic, oc = ngf * 2 ** i, ngf * 2 ** (i + 1)
        params["down"].append({"w": nrm((oc, ic, 3, 3)), "b": nrm((oc,))})
    dim = ngf * 2 ** n_downsampling
    assert dim // ratio >= 1
    for _ in range(n_blocks):
        params["blocks"].append({
            "conv1_w": nrm((dim, dim, 3, 3)), "conv1_b": nrm((dim,)),
            "conv2_w": nrm((dim, dim, 3, 3)), "conv2_b": nrm((dim,)),
            # shared-MLP 1x1 convs stored as (Cin, Cout) matmul matrices, no bias
            "ca_w1": nrm((dim, dim // ratio)),
            "ca_w2": nrm((dim // ratio, dim)),
            # spatial-attention conv, PyTorch layout (1, 2, 7, 7), no bias
            "sa_w": nrm((1, 2, 7, 7)),
        })
    for i in range(n_downsampling):
        ic = ngf * 2 ** (n_downsampling - i)
        oc = ic // 2
        params["up"].append({"w": nrm((ic, oc, 3, 3)), "b": nrm((oc,))})
    params["final_w"] = nrm((output_nc, ngf, 7, 7))
    params["final_b"] = nrm((output_nc,))
    return params


if __name__ == "__main__":
    key = jax.random.PRNGKey(0)
    k_p, k_x, k_h = jax.random.split(key, 3)

    # small config consistent with the module: input_nc=1, heatmap_nc=1,
    # output_nc=3, ngf=8, n_downsampling=2, n_blocks=2 (bottleneck dim=32, ratio=16)
    params = init_params(k_p, input_nc=1, heatmap_nc=1, output_nc=3,
                         ngf=8, n_downsampling=2, n_blocks=2)

    B, H, W = 2, 16, 16
    x = jax.random.normal(k_x, (B, 1, H, W), jnp.float32)
    heatmap = jax.random.normal(k_h, (B, 1, H, W), jnp.float32)

    fwd = jax.jit(generator_forward)
    out = fwd(params, x, heatmap)
    out = jax.block_until_ready(out)

    assert out.shape == (B, 3, H, W), out.shape
    assert bool(jnp.all(jnp.isfinite(out)))
    print("KERNEL_OK")
</pallas_src>

<mosaic_0001>
module attributes {stable_mosaic.version = 11 : i64} {
  func.func @_mm_kernel_single(%arg0: i32, %arg1: i32, %arg2: memref<256x98xbf16, #tpu.memory_space<vmem>>, %arg3: memref<98x128xbf16, #tpu.memory_space<vmem>>, %arg4: memref<1x128xf32, #tpu.memory_space<vmem>>, %arg5: memref<256x128xbf16, #tpu.memory_space<vmem>>) attributes {dimension_semantics = [#tpu.dimension_semantics<parallel>, #tpu.dimension_semantics<parallel>], iteration_bounds = array<i64: 2, 1>, scalar_prefetch = 0 : i64, scratch_operands = 0 : i64, tpu.core_type = #tpu.core_type<tc>, window_params = [{transform_indices = @transform_0, window_bounds = array<i64: 256, 98>}, {transform_indices = @transform_1, window_bounds = array<i64: 98, 128>}, {transform_indices = @transform_2, window_bounds = array<i64: 1, 128>}, {transform_indices = @transform_3, window_bounds = array<i64: 256, 128>}]} {
    %c0 = arith.constant 0 : index
    %c0_0 = arith.constant 0 : index
    %0 = vector.load %arg2[%c0, %c0_0] : memref<256x98xbf16, #tpu.memory_space<vmem>>, vector<256x98xbf16>
    %c0_1 = arith.constant 0 : index
    %c0_2 = arith.constant 0 : index
    %1 = vector.load %arg3[%c0_1, %c0_2] : memref<98x128xbf16, #tpu.memory_space<vmem>>, vector<98x128xbf16>
    %cst = arith.constant dense<0.000000e+00> : vector<256x128xf32>
    %2 = tpu.matmul %0, %1, %cst {dimension_numbers = #tpu.dot_dimension_numbers<[1], [0], [0], [1], [0, 0, 1, 1], [], []>} : vector<256x98xbf16>, vector<98x128xbf16>, vector<256x128xf32> -> vector<256x128xf32>
    %c0_3 = arith.constant 0 : index
    %c0_4 = arith.constant 0 : index
    %3 = vector.load %arg4[%c0_3, %c0_4] : memref<1x128xf32, #tpu.memory_space<vmem>>, vector<1x128xf32>
    %4 = vector.broadcast %3 : vector<1x128xf32> to vector<256x128xf32>
    %5 = arith.addf %2, %4 : vector<256x128xf32>
    %6 = arith.truncf %5 : vector<256x128xf32> to vector<256x128xbf16>
    %c0_5 = arith.constant 0 : index
    %c0_6 = arith.constant 0 : index
    %7 = vector.load %arg5[%c0_5, %c0_6] : memref<256x128xbf16, #tpu.memory_space<vmem>>, vector<256x128xbf16>
    tpu.vector_store %arg5[%c0_5, %c0_6], %6 {strides = array<i32>} : memref<256x128xbf16, #tpu.memory_space<vmem>>, vector<256x128xbf16>,
    return
  }
  func.func @transform_0(%arg0: i32, %arg1: i32) -> (i32, i32) {
    %c0_i32 = arith.constant 0 : i32
    %c0_i32_0 = arith.constant 0 : i32
    return %arg0, %c0_i32 : i32, i32
  }
  func.func @transform_1(%arg0: i32, %arg1: i32) -> (i32, i32) {
    %c0_i32 = arith.constant 0 : i32
    %c0_i32_0 = arith.constant 0 : i32
    return %c0_i32, %arg1 : i32, i32
  }
  func.func @transform_2(%arg0: i32, %arg1: i32) -> (i32, i32) {
    %c0_i32 = arith.constant 0 : i32
    %c0_i32_0 = arith.constant 0 : i32
    return %c0_i32, %arg1 : i32, i32
  }
  func.func @transform_3(%arg0: i32, %arg1: i32) -> (i32, i32) {
    %c0_i32 = arith.constant 0 : i32
    return %arg0, %arg1 : i32, i32
  }
}

module attributes {stable_mosaic.version = 11 : i64} {
  func.func @_in_kernel(%arg0: i32, %arg1: memref<1x256x8xbf16, #tpu.memory_space<vmem>>, %arg2: memref<1x256x8xbf16, #tpu.memory_space<vmem>>) attributes {dimension_semantics = [#tpu.dimension_semantics<parallel>], iteration_bounds = array<i64: 2>, scalar_prefetch = 0 : i64, scratch_operands = 0 : i64, tpu.core_type = #tpu.core_type<tc>, window_params = [{transform_indices = @transform_0, window_bounds = array<i64: 1, 256, 8>}, {transform_indices = @transform_1, window_bounds = array<i64: 1, 256, 8>}]} {
    %c0 = arith.constant 0 : index
    %c0_0 = arith.constant 0 : index
    %c0_1 = arith.constant 0 : index
    %0 = vector.load %arg1[%c0, %c0_0, %c0_1] : memref<1x256x8xbf16, #tpu.memory_space<vmem>>, vector<1x256x8xbf16>
    %1 = arith.extf %0 : vector<1x256x8xbf16> to vector<1x256x8xf32>
    %cst = arith.constant dense<0.000000e+00> : vector<1x8xf32>
    %2 = vector.multi_reduction <add>, %1, %cst [1] : vector<1x256x8xf32> to vector<1x8xf32>
    %3 = vector.shape_cast %2 : vector<1x8xf32> to vector<1x1x8xf32>
    %cst_2 = arith.constant 2.560000e+02 : f32
    %4 = vector.broadcast %cst_2 : f32 to vector<1x1x8xf32>
    %5 = arith.divf %3, %4 : vector<1x1x8xf32>
    %6 = vector.broadcast %5 : vector<1x1x8xf32> to vector<1x256x8xf32>
    %7 = arith.subf %1, %6 : vector<1x256x8xf32>
    %8 = arith.mulf %7, %7 : vector<1x256x8xf32>
    %cst_3 = arith.constant dense<0.000000e+00> : vector<1x8xf32>
    %9 = vector.multi_reduction <add>, %8, %cst_3 [1] : vector<1x256x8xf32> to vector<1x8xf32>
    %10 = vector.shape_cast %9 : vector<1x8xf32> to vector<1x1x8xf32>
    %cst_4 = arith.constant 2.560000e+02 : f32
    %11 = vector.broadcast %cst_4 : f32 to vector<1x1x8xf32>
    %12 = arith.divf %10, %11 : vector<1x1x8xf32>
    %13 = vector.broadcast %5 : vector<1x1x8xf32> to vector<1x256x8xf32>
    %14 = arith.subf %1, %13 : vector<1x256x8xf32>
    %cst_5 = arith.constant 9.99999974E-6 : f32
    %15 = vector.broadcast %cst_5 : f32 to vector<1x1x8xf32>
    %16 = arith.addf %12, %15 : vector<1x1x8xf32>
    %17 = math.rsqrt %16 : vector<1x1x8xf32>
    %18 = vector.broadcast %17 : vector<1x1x8xf32> to vector<1x256x8xf32>
    %19 = arith.mulf %14, %18 : vector<1x256x8xf32>
    %cst_6 = arith.constant 0.000000e+00 : f32
    %20 = vector.broadcast %cst_6 : f32 to vector<1x256x8xf32>
    %21 = arith.maximumf %19, %20 : vector<1x256x8xf32>
    %22 = arith.truncf %21 : vector<1x256x8xf32> to vector<1x256x8xbf16>
    %c0_7 = arith.constant 0 : index
    %c0_8 = arith.constant 0 : index
    %c0_9 = arith.constant 0 : index
    %23 = vector.load %arg2[%c0_7, %c0_8, %c0_9] : memref<1x256x8xbf16, #tpu.memory_space<vmem>>, vector<1x256x8xbf16>
    tpu.vector_store %arg2[%c0_7, %c0_8, %c0_9], %22 {strides = array<i32>} : memref<1x256x8xbf16, #tpu.memory_space<vmem>>, vector<1x256x8xbf16>,
    return
  }
  func.func @transform_0(%arg0: i32) -> (i32, i32, i32) {
    %c0_i32 = arith.constant 0 : i32
    %c0_i32_0 = arith.constant 0 : i32
    %c0_i32_1 = arith.constant 0 : i32
    return %arg0, %c0_i32, %c0_i32_0 : i32, i32, i32
  }
  func.func @transform_1(%arg0: i32) -> (i32, i32, i32) {
    %c0_i32 = arith.constant 0 : i32
    %c0_i32_0 = arith.constant 0 : i32
    %c0_i32_1 = arith.constant 0 : i32
    return %arg0, %c0_i32, %c0_i32_0 : i32, i32, i32
  }
}

module attributes {stable_mosaic.version = 11 : i64} {
  func.func @_mm_kernel_single(%arg0: i32, %arg1: i32, %arg2: memref<128x72xbf16, #tpu.memory_space<vmem>>, %arg3: memref<72x128xbf16, #tpu.memory_space<vmem>>, %arg4: memref<1x128xf32, #tpu.memory_space<vmem>>, %arg5: memref<128x128xbf16, #tpu.memory_space<vmem>>) attributes {dimension_semantics = [#tpu.dimension_semantics<parallel>, #tpu.dimension_semantics<parallel>], iteration_bounds = array<i64: 1, 1>, scalar_prefetch = 0 : i64, scratch_operands = 0 : i64, tpu.core_type = #tpu.core_type<tc>, window_params = [{transform_indices = @transform_0, window_bounds = array<i64: 128, 72>}, {transform_indices = @transform_1, window_bounds = array<i64: 72, 128>}, {transform_indices = @transform_2, window_bounds = array<i64: 1, 128>}, {transform_indices = @transform_3, window_bounds = array<i64: 128, 128>}]} {
    %c0 = arith.constant 0 : index
    %c0_0 = arith.constant 0 : index
    %0 = vector.load %arg2[%c0, %c0_0] : memref<128x72xbf16, #tpu.memory_space<vmem>>, vector<128x72xbf16>
    %c0_1 = arith.constant 0 : index
    %c0_2 = arith.constant 0 : index
    %1 = vector.load %arg3[%c0_1, %c0_2] : memref<72x128xbf16, #tpu.memory_space<vmem>>, vector<72x128xbf16>
    %cst = arith.constant dense<0.000000e+00> : vector<128x128xf32>
    %2 = tpu.matmul %0, %1, %cst {dimension_numbers = #tpu.dot_dimension_numbers<[1], [0], [0], [1], [0, 0, 1, 1], [], []>} : vector<128x72xbf16>, vector<72x128xbf16>, vector<128x128xf32> -> vector<128x128xf32>
    %c0_3 = arith.constant 0 : index
    %c0_4 = arith.constant 0 : index
    %3 = vector.load %arg4[%c0_3, %c0_4] : memref<1x128xf32, #tpu.memory_space<vmem>>, vector<1x128xf32>
    %4 = vector.broadcast %3 : vector<1x128xf32> to vector<128x128xf32>
    %5 = arith.addf %2, %4 : vector<128x128xf32>
    %6 = arith.truncf %5 : vector<128x128xf32> to vector<128x128xbf16>
    %c0_5 = arith.constant 0 : index
    %c0_6 = arith.constant 0 : index
    %7 = vector.load %arg5[%c0_5, %c0_6] : memref<128x128xbf16, #tpu.memory_space<vmem>>, vector<128x128xbf16>
    tpu.vector_store %arg5[%c0_5, %c0_6], %6 {strides = array<i32>} : memref<128x128xbf16, #tpu.memory_space<vmem>>, vector<128x128xbf16>,
    return
  }
  func.func @transform_0(%arg0: i32, %arg1: i32) -> (i32, i32) {
    %c0_i32 = arith.constant 0 : i32
    %c0_i32_0 = arith.constant 0 : i32
    return %arg0, %c0_i32 : i32, i32
  }
  func.func @transform_1(%arg0: i32, %arg1: i32) -> (i32, i32) {
    %c0_i32 = arith.constant 0 : i32
    %c0_i32_0 = arith.constant 0 : i32
    return %c0_i32, %arg1 : i32, i32
  }
  func.func @transform_2(%arg0: i32, %arg1: i32) -> (i32, i32) {
    %c0_i32 = arith.constant 0 : i32
    %c0_i32_0 = arith.constant 0 : i32
    return %c0_i32, %arg1 : i32, i32
  }
  func.func @transform_3(%arg0: i32, %arg1: i32) -> (i32, i32) {
    %c0_i32 = arith.constant 0 : i32
    return %arg0, %arg1 : i32, i32
  }
}

module attributes {stable_mosaic.version = 11 : i64} {
  func.func @_in_kernel(%arg0: i32, %arg1: memref<1x64x16xbf16, #tpu.memory_space<vmem>>, %arg2: memref<1x64x16xbf16, #tpu.memory_space<vmem>>) attributes {dimension_semantics = [#tpu.dimension_semantics<parallel>], iteration_bounds = array<i64: 2>, scalar_prefetch = 0 : i64, scratch_operands = 0 : i64, tpu.core_type = #tpu.core_type<tc>, window_params = [{transform_indices = @transform_0, window_bounds = array<i64: 1, 64, 16>}, {transform_indices = @transform_1, window_bounds = array<i64: 1, 64, 16>}]} {
    %c0 = arith.constant 0 : index
    %c0_0 = arith.constant 0 : index
    %c0_1 = arith.constant 0 : index
    %0 = vector.load %arg1[%c0, %c0_0, %c0_1] : memref<1x64x16xbf16, #tpu.memory_space<vmem>>, vector<1x64x16xbf16>
    %1 = arith.extf %0 : vector<1x64x16xbf16> to vector<1x64x16xf32>
    %cst = arith.constant dense<0.000000e+00> : vector<1x16xf32>
    %2 = vector.multi_reduction <add>, %1, %cst [1] : vector<1x64x16xf32> to vector<1x16xf32>
    %3 = vector.shape_cast %2 : vector<1x16xf32> to vector<1x1x16xf32>
    %cst_2 = arith.constant 6.400000e+01 : f32
    %4 = vector.broadcast %cst_2 : f32 to vector<1x1x16xf32>
    %5 = arith.divf %3, %4 : vector<1x1x16xf32>
    %6 = vector.broadcast %5 : vector<1x1x16xf32> to vector<1x64x16xf32>
    %7 = arith.subf %1, %6 : vector<1x64x16xf32>
    %8 = arith.mulf %7, %7 : vector<1x64x16xf32>
    %cst_3 = arith.constant dense<0.000000e+00> : vector<1x16xf32>
    %9 = vector.multi_reduction <add>, %8, %cst_3 [1] : vector<1x64x16xf32> to vector<1x16xf32>
    %10 = vector.shape_cast %9 : vector<1x16xf32> to vector<1x1x16xf32>
    %cst_4 = arith.constant 6.400000e+01 : f32
    %11 = vector.broadcast %cst_4 : f32 to vector<1x1x16xf32>
    %12 = arith.divf %10, %11 : vector<1x1x16xf32>
    %13 = vector.broadcast %5 : vector<1x1x16xf32> to vector<1x64x16xf32>
    %14 = arith.subf %1, %13 : vector<1x64x16xf32>
    %cst_5 = arith.constant 9.99999974E-6 : f32
    %15 = vector.broadcast %cst_5 : f32 to vector<1x1x16xf32>
    %16 = arith.addf %12, %15 : vector<1x1x16xf32>
    %17 = math.rsqrt %16 : vector<1x1x16xf32>
    %18 = vector.broadcast %17 : vector<1x1x16xf32> to vector<1x64x16xf32>
    %19 = arith.mulf %14, %18 : vector<1x64x16xf32>
    %cst_6 = arith.constant 0.000000e+00 : f32
    %20 = vector.broadcast %cst_6 : f32 to vector<1x64x16xf32>
    %21 = arith.maximumf %19, %20 : vector<1x64x16xf32>
    %22 = arith.truncf %21 : vector<1x64x16xf32> to vector<1x64x16xbf16>
    %c0_7 = arith.constant 0 : index
    %c0_8 = arith.constant 0 : index
    %c0_9 = arith.constant 0 : index
    %23 = vector.load %arg2[%c0_7, %c0_8, %c0_9] : memref<1x64x16xbf16, #tpu.memory_space<vmem>>, vector<1x64x16xbf16>
    tpu.vector_store %arg2[%c0_7, %c0_8, %c0_9], %22 {strides = array<i32>} : memref<1x64x16xbf16, #tpu.memory_space<vmem>>, vector<1x64x16xbf16>,
    return
  }
  func.func @transform_0(%arg0: i32) -> (i32, i32, i32) {
    %c0_i32 = arith.constant 0 : i32
    %c0_i32_0 = arith.constant 0 : i32
    %c0_i32_1 = arith.constant 0 : i32
    return %arg0, %c0_i32, %c0_i32_0 : i32, i32, i32
  }
  func.func @transform_1(%arg0: i32) -> (i32, i32, i32) {
    %c0_i32 = arith.constant 0 : i32
    %c0_i32_0 = arith.constant 0 : i32
    %c0_i32_1 = arith.constant 0 : i32
    return %arg0, %c0_i32, %c0_i32_0 : i32, i32, i32
  }
}

module attributes {stable_mosaic.version = 11 : i64} {
  func.func @_mm_kernel_single(%arg0: i32, %arg1: i32, %arg2: memref<128x144xbf16, #tpu.memory_space<vmem>>, %arg3: memref<144x128xbf16, #tpu.memory_space<vmem>>, %arg4: memref<1x128xf32, #tpu.memory_space<vmem>>, %arg5: memref<128x128xbf16, #tpu.memory_space<vmem>>) attributes {dimension_semantics = [#tpu.dimension_semantics<parallel>, #tpu.dimension_semantics<parallel>], iteration_bounds = array<i64: 1, 1>, scalar_prefetch = 0 : i64, scratch_operands = 0 : i64, tpu.core_type = #tpu.core_type<tc>, window_params = [{transform_indices = @transform_0, window_bounds = array<i64: 128, 144>}, {transform_indices = @transform_1, window_bounds = array<i64: 144, 128>}, {transform_indices = @transform_2, window_bounds = array<i64: 1, 128>}, {transform_indices = @transform_3, window_bounds = array<i64: 128, 128>}]} {
    %c0 = arith.constant 0 : index
    %c0_0 = arith.constant 0 : index
    %0 = vector.load %arg2[%c0, %c0_0] : memref<128x144xbf16, #tpu.memory_space<vmem>>, vector<128x144xbf16>
    %c0_1 = arith.constant 0 : index
    %c0_2 = arith.constant 0 : index
    %1 = vector.load %arg3[%c0_1, %c0_2] : memref<144x128xbf16, #tpu.memory_space<vmem>>, vector<144x128xbf16>
    %cst = arith.constant dense<0.000000e+00> : vector<128x128xf32>
    %2 = tpu.matmul %0, %1, %cst {dimension_numbers = #tpu.dot_dimension_numbers<[1], [0], [0], [1], [0, 0, 1, 1], [], []>} : vector<128x144xbf16>, vector<144x128xbf16>, vector<128x128xf32> -> vector<128x128xf32>
    %c0_3 = arith.constant 0 : index
    %c0_4 = arith.constant 0 : index
    %3 = vector.load %arg4[%c0_3, %c0_4] : memref<1x128xf32, #tpu.memory_space<vmem>>, vector<1x128xf32>
    %4 = vector.broadcast %3 : vector<1x128xf32> to vector<128x128xf32>
    %5 = arith.addf %2, %4 : vector<128x128xf32>
    %6 = arith.truncf %5 : vector<128x128xf32> to vector<128x128xbf16>
    %c0_5 = arith.constant 0 : index
    %c0_6 = arith.constant 0 : index
    %7 = vector.load %arg5[%c0_5, %c0_6] : memref<128x128xbf16, #tpu.memory_space<vmem>>, vector<128x128xbf16>
    tpu.vector_store %arg5[%c0_5, %c0_6], %6 {strides = array<i32>} : memref<128x128xbf16, #tpu.memory_space<vmem>>, vector<128x128xbf16>,
    return
  }
  func.func @transform_0(%arg0: i32, %arg1: i32) -> (i32, i32) {
    %c0_i32 = arith.constant 0 : i32
    %c0_i32_0 = arith.constant 0 : i32
    return %arg0, %c0_i32 : i32, i32
  }
  func.func @transform_1(%arg0: i32, %arg1: i32) -> (i32, i32) {
    %c0_i32 = arith.constant 0 : i32
    %c0_i32_0 = arith.constant 0 : i32
    return %c0_i32, %arg1 : i32, i32
  }
  func.func @transform_2(%arg0: i32, %arg1: i32) -> (i32, i32) {
    %c0_i32 = arith.constant 0 : i32
    %c0_i32_0 = arith.constant 0 : i32
    return %c0_i32, %arg1 : i32, i32
  }
  func.func @transform_3(%arg0: i32, %arg1: i32) -> (i32, i32) {
    %c0_i32 = arith.constant 0 : i32
    return %arg0, %arg1 : i32, i32
  }
}

module attributes {stable_mosaic.version = 11 : i64} {
  func.func @_in_kernel(%arg0: i32, %arg1: memref<1x16x32xbf16, #tpu.memory_space<vmem>>, %arg2: memref<1x16x32xbf16, #tpu.memory_space<vmem>>) attributes {dimension_semantics = [#tpu.dimension_semantics<parallel>], iteration_bounds = array<i64: 2>, scalar_prefetch = 0 : i64, scratch_operands = 0 : i64, tpu.core_type = #tpu.core_type<tc>, window_params = [{transform_indices = @transform_0, window_bounds = array<i64: 1, 16, 32>}, {transform_indices = @transform_1, window_bounds = array<i64: 1, 16, 32>}]} {
    %c0 = arith.constant 0 : index
    %c0_0 = arith.constant 0 : index
    %c0_1 = arith.constant 0 : index
    %0 = vector.load %arg1[%c0, %c0_0, %c0_1] : memref<1x16x32xbf16, #tpu.memory_space<vmem>>, vector<1x16x32xbf16>
    %1 = arith.extf %0 : vector<1x16x32xbf16> to vector<1x16x32xf32>
    %cst = arith.constant dense<0.000000e+00> : vector<1x32xf32>
    %2 = vector.multi_reduction <add>, %1, %cst [1] : vector<1x16x32xf32> to vector<1x32xf32>
    %3 = vector.shape_cast %2 : vector<1x32xf32> to vector<1x1x32xf32>
    %cst_2 = arith.constant 1.600000e+01 : f32
    %4 = vector.broadcast %cst_2 : f32 to vector<1x1x32xf32>
    %5 = arith.divf %3, %4 : vector<1x1x32xf32>
    %6 = vector.broadcast %5 : vector<1x1x32xf32> to vector<1x16x32xf32>
    %7 = arith.subf %1, %6 : vector<1x16x32xf32>
    %8 = arith.mulf %7, %7 : vector<1x16x32xf32>
    %cst_3 = arith.constant dense<0.000000e+00> : vector<1x32xf32>
    %9 = vector.multi_reduction <add>, %8, %cst_3 [1] : vector<1x16x32xf32> to vector<1x32xf32>
    %10 = vector.shape_cast %9 : vector<1x32xf32> to vector<1x1x32xf32>
    %cst_4 = arith.constant 1.600000e+01 : f32
    %11 = vector.broadcast %cst_4 : f32 to vector<1x1x32xf32>
    %12 = arith.divf %10, %11 : vector<1x1x32xf32>
    %13 = vector.broadcast %5 : vector<1x1x32xf32> to vector<1x16x32xf32>
    %14 = arith.subf %1, %13 : vector<1x16x32xf32>
    %cst_5 = arith.constant 9.99999974E-6 : f32
    %15 = vector.broadcast %cst_5 : f32 to vector<1x1x32xf32>
    %16 = arith.addf %12, %15 : vector<1x1x32xf32>
    %17 = math.rsqrt %16 : vector<1x1x32xf32>
    %18 = vector.broadcast %17 : vector<1x1x32xf32> to vector<1x16x32xf32>
    %19 = arith.mulf %14, %18 : vector<1x16x32xf32>
    %cst_6 = arith.constant 0.000000e+00 : f32
    %20 = vector.broadcast %cst_6 : f32 to vector<1x16x32xf32>
    %21 = arith.maximumf %19, %20 : vector<1x16x32xf32>
    %22 = arith.truncf %21 : vector<1x16x32xf32> to vector<1x16x32xbf16>
    %c0_7 = arith.constant 0 : index
    %c0_8 = arith.constant 0 : index
    %c0_9 = arith.constant 0 : index
    %23 = vector.load %arg2[%c0_7, %c0_8, %c0_9] : memref<1x16x32xbf16, #tpu.memory_space<vmem>>, vector<1x16x32xbf16>
    tpu.vector_store %arg2[%c0_7, %c0_8, %c0_9], %22 {strides = array<i32>} : memref<1x16x32xbf16, #tpu.memory_space<vmem>>, vector<1x16x32xbf16>,
    return
  }
  func.func @transform_0(%arg0: i32) -> (i32, i32, i32) {
    %c0_i32 = arith.constant 0 : i32
    %c0_i32_0 = arith.constant 0 : i32
    %c0_i32_1 = arith.constant 0 : i32
    return %arg0, %c0_i32, %c0_i32_0 : i32, i32, i32
  }
  func.func @transform_1(%arg0: i32) -> (i32, i32, i32) {
    %c0_i32 = arith.constant 0 : i32
    %c0_i32_0 = arith.constant 0 : i32
    %c0_i32_1 = arith.constant 0 : i32
    return %arg0, %c0_i32, %c0_i32_0 : i32, i32, i32
  }
}

module attributes {stable_mosaic.version = 11 : i64} {
  func.func @_mm_kernel_single(%arg0: i32, %arg1: i32, %arg2: memref<128x288xbf16, #tpu.memory_space<vmem>>, %arg3: memref<288x128xbf16, #tpu.memory_space<vmem>>, %arg4: memref<1x128xf32, #tpu.memory_space<vmem>>, %arg5: memref<128x128xbf16, #tpu.memory_space<vmem>>) attributes {dimension_semantics = [#tpu.dimension_semantics<parallel>, #tpu.dimension_semantics<parallel>], iteration_bounds = array<i64: 1, 1>, scalar_prefetch = 0 : i64, scratch_operands = 0 : i64, tpu.core_type = #tpu.core_type<tc>, window_params = [{transform_indices = @transform_0, window_bounds = array<i64: 128, 288>}, {transform_indices = @transform_1, window_bounds = array<i64: 288, 128>}, {transform_indices = @transform_2, window_bounds = array<i64: 1, 128>}, {transform_indices = @transform_3, window_bounds = array<i64: 128, 128>}]} {
    %c0 = arith.constant 0 : index
    %c0_0 = arith.constant 0 : index
    %0 = vector.load %arg2[%c0, %c0_0] : memref<128x288xbf16, #tpu.memory_space<vmem>>, vector<128x288xbf16>
    %c0_1 = arith.constant 0 : index
    %c0_2 = arith.constant 0 : index
    %1 = vector.load %arg3[%c0_1, %c0_2] : memref<288x128xbf16, #tpu.memory_space<vmem>>, vector<288x128xbf16>
    %cst = arith.constant dense<0.000000e+00> : vector<128x128xf32>
    %2 = tpu.matmul %0, %1, %cst {dimension_numbers = #tpu.dot_dimension_numbers<[1], [0], [0], [1], [0, 0, 1, 1], [], []>} : vector<128x288xbf16>, vector<288x128xbf16>, vector<128x128xf32> -> vector<128x128xf32>
    %c0_3 = arith.constant 0 : index
    %c0_4 = arith.constant 0 : index
    %3 = vector.load %arg4[%c0_3, %c0_4] : memref<1x128xf32, #tpu.memory_space<vmem>>, vector<1x128xf32>
    %4 = vector.broadcast %3 : vector<1x128xf32> to vector<128x128xf32>
    %5 = arith.addf %2, %4 : vector<128x128xf32>
    %6 = arith.truncf %5 : vector<128x128xf32> to vector<128x128xbf16>
    %c0_5 = arith.constant 0 : index
    %c0_6 = arith.constant 0 : index
    %7 = vector.load %arg5[%c0_5, %c0_6] : memref<128x128xbf16, #tpu.memory_space<vmem>>, vector<128x128xbf16>
    tpu.vector_store %arg5[%c0_5, %c0_6], %6 {strides = array<i32>} : memref<128x128xbf16, #tpu.memory_space<vmem>>, vector<128x128xbf16>,
    return
  }
  func.func @transform_0(%arg0: i32, %arg1: i32) -> (i32, i32) {
    %c0_i32 = arith.constant 0 : i32
    %c0_i32_0 = arith.constant 0 : i32
    return %arg0, %c0_i32 : i32, i32
  }
  func.func @transform_1(%arg0: i32, %arg1: i32) -> (i32, i32) {
    %c0_i32 = arith.constant 0 : i32
    %c0_i32_0 = arith.constant 0 : i32
    return %c0_i32, %arg1 : i32, i32
  }
  func.func @transform_2(%arg0: i32, %arg1: i32) -> (i32, i32) {
    %c0_i32 = arith.constant 0 : i32
    %c0_i32_0 = arith.constant 0 : i32
    return %c0_i32, %arg1 : i32, i32
  }
  func.func @transform_3(%arg0: i32, %arg1: i32) -> (i32, i32) {
    %c0_i32 = arith.constant 0 : i32
    return %arg0, %arg1 : i32, i32
  }
}

module attributes {stable_mosaic.version = 11 : i64} {
  func.func @_cbam_tail_kernel(%arg0: i32, %arg1: memref<1x4x4x32xbf16, #tpu.memory_space<vmem>>, %arg2: memref<1x4x4x32xbf16, #tpu.memory_space<vmem>>, %arg3: memref<32x2xf32, #tpu.memory_space<vmem>>, %arg4: memref<2x32xf32, #tpu.memory_space<vmem>>, %arg5: memref<2x49xf32, #tpu.memory_space<smem>>, %arg6: memref<1x4x4x32xbf16, #tpu.memory_space<vmem>>) attributes {dimension_semantics = [#tpu.dimension_semantics<parallel>], iteration_bounds = array<i64: 2>, scalar_prefetch = 0 : i64, scratch_operands = 0 : i64, tpu.core_type = #tpu.core_type<tc>, window_params = [{transform_indices = @transform_0, window_bounds = array<i64: 1, 4, 4, 32>}, {transform_indices = @transform_1, window_bounds = array<i64: 1, 4, 4, 32>}, {pipeline_mode = #tpu.pipeline_mode<synchronous>, transform_indices = @transform_2, window_bounds = array<i64: 32, 2>}, {pipeline_mode = #tpu.pipeline_mode<synchronous>, transform_indices = @transform_3, window_bounds = array<i64: 2, 32>}, {transform_indices = @transform_4, window_bounds = array<i64: 2, 49>}, {transform_indices = @transform_5, window_bounds = array<i64: 1, 4, 4, 32>}]} {
    %c0 = arith.constant 0 : index
    %c0_0 = arith.constant 0 : index
    %c0_1 = arith.constant 0 : index
    %c0_2 = arith.constant 0 : index
    %0 = vector.load %arg1[%c0, %c0_0, %c0_1, %c0_2] : memref<1x4x4x32xbf16, #tpu.memory_space<vmem>>, vector<1x4x4x32xbf16>
    %1 = vector.shape_cast %0 : vector<1x4x4x32xbf16> to vector<4x4x32xbf16>
    %2 = arith.extf %1 : vector<4x4x32xbf16> to vector<4x4x32xf32>
    %cst = arith.constant dense<0.000000e+00> : vector<32xf32>
    %3 = vector.multi_reduction <add>, %2, %cst [0, 1] : vector<4x4x32xf32> to vector<32xf32>
    %4 = vector.shape_cast %3 : vector<32xf32> to vector<1x1x32xf32>
    %cst_3 = arith.constant 1.600000e+01 : f32
    %5 = vector.broadcast %cst_3 : f32 to vector<1x1x32xf32>
    %6 = arith.divf %4, %5 : vector<1x1x32xf32>
    %7 = vector.broadcast %6 : vector<1x1x32xf32> to vector<4x4x32xf32>
    %8 = arith.subf %2, %7 : vector<4x4x32xf32>
    %9 = arith.mulf %8, %8 : vector<4x4x32xf32>
    %cst_4 = arith.constant dense<0.000000e+00> : vector<32xf32>
    %10 = vector.multi_reduction <add>, %9, %cst_4 [0, 1] : vector<4x4x32xf32> to vector<32xf32>
    %11 = vector.shape_cast %10 : vector<32xf32> to vector<1x1x32xf32>
    %cst_5 = arith.constant 1.600000e+01 : f32
    %12 = vector.broadcast %cst_5 : f32 to vector<1x1x32xf32>
    %13 = arith.divf %11, %12 : vector<1x1x32xf32>
    %14 = vector.broadcast %6 : vector<1x1x32xf32> to vector<4x4x32xf32>
    %15 = arith.subf %2, %14 : vector<4x4x32xf32>
    %cst_6 = arith.constant 9.99999974E-6 : f32
    %16 = vector.broadcast %cst_6 : f32 to vector<1x1x32xf32>
    %17 = arith.addf %13, %16 : vector<1x1x32xf32>
    %18 = math.rsqrt %17 : vector<1x1x32xf32>
    %19 = vector.broadcast %18 : vector<1x1x32xf32> to vector<4x4x32xf32>
    %20 = arith.mulf %15, %19 : vector<4x4x32xf32>
    %cst_7 = arith.constant dense<0.000000e+00> : vector<32xf32>
    %21 = vector.multi_reduction <add>, %20, %cst_7 [0, 1] : vector<4x4x32xf32> to vector<32xf32>
    %cst_8 = arith.constant 1.600000e+01 : f32
    %22 = vector.broadcast %cst_8 : f32 to vector<32xf32>
    %23 = arith.divf %21, %22 : vector<32xf32>
    %24 = vector.shape_cast %23 : vector<32xf32> to vector<1x32xf32>
    %cst_9 = arith.constant dense<0xFF800000> : vector<32xf32>
    %25 = vector.multi_reduction <maximumf>, %20, %cst_9 [0, 1] : vector<4x4x32xf32> to vector<32xf32>
    %26 = vector.shape_cast %25 : vector<32xf32> to vector<1x32xf32>
    %27 = tpu.concatenate %24, %26 in 0 : vector<1x32xf32>, vector<1x32xf32> -> vector<2x32xf32>
    %c0_10 = arith.constant 0 : index
    %c0_11 = arith.constant 0 : index
    %28 = vector.load %arg3[%c0_10, %c0_11] : memref<32x2xf32, #tpu.memory_space<vmem>>, vector<32x2xf32>
    %cst_12 = arith.constant dense<0.000000e+00> : vector<2x2xf32>
    %29 = tpu.matmul %27, %28, %cst_12 {dimension_numbers = #tpu.dot_dimension_numbers<[1], [0], [0], [1], [0, 0, 1, 1], [], []>} : vector<2x32xf32>, vector<32x2xf32>, vector<2x2xf32> -> vector<2x2xf32>
    %cst_13 = arith.constant 0.000000e+00 : f32
    %30 = vector.broadcast %cst_13 : f32 to vector<2x2xf32>
    %31 = arith.maximumf %29, %30 : vector<2x2xf32>
    %c0_14 = arith.constant 0 : index
    %c0_15 = arith.constant 0 : index
    %32 = vector.load %arg4[%c0_14, %c0_15] : memref<2x32xf32, #tpu.memory_space<vmem>>, vector<2x32xf32>
    %cst_16 = arith.constant dense<0.000000e+00> : vector<2x32xf32>
    %33 = tpu.matmul %31, %32, %cst_16 {dimension_numbers = #tpu.dot_dimension_numbers<[1], [0], [0], [1], [0, 0, 1, 1], [], []>} : vector<2x2xf32>, vector<2x32xf32>, vector<2x32xf32> -> vector<2x32xf32>
    %34 = vector.extract_strided_slice %33 {offsets = [0, 0], sizes = [1, 32], strides = [1, 1]} : vector<2x32xf32> to vector<1x32xf32>
    %35 = vector.extract_strided_slice %33 {offsets = [1, 0], sizes = [1, 32], strides = [1, 1]} : vector<2x32xf32> to vector<1x32xf32>
    %36 = arith.addf %34, %35 : vector<1x32xf32>
    %37 = arith.negf %36 : vector<1x32xf32>
    %38 = math.exp %37 : vector<1x32xf32>
    %cst_17 = arith.constant 1.000000e+00 : f32
    %39 = vector.broadcast %cst_17 : f32 to vector<1x32xf32>
    %40 = arith.addf %39, %38 : vector<1x32xf32>
    %41 = arith.divf %39, %40 : vector<1x32xf32>
    %42 = vector.shape_cast %41 : vector<1x32xf32> to vector<1x1x32xf32>
    %43 = vector.broadcast %42 : vector<1x1x32xf32> to vector<4x4x32xf32>
    %44 = arith.mulf %20, %43 : vector<4x4x32xf32>
    %cst_18 = arith.constant dense<0.000000e+00> : vector<4x4xf32>
    %45 = vector.multi_reduction <add>, %44, %cst_18 [2] : vector<4x4x32xf32> to vector<4x4xf32>
    %cst_19 = arith.constant 3.200000e+01 : f32
    %46 = vector.broadcast %cst_19 : f32 to vector<4x4xf32>
    %47 = arith.divf %45, %46 : vector<4x4xf32>
    %cst_20 = arith.constant dense<0xFF800000> : vector<4x4xf32>
    %48 = vector.multi_reduction <maximumf>, %44, %cst_20 [2] : vector<4x4x32xf32> to vector<4x4xf32>
    %cst_21 = arith.constant 0.000000e+00 : f32
    %49 = vector.broadcast %cst_21 : f32 to vector<3x4xf32>
    %50 = tpu.concatenate %49, %47, %49 in 0 : vector<3x4xf32>, vector<4x4xf32>, vector<3x4xf32> -> vector<10x4xf32>
    %cst_22 = arith.constant 0.000000e+00 : f32
    %51 = vector.broadcast %cst_22 : f32 to vector<10x3xf32>
    %52 = tpu.concatenate %51, %50, %51 in 1 : vector<10x3xf32>, vector<10x4xf32>, vector<10x3xf32> -> vector<10x10xf32>
    %cst_23 = arith.constant 0.000000e+00 : f32
    %53 = vector.broadcast %cst_23 : f32 to vector<3x4xf32>
    %54 = tpu.concatenate %53, %48, %53 in 0 : vector<3x4xf32>, vector<4x4xf32>, vector<3x4xf32> -> vector<10x4xf32>
    %cst_24 = arith.constant 0.000000e+00 : f32
    %55 = vector.broadcast %cst_24 : f32 to vector<10x3xf32>
    %56 = tpu.concatenate %55, %54, %55 in 1 : vector<10x3xf32>, vector<10x4xf32>, vector<10x3xf32> -> vector<10x10xf32>
    %cst_25 = arith.constant 0.000000e+00 : f32
    %57 = vector.broadcast %cst_25 : f32 to vector<4x4xf32>
    %58 = vector.extract_strided_slice %52 {offsets = [0, 0], sizes = [4, 4], strides = [1, 1]} : vector<10x10xf32> to vector<4x4xf32>
    %c0_26 = arith.constant 0 : index
    %c0_27 = arith.constant 0 : index
    %59 = memref.load %arg5[%c0_26, %c0_27] : memref<2x49xf32, #tpu.memory_space<smem>>
    %60 = vector.broadcast %59 : f32 to vector<4x4xf32>
    %61 = arith.mulf %58, %60 : vector<4x4xf32>
    %62 = arith.addf %57, %61 : vector<4x4xf32>
    %63 = vector.extract_strided_slice %56 {offsets = [0, 0], sizes = [4, 4], strides = [1, 1]} : vector<10x10xf32> to vector<4x4xf32>
    %c1 = arith.constant 1 : index
    %c0_28 = arith.constant 0 : index
    %64 = memref.load %arg5[%c1, %c0_28] : memref<2x49xf32, #tpu.memory_space<smem>>
    %65 = vector.broadcast %64 : f32 to vector<4x4xf32>
    %66 = arith.mulf %63, %65 : vector<4x4xf32>
    %67 = arith.addf %62, %66 : vector<4x4xf32>
    %68 = vector.extract_strided_slice %52 {offsets = [0, 1], sizes = [4, 4], strides = [1, 1]} : vector<10x10xf32> to vector<4x4xf32>
    %c0_29 = arith.constant 0 : index
    %c1_30 = arith.constant 1 : index
    %69 = memref.load %arg5[%c0_29, %c1_30] : memref<2x49xf32, #tpu.memory_space<smem>>
    %70 = vector.broadcast %69 : f32 to vector<4x4xf32>
    %71 = arith.mulf %68, %70 : vector<4x4xf32>
    %72 = arith.addf %67, %71 : vector<4x4xf32>
    %73 = vector.extract_strided_slice %56 {offsets = [0, 1], sizes = [4, 4], strides = [1, 1]} : vector<10x10xf32> to vector<4x4xf32>
    %c1_31 = arith.constant 1 : index
    %c1_32 = arith.constant 1 : index
    %74 = memref.load %arg5[%c1_31, %c1_32] : memref<2x49xf32, #tpu.memory_space<smem>>
    %75 = vector.broadcast %74 : f32 to vector<4x4xf32>
    %76 = arith.mulf %73, %75 : vector<4x4xf32>
    %77 = arith.addf %72, %76 : vector<4x4xf32>
    %78 = vector.extract_strided_slice %52 {offsets = [0, 2], sizes = [4, 4], strides = [1, 1]} : vector<10x10xf32> to vector<4x4xf32>
    %c0_33 = arith.constant 0 : index
    %c2 = arith.constant 2 : index
    %79 = memref.load %arg5[%c0_33, %c2] : memref<2x49xf32, #tpu.memory_space<smem>>
    %80 = vector.broadcast %79 : f32 to vector<4x4xf32>
    %81 = arith.mulf %78, %80 : vector<4x4xf32>
    %82 = arith.addf %77, %81 : vector<4x4xf32>
    %83 = vector.extract_strided_slice %56 {offsets = [0, 2], sizes = [4, 4], strides = [1, 1]} : vector<10x10xf32> to vector<4x4xf32>
    %c1_34 = arith.constant 1 : index
    %c2_35 = arith.constant 2 : index
    %84 = memref.load %arg5[%c1_34, %c2_35] : memref<2x49xf32, #tpu.memory_space<smem>>
    %85 = vector.broadcast %84 : f32 to vector<4x4xf32>
    %86 = arith.mulf %83, %85 : vector<4x4xf32>
    %87 = arith.addf %82, %86 : vector<4x4xf32>
    %88 = vector.extract_strided_slice %52 {offsets = [0, 3], sizes = [4, 4], strides = [1, 1]} : vector<10x10xf32> to vector<4x4xf32>
    %c0_36 = arith.constant 0 : index
    %c3 = arith.constant 3 : index
    %89 = memref.load %arg5[%c0_36, %c3] : memref<2x49xf32, #tpu.memory_space<smem>>
    %90 = vector.broadcast %89 : f32 to vector<4x4xf32>
    %91 = arith.mulf %88, %90 : vector<4x4xf32>
    %92 = arith.addf %87, %91 : vector<4x4xf32>
    %93 = vector.extract_strided_slice %56 {offsets = [0, 3], sizes = [4, 4], strides = [1, 1]} : vector<10x10xf32> to vector<4x4xf32>
    %c1_37 = arith.constant 1 : index
    %c3_38 = arith.constant 3 : index
    %94 = memref.load %arg5[%c1_37, %c3_38] : memref<2x49xf32, #tpu.memory_space<smem>>
    %95 = vector.broadcast %94 : f32 to vector<4x4xf32>
    %96 = arith.mulf %93, %95 : vector<4x4xf32>
    %97 = arith.addf %92, %96 : vector<4x4xf32>
    %98 = vector.extract_strided_slice %52 {offsets = [0, 4], sizes = [4, 4], strides = [1, 1]} : vector<10x10xf32> to vector<4x4xf32>
    %c0_39 = arith.constant 0 : index
    %c4 = arith.constant 4 : index
    %99 = memref.load %arg5[%c0_39, %c4] : memref<2x49xf32, #tpu.memory_space<smem>>
    %100 = vector.broadcast %99 : f32 to vector<4x4xf32>
    %101 = arith.mulf %98, %100 : vector<4x4xf32>
    %102 = arith.addf %97, %101 : vector<4x4xf32>
    %103 = vector.extract_strided_slice %56 {offsets = [0, 4], sizes = [4, 4], strides = [1, 1]} : vector<10x10xf32> to vector<4x4xf32>
    %c1_40 = arith.constant 1 : index
    %c4_41 = arith.constant 4 : index
    %104 = memref.load %arg5[%c1_40, %c4_41] : memref<2x49xf32, #tpu.memory_space<smem>>
    %105 = vector.broadcast %104 : f32 to vector<4x4xf32>
    %106 = arith.mulf %103, %105 : vector<4x4xf32>
    %107 = arith.addf %102, %106 : vector<4x4xf32>
    %108 = vector.extract_strided_slice %52 {offsets = [0, 5], sizes = [4, 4], strides = [1, 1]} : vector<10x10xf32> to vector<4x4xf32>
    %c0_42 = arith.constant 0 : index
    %c5 = arith.constant 5 : index
    %109 = memref.load %arg5[%c0_42, %c5] : memref<2x49xf32, #tpu.memory_space<smem>>
    %110 = vector.broadcast %109 : f32 to vector<4x4xf32>
    %111 = arith.mulf %108, %110 : vector<4x4xf32>
    %112 = arith.addf %107, %111 : vector<4x4xf32>
    %113 = vector.extract_strided_slice %56 {offsets = [0, 5], sizes = [4, 4], strides = [1, 1]} : vector<10x10xf32> to vector<4x4xf32>
    %c1_43 = arith.constant 1 : index
    %c5_44 = arith.constant 5 : index
    %114 = memref.load %arg5[%c1_43, %c5_44] : memref<2x49xf32, #tpu.memory_space<smem>>
    %115 = vector.broadcast %114 : f32 to vector<4x4xf32>
    %116 = arith.mulf %113, %115 : vector<4x4xf32>
    %117 = arith.addf %112, %116 : vector<4x4xf32>
    %118 = vector.extract_strided_slice %52 {offsets = [0, 6], sizes = [4, 4], strides = [1, 1]} : vector<10x10xf32> to vector<4x4xf32>
    %c0_45 = arith.constant 0 : index
    %c6 = arith.constant 6 : index
    %119 = memref.load %arg5[%c0_45, %c6] : memref<2x49xf32, #tpu.memory_space<smem>>
    %120 = vector.broadcast %119 : f32 to vector<4x4xf32>
    %121 = arith.mulf %118, %120 : vector<4x4xf32>
    %122 = arith.addf %117, %121 : vector<4x4xf32>
    %123 = vector.extract_strided_slice %56 {offsets = [0, 6], sizes = [4, 4], strides = [1, 1]} : vector<10x10xf32> to vector<4x4xf32>
    %c1_46 = arith.constant 1 : index
    %c6_47 = arith.constant 6 : index
    %124 = memref.load %arg5[%c1_46, %c6_47] : memref<2x49xf32, #tpu.memory_space<smem>>
    %125 = vector.broadcast %124 : f32 to vector<4x4xf32>
    %126 = arith.mulf %123, %125 : vector<4x4xf32>
    %127 = arith.addf %122, %126 : vector<4x4xf32>
    %128 = vector.extract_strided_slice %52 {offsets = [1, 0], sizes = [4, 4], strides = [1, 1]} : vector<10x10xf32> to vector<4x4xf32>
    %c0_48 = arith.constant 0 : index
    %c7 = arith.constant 7 : index
    %129 = memref.load %arg5[%c0_48, %c7] : memref<2x49xf32, #tpu.memory_space<smem>>
    %130 = vector.broadcast %129 : f32 to vector<4x4xf32>
    %131 = arith.mulf %128, %130 : vector<4x4xf32>
    %132 = arith.addf %127, %131 : vector<4x4xf32>
    %133 = vector.extract_strided_slice %56 {offsets = [1, 0], sizes = [4, 4], strides = [1, 1]} : vector<10x10xf32> to vector<4x4xf32>
    %c1_49 = arith.constant 1 : index
    %c7_50 = arith.constant 7 : index
    %134 = memref.load %arg5[%c1_49, %c7_50] : memref<2x49xf32, #tpu.memory_space<smem>>
    %135 = vector.broadcast %134 : f32 to vector<4x4xf32>
    %136 = arith.mulf %133, %135 : vector<4x4xf32>
    %137 = arith.addf %132, %136 : vector<4x4xf32>
    %138 = vector.extract_strided_slice %52 {offsets = [1, 1], sizes = [4, 4], strides = [1, 1]} : vector<10x10xf32> to vector<4x4xf32>
    %c0_51 = arith.constant 0 : index
    %c8 = arith.constant 8 : index
    %139 = memref.load %arg5[%c0_51, %c8] : memref<2x49xf32, #tpu.memory_space<smem>>
    %140 = vector.broadcast %139 : f32 to vector<4x4xf32>
    %141 = arith.mulf %138, %140 : vector<4x4xf32>
    %142 = arith.addf %137, %141 : vector<4x4xf32>
    %143 = vector.extract_strided_slice %56 {offsets = [1, 1], sizes = [4, 4], strides = [1, 1]} : vector<10x10xf32> to vector<4x4xf32>
    %c1_52 = arith.constant 1 : index
    %c8_53 = arith.constant 8 : index
    %144 = memref.load %arg5[%c1_52, %c8_53] : memref<2x49xf32, #tpu.memory_space<smem>>
    %145 = vector.broadcast %144 : f32 to vector<4x4xf32>
    %146 = arith.mulf %143, %145 : vector<4x4xf32>
    %147 = arith.addf %142, %146 : vector<4x4xf32>
    %148 = vector.extract_strided_slice %52 {offsets = [1, 2], sizes = [4, 4], strides = [1, 1]} : vector<10x10xf32> to vector<4x4xf32>
    %c0_54 = arith.constant 0 : index
    %c9 = arith.constant 9 : index
    %149 = memref.load %arg5[%c0_54, %c9] : memref<2x49xf32, #tpu.memory_space<smem>>
    %150 = vector.broadcast %149 : f32 to vector<4x4xf32>
    %151 = arith.mulf %148, %150 : vector<4x4xf32>
    %152 = arith.addf %147, %151 : vector<4x4xf32>
    %153 = vector.extract_strided_slice %56 {offsets = [1, 2], sizes = [4, 4], strides = [1, 1]} : vector<10x10xf32> to vector<4x4xf32>
    %c1_55 = arith.constant 1 : index
    %c9_56 = arith.constant 9 : index
    %154 = memref.load %arg5[%c1_55, %c9_56] : memref<2x49xf32, #tpu.memory_space<smem>>
    %155 = vector.broadcast %154 : f32 to vector<4x4xf32>
    %156 = arith.mulf %153, %155 : vector<4x4xf32>
    %157 = arith.addf %152, %156 : vector<4x4xf32>
    %158 = vector.extract_strided_slice %52 {offsets = [1, 3], sizes = [4, 4], strides = [1, 1]} : vector<10x10xf32> to vector<4x4xf32>
    %c0_57 = arith.constant 0 : index
    %c10 = arith.constant 10 : index
    %159 = memref.load %arg5[%c0_57, %c10] : memref<2x49xf32, #tpu.memory_space<smem>>
    %160 = vector.broadcast %159 : f32 to vector<4x4xf32>
    %161 = arith.mulf %158, %160 : vector<4x4xf32>
    %162 = arith.addf %157, %161 : vector<4x4xf32>
    %163 = vector.extract_strided_slice %56 {offsets = [1, 3], sizes = [4, 4], strides = [1, 1]} : vector<10x10xf32> to vector<4x4xf32>
    %c1_58 = arith.constant 1 : index
    %c10_59 = arith.constant 10 : index
    %164 = memref.load %arg5[%c1_58, %c10_59] : memref<2x49xf32, #tpu.memory_space<smem>>
    %165 = vector.broadcast %164 : f32 to vector<4x4xf32>
    %166 = arith.mulf %163, %165 : vector<4x4xf32>
    %167 = arith.addf %162, %166 : vector<4x4xf32>
    %168 = vector.extract_strided_slice %52 {offsets = [1, 4], sizes = [4, 4], strides = [1, 1]} : vector<10x10xf32> to vector<4x4xf32>
    %c0_60 = arith.constant 0 : index
    %c11 = arith.constant 11 : index
    %169 = memref.load %arg5[%c0_60, %c11] : memref<2x49xf32, #tpu.memory_space<smem>>
    %170 = vector.broadcast %169 : f32 to vector<4x4xf32>
    %171 = arith.mulf %168, %170 : vector<4x4xf32>
    %172 = arith.addf %167, %171 : vector<4x4xf32>
    %173 = vector.extract_strided_slice %56 {offsets = [1, 4], sizes = [4, 4], strides = [1, 1]} : vector<10x10xf32> to vector<4x4xf32>
    %c1_61 = arith.constant 1 : index
    %c11_62 = arith.constant 11 : index
    %174 = memref.load %arg5[%c1_61, %c11_62] : memref<2x49xf32, #tpu.memory_space<smem>>
    %175 = vector.broadcast %174 : f32 to vector<4x4xf32>
    %176 = arith.mulf %173, %175 : vector<4x4xf32>
    %177 = arith.addf %172, %176 : vector<4x4xf32>
    %178 = vector.extract_strided_slice %52 {offsets = [1, 5], sizes = [4, 4], strides = [1, 1]} : vector<10x10xf32> to vector<4x4xf32>
    %c0_63 = arith.constant 0 : index
    %c12 = arith.constant 12 : index
    %179 = memref.load %arg5[%c0_63, %c12] : memref<2x49xf32, #tpu.memory_space<smem>>
    %180 = vector.broadcast %179 : f32 to vector<4x4xf32>
    %181 = arith.mulf %178, %180 : vector<4x4xf32>
    %182 = arith.addf %177, %181 : vector<4x4xf32>
    %183 = vector.extract_strided_slice %56 {offsets = [1, 5], sizes = [4, 4], strides = [1, 1]} : vector<10x10xf32> to vector<4x4xf32>
    %c1_64 = arith.constant 1 : index
    %c12_65 = arith.constant 12 : index
    %184 = memref.load %arg5[%c1_64, %c12_65] : memref<2x49xf32, #tpu.memory_space<smem>>
    %185 = vector.broadcast %184 : f32 to vector<4x4xf32>
    %186 = arith.mulf %183, %185 : vector<4x4xf32>
    %187 = arith.addf %182, %186 : vector<4x4xf32>
    %188 = vector.extract_strided_slice %52 {offsets = [1, 6], sizes = [4, 4], strides = [1, 1]} : vector<10x10xf32> to vector<4x4xf32>
    %c0_66 = arith.constant 0 : index
    %c13 = arith.constant 13 : index
    %189 = memref.load %arg5[%c0_66, %c13] : memref<2x49xf32, #tpu.memory_space<smem>>
    %190 = vector.broadcast %189 : f32 to vector<4x4xf32>
    %191 = arith.mulf %188, %190 : vector<4x4xf32>
    %192 = arith.addf %187, %191 : vector<4x4xf32>
    %193 = vector.extract_strided_slice %56 {offsets = [1, 6], sizes = [4, 4], strides = [1, 1]} : vector<10x10xf32> to vector<4x4xf32>
    %c1_67 = arith.constant 1 : index
    %c13_68 = arith.constant 13 : index
    %194 = memref.load %arg5[%c1_67, %c13_68] : memref<2x49xf32, #tpu.memory_space<smem>>
    %195 = vector.broadcast %194 : f32 to vector<4x4xf32>
    %196 = arith.mulf %193, %195 : vector<4x4xf32>
    %197 = arith.addf %192, %196 : vector<4x4xf32>
    %198 = vector.extract_strided_slice %52 {offsets = [2, 0], sizes = [4, 4], strides = [1, 1]} : vector<10x10xf32> to vector<4x4xf32>
    %c0_69 = arith.constant 0 : index
    %c14 = arith.constant 14 : index
    %199 = memref.load %arg5[%c0_69, %c14] : memref<2x49xf32, #tpu.memory_space<smem>>
    %200 = vector.broadcast %199 : f32 to vector<4x4xf32>
    %201 = arith.mulf %198, %200 : vector<4x4xf32>
    %202 = arith.addf %197, %201 : vector<4x4xf32>
    %203 = vector.extract_strided_slice %56 {offsets = [2, 0], sizes = [4, 4], strides = [1, 1]} : vector<10x10xf32> to vector<4x4xf32>
    %c1_70 = arith.constant 1 : index
    %c14_71 = arith.constant 14 : index
    %204 = memref.load %arg5[%c1_70, %c14_71] : memref<2x49xf32, #tpu.memory_space<smem>>
    %205 = vector.broadcast %204 : f32 to vector<4x4xf32>
    %206 = arith.mulf %203, %205 : vector<4x4xf32>
    %207 = arith.addf %202, %206 : vector<4x4xf32>
    %208 = vector.extract_strided_slice %52 {offsets = [2, 1], sizes = [4, 4], strides = [1, 1]} : vector<10x10xf32> to vector<4x4xf32>
    %c0_72 = arith.constant 0 : index
    %c15 = arith.constant 15 : index
    %209 = memref.load %arg5[%c0_72, %c15] : memref<2x49xf32, #tpu.memory_space<smem>>
    %210 = vector.broadcast %209 : f32 to vector<4x4xf32>
    %211 = arith.mulf %208, %210 : vector<4x4xf32>
    %212 = arith.addf %207, %211 : vector<4x4xf32>
    %213 = vector.extract_strided_slice %56 {offsets = [2, 1], sizes = [4, 4], strides = [1, 1]} : vector<10x10xf32> to vector<4x4xf32>
    %c1_73 = arith.constant 1 : index
    %c15_74 = arith.constant 15 : index
    %214 = memref.load %arg5[%c1_73, %c15_74] : memref<2x49xf32, #tpu.memory_space<smem>>
    %215 = vector.broadcast %214 : f32 to vector<4x4xf32>
    %216 = arith.mulf %213, %215 : vector<4x4xf32>
    %217 = arith.addf %212, %216 : vector<4x4xf32>
    %218 = vector.extract_strided_slice %52 {offsets = [2, 2], sizes = [4, 4], strides = [1, 1]} : vector<10x10xf32> to vector<4x4xf32>
    %c0_75 = arith.constant 0 : index
    %c16 = arith.constant 16 : index
    %219 = memref.load %arg5[%c0_75, %c16] : memref<2x49xf32, #tpu.memory_space<smem>>
    %220 = vector.broadcast %219 : f32 to vector<4x4xf32>
    %221 = arith.mulf %218, %220 : vector<4x4xf32>
    %222 = arith.addf %217, %221 : vector<4x4xf32>
    %223 = vector.extract_strided_slice %56 {offsets = [2, 2], sizes = [4, 4], strides = [1, 1]} : vector<10x10xf32> to vector<4x4xf32>
    %c1_76 = arith.constant 1 : index
    %c16_77 = arith.constant 16 : index
    %224 = memref.load %arg5[%c1_76, %c16_77] : memref<2x49xf32, #tpu.memory_space<smem>>
    %225 = vector.broadcast %224 : f32 to vector<4x4xf32>
    %226 = arith.mulf %223, %225 : vector<4x4xf32>
    %227 = arith.addf %222, %226 : vector<4x4xf32>
    %228 = vector.extract_strided_slice %52 {offsets = [2, 3], sizes = [4, 4], strides = [1, 1]} : vector<10x10xf32> to vector<4x4xf32>
    %c0_78 = arith.constant 0 : index
    %c17 = arith.constant 17 : index
    %229 = memref.load %arg5[%c0_78, %c17] : memref<2x49xf32, #tpu.memory_space<smem>>
    %230 = vector.broadcast %229 : f32 to vector<4x4xf32>
    %231 = arith.mulf %228, %230 : vector<4x4xf32>
    %232 = arith.addf %227, %231 : vector<4x4xf32>
    %233 = vector.extract_strided_slice %56 {offsets = [2, 3], sizes = [4, 4], strides = [1, 1]} : vector<10x10xf32> to vector<4x4xf32>
    %c1_79 = arith.constant 1 : index
    %c17_80 = arith.constant 17 : index
    %234 = memref.load %arg5[%c1_79, %c17_80] : memref<2x49xf32, #tpu.memory_space<smem>>
    %235 = vector.broadcast %234 : f32 to vector<4x4xf32>
    %236 = arith.mulf %233, %235 : vector<4x4xf32>
    %237 = arith.addf %232, %236 : vector<4x4xf32>
    %238 = vector.extract_strided_slice %52 {offsets = [2, 4], sizes = [4, 4], strides = [1, 1]} : vector<10x10xf32> to vector<4x4xf32>
    %c0_81 = arith.constant 0 : index
    %c18 = arith.constant 18 : index
    %239 = memref.load %arg5[%c0_81, %c18] : memref<2x49xf32, #tpu.memory_space<smem>>
    %240 = vector.broadcast %239 : f32 to vector<4x4xf32>
    %241 = arith.mulf %238, %240 : vector<4x4xf32>
    %242 = arith.addf %237, %241 : vector<4x4xf32>
    %243 = vector.extract_strided_slice %56 {offsets = [2, 4], sizes = [4, 4], strides = [1, 1]} : vector<10x10xf32> to vector<4x4xf32>
    %c1_82 = arith.constant 1 : index
    %c18_83 = arith.constant 18 : index
    %244 = memref.load %arg5[%c1_82, %c18_83] : memref<2x49xf32, #tpu.memory_space<smem>>
    %245 = vector.broadcast %244 : f32 to vector<4x4xf32>
    %246 = arith.mulf %243, %245 : vector<4x4xf32>
    %247 = arith.addf %242, %246 : vector<4x4xf32>
    %248 = vector.extract_strided_slice %52 {offsets = [2, 5], sizes = [4, 4], strides = [1, 1]} : vector<10x10xf32> to vector<4x4xf32>
    %c0_84 = arith.constant 0 : index
    %c19 = arith.constant 19 : index
    %249 = memref.load %arg5[%c0_84, %c19] : memref<2x49xf32, #tpu.memory_space<smem>>
    %250 = vector.broadcast %249 : f32 to vector<4x4xf32>
    %251 = arith.mulf %248, %250 : vector<4x4xf32>
    %252 = arith.addf %247, %251 : vector<4x4xf32>
    %253 = vector.extract_strided_slice %56 {offsets = [2, 5], sizes = [4, 4], strides = [1, 1]} : vector<10x10xf32> to vector<4x4xf32>
    %c1_85 = arith.constant 1 : index
    %c19_86 = arith.constant 19 : index
    %254 = memref.load %arg5[%c1_85, %c19_86] : memref<2x49xf32, #tpu.memory_space<smem>>
    %255 = vector.broadcast %254 : f32 to vector<4x4xf32>
    %256 = arith.mulf %253, %255 : vector<4x4xf32>
    %257 = arith.addf %252, %256 : vector<4x4xf32>
    %258 = vector.extract_strided_slice %52 {offsets = [2, 6], sizes = [4, 4], strides = [1, 1]} : vector<10x10xf32> to vector<4x4xf32>
    %c0_87 = arith.constant 0 : index
    %c20 = arith.constant 20 : index
    %259 = memref.load %arg5[%c0_87, %c20] : memref<2x49xf32, #tpu.memory_space<smem>>
    %260 = vector.broadcast %259 : f32 to vector<4x4xf32>
    %261 = arith.mulf %258, %260 : vector<4x4xf32>
    %262 = arith.addf %257, %261 : vector<4x4xf32>
    %263 = vector.extract_strided_slice %56 {offsets = [2, 6], sizes = [4, 4], strides = [1, 1]} : vector<10x10xf32> to vector<4x4xf32>
    %c1_88 = arith.constant 1 : index
    %c20_89 = arith.constant 20 : index
    %264 = memref.load %arg5[%c1_88, %c20_89] : memref<2x49xf32, #tpu.memory_space<smem>>
    %265 = vector.broadcast %264 : f32 to vector<4x4xf32>
    %266 = arith.mulf %263, %265 : vector<4x4xf32>
    %267 = arith.addf %262, %266 : vector<4x4xf32>
    %268 = vector.extract_strided_slice %52 {offsets = [3, 0], sizes = [4, 4], strides = [1, 1]} : vector<10x10xf32> to vector<4x4xf32>
    %c0_90 = arith.constant 0 : index
    %c21 = arith.constant 21 : index
    %269 = memref.load %arg5[%c0_90, %c21] : memref<2x49xf32, #tpu.memory_space<smem>>
    %270 = vector.broadcast %269 : f32 to vector<4x4xf32>
    %271 = arith.mulf %268, %270 : vector<4x4xf32>
    %272 = arith.addf %267, %271 : vector<4x4xf32>
    %273 = vector.extract_strided_slice %56 {offsets = [3, 0], sizes = [4, 4], strides = [1, 1]} : vector<10x10xf32> to vector<4x4xf32>
    %c1_91 = arith.constant 1 : index
    %c21_92 = arith.constant 21 : index
    %274 = memref.load %arg5[%c1_91, %c21_92] : memref<2x49xf32, #tpu.memory_space<smem>>
    %275 = vector.broadcast %274 : f32 to vector<4x4xf32>
    %276 = arith.mulf %273, %275 : vector<4x4xf32>
    %277 = arith.addf %272, %276 : vector<4x4xf32>
    %278 = vector.extract_strided_slice %52 {offsets = [3, 1], sizes = [4, 4], strides = [1, 1]} : vector<10x10xf32> to vector<4x4xf32>
    %c0_93 = arith.constant 0 : index
    %c22 = arith.constant 22 : index
    %279 = memref.load %arg5[%c0_93, %c22] : memref<2x49xf32, #tpu.memory_space<smem>>
    %280 = vector.broadcast %279 : f32 to vector<4x4xf32>
    %281 = arith.mulf %278, %280 : vector<4x4xf32>
    %282 = arith.addf %277, %281 : vector<4x4xf32>
    %283 = vector.extract_strided_slice %56 {offsets = [3, 1], sizes = [4, 4], strides = [1, 1]} : vector<10x10xf32> to vector<4x4xf32>
    %c1_94 = arith.constant 1 : index
    %c22_95 = arith.constant 22 : index
    %284 = memref.load %arg5[%c1_94, %c22_95] : memref<2x49xf32, #tpu.memory_space<smem>>
    %285 = vector.broadcast %284 : f32 to vector<4x4xf32>
    %286 = arith.mulf %283, %285 : vector<4x4xf32>
    %287 = arith.addf %282, %286 : vector<4x4xf32>
    %288 = vector.extract_strided_slice %52 {offsets = [3, 2], sizes = [4, 4], strides = [1, 1]} : vector<10x10xf32> to vector<4x4xf32>
    %c0_96 = arith.constant 0 : index
    %c23 = arith.constant 23 : index
    %289 = memref.load %arg5[%c0_96, %c23] : memref<2x49xf32, #tpu.memory_space<smem>>
    %290 = vector.broadcast %289 : f32 to vector<4x4xf32>
    %291 = arith.mulf %288, %290 : vector<4x4xf32>
    %292 = arith.addf %287, %291 : vector<4x4xf32>
    %293 = vector.extract_strided_slice %56 {offsets = [3, 2], sizes = [4, 4], strides = [1, 1]} : vector<10x10xf32> to vector<4x4xf32>
    %c1_97 = arith.constant 1 : index
    %c23_98 = arith.constant 23 : index
    %294 = memref.load %arg5[%c1_97, %c23_98] : memref<2x49xf32, #tpu.memory_space<smem>>
    %295 = vector.broadcast %294 : f32 to vector<4x4xf32>
    %296 = arith.mulf %293, %295 : vector<4x4xf32>
    %297 = arith.addf %292, %296 : vector<4x4xf32>
    %298 = vector.extract_strided_slice %52 {offsets = [3, 3], sizes = [4, 4], strides = [1, 1]} : vector<10x10xf32> to vector<4x4xf32>
    %c0_99 = arith.constant 0 : index
    %c24 = arith.constant 24 : index
    %299 = memref.load %arg5[%c0_99, %c24] : memref<2x49xf32, #tpu.memory_space<smem>>
    %300 = vector.broadcast %299 : f32 to vector<4x4xf32>
    %301 = arith.mulf %298, %300 : vector<4x4xf32>
    %302 = arith.addf %297, %301 : vector<4x4xf32>
    %303 = vector.extract_strided_slice %56 {offsets = [3, 3], sizes = [4, 4], strides = [1, 1]} : vector<10x10xf32> to vector<4x4xf32>
    %c1_100 = arith.constant 1 : index
    %c24_101 = arith.constant 24 : index
    %304 = memref.load %arg5[%c1_100, %c24_101] : memref<2x49xf32, #tpu.memory_space<smem>>
    %305 = vector.broadcast %304 : f32 to vector<4x4xf32>
    %306 = arith.mulf %303, %305 : vector<4x4xf32>
    %307 = arith.addf %302, %306 : vector<4x4xf32>
    %308 = vector.extract_strided_slice %52 {offsets = [3, 4], sizes = [4, 4], strides = [1, 1]} : vector<10x10xf32> to vector<4x4xf32>
    %c0_102 = arith.constant 0 : index
    %c25 = arith.constant 25 : index
    %309 = memref.load %arg5[%c0_102, %c25] : memref<2x49xf32, #tpu.memory_space<smem>>
    %310 = vector.broadcast %309 : f32 to vector<4x4xf32>
    %311 = arith.mulf %308, %310 : vector<4x4xf32>
    %312 = arith.addf %307, %311 : vector<4x4xf32>
    %313 = vector.extract_strided_slice %56 {offsets = [3, 4], sizes = [4, 4], strides = [1, 1]} : vector<10x10xf32> to vector<4x4xf32>
    %c1_103 = arith.constant 1 : index
    %c25_104 = arith.constant 25 : index
    %314 = memref.load %arg5[%c1_103, %c25_104] : memref<2x49xf32, #tpu.memory_space<smem>>
    %315 = vector.broadcast %314 : f32 to vector<4x4xf32>
    %316 = arith.mulf %313, %315 : vector<4x4xf32>
    %317 = arith.addf %312, %316 : vector<4x4xf32>
    %318 = vector.extract_strided_slice %52 {offsets = [3, 5], sizes = [4, 4], strides = [1, 1]} : vector<10x10xf32> to vector<4x4xf32>
    %c0_105 = arith.constant 0 : index
    %c26 = arith.constant 26 : index
    %319 = memref.load %arg5[%c0_105, %c26] : memref<2x49xf32, #tpu.memory_space<smem>>
    %320 = vector.broadcast %319 : f32 to vector<4x4xf32>
    %321 = arith.mulf %318, %320 : vector<4x4xf32>
    %322 = arith.addf %317, %321 : vector<4x4xf32>
    %323 = vector.extract_strided_slice %56 {offsets = [3, 5], sizes = [4, 4], strides = [1, 1]} : vector<10x10xf32> to vector<4x4xf32>
    %c1_106 = arith.constant 1 : index
    %c26_107 = arith.constant 26 : index
    %324 = memref.load %arg5[%c1_106, %c26_107] : memref<2x49xf32, #tpu.memory_space<smem>>
    %325 = vector.broadcast %324 : f32 to vector<4x4xf32>
    %326 = arith.mulf %323, %325 : vector<4x4xf32>
    %327 = arith.addf %322, %326 : vector<4x4xf32>
    %328 = vector.extract_strided_slice %52 {offsets = [3, 6], sizes = [4, 4], strides = [1, 1]} : vector<10x10xf32> to vector<4x4xf32>
    %c0_108 = arith.constant 0 : index
    %c27 = arith.constant 27 : index
    %329 = memref.load %arg5[%c0_108, %c27] : memref<2x49xf32, #tpu.memory_space<smem>>
    %330 = vector.broadcast %329 : f32 to vector<4x4xf32>
    %331 = arith.mulf %328, %330 : vector<4x4xf32>
    %332 = arith.addf %327, %331 : vector<4x4xf32>
    %333 = vector.extract_strided_slice %56 {offsets = [3, 6], sizes = [4, 4], strides = [1, 1]} : vector<10x10xf32> to vector<4x4xf32>
    %c1_109 = arith.constant 1 : index
    %c27_110 = arith.constant 27 : index
    %334 = memref.load %arg5[%c1_109, %c27_110] : memref<2x49xf32, #tpu.memory_space<smem>>
    %335 = vector.broadcast %334 : f32 to vector<4x4xf32>
    %336 = arith.mulf %333, %335 : vector<4x4xf32>
    %337 = arith.addf %332, %336 : vector<4x4xf32>
    %338 = vector.extract_strided_slice %52 {offsets = [4, 0], sizes = [4, 4], strides = [1, 1]} : vector<10x10xf32> to vector<4x4xf32>
    %c0_111 = arith.constant 0 : index
    %c28 = arith.constant 28 : index
    %339 = memref.load %arg5[%c0_111, %c28] : memref<2x49xf32, #tpu.memory_space<smem>>
    %340 = vector.broadcast %339 : f32 to vector<4x4xf32>
    %341 = arith.mulf %338, %340 : vector<4x4xf32>
    %342 = arith.addf %337, %341 : vector<4x4xf32>
    %343 = vector.extract_strided_slice %56 {offsets = [4, 0], sizes = [4, 4], strides = [1, 1]} : vector<10x10xf32> to vector<4x4xf32>
    %c1_112 = arith.constant 1 : index
    %c28_113 = arith.constant 28 : index
    %344 = memref.load %arg5[%c1_112, %c28_113] : memref<2x49xf32, #tpu.memory_space<smem>>
    %345 = vector.broadcast %344 : f32 to vector<4x4xf32>
    %346 = arith.mulf %343, %345 : vector<4x4xf32>
    %347 = arith.addf %342, %346 : vector<4x4xf32>
    %348 = vector.extract_strided_slice %52 {offsets = [4, 1], sizes = [4, 4], strides = [1, 1]} : vector<10x10xf32> to vector<4x4xf32>
    %c0_114 = arith.constant 0 : index
    %c29 = arith.constant 29 : index
    %349 = memref.load %arg5[%c0_114, %c29] : memref<2x49xf32, #tpu.memory_space<smem>>
    %350 = vector.broadcast %349 : f32 to vector<4x4xf32>
    %351 = arith.mulf %348, %350 : vector<4x4xf32>
    %352 = arith.addf %347, %351 : vector<4x4xf32>
    %353 = vector.extract_strided_slice %56 {offsets = [4, 1], sizes = [4, 4], strides = [1, 1]} : vector<10x10xf32> to vector<4x4xf32>
    %c1_115 = arith.constant 1 : index
    %c29_116 = arith.constant 29 : index
    %354 = memref.load %arg5[%c1_115, %c29_116] : memref<2x49xf32, #tpu.memory_space<smem>>
    %355 = vector.broadcast %354 : f32 to vector<4x4xf32>
    %356 = arith.mulf %353, %355 : vector<4x4xf32>
    %357 = arith.addf %352, %356 : vector<4x4xf32>
    %358 = vector.extract_strided_slice %52 {offsets = [4, 2], sizes = [4, 4], strides = [1, 1]} : vector<10x10xf32> to vector<4x4xf32>
    %c0_117 = arith.constant 0 : index
    %c30 = arith.constant 30 : index
    %359 = memref.load %arg5[%c0_117, %c30] : memref<2x49xf32, #tpu.memory_space<smem>>
    %360 = vector.broadcast %359 : f32 to vector<4x4xf32>
    %361 = arith.mulf %358, %360 : vector<4x4xf32>
    %362 = arith.addf %357, %361 : vector<4x4xf32>
    %363 = vector.extract_strided_slice %56 {offsets = [4, 2], sizes = [4, 4], strides = [1, 1]} : vector<10x10xf32> to vector<4x4xf32>
    %c1_118 = arith.constant 1 : index
    %c30_119 = arith.constant 30 : index
    %364 = memref.load %arg5[%c1_118, %c30_119] : memref<2x49xf32, #tpu.memory_space<smem>>
    %365 = vector.broadcast %364 : f32 to vector<4x4xf32>
    %366 = arith.mulf %363, %365 : vector<4x4xf32>
    %367 = arith.addf %362, %366 : vector<4x4xf32>
    %368 = vector.extract_strided_slice %52 {offsets = [4, 3], sizes = [4, 4], strides = [1, 1]} : vector<10x10xf32> to vector<4x4xf32>
    %c0_120 = arith.constant 0 : index
    %c31 = arith.constant 31 : index
    %369 = memref.load %arg5[%c0_120, %c31] : memref<2x49xf32, #tpu.memory_space<smem>>
    %370 = vector.broadcast %369 : f32 to vector<4x4xf32>
    %371 = arith.mulf %368, %370 : vector<4x4xf32>
    %372 = arith.addf %367, %371 : vector<4x4xf32>
    %373 = vector.extract_strided_slice %56 {offsets = [4, 3], sizes = [4, 4], strides = [1, 1]} : vector<10x10xf32> to vector<4x4xf32>
    %c1_121 = arith.constant 1 : index
    %c31_122 = arith.constant 31 : index
    %374 = memref.load %arg5[%c1_121, %c31_122] : memref<2x49xf32, #tpu.memory_space<smem>>
    %375 = vector.broadcast %374 : f32 to vector<4x4xf32>
    %376 = arith.mulf %373, %375 : vector<4x4xf32>
    %377 = arith.addf %372, %376 : vector<4x4xf32>
    %378 = vector.extract_strided_slice %52 {offsets = [4, 4], sizes = [4, 4], strides = [1, 1]} : vector<10x10xf32> to vector<4x4xf32>
    %c0_123 = arith.constant 0 : index
    %c32 = arith.constant 32 : index
    %379 = memref.load %arg5[%c0_123, %c32] : memref<2x49xf32, #tpu.memory_space<smem>>
    %380 = vector.broadcast %379 : f32 to vector<4x4xf32>
    %381 = arith.mulf %378, %380 : vector<4x4xf32>
    %382 = arith.addf %377, %381 : vector<4x4xf32>
    %383 = vector.extract_strided_slice %56 {offsets = [4, 4], sizes = [4, 4], strides = [1, 1]} : vector<10x10xf32> to vector<4x4xf32>
    %c1_124 = arith.constant 1 : index
    %c32_125 = arith.constant 32 : index
    %384 = memref.load %arg5[%c1_124, %c32_125] : memref<2x49xf32, #tpu.memory_space<smem>>
    %385 = vector.broadcast %384 : f32 to vector<4x4xf32>
    %386 = arith.mulf %383, %385 : vector<4x4xf32>
    %387 = arith.addf %382, %386 : vector<4x4xf32>
    %388 = vector.extract_strided_slice %52 {offsets = [4, 5], sizes = [4, 4], strides = [1, 1]} : vector<10x10xf32> to vector<4x4xf32>
    %c0_126 = arith.constant 0 : index
    %c33 = arith.constant 33 : index
    %389 = memref.load %arg5[%c0_126, %c33] : memref<2x49xf32, #tpu.memory_space<smem>>
    %390 = vector.broadcast %389 : f32 to vector<4x4xf32>
    %391 = arith.mulf %388, %390 : vector<4x4xf32>
    %392 = arith.addf %387, %391 : vector<4x4xf32>
    %393 = vector.extract_strided_slice %56 {offsets = [4, 5], sizes = [4, 4], strides = [1, 1]} : vector<10x10xf32> to vector<4x4xf32>
    %c1_127 = arith.constant 1 : index
    %c33_128 = arith.constant 33 : index
    %394 = memref.load %arg5[%c1_127, %c33_128] : memref<2x49xf32, #tpu.memory_space<smem>>
    %395 = vector.broadcast %394 : f32 to vector<4x4xf32>
    %396 = arith.mulf %393, %395 : vector<4x4xf32>
    %397 = arith.addf %392, %396 : vector<4x4xf32>
    %398 = vector.extract_strided_slice %52 {offsets = [4, 6], sizes = [4, 4], strides = [1, 1]} : vector<10x10xf32> to vector<4x4xf32>
    %c0_129 = arith.constant 0 : index
    %c34 = arith.constant 34 : index
    %399 = memref.load %arg5[%c0_129, %c34] : memref<2x49xf32, #tpu.memory_space<smem>>
    %400 = vector.broadcast %399 : f32 to vector<4x4xf32>
    %401 = arith.mulf %398, %400 : vector<4x4xf32>
    %402 = arith.addf %397, %401 : vector<4x4xf32>
    %403 = vector.extract_strided_slice %56 {offsets = [4, 6], sizes = [4, 4], strides = [1, 1]} : vector<10x10xf32> to vector<4x4xf32>
    %c1_130 = arith.constant 1 : index
    %c34_131 = arith.constant 34 : index
    %404 = memref.load %arg5[%c1_130, %c34_131] : memref<2x49xf32, #tpu.memory_space<smem>>
    %405 = vector.broadcast %404 : f32 to vector<4x4xf32>
    %406 = arith.mulf %403, %405 : vector<4x4xf32>
    %407 = arith.addf %402, %406 : vector<4x4xf32>
    %408 = vector.extract_strided_slice %52 {offsets = [5, 0], sizes = [4, 4], strides = [1, 1]} : vector<10x10xf32> to vector<4x4xf32>
    %c0_132 = arith.constant 0 : index
    %c35 = arith.constant 35 : index
    %409 = memref.load %arg5[%c0_132, %c35] : memref<2x49xf32, #tpu.memory_space<smem>>
    %410 = vector.broadcast %409 : f32 to vector<4x4xf32>
    %411 = arith.mulf %408, %410 : vector<4x4xf32>
    %412 = arith.addf %407, %411 : vector<4x4xf32>
    %413 = vector.extract_strided_slice %56 {offsets = [5, 0], sizes = [4, 4], strides = [1, 1]} : vector<10x10xf32> to vector<4x4xf32>
    %c1_133 = arith.constant 1 : index
    %c35_134 = arith.constant 35 : index
    %414 = memref.load %arg5[%c1_133, %c35_134] : memref<2x49xf32, #tpu.memory_space<smem>>
    %415 = vector.broadcast %414 : f32 to vector<4x4xf32>
    %416 = arith.mulf %413, %415 : vector<4x4xf32>
    %417 = arith.addf %412, %416 : vector<4x4xf32>
    %418 = vector.extract_strided_slice %52 {offsets = [5, 1], sizes = [4, 4], strides = [1, 1]} : vector<10x10xf32> to vector<4x4xf32>
    %c0_135 = arith.constant 0 : index
    %c36 = arith.constant 36 : index
    %419 = memref.load %arg5[%c0_135, %c36] : memref<2x49xf32, #tpu.memory_space<smem>>
    %420 = vector.broadcast %419 : f32 to vector<4x4xf32>
    %421 = arith.mulf %418, %420 : vector<4x4xf32>
    %422 = arith.addf %417, %421 : vector<4x4xf32>
    %423 = vector.extract_strided_slice %56 {offsets = [5, 1], sizes = [4, 4], strides = [1, 1]} : vector<10x10xf32> to vector<4x4xf32>
    %c1_136 = arith.constant 1 : index
    %c36_137 = arith.constant 36 : index
    %424 = memref.load %arg5[%c1_136, %c36_137] : memref<2x49xf32, #tpu.memory_space<smem>>
    %425 = vector.broadcast %424 : f32 to vector<4x4xf32>
    %426 = arith.mulf %423, %425 : vector<4x4xf32>
    %427 = arith.addf %422, %426 : vector<4x4xf32>
    %428 = vector.extract_strided_slice %52 {offsets = [5, 2], sizes = [4, 4], strides = [1, 1]} : vector<10x10xf32> to vector<4x4xf32>
    %c0_138 = arith.constant 0 : index
    %c37 = arith.constant 37 : index
    %429 = memref.load %arg5[%c0_138, %c37] : memref<2x49xf32, #tpu.memory_space<smem>>
    %430 = vector.broadcast %429 : f32 to vector<4x4xf32>
    %431 = arith.mulf %428, %430 : vector<4x4xf32>
    %432 = arith.addf %427, %431 : vector<4x4xf32>
    %433 = vector.extract_strided_slice %56 {offsets = [5, 2], sizes = [4, 4], strides = [1, 1]} : vector<10x10xf32> to vector<4x4xf32>
    %c1_139 = arith.constant 1 : index
    %c37_140 = arith.constant 37 : index
    %434 = memref.load %arg5[%c1_139, %c37_140] : memref<2x49xf32, #tpu.memory_space<smem>>
    %435 = vector.broadcast %434 : f32 to vector<4x4xf32>
    %436 = arith.mulf %433, %435 : vector<4x4xf32>
    %437 = arith.addf %432, %436 : vector<4x4xf32>
    %438 = vector.extract_strided_slice %52 {offsets = [5, 3], sizes = [4, 4], strides = [1, 1]} : vector<10x10xf32> to vector<4x4xf32>
    %c0_141 = arith.constant 0 : index
    %c38 = arith.constant 38 : index
    %439 = memref.load %arg5[%c0_141, %c38] : memref<2x49xf32, #tpu.memory_space<smem>>
    %440 = vector.broadcast %439 : f32 to vector<4x4xf32>
    %441 = arith.mulf %438, %440 : vector<4x4xf32>
    %442 = arith.addf %437, %441 : vector<4x4xf32>
    %443 = vector.extract_strided_slice %56 {offsets = [5, 3], sizes = [4, 4], strides = [1, 1]} : vector<10x10xf32> to vector<4x4xf32>
    %c1_142 = arith.constant 1 : index
    %c38_143 = arith.constant 38 : index
    %444 = memref.load %arg5[%c1_142, %c38_143] : memref<2x49xf32, #tpu.memory_space<smem>>
    %445 = vector.broadcast %444 : f32 to vector<4x4xf32>
    %446 = arith.mulf %443, %445 : vector<4x4xf32>
    %447 = arith.addf %442, %446 : vector<4x4xf32>
    %448 = vector.extract_strided_slice %52 {offsets = [5, 4], sizes = [4, 4], strides = [1, 1]} : vector<10x10xf32> to vector<4x4xf32>
    %c0_144 = arith.constant 0 : index
    %c39 = arith.constant 39 : index
    %449 = memref.load %arg5[%c0_144, %c39] : memref<2x49xf32, #tpu.memory_space<smem>>
    %450 = vector.broadcast %449 : f32 to vector<4x4xf32>
    %451 = arith.mulf %448, %450 : vector<4x4xf32>
    %452 = arith.addf %447, %451 : vector<4x4xf32>
    %453 = vector.extract_strided_slice %56 {offsets = [5, 4], sizes = [4, 4], strides = [1, 1]} : vector<10x10xf32> to vector<4x4xf32>
    %c1_145 = arith.constant 1 : index
    %c39_146 = arith.constant 39 : index
    %454 = memref.load %arg5[%c1_145, %c39_146] : memref<2x49xf32, #tpu.memory_space<smem>>
    %455 = vector.broadcast %454 : f32 to vector<4x4xf32>
    %456 = arith.mulf %453, %455 : vector<4x4xf32>
    %457 = arith.addf %452, %456 : vector<4x4xf32>
    %458 = vector.extract_strided_slice %52 {offsets = [5, 5], sizes = [4, 4], strides = [1, 1]} : vector<10x10xf32> to vector<4x4xf32>
    %c0_147 = arith.constant 0 : index
    %c40 = arith.constant 40 : index
    %459 = memref.load %arg5[%c0_147, %c40] : memref<2x49xf32, #tpu.memory_space<smem>>
    %460 = vector.broadcast %459 : f32 to vector<4x4xf32>
    %461 = arith.mulf %458, %460 : vector<4x4xf32>
    %462 = arith.addf %457, %461 : vector<4x4xf32>
    %463 = vector.extract_strided_slice %56 {offsets = [5, 5], sizes = [4, 4], strides = [1, 1]} : vector<10x10xf32> to vector<4x4xf32>
    %c1_148 = arith.constant 1 : index
    %c40_149 = arith.constant 40 : index
    %464 = memref.load %arg5[%c1_148, %c40_149] : memref<2x49xf32, #tpu.memory_space<smem>>
    %465 = vector.broadcast %464 : f32 to vector<4x4xf32>
    %466 = arith.mulf %463, %465 : vector<4x4xf32>
    %467 = arith.addf %462, %466 : vector<4x4xf32>
    %468 = vector.extract_strided_slice %52 {offsets = [5, 6], sizes = [4, 4], strides = [1, 1]} : vector<10x10xf32> to vector<4x4xf32>
    %c0_150 = arith.constant 0 : index
    %c41 = arith.constant 41 : index
    %469 = memref.load %arg5[%c0_150, %c41] : memref<2x49xf32, #tpu.memory_space<smem>>
    %470 = vector.broadcast %469 : f32 to vector<4x4xf32>
    %471 = arith.mulf %468, %470 : vector<4x4xf32>
    %472 = arith.addf %467, %471 : vector<4x4xf32>
    %473 = vector.extract_strided_slice %56 {offsets = [5, 6], sizes = [4, 4], strides = [1, 1]} : vector<10x10xf32> to vector<4x4xf32>
    %c1_151 = arith.constant 1 : index
    %c41_152 = arith.constant 41 : index
    %474 = memref.load %arg5[%c1_151, %c41_152] : memref<2x49xf32, #tpu.memory_space<smem>>
    %475 = vector.broadcast %474 : f32 to vector<4x4xf32>
    %476 = arith.mulf %473, %475 : vector<4x4xf32>
    %477 = arith.addf %472, %476 : vector<4x4xf32>
    %478 = vector.extract_strided_slice %52 {offsets = [6, 0], sizes = [4, 4], strides = [1, 1]} : vector<10x10xf32> to vector<4x4xf32>
    %c0_153 = arith.constant 0 : index
    %c42 = arith.constant 42 : index
    %479 = memref.load %arg5[%c0_153, %c42] : memref<2x49xf32, #tpu.memory_space<smem>>
    %480 = vector.broadcast %479 : f32 to vector<4x4xf32>
    %481 = arith.mulf %478, %480 : vector<4x4xf32>
    %482 = arith.addf %477, %481 : vector<4x4xf32>
    %483 = vector.extract_strided_slice %56 {offsets = [6, 0], sizes = [4, 4], strides = [1, 1]} : vector<10x10xf32> to vector<4x4xf32>
    %c1_154 = arith.constant 1 : index
    %c42_155 = arith.constant 42 : index
    %484 = memref.load %arg5[%c1_154, %c42_155] : memref<2x49xf32, #tpu.memory_space<smem>>
    %485 = vector.broadcast %484 : f32 to vector<4x4xf32>
    %486 = arith.mulf %483, %485 : vector<4x4xf32>
    %487 = arith.addf %482, %486 : vector<4x4xf32>
    %488 = vector.extract_strided_slice %52 {offsets = [6, 1], sizes = [4, 4], strides = [1, 1]} : vector<10x10xf32> to vector<4x4xf32>
    %c0_156 = arith.constant 0 : index
    %c43 = arith.constant 43 : index
    %489 = memref.load %arg5[%c0_156, %c43] : memref<2x49xf32, #tpu.memory_space<smem>>
    %490 = vector.broadcast %489 : f32 to vector<4x4xf32>
    %491 = arith.mulf %488, %490 : vector<4x4xf32>
    %492 = arith.addf %487, %491 : vector<4x4xf32>
    %493 = vector.extract_strided_slice %56 {offsets = [6, 1], sizes = [4, 4], strides = [1, 1]} : vector<10x10xf32> to vector<4x4xf32>
    %c1_157 = arith.constant 1 : index
    %c43_158 = arith.constant 43 : index
    %494 = memref.load %arg5[%c1_157, %c43_158] : memref<2x49xf32, #tpu.memory_space<smem>>
    %495 = vector.broadcast %494 : f32 to vector<4x4xf32>
    %496 = arith.mulf %493, %495 : vector<4x4xf32>
    %497 = arith.addf %492, %496 : vector<4x4xf32>
    %498 = vector.extract_strided_slice %52 {offsets = [6, 2], sizes = [4, 4], strides = [1, 1]} : vector<10x10xf32> to vector<4x4xf32>
    %c0_159 = arith.constant 0 : index
    %c44 = arith.constant 44 : index
    %499 = memref.load %arg5[%c0_159, %c44] : memref<2x49xf32, #tpu.memory_space<smem>>
    %500 = vector.broadcast %499 : f32 to vector<4x4xf32>
    %501 = arith.mulf %498, %500 : vector<4x4xf32>
    %502 = arith.addf %497, %501 : vector<4x4xf32>
    %503 = vector.extract_strided_slice %56 {offsets = [6, 2], sizes = [4, 4], strides = [1, 1]} : vector<10x10xf32> to vector<4x4xf32>
    %c1_160 = arith.constant 1 : index
    %c44_161 = arith.constant 44 : index
    %504 = memref.load %arg5[%c1_160, %c44_161] : memref<2x49xf32, #tpu.memory_space<smem>>
    %505 = vector.broadcast %504 : f32 to vector<4x4xf32>
    %506 = arith.mulf %503, %505 : vector<4x4xf32>
    %507 = arith.addf %502, %506 : vector<4x4xf32>
    %508 = vector.extract_strided_slice %52 {offsets = [6, 3], sizes = [4, 4], strides = [1, 1]} : vector<10x10xf32> to vector<4x4xf32>
    %c0_162 = arith.constant 0 : index
    %c45 = arith.constant 45 : index
    %509 = memref.load %arg5[%c0_162, %c45] : memref<2x49xf32, #tpu.memory_space<smem>>
    %510 = vector.broadcast %509 : f32 to vector<4x4xf32>
    %511 = arith.mulf %508, %510 : vector<4x4xf32>
    %512 = arith.addf %507, %511 : vector<4x4xf32>
    %513 = vector.extract_strided_slice %56 {offsets = [6, 3], sizes = [4, 4], strides = [1, 1]} : vector<10x10xf32> to vector<4x4xf32>
    %c1_163 = arith.constant 1 : index
    %c45_164 = arith.constant 45 : index
    %514 = memref.load %arg5[%c1_163, %c45_164] : memref<2x49xf32, #tpu.memory_space<smem>>
    %515 = vector.broadcast %514 : f32 to vector<4x4xf32>
    %516 = arith.mulf %513, %515 : vector<4x4xf32>
    %517 = arith.addf %512, %516 : vector<4x4xf32>
    %518 = vector.extract_strided_slice %52 {offsets = [6, 4], sizes = [4, 4], strides = [1, 1]} : vector<10x10xf32> to vector<4x4xf32>
    %c0_165 = arith.constant 0 : index
    %c46 = arith.constant 46 : index
    %519 = memref.load %arg5[%c0_165, %c46] : memref<2x49xf32, #tpu.memory_space<smem>>
    %520 = vector.broadcast %519 : f32 to vector<4x4xf32>
    %521 = arith.mulf %518, %520 : vector<4x4xf32>
    %522 = arith.addf %517, %521 : vector<4x4xf32>
    %523 = vector.extract_strided_slice %56 {offsets = [6, 4], sizes = [4, 4], strides = [1, 1]} : vector<10x10xf32> to vector<4x4xf32>
    %c1_166 = arith.constant 1 : index
    %c46_167 = arith.constant 46 : index
    %524 = memref.load %arg5[%c1_166, %c46_167] : memref<2x49xf32, #tpu.memory_space<smem>>
    %525 = vector.broadcast %524 : f32 to vector<4x4xf32>
    %526 = arith.mulf %523, %525 : vector<4x4xf32>
    %527 = arith.addf %522, %526 : vector<4x4xf32>
    %528 = vector.extract_strided_slice %52 {offsets = [6, 5], sizes = [4, 4], strides = [1, 1]} : vector<10x10xf32> to vector<4x4xf32>
    %c0_168 = arith.constant 0 : index
    %c47 = arith.constant 47 : index
    %529 = memref.load %arg5[%c0_168, %c47] : memref<2x49xf32, #tpu.memory_space<smem>>
    %530 = vector.broadcast %529 : f32 to vector<4x4xf32>
    %531 = arith.mulf %528, %530 : vector<4x4xf32>
    %532 = arith.addf %527, %531 : vector<4x4xf32>
    %533 = vector.extract_strided_slice %56 {offsets = [6, 5], sizes = [4, 4], strides = [1, 1]} : vector<10x10xf32> to vector<4x4xf32>
    %c1_169 = arith.constant 1 : index
    %c47_170 = arith.constant 47 : index
    %534 = memref.load %arg5[%c1_169, %c47_170] : memref<2x49xf32, #tpu.memory_space<smem>>
    %535 = vector.broadcast %534 : f32 to vector<4x4xf32>
    %536 = arith.mulf %533, %535 : vector<4x4xf32>
    %537 = arith.addf %532, %536 : vector<4x4xf32>
    %538 = vector.extract_strided_slice %52 {offsets = [6, 6], sizes = [4, 4], strides = [1, 1]} : vector<10x10xf32> to vector<4x4xf32>
    %c0_171 = arith.constant 0 : index
    %c48 = arith.constant 48 : index
    %539 = memref.load %arg5[%c0_171, %c48] : memref<2x49xf32, #tpu.memory_space<smem>>
    %540 = vector.broadcast %539 : f32 to vector<4x4xf32>
    %541 = arith.mulf %538, %540 : vector<4x4xf32>
    %542 = arith.addf %537, %541 : vector<4x4xf32>
    %543 = vector.extract_strided_slice %56 {offsets = [6, 6], sizes = [4, 4], strides = [1, 1]} : vector<10x10xf32> to vector<4x4xf32>
    %c1_172 = arith.constant 1 : index
    %c48_173 = arith.constant 48 : index
    %544 = memref.load %arg5[%c1_172, %c48_173] : memref<2x49xf32, #tpu.memory_space<smem>>
    %545 = vector.broadcast %544 : f32 to vector<4x4xf32>
    %546 = arith.mulf %543, %545 : vector<4x4xf32>
    %547 = arith.addf %542, %546 : vector<4x4xf32>
    %548 = arith.negf %547 : vector<4x4xf32>
    %549 = math.exp %548 : vector<4x4xf32>
    %cst_174 = arith.constant 1.000000e+00 : f32
    %550 = vector.broadcast %cst_174 : f32 to vector<4x4xf32>
    %551 = arith.addf %550, %549 : vector<4x4xf32>
    %552 = arith.divf %550, %551 : vector<4x4xf32>
    %553 = vector.shape_cast %552 : vector<4x4xf32> to vector<4x4x1xf32>
    %c0_175 = arith.constant 0 : index
    %c0_176 = arith.constant 0 : index
    %c0_177 = arith.constant 0 : index
    %c0_178 = arith.constant 0 : index
    %554 = vector.load %arg2[%c0_175, %c0_176, %c0_177, %c0_178] : memref<1x4x4x32xbf16, #tpu.memory_space<vmem>>, vector<1x4x4x32xbf16>
    %555 = vector.shape_cast %554 : vector<1x4x4x32xbf16> to vector<4x4x32xbf16>
    %556 = arith.extf %555 : vector<4x4x32xbf16> to vector<4x4x32xf32>
    %557 = vector.broadcast %553 : vector<4x4x1xf32> to vector<4x4x32xf32>
    %558 = arith.mulf %44, %557 : vector<4x4x32xf32>
    %559 = arith.addf %556, %558 : vector<4x4x32xf32>
    %560 = vector.shape_cast %559 : vector<4x4x32xf32> to vector<1x4x4x32xf32>
    %561 = arith.truncf %560 : vector<1x4x4x32xf32> to vector<1x4x4x32xbf16>
    %c0_179 = arith.constant 0 : index
    %c0_180 = arith.constant 0 : index
    %c0_181 = arith.constant 0 : index
    %c0_182 = arith.constant 0 : index
    %562 = vector.load %arg6[%c0_179, %c0_180, %c0_181, %c0_182] : memref<1x4x4x32xbf16, #tpu.memory_space<vmem>>, vector<1x4x4x32xbf16>
    tpu.vector_store %arg6[%c0_179, %c0_180, %c0_181, %c0_182], %561 {strides = array<i32>} : memref<1x4x4x32xbf16, #tpu.memory_space<vmem>>, vector<1x4x4x32xbf16>,
    return
  }
  func.func @transform_0(%arg0: i32) -> (i32, i32, i32, i32) {
    %c0_i32 = arith.constant 0 : i32
    %c0_i32_0 = arith.constant 0 : i32
    %c0_i32_1 = arith.constant 0 : i32
    %c0_i32_2 = arith.constant 0 : i32
    return %arg0, %c0_i32, %c0_i32_0, %c0_i32_1 : i32, i32, i32, i32
  }
  func.func @transform_1(%arg0: i32) -> (i32, i32, i32, i32) {
    %c0_i32 = arith.constant 0 : i32
    %c0_i32_0 = arith.constant 0 : i32
    %c0_i32_1 = arith.constant 0 : i32
    %c0_i32_2 = arith.constant 0 : i32
    return %arg0, %c0_i32, %c0_i32_0, %c0_i32_1 : i32, i32, i32, i32
  }
  func.func @transform_2(%arg0: i32) -> (i32, i32) {
    %c0_i32 = arith.constant 0 : i32
    %c0_i32_0 = arith.constant 0 : i32
    %c0_i32_1 = arith.constant 0 : i32
    return %c0_i32, %c0_i32_0 : i32, i32
  }
  func.func @transform_3(%arg0: i32) -> (i32, i32) {
    %c0_i32 = arith.constant 0 : i32
    %c0_i32_0 = arith.constant 0 : i32
    %c0_i32_1 = arith.constant 0 : i32
    return %c0_i32, %c0_i32_0 : i32, i32
  }
  func.func @transform_4(%arg0: i32) -> (i32, i32) {
    %c0_i32 = arith.constant 0 : i32
    %c0_i32_0 = arith.constant 0 : i32
    %c0_i32_1 = arith.constant 0 : i32
    return %c0_i32, %c0_i32_0 : i32, i32
  }
  func.func @transform_5(%arg0: i32) -> (i32, i32, i32, i32) {
    %c0_i32 = arith.constant 0 : i32
    %c0_i32_0 = arith.constant 0 : i32
    %c0_i32_1 = arith.constant 0 : i32
    %c0_i32_2 = arith.constant 0 : i32
    return %arg0, %c0_i32, %c0_i32_0, %c0_i32_1 : i32, i32, i32, i32
  }
}

module attributes {stable_mosaic.version = 11 : i64} {
  func.func @_mm_kernel_single(%arg0: i32, %arg1: i32, %arg2: memref<128x64xbf16, #tpu.memory_space<vmem>>, %arg3: memref<64x128xbf16, #tpu.memory_space<vmem>>, %arg4: memref<1x128xf32, #tpu.memory_space<vmem>>, %arg5: memref<128x128xbf16, #tpu.memory_space<vmem>>) attributes {dimension_semantics = [#tpu.dimension_semantics<parallel>, #tpu.dimension_semantics<parallel>], iteration_bounds = array<i64: 1, 1>, scalar_prefetch = 0 : i64, scratch_operands = 0 : i64, tpu.core_type = #tpu.core_type<tc>, window_params = [{transform_indices = @transform_0, window_bounds = array<i64: 128, 64>}, {transform_indices = @transform_1, window_bounds = array<i64: 64, 128>}, {transform_indices = @transform_2, window_bounds = array<i64: 1, 128>}, {transform_indices = @transform_3, window_bounds = array<i64: 128, 128>}]} {
    %c0 = arith.constant 0 : index
    %c0_0 = arith.constant 0 : index
    %0 = vector.load %arg2[%c0, %c0_0] : memref<128x64xbf16, #tpu.memory_space<vmem>>, vector<128x64xbf16>
    %c0_1 = arith.constant 0 : index
    %c0_2 = arith.constant 0 : index
    %1 = vector.load %arg3[%c0_1, %c0_2] : memref<64x128xbf16, #tpu.memory_space<vmem>>, vector<64x128xbf16>
    %cst = arith.constant dense<0.000000e+00> : vector<128x128xf32>
    %2 = tpu.matmul %0, %1, %cst {dimension_numbers = #tpu.dot_dimension_numbers<[1], [0], [0], [1], [0, 0, 1, 1], [], []>} : vector<128x64xbf16>, vector<64x128xbf16>, vector<128x128xf32> -> vector<128x128xf32>
    %c0_3 = arith.constant 0 : index
    %c0_4 = arith.constant 0 : index
    %3 = vector.load %arg4[%c0_3, %c0_4] : memref<1x128xf32, #tpu.memory_space<vmem>>, vector<1x128xf32>
    %4 = vector.broadcast %3 : vector<1x128xf32> to vector<128x128xf32>
    %5 = arith.addf %2, %4 : vector<128x128xf32>
    %6 = arith.truncf %5 : vector<128x128xf32> to vector<128x128xbf16>
    %c0_5 = arith.constant 0 : index
    %c0_6 = arith.constant 0 : index
    %7 = vector.load %arg5[%c0_5, %c0_6] : memref<128x128xbf16, #tpu.memory_space<vmem>>, vector<128x128xbf16>
    tpu.vector_store %arg5[%c0_5, %c0_6], %6 {strides = array<i32>} : memref<128x128xbf16, #tpu.memory_space<vmem>>, vector<128x128xbf16>,
    return
  }
  func.func @transform_0(%arg0: i32, %arg1: i32) -> (i32, i32) {
    %c0_i32 = arith.constant 0 : i32
    %c0_i32_0 = arith.constant 0 : i32
    return %arg0, %c0_i32 : i32, i32
  }
  func.func @transform_1(%arg0: i32, %arg1: i32) -> (i32, i32) {
    %c0_i32 = arith.constant 0 : i32
    %c0_i32_0 = arith.constant 0 : i32
    return %c0_i32, %arg1 : i32, i32
  }
  func.func @transform_2(%arg0: i32, %arg1: i32) -> (i32, i32) {
    %c0_i32 = arith.constant 0 : i32
    %c0_i32_0 = arith.constant 0 : i32
    return %c0_i32, %arg1 : i32, i32
  }
  func.func @transform_3(%arg0: i32, %arg1: i32) -> (i32, i32) {
    %c0_i32 = arith.constant 0 : i32
    return %arg0, %arg1 : i32, i32
  }
}

module attributes {stable_mosaic.version = 11 : i64} {
  func.func @_mm_kernel_single(%arg0: i32, %arg1: i32, %arg2: memref<128x32xbf16, #tpu.memory_space<vmem>>, %arg3: memref<32x128xbf16, #tpu.memory_space<vmem>>, %arg4: memref<1x128xf32, #tpu.memory_space<vmem>>, %arg5: memref<128x128xbf16, #tpu.memory_space<vmem>>) attributes {dimension_semantics = [#tpu.dimension_semantics<parallel>, #tpu.dimension_semantics<parallel>], iteration_bounds = array<i64: 1, 1>, scalar_prefetch = 0 : i64, scratch_operands = 0 : i64, tpu.core_type = #tpu.core_type<tc>, window_params = [{transform_indices = @transform_0, window_bounds = array<i64: 128, 32>}, {transform_indices = @transform_1, window_bounds = array<i64: 32, 128>}, {transform_indices = @transform_2, window_bounds = array<i64: 1, 128>}, {transform_indices = @transform_3, window_bounds = array<i64: 128, 128>}]} {
    %c0 = arith.constant 0 : index
    %c0_0 = arith.constant 0 : index
    %0 = vector.load %arg2[%c0, %c0_0] : memref<128x32xbf16, #tpu.memory_space<vmem>>, vector<128x32xbf16>
    %c0_1 = arith.constant 0 : index
    %c0_2 = arith.constant 0 : index
    %1 = vector.load %arg3[%c0_1, %c0_2] : memref<32x128xbf16, #tpu.memory_space<vmem>>, vector<32x128xbf16>
    %cst = arith.constant dense<0.000000e+00> : vector<128x128xf32>
    %2 = tpu.matmul %0, %1, %cst {dimension_numbers = #tpu.dot_dimension_numbers<[1], [0], [0], [1], [0, 0, 1, 1], [], []>} : vector<128x32xbf16>, vector<32x128xbf16>, vector<128x128xf32> -> vector<128x128xf32>
    %c0_3 = arith.constant 0 : index
    %c0_4 = arith.constant 0 : index
    %3 = vector.load %arg4[%c0_3, %c0_4] : memref<1x128xf32, #tpu.memory_space<vmem>>, vector<1x128xf32>
    %4 = vector.broadcast %3 : vector<1x128xf32> to vector<128x128xf32>
    %5 = arith.addf %2, %4 : vector<128x128xf32>
    %6 = arith.truncf %5 : vector<128x128xf32> to vector<128x128xbf16>
    %c0_5 = arith.constant 0 : index
    %c0_6 = arith.constant 0 : index
    %7 = vector.load %arg5[%c0_5, %c0_6] : memref<128x128xbf16, #tpu.memory_space<vmem>>, vector<128x128xbf16>
    tpu.vector_store %arg5[%c0_5, %c0_6], %6 {strides = array<i32>} : memref<128x128xbf16, #tpu.memory_space<vmem>>, vector<128x128xbf16>,
    return
  }
  func.func @transform_0(%arg0: i32, %arg1: i32) -> (i32, i32) {
    %c0_i32 = arith.constant 0 : i32
    %c0_i32_0 = arith.constant 0 : i32
    return %arg0, %c0_i32 : i32, i32
  }
  func.func @transform_1(%arg0: i32, %arg1: i32) -> (i32, i32) {
    %c0_i32 = arith.constant 0 : i32
    %c0_i32_0 = arith.constant 0 : i32
    return %c0_i32, %arg1 : i32, i32
  }
  func.func @transform_2(%arg0: i32, %arg1: i32) -> (i32, i32) {
    %c0_i32 = arith.constant 0 : i32
    %c0_i32_0 = arith.constant 0 : i32
    return %c0_i32, %arg1 : i32, i32
  }
  func.func @transform_3(%arg0: i32, %arg1: i32) -> (i32, i32) {
    %c0_i32 = arith.constant 0 : i32
    return %arg0, %arg1 : i32, i32
  }
}

module attributes {stable_mosaic.version = 11 : i64} {
  func.func @_mm_kernel_single(%arg0: i32, %arg1: i32, %arg2: memref<128x128xbf16, #tpu.memory_space<vmem>>, %arg3: memref<128x128xbf16, #tpu.memory_space<vmem>>, %arg4: memref<1x128xf32, #tpu.memory_space<vmem>>, %arg5: memref<128x128xbf16, #tpu.memory_space<vmem>>) attributes {dimension_semantics = [#tpu.dimension_semantics<parallel>, #tpu.dimension_semantics<parallel>], iteration_bounds = array<i64: 1, 1>, scalar_prefetch = 0 : i64, scratch_operands = 0 : i64, tpu.core_type = #tpu.core_type<tc>, window_params = [{transform_indices = @transform_0, window_bounds = array<i64: 128, 128>}, {transform_indices = @transform_1, window_bounds = array<i64: 128, 128>}, {transform_indices = @transform_2, window_bounds = array<i64: 1, 128>}, {transform_indices = @transform_3, window_bounds = array<i64: 128, 128>}]} {
    %c0 = arith.constant 0 : index
    %c0_0 = arith.constant 0 : index
    %0 = vector.load %arg2[%c0, %c0_0] : memref<128x128xbf16, #tpu.memory_space<vmem>>, vector<128x128xbf16>
    %c0_1 = arith.constant 0 : index
    %c0_2 = arith.constant 0 : index
    %1 = vector.load %arg3[%c0_1, %c0_2] : memref<128x128xbf16, #tpu.memory_space<vmem>>, vector<128x128xbf16>
    %cst = arith.constant dense<0.000000e+00> : vector<128x128xf32>
    %2 = tpu.matmul %0, %1, %cst {dimension_numbers = #tpu.dot_dimension_numbers<[1], [0], [0], [1], [0, 0, 1, 1], [], []>} : vector<128x128xbf16>, vector<128x128xbf16>, vector<128x128xf32> -> vector<128x128xf32>
    %c0_3 = arith.constant 0 : index
    %c0_4 = arith.constant 0 : index
    %3 = vector.load %arg4[%c0_3, %c0_4] : memref<1x128xf32, #tpu.memory_space<vmem>>, vector<1x128xf32>
    %4 = vector.broadcast %3 : vector<1x128xf32> to vector<128x128xf32>
    %5 = arith.addf %2, %4 : vector<128x128xf32>
    %6 = arith.truncf %5 : vector<128x128xf32> to vector<128x128xbf16>
    %c0_5 = arith.constant 0 : index
    %c0_6 = arith.constant 0 : index
    %7 = vector.load %arg5[%c0_5, %c0_6] : memref<128x128xbf16, #tpu.memory_space<vmem>>, vector<128x128xbf16>
    tpu.vector_store %arg5[%c0_5, %c0_6], %6 {strides = array<i32>} : memref<128x128xbf16, #tpu.memory_space<vmem>>, vector<128x128xbf16>,
    return
  }
  func.func @transform_0(%arg0: i32, %arg1: i32) -> (i32, i32) {
    %c0_i32 = arith.constant 0 : i32
    %c0_i32_0 = arith.constant 0 : i32
    return %arg0, %c0_i32 : i32, i32
  }
  func.func @transform_1(%arg0: i32, %arg1: i32) -> (i32, i32) {
    %c0_i32 = arith.constant 0 : i32
    %c0_i32_0 = arith.constant 0 : i32
    return %c0_i32, %arg1 : i32, i32
  }
  func.func @transform_2(%arg0: i32, %arg1: i32) -> (i32, i32) {
    %c0_i32 = arith.constant 0 : i32
    %c0_i32_0 = arith.constant 0 : i32
    return %c0_i32, %arg1 : i32, i32
  }
  func.func @transform_3(%arg0: i32, %arg1: i32) -> (i32, i32) {
    %c0_i32 = arith.constant 0 : i32
    return %arg0, %arg1 : i32, i32
  }
}

module attributes {stable_mosaic.version = 11 : i64} {
  func.func @_mm_kernel_single(%arg0: i32, %arg1: i32, %arg2: memref<128x16xbf16, #tpu.memory_space<vmem>>, %arg3: memref<16x128xbf16, #tpu.memory_space<vmem>>, %arg4: memref<1x128xf32, #tpu.memory_space<vmem>>, %arg5: memref<128x128xbf16, #tpu.memory_space<vmem>>) attributes {dimension_semantics = [#tpu.dimension_semantics<parallel>, #tpu.dimension_semantics<parallel>], iteration_bounds = array<i64: 1, 1>, scalar_prefetch = 0 : i64, scratch_operands = 0 : i64, tpu.core_type = #tpu.core_type<tc>, window_params = [{transform_indices = @transform_0, window_bounds = array<i64: 128, 16>}, {transform_indices = @transform_1, window_bounds = array<i64: 16, 128>}, {transform_indices = @transform_2, window_bounds = array<i64: 1, 128>}, {transform_indices = @transform_3, window_bounds = array<i64: 128, 128>}]} {
    %c0 = arith.constant 0 : index
    %c0_0 = arith.constant 0 : index
    %0 = vector.load %arg2[%c0, %c0_0] : memref<128x16xbf16, #tpu.memory_space<vmem>>, vector<128x16xbf16>
    %c0_1 = arith.constant 0 : index
    %c0_2 = arith.constant 0 : index
    %1 = vector.load %arg3[%c0_1, %c0_2] : memref<16x128xbf16, #tpu.memory_space<vmem>>, vector<16x128xbf16>
    %cst = arith.constant dense<0.000000e+00> : vector<128x128xf32>
    %2 = tpu.matmul %0, %1, %cst {dimension_numbers = #tpu.dot_dimension_numbers<[1], [0], [0], [1], [0, 0, 1, 1], [], []>} : vector<128x16xbf16>, vector<16x128xbf16>, vector<128x128xf32> -> vector<128x128xf32>
    %c0_3 = arith.constant 0 : index
    %c0_4 = arith.constant 0 : index
    %3 = vector.load %arg4[%c0_3, %c0_4] : memref<1x128xf32, #tpu.memory_space<vmem>>, vector<1x128xf32>
    %4 = vector.broadcast %3 : vector<1x128xf32> to vector<128x128xf32>
    %5 = arith.addf %2, %4 : vector<128x128xf32>
    %6 = arith.truncf %5 : vector<128x128xf32> to vector<128x128xbf16>
    %c0_5 = arith.constant 0 : index
    %c0_6 = arith.constant 0 : index
    %7 = vector.load %arg5[%c0_5, %c0_6] : memref<128x128xbf16, #tpu.memory_space<vmem>>, vector<128x128xbf16>
    tpu.vector_store %arg5[%c0_5, %c0_6], %6 {strides = array<i32>} : memref<128x128xbf16, #tpu.memory_space<vmem>>, vector<128x128xbf16>,
    return
  }
  func.func @transform_0(%arg0: i32, %arg1: i32) -> (i32, i32) {
    %c0_i32 = arith.constant 0 : i32
    %c0_i32_0 = arith.constant 0 : i32
    return %arg0, %c0_i32 : i32, i32
  }
  func.func @transform_1(%arg0: i32, %arg1: i32) -> (i32, i32) {
    %c0_i32 = arith.constant 0 : i32
    %c0_i32_0 = arith.constant 0 : i32
    return %c0_i32, %arg1 : i32, i32
  }
  func.func @transform_2(%arg0: i32, %arg1: i32) -> (i32, i32) {
    %c0_i32 = arith.constant 0 : i32
    %c0_i32_0 = arith.constant 0 : i32
    return %c0_i32, %arg1 : i32, i32
  }
  func.func @transform_3(%arg0: i32, %arg1: i32) -> (i32, i32) {
    %c0_i32 = arith.constant 0 : i32
    return %arg0, %arg1 : i32, i32
  }
}

module attributes {stable_mosaic.version = 11 : i64} {
  func.func @_mm_kernel_single(%arg0: i32, %arg1: i32, %arg2: memref<256x392xbf16, #tpu.memory_space<vmem>>, %arg3: memref<392x128xbf16, #tpu.memory_space<vmem>>, %arg4: memref<1x128xf32, #tpu.memory_space<vmem>>, %arg5: memref<256x128xf32, #tpu.memory_space<vmem>>) attributes {dimension_semantics = [#tpu.dimension_semantics<parallel>, #tpu.dimension_semantics<parallel>], iteration_bounds = array<i64: 2, 1>, scalar_prefetch = 0 : i64, scratch_operands = 0 : i64, tpu.core_type = #tpu.core_type<tc>, window_params = [{transform_indices = @transform_0, window_bounds = array<i64: 256, 392>}, {transform_indices = @transform_1, window_bounds = array<i64: 392, 128>}, {transform_indices = @transform_2, window_bounds = array<i64: 1, 128>}, {transform_indices = @transform_3, window_bounds = array<i64: 256, 128>}]} {
    %c0 = arith.constant 0 : index
    %c0_0 = arith.constant 0 : index
    %0 = vector.load %arg2[%c0, %c0_0] : memref<256x392xbf16, #tpu.memory_space<vmem>>, vector<256x392xbf16>
    %c0_1 = arith.constant 0 : index
    %c0_2 = arith.constant 0 : index
    %1 = vector.load %arg3[%c0_1, %c0_2] : memref<392x128xbf16, #tpu.memory_space<vmem>>, vector<392x128xbf16>
    %cst = arith.constant dense<0.000000e+00> : vector<256x128xf32>
    %2 = tpu.matmul %0, %1, %cst {dimension_numbers = #tpu.dot_dimension_numbers<[1], [0], [0], [1], [0, 0, 1, 1], [], []>} : vector<256x392xbf16>, vector<392x128xbf16>, vector<256x128xf32> -> vector<256x128xf32>
    %c0_3 = arith.constant 0 : index
    %c0_4 = arith.constant 0 : index
    %3 = vector.load %arg4[%c0_3, %c0_4] : memref<1x128xf32, #tpu.memory_space<vmem>>, vector<1x128xf32>
    %4 = vector.broadcast %3 : vector<1x128xf32> to vector<256x128xf32>
    %5 = arith.addf %2, %4 : vector<256x128xf32>
    %6 = math.tanh %5 : vector<256x128xf32>
    %c0_5 = arith.constant 0 : index
    %c0_6 = arith.constant 0 : index
    %7 = vector.load %arg5[%c0_5, %c0_6] : memref<256x128xf32, #tpu.memory_space<vmem>>, vector<256x128xf32>
    tpu.vector_store %arg5[%c0_5, %c0_6], %6 {strides = array<i32>} : memref<256x128xf32, #tpu.memory_space<vmem>>, vector<256x128xf32>,
    return
  }
  func.func @transform_0(%arg0: i32, %arg1: i32) -> (i32, i32) {
    %c0_i32 = arith.constant 0 : i32
    %c0_i32_0 = arith.constant 0 : i32
    return %arg0, %c0_i32 : i32, i32
  }
  func.func @transform_1(%arg0: i32, %arg1: i32) -> (i32, i32) {
    %c0_i32 = arith.constant 0 : i32
    %c0_i32_0 = arith.constant 0 : i32
    return %c0_i32, %arg1 : i32, i32
  }
  func.func @transform_2(%arg0: i32, %arg1: i32) -> (i32, i32) {
    %c0_i32 = arith.constant 0 : i32
    %c0_i32_0 = arith.constant 0 : i32
    return %c0_i32, %arg1 : i32, i32
  }
  func.func @transform_3(%arg0: i32, %arg1: i32) -> (i32, i32) {
    %c0_i32 = arith.constant 0 : i32
    return %arg0, %arg1 : i32, i32
  }
}

</mosaic_0001>

<bundles_post_ra>
// kernel: generator_forward.26
= control target key start
LH: loop header
LB: loop body
LE: loop exit
PB: predicated region body
PF: predicated region fallthrough
CT: control target
= control target key end

     0   :  { %s712_s6 = smov 0   ;;  %s1308_s0 = inlined_call_operand.vmem [shape: bf16[2,256,8], index: 0, kind: input, shape index: {}]   ;;  %s1309_s1 = inlined_call_operand.vmem [shape: bf16[2,256,8], index: 1, kind: output, shape index: {}]  }
   0x1 LB: > { %s588_s7 = sadd.s32 4294967295, %s699_s6   ;;  %p592_p0 = scmp.ge.s32.totalorder %s699_s6, 1  ;;  %s699_s6 = sphi %s712_s6, %s11_s6  }
   0x2   : > { %p87_p1 = scmp.lt.s32.totalorder %s699_s6, 3 }
   0x4   : > { %p88_p2 = pnand %p592_p0, %p87_p1 }
   0x5   : > { %p107_p3 = scmp.lt.s32.totalorder (!%p88_p2), %s588_s7, 1 }
   0x6   : > { %91 = sbr.rel (%p88_p2) target bundleno = 233 (0xe9), region = 24 }
   0xb   : > { %s1317_s7 = smov (!%p107_p3, %s588_s7), 1  ;;  %vm181_vm0 = vcmask 64512   ;;  %vm500_vm5 = vcmask 60416  }
   0xc   : > { %s599_s8 = sshll.u32 %s1317_s7, 7 }
   0xd   : > { %s728_s11 = scalar_lea.vmem %s1308_s0, %s599_s8  ;;  %s1191_s14 = scalar_lea.vmem %s1309_s1, %s599_s8 }
   0xe   : > { %v731_v0 = vld [vmem:[%s728_s11] sm:$0xff]   ;;  %v734_v1 = vld [vmem:[%s728_s11 + $0x8] sm:$0xff]   ;;  %v740_v5 = vld [vmem:[%s728_s11 + $0x10] sm:$0xff]  }
   0xf   : > { %v603_v2 = vunpack.c.l.bf16 %v731_v0  ;;  %v604_v3 = vunpack.c.h.bf16 %v731_v0  ;;  %v607_v4 = vunpack.c.l.bf16 %v734_v1  ;;  %v608_v6 = vunpack.c.h.bf16 %v734_v1  ;;  %v754_v11 = vld [vmem:[%s728_s11 + $0x18] sm:$0xff]   ;;  %v765_v18 = vld [vmem:[%s728_s11 + $0x20] sm:$0xff]   ;;  %v776_v25 = vld [vmem:[%s728_s11 + $0x28] sm:$0xff]  }
  0x10   : > { %v611_v7 = vunpack.c.l.bf16 %v740_v5  ;;  %v612_v13 = vunpack.c.h.bf16 %v740_v5  ;;  %v615_v16 = vunpack.c.l.bf16 %v754_v11  ;;  %v616_v20 = vunpack.c.h.bf16 %v754_v11  ;;  %v787_v32 = vld [vmem:[%s728_s11 + $0x30] sm:$0xff]   ;;  %v798_v39 = vld [vmem:[%s728_s11 + $0x38] sm:$0xff]   ;;  %v809_v46 = vld [vmem:[%s728_s11 + $0x40] sm:$0xff]  }
  0x11   : > { %v182_v8 = vsel %vm181_vm0, %v603_v2, 0.0  ;;  %v183_v9 = vsel %vm181_vm0, %v604_v3, 0.0  ;;  %v185_v10 = vsel %vm181_vm0, %v607_v4, 0.0  ;;  %v187_v14 = vsel %vm181_vm0, %v608_v6, 0.0  ;;  %v820_v53 = vld [vmem:[%s728_s11 + $0x48] sm:$0xff]   ;;  %v831_v60 = vld [vmem:[%s728_s11 + $0x50] sm:$0xff]  }
  0x12   : > { %v184_v12 = vadd.f32 %v183_v9, %v182_v8  ;;  %v189_v17 = vsel %vm181_vm0, %v611_v7, 0.0  ;;  %v191_v21 = vsel %vm181_vm0, %v612_v13, 0.0  ;;  %v619_v23 = vunpack.c.l.bf16 %v765_v18 }
  0x13   : > { %v193_v24 = vsel %vm181_vm0, %v615_v16, 0.0  ;;  %v620_v27 = vunpack.c.h.bf16 %v765_v18  ;;  %v195_v28 = vsel %vm181_vm0, %v616_v20, 0.0  ;;  %v623_v30 = vunpack.c.l.bf16 %v776_v25 }
  0x14   : > { %v186_v15 = vadd.f32 %v185_v10, %v184_v12  ;;  %v197_v31 = vsel %vm181_vm0, %v619_v23, 0.0  ;;  %v624_v34 = vunpack.c.h.bf16 %v776_v25  ;;  %v627_v37 = vunpack.c.l.bf16 %v787_v32  ;;  %v842_v12 = vld [vmem:[%s728_s11 + $0x58] sm:$0xff]  }
  0x15   : > { %v199_v35 = vsel %vm181_vm0, %v620_v27, 0.0  ;;  %v201_v38 = vsel %vm181_vm0, %v623_v30, 0.0  ;;  %v628_v41 = vunpack.c.h.bf16 %v787_v32  ;;  %v631_v44 = vunpack.c.l.bf16 %v798_v39 }
  0x16   : > { %v188_v19 = vadd.f32 %v187_v14, %v186_v15  ;;  %v203_v42 = vsel %vm181_vm0, %v624_v34, 0.0  ;;  %v205_v45 = vsel %vm181_vm0, %v627_v37, 0.0  ;;  %v632_v48 = vunpack.c.h.bf16 %v798_v39 }
  0x17   : > { %v207_v49 = vsel %vm181_vm0, %v628_v41, 0.0  ;;  %v635_v51 = vunpack.c.l.bf16 %v809_v46  ;;  %v209_v52 = vsel %vm181_vm0, %v631_v44, 0.0  ;;  %v636_v55 = vunpack.c.h.bf16 %v809_v46 }
  0x18   : > { %v190_v22 = vadd.f32 %v189_v17, %v188_v19  ;;  %v211_v56 = vsel %vm181_vm0, %v632_v48, 0.0  ;;  %v639_v58 = vunpack.c.l.bf16 %v820_v53  ;;  %v640_v62 = vunpack.c.h.bf16 %v820_v53 }
  0x19   : > { %v213_v59 = vsel %vm181_vm0, %v635_v51, 0.0  ;;  %v215_v63 = vsel %vm181_vm0, %v636_v55, 0.0  ;;  %v643_v9 = vunpack.c.l.bf16 %v831_v60  ;;  %v644_v15 = vunpack.c.h.bf16 %v831_v60 }
  0x1a   : > { %v192_v26 = vadd.f32 %v191_v21, %v190_v22  ;;  %v217_v10 = vsel %vm181_vm0, %v639_v58, 0.0  ;;  %v219_v17 = vsel %vm181_vm0, %v640_v62, 0.0  ;;  %v647_v21 = vunpack.c.l.bf16 %v842_v12 }
  0x1b   : > { %v221_v22 = vsel %vm181_vm0, %v643_v9, 0.0 }
  0x1c   : > { %v194_v29 = vadd.f32 %v193_v24, %v192_v26  ;;  %v853_v24 = vld [vmem:[%s728_s11 + $0x60] sm:$0xff]  }
  0x1e   : > { %v196_v33 = vadd.f32 %v195_v28, %v194_v29  ;;  %v648_v28 = vunpack.c.h.bf16 %v842_v12  ;;  %v223_v29 = vsel %vm181_vm0, %v644_v15, 0.0 }
  0x20   : > { %v198_v36 = vadd.f32 %v197_v31, %v196_v33  ;;  %v651_v33 = vunpack.c.l.bf16 %v853_v24 }
  0x22   : > { %v200_v40 = vadd.f32 %v199_v35, %v198_v36  ;;  %v225_v35 = vsel %vm181_vm0, %v647_v21, 0.0  ;;  %v864_v36 = vld [vmem:[%s728_s11 + $0x68] sm:$0xff]  }
  0x24   : > { %v202_v43 = vadd.f32 %v201_v38, %v200_v40  ;;  %v652_v40 = vunpack.c.h.bf16 %v853_v24 }
  0x26   : > { %v204_v47 = vadd.f32 %v203_v42, %v202_v43  ;;  %v227_v42 = vsel %vm181_vm0, %v648_v28, 0.0 }
  0x28   : > { %v206_v50 = vadd.f32 %v205_v45, %v204_v47  ;;  %v655_v45 = vunpack.c.l.bf16 %v864_v36  ;;  %v229_v47 = vsel %vm181_vm0, %v651_v33, 0.0 }
  0x2a   : > { %v208_v54 = vadd.f32 %v207_v49, %v206_v50  ;;  %v875_v49 = vld [vmem:[%s728_s11 + $0x70] sm:$0xff]  }
  0x2c   : > { %v210_v57 = vadd.f32 %v209_v52, %v208_v54  ;;  %v656_v52 = vunpack.c.h.bf16 %v864_v36  ;;  %v231_v54 = vsel %vm181_vm0, %v652_v40, 0.0  ;;  %v1314_v36 = vunpack.c.h.bf16 %v875_v49 }
  0x2e   : > { %v212_v61 = vadd.f32 %v211_v56, %v210_v57  ;;  %v1311_v57 = vunpack.c.l.bf16 %v875_v49 }
  0x30   : > { %v214_v8 = vadd.f32 %v213_v59, %v212_v61  ;;  %v233_v59 = vsel %vm181_vm0, %v655_v45, 0.0  ;;  %v886_v61 = vld [vmem:[%s728_s11 + $0x78] sm:$0xff]  }
  0x32   : > { %v216_v14 = vadd.f32 %v215_v63, %v214_v8  ;;  %v1310_v8 = vunpack.c.h.bf16 %v875_v49 }
  0x34   : > { %v218_v19 = vadd.f32 %v217_v10, %v216_v14  ;;  %v235_v10 = vsel %vm181_vm0, %v656_v52, 0.0 }
  0x36   : > { %v220_v26 = vadd.f32 %v219_v17, %v218_v19  ;;  %v1312_v17 = vunpack.c.l.bf16 %v886_v61  ;;  %v237_v19 = vsel %vm181_vm0, %v1311_v57, 0.0 }
  0x38   : > { %v222_v31 = vadd.f32 %v221_v22, %v220_v26  ;;  %v701_v26 = vmov 256.0  }
  0x39   : > { %689 = vrcp.f32 %v701_v26 }
  0x3a   : > { %v224_v38 = vadd.f32 %v223_v29, %v222_v31  ;;  %v664_v29 = vunpack.c.h.bf16 %v886_v61  ;;  %v239_v31 = vsel %vm181_vm0, %v1310_v8, 0.0 }
  0x3c   : > { %v226_v43 = vadd.f32 %v225_v35, %v224_v38  ;;  %v241_v38 = vsel %vm181_vm0, %v1312_v17, 0.0 }
  0x3e   : > { %v228_v50 = vadd.f32 %v227_v42, %v226_v43  ;;  %v243_v43 = vsel %vm181_vm0, %v664_v29, 0.0 }
  0x40   : > { %v230_v56 = vadd.f32 %v229_v47, %v228_v50  ;;  %v690_v47 = vpop.eup %689 }
  0x41   : > { %vm256_vm1 = vweird.f32 %v690_v47 }
  0x42   : > { %v232_v63 = vadd.f32 %v231_v54, %v230_v56  ;;  %v252_v56 = vmul.f32 256.0, %v690_v47 }
  0x44   : > { %v234_v14 = vadd.f32 %v233_v59, %v232_v63 }
  0x46   : > { %v236_v22 = vadd.f32 %v235_v10, %v234_v14  ;;  %v253_v10 = vsub.f32 1.0, %v252_v56 }
  0x48   : > { %v238_v35 = vadd.f32 %v237_v19, %v236_v22  ;;  %v254_v8 = vmul.f32 %v690_v47, %v253_v10 }
  0x4a   : > { %v240_v42 = vadd.f32 %v239_v31, %v238_v35  ;;  %v255_v22 = vadd.f32 %v690_v47, %v254_v8 }
  0x4c   : > { %v242_v50 = vadd.f32 %v241_v38, %v240_v42  ;;  %v906_v17 = vsel %vm256_vm1, %v690_v47, %v255_v22 }
  0x4e   : > { %v244_v54 = vadd.f32 %v243_v43, %v242_v50 }
  0x50   : > { %v245_v59 = vrot.slane %v244_v54, 4 }
  0x52   : > { %v246_v63 = vadd.f32 %v245_v59, %v244_v54 }
  0x54   : > { %v247_v14 = vrot.slane %v246_v63, 2 }
  0x56   : > { %v248_v26 = vadd.f32 %v247_v14, %v246_v63 }
  0x58   : > { %v249_v19 = vrot.slane %v248_v26, 1 }
  0x5a   : > { %v250_v57 = vadd.f32 %v249_v19, %v248_v26 }
  0x5c   : > { %v909_v31 = vmul.f32 %v906_v17, %v250_v57 }
  0x5e   : > { %v914_v35 = vsub.f32 %v603_v2, %v909_v31  ;;  %v919_v38 = vsub.f32 %v604_v3, %v909_v31  ;;  %v924_v8 = vsub.f32 %v607_v4, %v909_v31  ;;  %v929_v57 = vsub.f32 %v608_v6, %v909_v31 }
  0x5f   : > { %v934_v2 = vsub.f32 %v611_v7, %v909_v31  ;;  %v945_v1 = vsub.f32 %v612_v13, %v909_v31  ;;  %v952_v7 = vsub.f32 %v615_v16, %v909_v31  ;;  %v962_v13 = vsub.f32 %v616_v20, %v909_v31 }
  0x60   : > { %v291_v0 = vmul.f32 %v914_v35, %v914_v35  ;;  %v292_v3 = vmul.f32 %v919_v38, %v919_v38  ;;  %v293_v4 = vmul.f32 %v924_v8, %v924_v8  ;;  %v294_v6 = vmul.f32 %v929_v57, %v929_v57 }
  0x61   : > { %v295_v42 = vmul.f32 %v934_v2, %v934_v2  ;;  %v296_v54 = vmul.f32 %v945_v1, %v945_v1  ;;  %v970_v59 = vsub.f32 %v619_v23, %v909_v31  ;;  %v297_v63 = vmul.f32 %v952_v7, %v952_v7 }
  0x62   : > { %v323_v43 = vsel %vm181_vm0, %v291_v0, 0.0  ;;  %v324_v47 = vsel %vm181_vm0, %v292_v3, 0.0  ;;  %v326_v50 = vsel %vm181_vm0, %v293_v4, 0.0  ;;  %v328_v16 = vsel %vm181_vm0, %v294_v6, 0.0 }
  0x63   : > { %v325_v5 = vadd.f32 %v324_v47, %v323_v43  ;;  %v330_v10 = vsel %vm181_vm0, %v295_v42, 0.0  ;;  %v978_v11 = vsub.f32 %v620_v27, %v909_v31  ;;  %v298_v20 = vmul.f32 %v962_v13, %v962_v13 }
  0x64   : > { %v332_v26 = vsel %vm181_vm0, %v296_v54, 0.0  ;;  %v986_v23 = vsub.f32 %v623_v30, %v909_v31  ;;  %v299_v22 = vmul.f32 %v970_v59, %v970_v59  ;;  %v334_v0 = vsel %vm181_vm0, %v297_v63, 0.0 }
  0x65   : > { %v327_v56 = vadd.f32 %v326_v50, %v325_v5  ;;  %v994_v18 = vsub.f32 %v624_v34, %v909_v31  ;;  %v300_v27 = vmul.f32 %v978_v11, %v978_v11  ;;  %v336_v4 = vsel %vm181_vm0, %v298_v20, 0.0 }
  0x66   : > { %v1002_v30 = vsub.f32 %v627_v37, %v909_v31  ;;  %v301_v42 = vmul.f32 %v986_v23, %v986_v23  ;;  %v338_v43 = vsel %vm181_vm0, %v299_v22, 0.0  ;;  %v1010_v25 = vsub.f32 %v628_v41, %v909_v31 }
  0x67   : > { %v329_v14 = vadd.f32 %v328_v16, %v327_v56  ;;  %v302_v34 = vmul.f32 %v994_v18, %v994_v18  ;;  %v340_v50 = vsel %vm181_vm0, %v300_v27, 0.0  ;;  %v1018_v37 = vsub.f32 %v631_v44, %v909_v31 }
  0x68   : > { %v303_v54 = vmul.f32 %v1002_v30, %v1002_v30  ;;  %v342_v16 = vsel %vm181_vm0, %v301_v42, 0.0  ;;  %v1026_v32 = vsub.f32 %v632_v48, %v909_v31  ;;  %v304_v41 = vmul.f32 %v1010_v25, %v1010_v25 }
  0x69   : > { %v331_v19 = vadd.f32 %v330_v10, %v329_v14  ;;  %v344_v63 = vsel %vm181_vm0, %v302_v34, 0.0  ;;  %v1034_v44 = vsub.f32 %v635_v51, %v909_v31  ;;  %v305_v14 = vmul.f32 %v1018_v37, %v1018_v37 }
  0x6a   : > { %v346_v20 = vsel %vm181_vm0, %v303_v54, 0.0  ;;  %v1042_v39 = vsub.f32 %v636_v55, %v909_v31  ;;  %v306_v48 = vmul.f32 %v1026_v32, %v1026_v32  ;;  %v1050_v51 = vsub.f32 %v639_v58, %v909_v31 }
  0x6b   : > { %v333_v3 = vadd.f32 %v332_v26, %v331_v19  ;;  %v348_v19 = vsel %vm181_vm0, %v304_v41, 0.0  ;;  %v1058_v46 = vsub.f32 %v640_v62, %v909_v31  ;;  %v1066_v58 = vsub.f32 %v643_v9, %v909_v31 }
  0x6c   : > { %v308_v55 = vmul.f32 %v1042_v39, %v1042_v39  ;;  %v309_v42 = vmul.f32 %v1050_v51, %v1050_v51  ;;  %v1074_v53 = vsub.f32 %v644_v15, %v909_v31  ;;  %v1082_v9 = vsub.f32 %v647_v21, %v909_v31 }
  0x6d   : > { %v335_v6 = vadd.f32 %v334_v0, %v333_v3  ;;  %v307_v0 = vmul.f32 %v1034_v44, %v1034_v44  ;;  %v350_v3 = vsel %vm181_vm0, %v305_v14, 0.0  ;;  %v310_v62 = vmul.f32 %v1058_v46, %v1058_v46 }
  0x6e   : > { %v356_v34 = vsel %vm181_vm0, %v308_v55, 0.0  ;;  %v358_v54 = vsel %vm181_vm0, %v309_v42, 0.0  ;;  %v1090_v60 = vsub.f32 %v648_v28, %v909_v31  ;;  %v312_v15 = vmul.f32 %v1074_v53, %v1074_v53 }
  0x6f   : > { %v337_v47 = vadd.f32 %v336_v4, %v335_v6  ;;  %v352_v4 = vsel %vm181_vm0, %v306_v48, 0.0  ;;  %v1098_v21 = vsub.f32 %v651_v33, %v909_v31  ;;  %v1106_v12 = vsub.f32 %v652_v40, %v909_v31 }
  0x70   : > { %v314_v28 = vmul.f32 %v1090_v60, %v1090_v60  ;;  %v1114_v33 = vsub.f32 %v655_v45, %v909_v31  ;;  %v1122_v24 = vsub.f32 %v656_v52, %v909_v31  ;;  %v1313_v45 = vunpack.c.l.bf16 %v875_v49 }
  0x71   : > { %v339_v5 = vadd.f32 %v338_v43, %v337_v47  ;;  %v354_v43 = vsel %vm181_vm0, %v307_v0, 0.0  ;;  %v315_v48 = vmul.f32 %v1098_v21, %v1098_v21  ;;  %v316_v40 = vmul.f32 %v1106_v12, %v1106_v12 }
  0x72   : > { %v368_v0 = vsel %vm181_vm0, %v314_v28, 0.0  ;;  %v317_v55 = vmul.f32 %v1114_v33, %v1114_v33  ;;  %v1138_v52 = vsub.f32 %v1314_v36, %v909_v31  ;;  %v318_v42 = vmul.f32 %v1122_v24, %v1122_v24 }
  0x73   : > { %v341_v56 = vadd.f32 %v340_v50, %v339_v5  ;;  %v311_v5 = vmul.f32 %v1066_v58, %v1066_v58  ;;  %v1154_v49 = vsub.f32 %v664_v29, %v909_v31 }
  0x75   : > { %v343_v10 = vadd.f32 %v342_v16, %v341_v56  ;;  %v360_v56 = vsel %vm181_vm0, %v310_v62, 0.0  ;;  %v1315_v62 = vunpack.c.l.bf16 %v886_v61 }
  0x77   : > { %v345_v26 = vadd.f32 %v344_v63, %v343_v10  ;;  %v313_v63 = vmul.f32 %v1082_v9, %v1082_v9  ;;  %v362_v10 = vsel %vm181_vm0, %v311_v5, 0.0  ;;  %v374_v5 = vsel %vm181_vm0, %v317_v55, 0.0 }
  0x79   : > { %v347_v22 = vadd.f32 %v346_v20, %v345_v26  ;;  %v364_v20 = vsel %vm181_vm0, %v312_v15, 0.0  ;;  %v376_v15 = vsel %vm181_vm0, %v318_v42, 0.0 }
  0x7b   : > { %v349_v27 = vadd.f32 %v348_v19, %v347_v22  ;;  %v366_v19 = vsel %vm181_vm0, %v313_v63, 0.0 }
  0x7d   : > { %v351_v6 = vadd.f32 %v350_v3, %v349_v27  ;;  %v1130_v27 = vsub.f32 %v1313_v45, %v909_v31 }
  0x7f   : > { %v353_v47 = vadd.f32 %v352_v4, %v351_v6  ;;  %v370_v4 = vsel %vm181_vm0, %v315_v48, 0.0 }
  0x81   : > { %v355_v50 = vadd.f32 %v354_v43, %v353_v47  ;;  %v372_v43 = vsel %vm181_vm0, %v316_v40, 0.0 }
  0x83   : > { %v357_v16 = vadd.f32 %v356_v34, %v355_v50  ;;  %v1146_v34 = vsub.f32 %v1315_v62, %v909_v31  ;;  %v319_v50 = vmul.f32 %v1130_v27, %v1130_v27 }
  0x85   : > { %v359_v41 = vadd.f32 %v358_v54, %v357_v16  ;;  %v320_v16 = vmul.f32 %v1138_v52, %v1138_v52  ;;  %v378_v63 = vsel %vm181_vm0, %v319_v50, 0.0 }
  0x87   : > { %v361_v14 = vadd.f32 %v360_v56, %v359_v41  ;;  %v321_v41 = vmul.f32 %v1146_v34, %v1146_v34  ;;  %v380_v28 = vsel %vm181_vm0, %v320_v16, 0.0 }
  0x89   : > { %v363_v26 = vadd.f32 %v362_v10, %v361_v14  ;;  %v322_v14 = vmul.f32 %v1154_v49, %v1154_v49  ;;  %v382_v29 = vsel %vm181_vm0, %v321_v41, 0.0 }
  0x8b   : > { %v365_v22 = vadd.f32 %v364_v20, %v363_v26  ;;  %v384_v20 = vsel %vm181_vm0, %v322_v14, 0.0 }
  0x8d   : > { %v367_v3 = vadd.f32 %v366_v19, %v365_v22 }
  0x8f   : > { %v369_v6 = vadd.f32 %v368_v0, %v367_v3 }
  0x91   : > { %v371_v47 = vadd.f32 %v370_v4, %v369_v6 }
  0x93   : > { %v373_v54 = vadd.f32 %v372_v43, %v371_v47 }
  0x95   : > { %v375_v56 = vadd.f32 %v374_v5, %v373_v54 }
  0x97   : > { %v377_v10 = vadd.f32 %v376_v15, %v375_v56 }
  0x99   : > { %v379_v61 = vadd.f32 %v378_v63, %v377_v10 }
  0x9b   : > { %v381_v31 = vadd.f32 %v380_v28, %v379_v61 }
  0x9d   : > { %v383_v26 = vadd.f32 %v382_v29, %v381_v31 }
  0x9f   : > { %v385_v48 = vadd.f32 %v384_v20, %v383_v26 }
  0xa1   : > { %v386_v19 = vrot.slane %v385_v48, 4 }
  0xa3   : > { %v387_v22 = vadd.f32 %v386_v19, %v385_v48 }
  0xa5   : > { %v388_v40 = vrot.slane %v387_v22, 2 }
  0xa7   : > { %v389_v0 = vadd.f32 %v388_v40, %v387_v22 }
  0xa9   : > { %v390_v3 = vrot.slane %v389_v0, 1 }
  0xab   : > { %v391_v45 = vadd.f32 %v390_v3, %v389_v0 }
  0xad   : > { %v392_v55 = vmul.f32 %v391_v45, %v906_v17 }
  0xaf   : > { %v393_v4 = vadd.f32 1e-05, %v392_v55 }
  0xb1   : > { %691 = vrsqrt.f32 %v393_v4  ;;  %vm400_vm2 = vweird.f32 %v393_v4 }
  0xb7   : > { %v692_v6 = vpop.eup %691 }
  0xb8   : > { %v395_v36 = vmul.f32 %v692_v6, %v393_v4  ;;  %vm401_vm3 = vweird.f32 %v692_v6 }
  0xb9   : > { %vm402_vm4 = vmor %vm400_vm2, %vm401_vm3 }
  0xba   : > { %v396_v42 = vmul.f32 %v692_v6, %v395_v36 }
  0xbc   : > { %v397_v43 = vmul.f32 0.5, %v396_v42 }
  0xbe   : > { %v398_v47 = vsub.f32 1.5, %v397_v43 }
  0xc0   : > { %v399_v62 = vmul.f32 %v692_v6, %v398_v47 }
  0xc2   : > { %v1168_v50 = vsel %vm402_vm4, %v692_v6, %v399_v62 }
  0xc3   : > { %v404_v5 = vmul.f32 %v1168_v50, %v914_v35  ;;  %v405_v17 = vmul.f32 %v1168_v50, %v919_v38  ;;  %v406_v54 = vmul.f32 %v1168_v50, %v924_v8  ;;  %v407_v16 = vmul.f32 %v1168_v50, %v929_v57 }
  0xc4   : > { %v408_v15 = vmul.f32 %v1168_v50, %v934_v2  ;;  %v409_v56 = vmul.f32 %v1168_v50, %v945_v1  ;;  %v410_v41 = vmul.f32 %v1168_v50, %v952_v7  ;;  %v411_v35 = vmul.f32 %v1168_v50, %v962_v13 }
  0xc5   : > { %v436_v63 = vmax.f32 %v404_v5, 0.0  ;;  %v437_v38 = vmax.f32 %v405_v17, 0.0  ;;  %v438_v10 = vmax.f32 %v406_v54, 0.0  ;;  %v439_v14 = vmax.f32 %v407_v16, 0.0 }
  0xc6   : > { %v440_v8 = vmax.f32 %v408_v15, 0.0  ;;  %v441_v57 = vmax.f32 %v409_v56, 0.0  ;;  %v442_v13 = vmax.f32 %v410_v41, 0.0  ;;  %v443_v29 = vmax.f32 %v411_v35, 0.0 }
  0xc7   : > { %v468_v2 = vpack.c.bf16 %v436_v63, %v436_v63  ;;  %v469_v1 = vpack.c.bf16 %v437_v38, %v437_v38  ;;  %v470_v7 = vpack.c.bf16 %v438_v10, %v438_v10  ;;  %v471_v28 = vpack.c.bf16 %v439_v14, %v439_v14 }
  0xc8   : > { %v472_v61 = vpack.c.bf16 %v440_v8, %v440_v8  ;;  %v412_v31 = vmul.f32 %v1168_v50, %v970_v59  ;;  %v413_v20 = vmul.f32 %v1168_v50, %v978_v11  ;;  %v414_v26 = vmul.f32 %v1168_v50, %v986_v23 }
  0xc9   : > { %501 = vst.msk [vmem:[%s1191_s14] sm:$0xf] %vm500_vm5, %v468_v2  ;;  %v415_v48 = vmul.f32 %v1168_v50, %v994_v18  ;;  %v473_v19 = vpack.c.bf16 %v441_v57, %v441_v57  ;;  %v416_v22 = vmul.f32 %v1168_v50, %v1002_v30  ;;  %v417_v59 = vmul.f32 %v1168_v50, %v1010_v25 }
  0xca   : > { %502 = vst.msk [vmem:[%s1191_s14 + $0x4] sm:$0xf] %vm500_vm5, %v469_v1  ;;  %v418_v11 = vmul.f32 %v1168_v50, %v1018_v37  ;;  %v474_v23 = vpack.c.bf16 %v442_v13, %v442_v13  ;;  %v444_v40 = vmax.f32 %v412_v31, 0.0  ;;  %v445_v0 = vmax.f32 %v413_v20, 0.0 }
  0xcb   : > { %503 = vst.msk [vmem:[%s1191_s14 + $0x8] sm:$0xf] %vm500_vm5, %v470_v7  ;;  %v446_v18 = vmax.f32 %v414_v26, 0.0  ;;  %v475_v3 = vpack.c.bf16 %v443_v29, %v443_v29  ;;  %v447_v45 = vmax.f32 %v415_v48, 0.0  ;;  %v419_v30 = vmul.f32 %v1168_v50, %v1026_v32 }
  0xcc   : > { %504 = vst.msk [vmem:[%s1191_s14 + $0xc] sm:$0xf] %vm500_vm5, %v471_v28  ;;  %v476_v25 = vpack.c.bf16 %v444_v40, %v444_v40  ;;  %v448_v37 = vmax.f32 %v416_v22, 0.0  ;;  %v477_v55 = vpack.c.bf16 %v445_v0, %v445_v0  ;;  %v449_v4 = vmax.f32 %v417_v59, 0.0 }
  0xcd   : > { %505 = vst.msk [vmem:[%s1191_s14 + $0x10] sm:$0xf] %vm500_vm5, %v472_v61  ;;  %v450_v6 = vmax.f32 %v418_v11, 0.0  ;;  %v478_v36 = vpack.c.bf16 %v446_v18, %v446_v18  ;;  %v420_v42 = vmul.f32 %v1168_v50, %v1034_v44  ;;  %v421_v32 = vmul.f32 %v1168_v50, %v1042_v39 }
  0xce   : > { %506 = vst.msk [vmem:[%s1191_s14 + $0x14] sm:$0xf] %vm500_vm5, %v473_v19  ;;  %v422_v43 = vmul.f32 %v1168_v50, %v1050_v51  ;;  %v479_v47 = vpack.c.bf16 %v447_v45, %v447_v45  ;;  %v451_v62 = vmax.f32 %v419_v30, 0.0  ;;  %v423_v5 = vmul.f32 %v1168_v50, %v1058_v46 }
  0xcf   : > { %507 = vst.msk [vmem:[%s1191_s14 + $0x18] sm:$0xf] %vm500_vm5, %v474_v23  ;;  %v480_v17 = vpack.c.bf16 %v448_v37, %v448_v37  ;;  %v452_v54 = vmax.f32 %v420_v42, 0.0  ;;  %v424_v44 = vmul.f32 %v1168_v50, %v1066_v58  ;;  %v481_v39 = vpack.c.bf16 %v449_v4, %v449_v4 }
  0xd0   : > { %508 = vst.msk [vmem:[%s1191_s14 + $0x1c] sm:$0xf] %vm500_vm5, %v475_v3  ;;  %v453_v51 = vmax.f32 %v421_v32, 0.0  ;;  %v425_v16 = vmul.f32 %v1168_v50, %v1074_v53  ;;  %v482_v46 = vpack.c.bf16 %v450_v6, %v450_v6  ;;  %v454_v15 = vmax.f32 %v422_v43, 0.0 }
  0xd1   : > { %509 = vst.msk [vmem:[%s1191_s14 + $0x20] sm:$0xf] %vm500_vm5, %v476_v25  ;;  %v426_v56 = vmul.f32 %v1168_v50, %v1082_v9  ;;  %v483_v58 = vpack.c.bf16 %v451_v62, %v451_v62  ;;  %v455_v41 = vmax.f32 %v423_v5, 0.0  ;;  %v427_v35 = vmul.f32 %v1168_v50, %v1090_v60 }
  0xd2   : > { %510 = vst.msk [vmem:[%s1191_s14 + $0x24] sm:$0xf] %vm500_vm5, %v477_v55  ;;  %v484_v53 = vpack.c.bf16 %v452_v54, %v452_v54  ;;  %v456_v63 = vmax.f32 %v424_v44, 0.0  ;;  %v428_v38 = vmul.f32 %v1168_v50, %v1098_v21  ;;  %v485_v9 = vpack.c.bf16 %v453_v51, %v453_v51 }
  0xd3   : > { %511 = vst.msk [vmem:[%s1191_s14 + $0x28] sm:$0xf] %vm500_vm5, %v478_v36  ;;  %v457_v10 = vmax.f32 %v425_v16, 0.0  ;;  %v429_v14 = vmul.f32 %v1168_v50, %v1106_v12  ;;  %v486_v60 = vpack.c.bf16 %v454_v15, %v454_v15  ;;  %v458_v8 = vmax.f32 %v426_v56, 0.0 }
  0xd4   : > { %512 = vst.msk [vmem:[%s1191_s14 + $0x2c] sm:$0xf] %vm500_vm5, %v479_v47  ;;  %v430_v57 = vmul.f32 %v1168_v50, %v1114_v33  ;;  %v487_v21 = vpack.c.bf16 %v455_v41, %v455_v41  ;;  %v459_v2 = vmax.f32 %v427_v35, 0.0  ;;  %v431_v1 = vmul.f32 %v1168_v50, %v1122_v24 }
  0xd5   : > { %513 = vst.msk [vmem:[%s1191_s14 + $0x30] sm:$0xf] %vm500_vm5, %v480_v17  ;;  %v488_v12 = vpack.c.bf16 %v456_v63, %v456_v63  ;;  %v460_v7 = vmax.f32 %v428_v38, 0.0  ;;  %v432_v13 = vmul.f32 %v1168_v50, %v1130_v27  ;;  %v489_v33 = vpack.c.bf16 %v457_v10, %v457_v10 }
  0xd6   : > { %514 = vst.msk [vmem:[%s1191_s14 + $0x34] sm:$0xf] %vm500_vm5, %v481_v39  ;;  %v461_v28 = vmax.f32 %v429_v14, 0.0  ;;  %v433_v61 = vmul.f32 %v1168_v50, %v1138_v52  ;;  %v490_v24 = vpack.c.bf16 %v458_v8, %v458_v8  ;;  %v462_v29 = vmax.f32 %v430_v57, 0.0 }
  0xd7   : > { %515 = vst.msk [vmem:[%s1191_s14 + $0x38] sm:$0xf] %vm500_vm5, %v482_v46  ;;  %v434_v31 = vmul.f32 %v1168_v50, %v1146_v34  ;;  %v491_v27 = vpack.c.bf16 %v459_v2, %v459_v2  ;;  %v463_v20 = vmax.f32 %v431_v1, 0.0  ;;  %v435_v26 = vmul.f32 %v1168_v50, %v1154_v49 }
  0xd8   : > { %516 = vst.msk [vmem:[%s1191_s14 + $0x3c] sm:$0xf] %vm500_vm5, %v483_v58  ;;  %v492_v52 = vpack.c.bf16 %v460_v7, %v460_v7  ;;  %v464_v48 = vmax.f32 %v432_v13, 0.0  ;;  %v493_v19 = vpack.c.bf16 %v461_v28, %v461_v28  ;;  %v465_v34 = vmax.f32 %v433_v61, 0.0 }
  0xd9   : > { %517 = vst.msk [vmem:[%s1191_s14 + $0x40] sm:$0xf] %vm500_vm5, %v484_v53  ;;  %v494_v22 = vpack.c.bf16 %v462_v29, %v462_v29  ;;  %v466_v59 = vmax.f32 %v434_v31, 0.0  ;;  %v495_v49 = vpack.c.bf16 %v463_v20, %v463_v20  ;;  %v467_v50 = vmax.f32 %v435_v26, 0.0 }
  0xda   : > { %518 = vst.msk [vmem:[%s1191_s14 + $0x44] sm:$0xf] %vm500_vm5, %v485_v9  ;;  %v496_v11 = vpack.c.bf16 %v464_v48, %v464_v48  ;;  %v497_v23 = vpack.c.bf16 %v465_v34, %v465_v34 }
  0xdb   : > { %519 = vst.msk [vmem:[%s1191_s14 + $0x48] sm:$0xf] %vm500_vm5, %v486_v60  ;;  %v498_v40 = vpack.c.bf16 %v466_v59, %v466_v59  ;;  %v499_v0 = vpack.c.bf16 %v467_v50, %v467_v50 }
  0xdc   : > { %520 = vst.msk [vmem:[%s1191_s14 + $0x4c] sm:$0xf] %vm500_vm5, %v487_v21 }
  0xdd   : > { %521 = vst.msk [vmem:[%s1191_s14 + $0x50] sm:$0xf] %vm500_vm5, %v488_v12 }
  0xde   : > { %522 = vst.msk [vmem:[%s1191_s14 + $0x54] sm:$0xf] %vm500_vm5, %v489_v33 }
  0xdf   : > { %523 = vst.msk [vmem:[%s1191_s14 + $0x58] sm:$0xf] %vm500_vm5, %v490_v24 }
  0xe0   : > { %524 = vst.msk [vmem:[%s1191_s14 + $0x5c] sm:$0xf] %vm500_vm5, %v491_v27 }
  0xe1   : > { %525 = vst.msk [vmem:[%s1191_s14 + $0x60] sm:$0xf] %vm500_vm5, %v492_v52 }
  0xe2   : > { %526 = vst.msk [vmem:[%s1191_s14 + $0x64] sm:$0xf] %vm500_vm5, %v493_v19 }
  0xe3   : > { %527 = vst.msk [vmem:[%s1191_s14 + $0x68] sm:$0xf] %vm500_vm5, %v494_v22 }
  0xe4   : > { %528 = vst.msk [vmem:[%s1191_s14 + $0x6c] sm:$0xf] %vm500_vm5, %v495_v49 }
  0xe5   : > { %529 = vst.msk [vmem:[%s1191_s14 + $0x70] sm:$0xf] %vm500_vm5, %v496_v11 }
  0xe6   : > { %530 = vst.msk [vmem:[%s1191_s14 + $0x74] sm:$0xf] %vm500_vm5, %v497_v23 }
  0xe7   : > { %531 = vst.msk [vmem:[%s1191_s14 + $0x78] sm:$0xf] %vm500_vm5, %v498_v40 }
  0xe8   : > { %532 = vst.msk [vmem:[%s1191_s14 + $0x7c] sm:$0xf] %vm500_vm5, %v499_v0 }
  0xe9 PF: > { %s11_s6 = sadd.s32 1, %s699_s6  }
  0xea   : > { %p8_p4 = scmp.ge.s32.totalorder %s11_s6, 4  }
  0xec   :  { %10 = sbr.rel (!%p8_p4) target bundleno = 1 (0x1), region = 54 }

// kernel: generator_forward.25
= control target key start
LH: loop header
LB: loop body
LE: loop exit
PB: predicated region body
PF: predicated region fallthrough
CT: control target
= control target key end

     0   :  { %s1026_s12 = smov 0   ;;  %s1028_s13 = smov 0   ;;  %s1179_s0 = inlined_call_operand.vmem [shape: bf16[512,98], index: 0, kind: input, shape index: {}]   ;;  %s1180_s1 = inlined_call_operand.vmem [shape: bf16[98,128], index: 1, kind: input, shape index: {}]   ;;  %s1181_s2 = inlined_call_operand.vmem [shape: f32[1,128], index: 2, kind: input, shape index: {}]   ;;  %s1182_s3 = inlined_call_operand.vmem [shape: bf16[512,128], index: 3, kind: output, shape index: {}]  }
   0x1   :  { %s1030_s14 = smov 0  }
   0x2 LB: > { %s25_s15 = sadd.s32 1, %s1000_s13  ;;  %p708_p0 = scmp.ge.s32.totalorder %s1004_s14, 1  ;;  %s1004_s14 = sphi %s1030_s14, %s13_s14   ;;  %s1000_s13 = sphi %s1028_s13, %s1184_s13   ;;  %s996_s12 = sphi %s1026_s12, %s1183_s12  }
   0x3   : > { %p27_p1 = scmp.ge.s32.totalorder %s25_s15, 2  ;;  %p169_p2 = scmp.lt.s32.totalorder %s1004_s14, 3 }
   0x5   : > { %s1186_s15 = smov (%p27_p1, %s25_s15), 0  ;;  %p170_p3 = pnand %p708_p0, %p169_p2 }
   0x6   : > { %s709_s22 = sshll.u32 (!%p170_p3), %s996_s12, 5 }
   0x7   : > { %173 = sbr.rel (%p170_p3) target bundleno = 240 (0xf0), region = 32  ;;  %p204_p4 = scmp.lt.s32.totalorder (!%p170_p3), %s709_s22, 63 }
   0xc   : > { %v270_v0 = vld [vmem:[%s1180_s1 + $0x30] sm:$0x1]  ;;  %vm443_vm0 = vcmask 1040384   ;;  %v840_v4 = vld [vmem:[%s1180_s1 + $0x28] sm:$0xff]  ;;  %v839_v5 = vld [vmem:[%s1180_s1 + $0x20] sm:$0xff]  ;;  %s1188_s22 = smov (!%p204_p4, %s709_s22), 63 }
   0xd   : > { %v380_v1 = vunpack.c.l.b16 %v270_v0  ;;  %v838_v6 = vld [vmem:[%s1180_s1 + $0x18] sm:$0xff]  ;;  %v837_v7 = vld [vmem:[%s1180_s1 + $0x10] sm:$0xff]  ;;  %v836_v8 = vld [vmem:[%s1180_s1 + $0x8] sm:$0xff]  ;;  %s710_s29 = sshll.u32 %s1188_s22, 2  ;;  %vm394_vm1 = vcmask 801792  }
   0xe   : > { %v835_v9 = vld [vmem:[%s1180_s1] sm:$0xff]  ;;  %s1076_s7 = scalar_lea.vmem %s1179_s0, %s710_s29  ;;  %s1124_s12 = scalar_lea.vmem %s1182_s3, %s710_s29 }
   0xf   : > { %v387_v2 = vpack.c.b16 %v380_v1, %v380_v1  ;;  %v819_v10 = vld [vmem:[%s1076_s7] sm:$0xff]  ;;  %v820_v14 = vld [vmem:[%s1076_s7 + $0x8] sm:$0xff]  ;;  %v821_v18 = vld [vmem:[%s1076_s7 + $0x10] sm:$0xff] }
  0x10   : > { %v823_v11 = vld [vmem:[%s1076_s7 + $0x20] sm:$0xff]  ;;  %v824_v15 = vld [vmem:[%s1076_s7 + $0x28] sm:$0xff]  ;;  %v825_v19 = vld [vmem:[%s1076_s7 + $0x30] sm:$0xff] }
  0x11   : > { %v445_v3 = vsel %vm443_vm0, %v387_v2, 0  ;;  %v827_v12 = vld [vmem:[%s1076_s7 + $0x40] sm:$0xff]  ;;  %v828_v16 = vld [vmem:[%s1076_s7 + $0x48] sm:$0xff]  ;;  %v829_v20 = vld [vmem:[%s1076_s7 + $0x50] sm:$0xff] }
  0x12   : > { %448 = vmatpush.bf16.msra.mxu0 %v445_v3  ;;  %936 = vmatpush.bf16.msra.mxu1 %v445_v3  ;;  %v831_v13 = vld [vmem:[%s1076_s7 + $0x60] sm:$0xff]  ;;  %v832_v17 = vld [vmem:[%s1076_s7 + $0x68] sm:$0xff]  ;;  %v833_v21 = vld [vmem:[%s1076_s7 + $0x70] sm:$0xff] }
  0x13   : > { %937 = vmatpush.bf16.msra.mxu2 %v445_v3  ;;  %938 = vmatpush.bf16.msra.mxu3 %v445_v3  ;;  %v822_v22 = vld [vmem:[%s1076_s7 + $0x18] sm:$0xff]  ;;  %v1113_v28 = vld [vmem:[%s1181_s2] ss:$0 sm:$0xff] }
  0x14   : > { %v826_v23 = vld [vmem:[%s1076_s7 + $0x38] sm:$0xff] }
  0x15   : > { %v830_v24 = vld [vmem:[%s1076_s7 + $0x58] sm:$0xff] }
  0x16   : > { %449 = vmatpush.bf16.msra.mxu0 %v840_v4  ;;  %939 = vmatpush.bf16.msra.mxu1 %v840_v4  ;;  %v834_v25 = vld [vmem:[%s1076_s7 + $0x78] sm:$0xff] }
  0x17   : > { %940 = vmatpush.bf16.msra.mxu2 %v840_v4  ;;  %941 = vmatpush.bf16.msra.mxu3 %v840_v4 }
  0x1a   : > { %450 = vmatpush.bf16.msra.mxu0 %v839_v5  ;;  %942 = vmatpush.bf16.msra.mxu1 %v839_v5 }
  0x1b   : > { %943 = vmatpush.bf16.msra.mxu2 %v839_v5  ;;  %944 = vmatpush.bf16.msra.mxu3 %v839_v5 }
  0x1e   : > { %451 = vmatpush.bf16.msra.mxu0 %v838_v6  ;;  %945 = vmatpush.bf16.msra.mxu1 %v838_v6 }
  0x1f   : > { %946 = vmatpush.bf16.msra.mxu2 %v838_v6  ;;  %947 = vmatpush.bf16.msra.mxu3 %v838_v6 }
  0x22   : > { %452 = vmatpush.bf16.msra.mxu0 %v837_v7  ;;  %948 = vmatpush.bf16.msra.mxu1 %v837_v7 }
  0x23   : > { %949 = vmatpush.bf16.msra.mxu2 %v837_v7  ;;  %950 = vmatpush.bf16.msra.mxu3 %v837_v7 }
  0x26   : > { %453 = vmatpush.bf16.msra.mxu0 %v836_v8  ;;  %951 = vmatpush.bf16.msra.mxu1 %v836_v8 }
  0x27   : > { %952 = vmatpush.bf16.msra.mxu2 %v836_v8  ;;  %953 = vmatpush.bf16.msra.mxu3 %v836_v8 }
  0x2a   : > { %454 = vmatpush.bf16.msra.mxu0 %v835_v9  ;;  %954 = vmatpush.bf16.msra.mxu1 %v835_v9 }
  0x2b   : > { %955 = vmatpush.bf16.msra.mxu2 %v835_v9  ;;  %956 = vmatpush.bf16.msra.mxu3 %v835_v9 }
  0x2d   : > { %801 = vmatmul.msk.bf16.vlgmr.msra.gmra.mxu0 %vm394_vm1, %v819_v10  ;;  %805 = vmatmul.msk.bf16.vlgmr.msra.gmra.mxu1 %vm394_vm1, %v823_v11 }
  0x2e   : > { %809 = vmatmul.msk.bf16.vlgmr.msra.gmra.mxu2 %vm394_vm1, %v827_v12  ;;  %813 = vmatmul.msk.bf16.vlgmr.msra.gmra.mxu3 %vm394_vm1, %v831_v13 }
  0x3d   : > { %802 = vmatmul.msk.bf16.gmra.mxu0 %vm394_vm1, %v820_v14  ;;  %806 = vmatmul.msk.bf16.gmra.mxu1 %vm394_vm1, %v824_v15 }
  0x3e   : > { %810 = vmatmul.msk.bf16.gmra.mxu2 %vm394_vm1, %v828_v16  ;;  %814 = vmatmul.msk.bf16.gmra.mxu3 %vm394_vm1, %v832_v17 }
  0x4d   : > { %803 = vmatmul.msk.bf16.gmra.mxu0 %vm394_vm1, %v821_v18  ;;  %807 = vmatmul.msk.bf16.gmra.mxu1 %vm394_vm1, %v825_v19 }
  0x4e   : > { %811 = vmatmul.msk.bf16.gmra.mxu2 %vm394_vm1, %v829_v20  ;;  %815 = vmatmul.msk.bf16.gmra.mxu3 %vm394_vm1, %v833_v21 }
  0x5d   : > { %804 = vmatmul.msk.bf16.gmra.mxu0 %vm394_vm1, %v822_v22  ;;  %808 = vmatmul.msk.bf16.gmra.mxu1 %vm394_vm1, %v826_v23 }
  0x5e   : > { %812 = vmatmul.msk.bf16.gmra.mxu2 %vm394_vm1, %v830_v24  ;;  %816 = vmatmul.msk.bf16.gmra.mxu3 %vm394_vm1, %v834_v25 }
  0xaa   : > { %v456_v26 = vpop.f32.mrf.mxu0  ;;  %v476_v27 = vpop.f32.mrf.mxu1 }
  0xab   : > { %v457_v33 = vadd.f32 %v1113_v28, %v456_v26  ;;  %v477_v34 = vadd.f32 %v1113_v28, %v476_v27 }
  0xb1   : > { %v496_v29 = vpop.f32.mrf.mxu2  ;;  %v516_v30 = vpop.f32.mrf.mxu3 }
  0xb2   : > { %v458_v31 = vpop.f32.mrf.mxu0  ;;  %v478_v32 = vpop.f32.mrf.mxu1  ;;  %v497_v41 = vadd.f32 %v1113_v28, %v496_v29  ;;  %v517_v42 = vadd.f32 %v1113_v28, %v516_v30 }
  0xb3   : > { %v459_v35 = vadd.f32 %v1113_v28, %v458_v31  ;;  %v479_v36 = vadd.f32 %v1113_v28, %v478_v32 }
  0xb5   : > { %v844_v37 = vpack.c.bf16 %v459_v35, %v457_v33  ;;  %v864_v38 = vpack.c.bf16 %v479_v36, %v477_v34 }
  0xb7   : > { %845 = vst [vmem:[%s1124_s12] sm:$0xff] %v844_v37  }
  0xb8   : > { %924 = vst [vmem:[%s1124_s12 + $0x20] sm:$0xff] %v864_v38  }
  0xb9   : > { %v498_v39 = vpop.f32.mrf.mxu2  ;;  %v518_v40 = vpop.f32.mrf.mxu3 }
  0xba   : > { %v499_v43 = vadd.f32 %v1113_v28, %v498_v39  ;;  %v519_v44 = vadd.f32 %v1113_v28, %v518_v40  ;;  %v461_v45 = vpop.f32.mrf.mxu0  ;;  %v481_v46 = vpop.f32.mrf.mxu1 }
  0xbb   : > { %v462_v53 = vadd.f32 %v1113_v28, %v461_v45  ;;  %v482_v54 = vadd.f32 %v1113_v28, %v481_v46 }
  0xbc   : > { %v884_v47 = vpack.c.bf16 %v499_v43, %v497_v41  ;;  %v904_v48 = vpack.c.bf16 %v519_v44, %v517_v42 }
  0xbe   : > { %928 = vst [vmem:[%s1124_s12 + $0x40] sm:$0xff] %v884_v47  }
  0xbf   : > { %932 = vst [vmem:[%s1124_s12 + $0x60] sm:$0xff] %v904_v48  }
  0xc1   : > { %v501_v49 = vpop.f32.mrf.mxu2  ;;  %v521_v50 = vpop.f32.mrf.mxu3 }
  0xc2   : > { %v463_v51 = vpop.f32.mrf.mxu0  ;;  %v483_v52 = vpop.f32.mrf.mxu1  ;;  %v502_v61 = vadd.f32 %v1113_v28, %v501_v49  ;;  %v522_v62 = vadd.f32 %v1113_v28, %v521_v50 }
  0xc3   : > { %v464_v55 = vadd.f32 %v1113_v28, %v463_v51  ;;  %v484_v56 = vadd.f32 %v1113_v28, %v483_v52 }
  0xc5   : > { %v849_v57 = vpack.c.bf16 %v464_v55, %v462_v53  ;;  %v869_v58 = vpack.c.bf16 %v484_v56, %v482_v54 }
  0xc7   : > { %921 = vst [vmem:[%s1124_s12 + $0x8] sm:$0xff] %v849_v57  }
  0xc8   : > { %925 = vst [vmem:[%s1124_s12 + $0x28] sm:$0xff] %v869_v58  }
  0xc9   : > { %v503_v59 = vpop.f32.mrf.mxu2  ;;  %v523_v60 = vpop.f32.mrf.mxu3 }
  0xca   : > { %v504_v63 = vadd.f32 %v1113_v28, %v503_v59  ;;  %v524_v0 = vadd.f32 %v1113_v28, %v523_v60  ;;  %v466_v1 = vpop.f32.mrf.mxu0  ;;  %v486_v2 = vpop.f32.mrf.mxu1 }
  0xcb   : > { %v467_v9 = vadd.f32 %v1113_v28, %v466_v1  ;;  %v487_v10 = vadd.f32 %v1113_v28, %v486_v2 }
  0xcc   : > { %v889_v3 = vpack.c.bf16 %v504_v63, %v502_v61  ;;  %v909_v4 = vpack.c.bf16 %v524_v0, %v522_v62 }
  0xce   : > { %929 = vst [vmem:[%s1124_s12 + $0x48] sm:$0xff] %v889_v3  }
  0xcf   : > { %933 = vst [vmem:[%s1124_s12 + $0x68] sm:$0xff] %v909_v4  }
  0xd1   : > { %v506_v5 = vpop.f32.mrf.mxu2  ;;  %v526_v6 = vpop.f32.mrf.mxu3 }
  0xd2   : > { %v468_v7 = vpop.f32.mrf.mxu0  ;;  %v488_v8 = vpop.f32.mrf.mxu1  ;;  %v507_v17 = vadd.f32 %v1113_v28, %v506_v5  ;;  %v527_v18 = vadd.f32 %v1113_v28, %v526_v6 }
  0xd3   : > { %v469_v11 = vadd.f32 %v1113_v28, %v468_v7  ;;  %v489_v12 = vadd.f32 %v1113_v28, %v488_v8 }
  0xd5   : > { %v854_v13 = vpack.c.bf16 %v469_v11, %v467_v9  ;;  %v874_v14 = vpack.c.bf16 %v489_v12, %v487_v10 }
  0xd7   : > { %922 = vst [vmem:[%s1124_s12 + $0x10] sm:$0xff] %v854_v13  }
  0xd8   : > { %926 = vst [vmem:[%s1124_s12 + $0x30] sm:$0xff] %v874_v14  }
  0xd9   : > { %v508_v15 = vpop.f32.mrf.mxu2  ;;  %v528_v16 = vpop.f32.mrf.mxu3 }
  0xda   : > { %v509_v19 = vadd.f32 %v1113_v28, %v508_v15  ;;  %v529_v20 = vadd.f32 %v1113_v28, %v528_v16  ;;  %v471_v21 = vpop.f32.mrf.mxu0  ;;  %v491_v22 = vpop.f32.mrf.mxu1 }
  0xdb   : > { %v472_v30 = vadd.f32 %v1113_v28, %v471_v21  ;;  %v492_v31 = vadd.f32 %v1113_v28, %v491_v22 }
  0xdc   : > { %v894_v23 = vpack.c.bf16 %v509_v19, %v507_v17  ;;  %v914_v24 = vpack.c.bf16 %v529_v20, %v527_v18 }
  0xde   : > { %930 = vst [vmem:[%s1124_s12 + $0x50] sm:$0xff] %v894_v23  }
  0xdf   : > { %934 = vst [vmem:[%s1124_s12 + $0x70] sm:$0xff] %v914_v24  }
  0xe1   : > { %v511_v25 = vpop.f32.mrf.mxu2  ;;  %v531_v26 = vpop.f32.mrf.mxu3 }
  0xe2   : > { %v473_v27 = vpop.f32.mrf.mxu0  ;;  %v493_v29 = vpop.f32.mrf.mxu1  ;;  %v512_v38 = vadd.f32 %v1113_v28, %v511_v25  ;;  %v532_v39 = vadd.f32 %v1113_v28, %v531_v26 }
  0xe3   : > { %v474_v32 = vadd.f32 %v1113_v28, %v473_v27  ;;  %v494_v33 = vadd.f32 %v1113_v28, %v493_v29 }
  0xe5   : > { %v859_v34 = vpack.c.bf16 %v474_v32, %v472_v30  ;;  %v879_v35 = vpack.c.bf16 %v494_v33, %v492_v31 }
  0xe7   : > { %923 = vst [vmem:[%s1124_s12 + $0x18] sm:$0xff] %v859_v34  }
  0xe8   : > { %927 = vst [vmem:[%s1124_s12 + $0x38] sm:$0xff] %v879_v35  }
  0xe9   : > { %v513_v36 = vpop.f32.mrf.mxu2  ;;  %v533_v37 = vpop.f32.mrf.mxu3 }
  0xea   : > { %v514_v40 = vadd.f32 %v1113_v28, %v513_v36  ;;  %v534_v41 = vadd.f32 %v1113_v28, %v533_v37 }
  0xec   : > { %v899_v42 = vpack.c.bf16 %v514_v40, %v512_v38  ;;  %v919_v43 = vpack.c.bf16 %v534_v41, %v532_v39 }
  0xee   : > { %931 = vst [vmem:[%s1124_s12 + $0x58] sm:$0xff] %v899_v42  }
  0xef   : > { %935 = vst [vmem:[%s1124_s12 + $0x78] sm:$0xff] %v919_v43  }
  0xf0 PF: > { %s13_s14 = sadd.s32 1, %s1004_s14   ;;  %s1183_s12 = smov %s1000_s13 }
  0xf1   : > { %p10_p5 = scmp.ge.s32.totalorder %s13_s14, 4   ;;  %s1184_s13 = smov %s1186_s15 }
  0xf3   :  { %12 = sbr.rel (!%p10_p5) target bundleno = 2 (0x2), region = 68 }

// kernel: generator_forward.27
= control target key start
LH: loop header
LB: loop body
LE: loop exit
PB: predicated region body
PF: predicated region fallthrough
CT: control target
= control target key end

     0   :  { %vm136_vm0 = vcmask 1043456   ;;  %vm111_vm1 = vcmask 588800   ;;  %s450_s1 = inlined_call_operand.vmem [shape: bf16[72,128], index: 1, kind: input, shape index: {}]   ;;  %s451_s2 = inlined_call_operand.vmem [shape: f32[1,128], index: 2, kind: input, shape index: {}]   ;;  %s452_s0 = inlined_call_operand.vmem [shape: bf16[128,72], index: 0, kind: input, shape index: {}]   ;;  %s453_s3 = inlined_call_operand.vmem [shape: bf16[128,128], index: 3, kind: output, shape index: {}]  }
   0x1   :  { %v39_v0 = vld [vmem:[%s450_s1 + $0x20] sm:$0xf]  ;;  %v292_v4 = vld [vmem:[%s450_s1 + $0x18] sm:$0xff]  ;;  %v291_v5 = vld [vmem:[%s450_s1 + $0x10] sm:$0xff] }
   0x2   :  { %v101_v1 = vunpack.c.l.b16 %v39_v0  ;;  %v290_v6 = vld [vmem:[%s450_s1 + $0x8] sm:$0xff]  ;;  %v289_v7 = vld [vmem:[%s450_s1] sm:$0xff]  ;;  %v283_v9 = vld [vmem:[%s452_s0 + $0x10] sm:$0xff] }
   0x3   :  { %v281_v8 = vld [vmem:[%s452_s0] sm:$0xff]  ;;  %v287_v11 = vld [vmem:[%s452_s0 + $0x30] sm:$0xff]  ;;  %v282_v12 = vld [vmem:[%s452_s0 + $0x8] sm:$0xff] }
   0x4   :  { %v106_v2 = vpack.c.b16 %v101_v1, %v101_v1  ;;  %v285_v10 = vld [vmem:[%s452_s0 + $0x20] sm:$0xff]  ;;  %v284_v13 = vld [vmem:[%s452_s0 + $0x18] sm:$0xff]  ;;  %v286_v14 = vld [vmem:[%s452_s0 + $0x28] sm:$0xff] }
   0x5   :  { %v288_v15 = vld [vmem:[%s452_s0 + $0x38] sm:$0xff]  ;;  %v355_v18 = vld [vmem:[%s451_s2] ss:$0 sm:$0xff] }
   0x6   :  { %v138_v3 = vsel %vm136_vm0, %v106_v2, 0 }
   0x7   :  { %143 = vmatpush.bf16.msra.mxu0 %v138_v3  ;;  %340 = vmatpush.bf16.msra.mxu1 %v138_v3 }
   0x8   :  { %341 = vmatpush.bf16.msra.mxu2 %v138_v3  ;;  %342 = vmatpush.bf16.msra.mxu3 %v138_v3 }
   0xb   :  { %144 = vmatpush.bf16.msra.mxu0 %v292_v4  ;;  %343 = vmatpush.bf16.msra.mxu1 %v292_v4 }
   0xc   :  { %344 = vmatpush.bf16.msra.mxu2 %v292_v4  ;;  %345 = vmatpush.bf16.msra.mxu3 %v292_v4 }
   0xf   :  { %145 = vmatpush.bf16.msra.mxu0 %v291_v5  ;;  %346 = vmatpush.bf16.msra.mxu1 %v291_v5 }
  0x10   :  { %347 = vmatpush.bf16.msra.mxu2 %v291_v5  ;;  %348 = vmatpush.bf16.msra.mxu3 %v291_v5 }
  0x13   :  { %146 = vmatpush.bf16.msra.mxu0 %v290_v6  ;;  %349 = vmatpush.bf16.msra.mxu1 %v290_v6 }
  0x14   :  { %350 = vmatpush.bf16.msra.mxu2 %v290_v6  ;;  %351 = vmatpush.bf16.msra.mxu3 %v290_v6 }
  0x17   :  { %147 = vmatpush.bf16.msra.mxu0 %v289_v7  ;;  %352 = vmatpush.bf16.msra.mxu1 %v289_v7 }
  0x18   :  { %353 = vmatpush.bf16.msra.mxu2 %v289_v7  ;;  %354 = vmatpush.bf16.msra.mxu3 %v289_v7 }
  0x1a   :  { %273 = vmatmul.msk.bf16.vlgmr.msra.gmra.mxu0 %vm111_vm1, %v281_v8  ;;  %275 = vmatmul.msk.bf16.vlgmr.msra.gmra.mxu1 %vm111_vm1, %v283_v9 }
  0x1b   :  { %277 = vmatmul.msk.bf16.vlgmr.msra.gmra.mxu2 %vm111_vm1, %v285_v10  ;;  %279 = vmatmul.msk.bf16.vlgmr.msra.gmra.mxu3 %vm111_vm1, %v287_v11 }
  0x2a   :  { %274 = vmatmul.msk.bf16.gmra.mxu0 %vm111_vm1, %v282_v12  ;;  %276 = vmatmul.msk.bf16.gmra.mxu1 %vm111_vm1, %v284_v13 }
  0x2b   :  { %278 = vmatmul.msk.bf16.gmra.mxu2 %vm111_vm1, %v286_v14  ;;  %280 = vmatmul.msk.bf16.gmra.mxu3 %vm111_vm1, %v288_v15 }
  0x97   :  { %v149_v16 = vpop.f32.mrf.mxu0  ;;  %v159_v17 = vpop.f32.mrf.mxu1 }
  0x98   :  { %v150_v23 = vadd.f32 %v355_v18, %v149_v16  ;;  %v160_v24 = vadd.f32 %v355_v18, %v159_v17 }
  0x9e   :  { %v169_v19 = vpop.f32.mrf.mxu2  ;;  %v179_v20 = vpop.f32.mrf.mxu3 }
  0x9f   :  { %v151_v21 = vpop.f32.mrf.mxu0  ;;  %v161_v22 = vpop.f32.mrf.mxu1  ;;  %v170_v31 = vadd.f32 %v355_v18, %v169_v19  ;;  %v180_v32 = vadd.f32 %v355_v18, %v179_v20 }
  0xa0   :  { %v152_v25 = vadd.f32 %v355_v18, %v151_v21  ;;  %v162_v26 = vadd.f32 %v355_v18, %v161_v22 }
  0xa2   :  { %v296_v27 = vpack.c.bf16 %v152_v25, %v150_v23  ;;  %v306_v28 = vpack.c.bf16 %v162_v26, %v160_v24 }
  0xa4   :  { %297 = vst [vmem:[%s453_s3] sm:$0xff] %v296_v27  }
  0xa5   :  { %334 = vst [vmem:[%s453_s3 + $0x10] sm:$0xff] %v306_v28  }
  0xa6   :  { %v171_v29 = vpop.f32.mrf.mxu2  ;;  %v181_v30 = vpop.f32.mrf.mxu3 }
  0xa7   :  { %v172_v33 = vadd.f32 %v355_v18, %v171_v29  ;;  %v182_v34 = vadd.f32 %v355_v18, %v181_v30  ;;  %v154_v35 = vpop.f32.mrf.mxu0  ;;  %v164_v36 = vpop.f32.mrf.mxu1 }
  0xa8   :  { %v155_v43 = vadd.f32 %v355_v18, %v154_v35  ;;  %v165_v44 = vadd.f32 %v355_v18, %v164_v36 }
  0xa9   :  { %v316_v37 = vpack.c.bf16 %v172_v33, %v170_v31  ;;  %v326_v38 = vpack.c.bf16 %v182_v34, %v180_v32 }
  0xab   :  { %336 = vst [vmem:[%s453_s3 + $0x20] sm:$0xff] %v316_v37  }
  0xac   :  { %338 = vst [vmem:[%s453_s3 + $0x30] sm:$0xff] %v326_v38  }
  0xae   :  { %v174_v39 = vpop.f32.mrf.mxu2  ;;  %v184_v40 = vpop.f32.mrf.mxu3 }
  0xaf   :  { %v156_v41 = vpop.f32.mrf.mxu0  ;;  %v166_v42 = vpop.f32.mrf.mxu1  ;;  %v175_v51 = vadd.f32 %v355_v18, %v174_v39  ;;  %v185_v52 = vadd.f32 %v355_v18, %v184_v40 }
  0xb0   :  { %v157_v45 = vadd.f32 %v355_v18, %v156_v41  ;;  %v167_v46 = vadd.f32 %v355_v18, %v166_v42 }
  0xb2   :  { %v301_v47 = vpack.c.bf16 %v157_v45, %v155_v43  ;;  %v311_v48 = vpack.c.bf16 %v167_v46, %v165_v44 }
  0xb4   :  { %333 = vst [vmem:[%s453_s3 + $0x8] sm:$0xff] %v301_v47  }
  0xb5   :  { %335 = vst [vmem:[%s453_s3 + $0x18] sm:$0xff] %v311_v48  }
  0xb6   :  { %v176_v49 = vpop.f32.mrf.mxu2  ;;  %v186_v50 = vpop.f32.mrf.mxu3 }
  0xb7   :  { %v177_v53 = vadd.f32 %v355_v18, %v176_v49  ;;  %v187_v54 = vadd.f32 %v355_v18, %v186_v50 }
  0xb9   :  { %v321_v55 = vpack.c.bf16 %v177_v53, %v175_v51  ;;  %v331_v56 = vpack.c.bf16 %v187_v54, %v185_v52 }
  0xbb   :  { %337 = vst [vmem:[%s453_s3 + $0x28] sm:$0xff] %v321_v55  }
  0xbc   :  { %339 = vst [vmem:[%s453_s3 + $0x38] sm:$0xff] %v331_v56  }

// kernel: generator_forward.28
= control target key start
LH: loop header
LB: loop body
LE: loop exit
PB: predicated region body
PF: predicated region fallthrough
CT: control target
= control target key end

     0   :  { %s364_s6 = smov 0   ;;  %s412_s0 = inlined_call_operand.vmem [shape: bf16[2,64,16], index: 0, kind: input, shape index: {}]   ;;  %s413_s1 = inlined_call_operand.vmem [shape: bf16[2,64,16], index: 1, kind: output, shape index: {}]  }
   0x1 LB: > { %s300_s7 = sadd.s32 4294967295, %s351_s6   ;;  %p304_p0 = scmp.ge.s32.totalorder %s351_s6, 1  ;;  %s351_s6 = sphi %s364_s6, %s11_s6  }
   0x2   : > { %p87_p1 = scmp.lt.s32.totalorder %s351_s6, 3 }
   0x4   : > { %p88_p2 = pnand %p304_p0, %p87_p1 }
   0x5   : > { %p107_p3 = scmp.lt.s32.totalorder (!%p88_p2), %s300_s7, 1 }
   0x6   : > { %91 = sbr.rel (%p88_p2) target bundleno = 113 (0x71), region = 24 }
   0xb   : > { %s415_s7 = smov (!%p107_p3, %s300_s7), 1  ;;  %vm133_vm0 = vcmask 130048   ;;  %v353_v7 = vmov 64.0   ;;  %vm236_vm5 = vcmask 125952  }
   0xc   : > { %s311_s8 = sshll.u32 %s415_s7, 5  ;;  %341 = vrcp.f32 %v353_v7 }
   0xd   : > { %s111_s11 = scalar_lea.vmem %s412_s0, %s311_s8  ;;  %s116_s14 = scalar_lea.vmem %s413_s1, %s311_s8 }
   0xe   : > { %v314_v0 = vld [vmem:[%s111_s11] sm:$0xff]   ;;  %v329_v1 = vld [vmem:[%s111_s11 + $0x8] sm:$0xff]   ;;  %v330_v2 = vld [vmem:[%s111_s11 + $0x10] sm:$0xff]  }
   0xf   : > { %v315_v3 = vunpack.c.l.bf16 %v314_v0  ;;  %v316_v4 = vunpack.c.h.bf16 %v314_v0  ;;  %v319_v5 = vunpack.c.l.bf16 %v329_v1  ;;  %v320_v6 = vunpack.c.h.bf16 %v329_v1  ;;  %v331_v12 = vld [vmem:[%s111_s11 + $0x18] sm:$0xff]  }
  0x10   : > { %v323_v8 = vunpack.c.l.bf16 %v330_v2  ;;  %v324_v14 = vunpack.c.h.bf16 %v330_v2  ;;  %v327_v17 = vunpack.c.l.bf16 %v331_v12  ;;  %v328_v21 = vunpack.c.h.bf16 %v331_v12 }
  0x11   : > { %v134_v9 = vsel %vm133_vm0, %v315_v3, 0.0  ;;  %v135_v10 = vsel %vm133_vm0, %v316_v4, 0.0  ;;  %v137_v11 = vsel %vm133_vm0, %v319_v5, 0.0  ;;  %v139_v15 = vsel %vm133_vm0, %v320_v6, 0.0 }
  0x12   : > { %v136_v13 = vadd.f32 %v135_v10, %v134_v9  ;;  %v141_v18 = vsel %vm133_vm0, %v323_v8, 0.0  ;;  %v342_v19 = vpop.eup %341  ;;  %v143_v22 = vsel %vm133_vm0, %v324_v14, 0.0  ;;  %v145_v24 = vsel %vm133_vm0, %v327_v17, 0.0 }
  0x13   : > { %v156_v25 = vmul.f32 64.0, %v342_v19  ;;  %v147_v27 = vsel %vm133_vm0, %v328_v21, 0.0  ;;  %vm160_vm1 = vweird.f32 %v342_v19 }
  0x14   : > { %v138_v16 = vadd.f32 %v137_v11, %v136_v13 }
  0x15   : > { %v157_v29 = vsub.f32 1.0, %v156_v25 }
  0x16   : > { %v140_v20 = vadd.f32 %v139_v15, %v138_v16 }
  0x17   : > { %v158_v32 = vmul.f32 %v342_v19, %v157_v29 }
  0x18   : > { %v142_v23 = vadd.f32 %v141_v18, %v140_v20 }
  0x19   : > { %v159_v35 = vadd.f32 %v342_v19, %v158_v32 }
  0x1a   : > { %v144_v26 = vadd.f32 %v143_v22, %v142_v23 }
  0x1b   : > { %v161_v38 = vsel %vm160_vm1, %v342_v19, %v159_v35 }
  0x1c   : > { %v146_v28 = vadd.f32 %v145_v24, %v144_v26 }
  0x1e   : > { %v148_v30 = vadd.f32 %v147_v27, %v146_v28 }
  0x20   : > { %v149_v31 = vrot.slane %v148_v30, 4 }
  0x22   : > { %v150_v33 = vadd.f32 %v149_v31, %v148_v30 }
  0x24   : > { %v151_v34 = vrot.slane %v150_v33, 2 }
  0x26   : > { %v152_v36 = vadd.f32 %v151_v34, %v150_v33 }
  0x28   : > { %v153_v37 = vrot.slane %v152_v36, 1 }
  0x2a   : > { %v154_v39 = vadd.f32 %v153_v37, %v152_v36 }
  0x2c   : > { %v162_v40 = vmul.f32 %v161_v38, %v154_v39 }
  0x2e   : > { %v163_v41 = vsub.f32 %v315_v3, %v162_v40  ;;  %v164_v42 = vsub.f32 %v316_v4, %v162_v40  ;;  %v165_v43 = vsub.f32 %v319_v5, %v162_v40  ;;  %v166_v44 = vsub.f32 %v320_v6, %v162_v40 }
  0x2f   : > { %v167_v45 = vsub.f32 %v323_v8, %v162_v40  ;;  %v168_v46 = vsub.f32 %v324_v14, %v162_v40  ;;  %v169_v51 = vsub.f32 %v327_v17, %v162_v40  ;;  %v170_v57 = vsub.f32 %v328_v21, %v162_v40 }
  0x30   : > { %v171_v47 = vmul.f32 %v163_v41, %v163_v41  ;;  %v172_v48 = vmul.f32 %v164_v42, %v164_v42  ;;  %v173_v49 = vmul.f32 %v165_v43, %v165_v43  ;;  %v174_v50 = vmul.f32 %v166_v44, %v166_v44 }
  0x31   : > { %v175_v52 = vmul.f32 %v167_v45, %v167_v45  ;;  %v176_v58 = vmul.f32 %v168_v46, %v168_v46  ;;  %v177_v61 = vmul.f32 %v169_v51, %v169_v51  ;;  %v178_v0 = vmul.f32 %v170_v57, %v170_v57 }
  0x32   : > { %v179_v53 = vsel %vm133_vm0, %v171_v47, 0.0  ;;  %v180_v54 = vsel %vm133_vm0, %v172_v48, 0.0  ;;  %v182_v55 = vsel %vm133_vm0, %v173_v49, 0.0  ;;  %v184_v59 = vsel %vm133_vm0, %v174_v50, 0.0 }
  0x33   : > { %v181_v56 = vadd.f32 %v180_v54, %v179_v53  ;;  %v186_v62 = vsel %vm133_vm0, %v175_v52, 0.0  ;;  %v188_v1 = vsel %vm133_vm0, %v176_v58, 0.0  ;;  %v190_v3 = vsel %vm133_vm0, %v177_v61, 0.0 }
  0x34   : > { %v192_v5 = vsel %vm133_vm0, %v178_v0, 0.0 }
  0x35   : > { %v183_v60 = vadd.f32 %v182_v55, %v181_v56 }
  0x37   : > { %v185_v63 = vadd.f32 %v184_v59, %v183_v60 }
  0x39   : > { %v187_v2 = vadd.f32 %v186_v62, %v185_v63 }
  0x3b   : > { %v189_v4 = vadd.f32 %v188_v1, %v187_v2 }
  0x3d   : > { %v191_v6 = vadd.f32 %v190_v3, %v189_v4 }
  0x3f   : > { %v193_v7 = vadd.f32 %v192_v5, %v191_v6 }
  0x41   : > { %v194_v8 = vrot.slane %v193_v7, 4 }
  0x43   : > { %v195_v9 = vadd.f32 %v194_v8, %v193_v7 }
  0x45   : > { %v196_v10 = vrot.slane %v195_v9, 2 }
  0x47   : > { %v197_v11 = vadd.f32 %v196_v10, %v195_v9 }
  0x49   : > { %v198_v12 = vrot.slane %v197_v11, 1 }
  0x4b   : > { %v199_v13 = vadd.f32 %v198_v12, %v197_v11 }
  0x4d   : > { %v200_v14 = vmul.f32 %v199_v13, %v161_v38 }
  0x4f   : > { %v201_v15 = vadd.f32 1e-05, %v200_v14 }
  0x51   : > { %343 = vrsqrt.f32 %v201_v15  ;;  %vm208_vm2 = vweird.f32 %v201_v15 }
  0x57   : > { %v344_v16 = vpop.eup %343 }
  0x58   : > { %v203_v17 = vmul.f32 %v344_v16, %v201_v15  ;;  %vm209_vm3 = vweird.f32 %v344_v16 }
  0x59   : > { %vm210_vm4 = vmor %vm208_vm2, %vm209_vm3 }
  0x5a   : > { %v204_v18 = vmul.f32 %v344_v16, %v203_v17 }
  0x5c   : > { %v205_v19 = vmul.f32 0.5, %v204_v18 }
  0x5e   : > { %v206_v20 = vsub.f32 1.5, %v205_v19 }
  0x60   : > { %v207_v21 = vmul.f32 %v344_v16, %v206_v20 }
  0x62   : > { %v211_v22 = vsel %vm210_vm4, %v344_v16, %v207_v21 }
  0x63   : > { %v212_v23 = vmul.f32 %v211_v22, %v163_v41  ;;  %v213_v24 = vmul.f32 %v211_v22, %v164_v42  ;;  %v214_v25 = vmul.f32 %v211_v22, %v165_v43  ;;  %v215_v26 = vmul.f32 %v211_v22, %v166_v44 }
  0x64   : > { %v216_v27 = vmul.f32 %v211_v22, %v167_v45  ;;  %v217_v28 = vmul.f32 %v211_v22, %v168_v46  ;;  %v218_v29 = vmul.f32 %v211_v22, %v169_v51  ;;  %v219_v30 = vmul.f32 %v211_v22, %v170_v57 }
  0x65   : > { %v220_v31 = vmax.f32 %v212_v23, 0.0  ;;  %v221_v32 = vmax.f32 %v213_v24, 0.0  ;;  %v222_v33 = vmax.f32 %v214_v25, 0.0  ;;  %v223_v34 = vmax.f32 %v215_v26, 0.0 }
  0x66   : > { %v224_v35 = vmax.f32 %v216_v27, 0.0  ;;  %v225_v36 = vmax.f32 %v217_v28, 0.0  ;;  %v226_v40 = vmax.f32 %v218_v29, 0.0  ;;  %v227_v42 = vmax.f32 %v219_v30, 0.0 }
  0x67   : > { %v228_v37 = vpack.c.bf16 %v220_v31, %v220_v31  ;;  %v229_v38 = vpack.c.bf16 %v221_v32, %v221_v32  ;;  %v230_v39 = vpack.c.bf16 %v222_v33, %v222_v33  ;;  %v231_v41 = vpack.c.bf16 %v223_v34, %v223_v34 }
  0x68   : > { %v232_v43 = vpack.c.bf16 %v224_v35, %v224_v35  ;;  %v233_v44 = vpack.c.bf16 %v225_v36, %v225_v36  ;;  %v234_v45 = vpack.c.bf16 %v226_v40, %v226_v40  ;;  %v235_v46 = vpack.c.bf16 %v227_v42, %v227_v42 }
  0x69   : > { %237 = vst.msk [vmem:[%s116_s14] sm:$0xf] %vm236_vm5, %v228_v37 }
  0x6a   : > { %238 = vst.msk [vmem:[%s116_s14 + $0x4] sm:$0xf] %vm236_vm5, %v229_v38 }
  0x6b   : > { %239 = vst.msk [vmem:[%s116_s14 + $0x8] sm:$0xf] %vm236_vm5, %v230_v39 }
  0x6c   : > { %240 = vst.msk [vmem:[%s116_s14 + $0xc] sm:$0xf] %vm236_vm5, %v231_v41 }
  0x6d   : > { %241 = vst.msk [vmem:[%s116_s14 + $0x10] sm:$0xf] %vm236_vm5, %v232_v43 }
  0x6e   : > { %242 = vst.msk [vmem:[%s116_s14 + $0x14] sm:$0xf] %vm236_vm5, %v233_v44 }
  0x6f   : > { %243 = vst.msk [vmem:[%s116_s14 + $0x18] sm:$0xf] %vm236_vm5, %v234_v45 }
  0x70   : > { %244 = vst.msk [vmem:[%s116_s14 + $0x1c] sm:$0xf] %vm236_vm5, %v235_v46 }
  0x71 PF: > { %s11_s6 = sadd.s32 1, %s351_s6  }
  0x72   : > { %p8_p4 = scmp.ge.s32.totalorder %s11_s6, 4  }
  0x74   :  { %10 = sbr.rel (!%p8_p4) target bundleno = 1 (0x1), region = 54 }

// kernel: generator_forward.30
= control target key start
LH: loop header
LB: loop body
LE: loop exit
PB: predicated region body
PF: predicated region fallthrough
CT: control target
= control target key end

     0   :  { %s277_s6 = smov 0   ;;  %s305_s0 = inlined_call_operand.vmem [shape: bf16[2,16,32], index: 0, kind: input, shape index: {}]   ;;  %s306_s1 = inlined_call_operand.vmem [shape: bf16[2,16,32], index: 1, kind: output, shape index: {}]  }
   0x1 LB: > { %s228_s7 = sadd.s32 4294967295, %s264_s6   ;;  %p232_p0 = scmp.ge.s32.totalorder %s264_s6, 1  ;;  %s264_s6 = sphi %s277_s6, %s11_s6  }
   0x2   : > { %p87_p1 = scmp.lt.s32.totalorder %s264_s6, 3 }
   0x4   : > { %p88_p2 = pnand %p232_p0, %p87_p1 }
   0x5   : > { %p107_p3 = scmp.lt.s32.totalorder (!%p88_p2), %s228_s7, 1 }
   0x6   : > { %91 = sbr.rel (%p88_p2) target bundleno = 83 (0x53), region = 24 }
   0xb   : > { %v266_v0 = vmov 16.0   ;;  %s308_s7 = smov (!%p107_p3, %s228_s7), 1  ;;  %vm121_vm0 = vcmask 261120   ;;  %vm170_vm5 = vcmask 257024  }
   0xc   : > { %254 = vrcp.f32 %v266_v0  ;;  %s239_s8 = sshll.u32 %s308_s7, 3 }
   0xd   : > { %s111_s11 = scalar_lea.vmem %s305_s0, %s239_s8  ;;  %s116_s14 = scalar_lea.vmem %s306_s1, %s239_s8 }
   0xe   : > { %v242_v1 = vld [vmem:[%s111_s11] sm:$0xff]  }
   0xf   : > { %v243_v3 = vunpack.c.l.bf16 %v242_v1  ;;  %v244_v4 = vunpack.c.h.bf16 %v242_v1 }
  0x11   : > { %v122_v6 = vsel %vm121_vm0, %v243_v3, 0.0  ;;  %v123_v7 = vsel %vm121_vm0, %v244_v4, 0.0 }
  0x12   : > { %v255_v2 = vpop.eup %254  ;;  %v124_v8 = vadd.f32 %v123_v7, %v122_v6 }
  0x13   : > { %v132_v5 = vmul.f32 16.0, %v255_v2  ;;  %vm136_vm1 = vweird.f32 %v255_v2 }
  0x14   : > { %v125_v10 = vrot.slane %v124_v8, 4 }
  0x15   : > { %v133_v9 = vsub.f32 1.0, %v132_v5 }
  0x16   : > { %v126_v12 = vadd.f32 %v125_v10, %v124_v8 }
  0x17   : > { %v134_v11 = vmul.f32 %v255_v2, %v133_v9 }
  0x18   : > { %v127_v13 = vrot.slane %v126_v12, 2 }
  0x19   : > { %v135_v14 = vadd.f32 %v255_v2, %v134_v11 }
  0x1a   : > { %v128_v15 = vadd.f32 %v127_v13, %v126_v12 }
  0x1b   : > { %v137_v17 = vsel %vm136_vm1, %v255_v2, %v135_v14 }
  0x1c   : > { %v129_v16 = vrot.slane %v128_v15, 1 }
  0x1e   : > { %v130_v18 = vadd.f32 %v129_v16, %v128_v15 }
  0x20   : > { %v138_v19 = vmul.f32 %v137_v17, %v130_v18 }
  0x22   : > { %v139_v20 = vsub.f32 %v243_v3, %v138_v19  ;;  %v140_v21 = vsub.f32 %v244_v4, %v138_v19 }
  0x24   : > { %v141_v22 = vmul.f32 %v139_v20, %v139_v20  ;;  %v142_v23 = vmul.f32 %v140_v21, %v140_v21 }
  0x26   : > { %v143_v24 = vsel %vm121_vm0, %v141_v22, 0.0  ;;  %v144_v25 = vsel %vm121_vm0, %v142_v23, 0.0 }
  0x27   : > { %v145_v26 = vadd.f32 %v144_v25, %v143_v24 }
  0x29   : > { %v146_v27 = vrot.slane %v145_v26, 4 }
  0x2b   : > { %v147_v28 = vadd.f32 %v146_v27, %v145_v26 }
  0x2d   : > { %v148_v29 = vrot.slane %v147_v28, 2 }
  0x2f   : > { %v149_v30 = vadd.f32 %v148_v29, %v147_v28 }
  0x31   : > { %v150_v31 = vrot.slane %v149_v30, 1 }
  0x33   : > { %v151_v32 = vadd.f32 %v150_v31, %v149_v30 }
  0x35   : > { %v152_v33 = vmul.f32 %v151_v32, %v137_v17 }
  0x37   : > { %v153_v34 = vadd.f32 1e-05, %v152_v33 }
  0x39   : > { %256 = vrsqrt.f32 %v153_v34  ;;  %vm160_vm2 = vweird.f32 %v153_v34 }
  0x3f   : > { %v257_v35 = vpop.eup %256 }
  0x40   : > { %v155_v36 = vmul.f32 %v257_v35, %v153_v34  ;;  %vm161_vm3 = vweird.f32 %v257_v35 }
  0x41   : > { %vm162_vm4 = vmor %vm160_vm2, %vm161_vm3 }
  0x42   : > { %v156_v37 = vmul.f32 %v257_v35, %v155_v36 }
  0x44   : > { %v157_v38 = vmul.f32 0.5, %v156_v37 }
  0x46   : > { %v158_v39 = vsub.f32 1.5, %v157_v38 }
  0x48   : > { %v159_v40 = vmul.f32 %v257_v35, %v158_v39 }
  0x4a   : > { %v163_v41 = vsel %vm162_vm4, %v257_v35, %v159_v40 }
  0x4b   : > { %v164_v42 = vmul.f32 %v163_v41, %v139_v20  ;;  %v165_v43 = vmul.f32 %v163_v41, %v140_v21 }
  0x4d   : > { %v166_v44 = vmax.f32 %v164_v42, 0.0  ;;  %v167_v45 = vmax.f32 %v165_v43, 0.0 }
  0x4f   : > { %v168_v46 = vpack.c.bf16 %v166_v44, %v166_v44  ;;  %v169_v47 = vpack.c.bf16 %v167_v45, %v167_v45 }
  0x51   : > { %171 = vst.msk [vmem:[%s116_s14] sm:$0xf] %vm170_vm5, %v168_v46 }
  0x52   : > { %172 = vst.msk [vmem:[%s116_s14 + $0x4] sm:$0xf] %vm170_vm5, %v169_v47 }
  0x53 PF: > { %s11_s6 = sadd.s32 1, %s264_s6  }
  0x54   : > { %p8_p4 = scmp.ge.s32.totalorder %s11_s6, 4  }
  0x56   :  { %10 = sbr.rel (!%p8_p4) target bundleno = 1 (0x1), region = 54 }

// kernel: generator_forward.29
= control target key start
LH: loop header
LB: loop body
LE: loop exit
PB: predicated region body
PF: predicated region fallthrough
CT: control target
= control target key end

     0   :  { %vm179_vm0 = vcmask 130048   ;;  %s724_s1 = inlined_call_operand.vmem [shape: bf16[144,128], index: 1, kind: input, shape index: {}]   ;;  %s725_s0 = inlined_call_operand.vmem [shape: bf16[128,144], index: 0, kind: input, shape index: {}]   ;;  %s726_s2 = inlined_call_operand.vmem [shape: f32[1,128], index: 2, kind: input, shape index: {}]   ;;  %s727_s3 = inlined_call_operand.vmem [shape: bf16[128,128], index: 3, kind: output, shape index: {}]  }
   0x1   :  { %v469_v0 = vld [vmem:[%s724_s1 + $0x38] sm:$0xff]  ;;  %v470_v1 = vld [vmem:[%s724_s1 + $0x40] sm:$0xff]  ;;  %v342_v3 = vld [vmem:[%s725_s0 + $0x8] sm:$0xf0] }
   0x2   :  { %v446_v2 = vld [vmem:[%s725_s0 + $0x4] sm:$0xf]  ;;  %204 = vmatpush.bf16.msra.mxu0 %v469_v0  ;;  %518 = vmatpush.bf16.msra.mxu2 %v469_v0  ;;  %v468_v5 = vld [vmem:[%s724_s1 + $0x30] sm:$0xff]  ;;  %v467_v6 = vld [vmem:[%s724_s1 + $0x28] sm:$0xff] }
   0x3   :  { %v345_v4 = vor.u32 %v446_v2, %v342_v3  ;;  %260 = vmatpush.bf16.msra.mxu1 %v470_v1  ;;  %526 = vmatpush.bf16.msra.mxu3 %v470_v1  ;;  %v456_v7 = vld [vmem:[%s725_s0 + $0x54] sm:$0xf]  ;;  %v382_v8 = vld [vmem:[%s725_s0 + $0x58] sm:$0xf0]  ;;  %v466_v10 = vld [vmem:[%s724_s1 + $0x20] sm:$0xff] }
   0x4   :  { %v385_v9 = vor.u32 %v456_v7, %v382_v8  ;;  %v465_v11 = vld [vmem:[%s724_s1 + $0x18] sm:$0xff]  ;;  %v448_v12 = vld [vmem:[%s725_s0 + $0x14] sm:$0xf]  ;;  %v463_v16 = vld [vmem:[%s724_s1 + $0x8] sm:$0xff] }
   0x5   :  { %v350_v13 = vld [vmem:[%s725_s0 + $0x18] sm:$0xf0]  ;;  %v464_v15 = vld [vmem:[%s724_s1 + $0x10] sm:$0xff]  ;;  %v458_v17 = vld [vmem:[%s725_s0 + $0x64] sm:$0xf] }
   0x6   :  { %438 = vmatmul.msk.bf16.vlgmr.msra.gmra.mxu1 %vm179_vm0, %v345_v4  ;;  %205 = vmatpush.bf16.msra.mxu0 %v468_v5  ;;  %v353_v14 = vor.u32 %v448_v12, %v350_v13  ;;  %v390_v18 = vld [vmem:[%s725_s0 + $0x68] sm:$0xf0]  ;;  %v462_v20 = vld [vmem:[%s724_s1] sm:$0xff]  ;;  %v447_v22 = vld [vmem:[%s725_s0 + $0x4] sm:$0xf0] }
   0x7   :  { %519 = vmatpush.bf16.msra.mxu2 %v468_v5  ;;  %443 = vmatmul.msk.bf16.vlgmr.msra.gmra.mxu3 %vm179_vm0, %v385_v9  ;;  %v393_v19 = vor.u32 %v458_v17, %v390_v18  ;;  %v340_v21 = vld [vmem:[%s725_s0] sm:$0xf]  ;;  %v455_v24 = vld [vmem:[%s725_s0 + $0x44] sm:$0xf0]  ;;  %v450_v27 = vld [vmem:[%s725_s0 + $0x24] sm:$0xf] }
   0x8   :  { %v372_v23 = vld [vmem:[%s725_s0 + $0x40] sm:$0xf]  ;;  %v341_v25 = vor.u32 %v447_v22, %v340_v21  ;;  %v358_v28 = vld [vmem:[%s725_s0 + $0x28] sm:$0xf0]  ;;  %v460_v30 = vld [vmem:[%s725_s0 + $0x74] sm:$0xf] }
   0x9   :  { %v373_v26 = vor.u32 %v455_v24, %v372_v23  ;;  %v361_v29 = vor.u32 %v450_v27, %v358_v28  ;;  %v398_v31 = vld [vmem:[%s725_s0 + $0x78] sm:$0xf0]  ;;  %v348_v33 = vld [vmem:[%s725_s0 + $0x10] sm:$0xf]  ;;  %v449_v34 = vld [vmem:[%s725_s0 + $0x14] sm:$0xf0] }
   0xa   :  { %206 = vmatpush.bf16.msra.mxu0 %v467_v6  ;;  %v401_v32 = vor.u32 %v460_v30, %v398_v31  ;;  %v380_v35 = vld [vmem:[%s725_s0 + $0x50] sm:$0xf]  ;;  %v457_v36 = vld [vmem:[%s725_s0 + $0x54] sm:$0xf0]  ;;  %v349_v37 = vor.u32 %v449_v34, %v348_v33  ;;  %v452_v39 = vld [vmem:[%s725_s0 + $0x34] sm:$0xf] }
   0xb   :  { %520 = vmatpush.bf16.msra.mxu2 %v467_v6  ;;  %v381_v38 = vor.u32 %v457_v36, %v380_v35  ;;  %v366_v40 = vld [vmem:[%s725_s0 + $0x38] sm:$0xf0]  ;;  %v356_v42 = vld [vmem:[%s725_s0 + $0x20] sm:$0xf]  ;;  %v451_v43 = vld [vmem:[%s725_s0 + $0x24] sm:$0xf0] }
   0xc   :  { %v369_v41 = vor.u32 %v452_v39, %v366_v40  ;;  %v388_v44 = vld [vmem:[%s725_s0 + $0x60] sm:$0xf]  ;;  %v459_v45 = vld [vmem:[%s725_s0 + $0x64] sm:$0xf0]  ;;  %v357_v46 = vor.u32 %v451_v43, %v356_v42  ;;  %v454_v48 = vld [vmem:[%s725_s0 + $0x44] sm:$0xf] }
   0xd   :  { %v389_v47 = vor.u32 %v459_v45, %v388_v44  ;;  %v374_v49 = vld [vmem:[%s725_s0 + $0x48] sm:$0xf0]  ;;  %v364_v51 = vld [vmem:[%s725_s0 + $0x30] sm:$0xf]  ;;  %v453_v52 = vld [vmem:[%s725_s0 + $0x34] sm:$0xf0] }
   0xe   :  { %207 = vmatpush.bf16.msra.mxu0 %v466_v10  ;;  %v377_v50 = vor.u32 %v454_v48, %v374_v49  ;;  %v396_v53 = vld [vmem:[%s725_s0 + $0x70] sm:$0xf]  ;;  %v461_v54 = vld [vmem:[%s725_s0 + $0x74] sm:$0xf0]  ;;  %v365_v55 = vor.u32 %v453_v52, %v364_v51  ;;  %v682_v62 = vld [vmem:[%s726_s2] ss:$0 sm:$0xff] }
   0xf   :  { %521 = vmatpush.bf16.msra.mxu2 %v466_v10  ;;  %v397_v56 = vor.u32 %v461_v54, %v396_v53 }
  0x12   :  { %208 = vmatpush.bf16.msra.mxu0 %v465_v11 }
  0x13   :  { %522 = vmatpush.bf16.msra.mxu2 %v465_v11 }
  0x16   :  { %439 = vmatmul.msk.bf16.gmra.mxu1 %vm179_vm0, %v353_v14  ;;  %209 = vmatpush.bf16.msra.mxu0 %v464_v15 }
  0x17   :  { %523 = vmatpush.bf16.msra.mxu2 %v464_v15  ;;  %444 = vmatmul.msk.bf16.gmra.mxu3 %vm179_vm0, %v393_v19 }
  0x1a   :  { %210 = vmatpush.bf16.msra.mxu0 %v463_v16 }
  0x1b   :  { %524 = vmatpush.bf16.msra.mxu2 %v463_v16 }
  0x1e   :  { %211 = vmatpush.bf16.msra.mxu0 %v462_v20 }
  0x1f   :  { %525 = vmatpush.bf16.msra.mxu2 %v462_v20 }
  0x21   :  { %212 = vmatmul.bf16.vlgmr.msra.gmra.mxu0 %v341_v25 }
  0x22   :  { %232 = vmatmul.bf16.vlgmr.msra.gmra.mxu2 %v373_v26 }
  0x26   :  { %440 = vmatmul.msk.bf16.gmra.mxu1 %vm179_vm0, %v361_v29 }
  0x27   :  { %445 = vmatmul.msk.bf16.gmra.mxu3 %vm179_vm0, %v401_v32 }
  0x31   :  { %217 = vmatmul.bf16.gmra.mxu0 %v349_v37 }
  0x32   :  { %237 = vmatmul.bf16.gmra.mxu2 %v381_v38 }
  0x36   :  { %441 = vmatmul.msk.bf16.gmra.mxu1 %vm179_vm0, %v369_v41 }
  0x41   :  { %222 = vmatmul.bf16.gmra.mxu0 %v357_v46 }
  0x42   :  { %242 = vmatmul.bf16.gmra.mxu2 %v389_v47 }
  0x46   :  { %442 = vmatmul.msk.bf16.gmra.mxu1 %vm179_vm0, %v377_v50 }
  0x51   :  { %227 = vmatmul.bf16.gmra.mxu0 %v365_v55 }
  0x52   :  { %247 = vmatmul.bf16.gmra.mxu2 %v397_v56 }
  0x83   :  { %v262_v57 = vpop.f32.mrf.mxu1 }
  0x8a   :  { %v287_v9 = vpop.f32.mrf.mxu3 }
  0x8b   :  { %v264_v58 = vpop.f32.mrf.mxu1 }
  0x92   :  { %v289_v16 = vpop.f32.mrf.mxu3 }
  0x93   :  { %v267_v59 = vpop.f32.mrf.mxu1 }
  0x9a   :  { %v292_v27 = vpop.f32.mrf.mxu3 }
  0x9b   :  { %v269_v60 = vpop.f32.mrf.mxu1 }
  0x9e   :  { %v213_v61 = vpop.f32.mrf.mxu0 }
  0x9f   :  { %v214_v0 = vadd.f32 %v682_v62, %v213_v61 }
  0xa1   :  { %v263_v4 = vadd.f32 %v262_v57, %v214_v0 }
  0xa2   :  { %v294_v39 = vpop.f32.mrf.mxu3 }
  0xa3   :  { %v272_v63 = vpop.f32.mrf.mxu1 }
  0xa5   :  { %v233_v1 = vpop.f32.mrf.mxu2 }
  0xa6   :  { %v215_v2 = vpop.f32.mrf.mxu0  ;;  %v234_v36 = vadd.f32 %v682_v62, %v233_v1 }
  0xa7   :  { %v216_v3 = vadd.f32 %v682_v62, %v215_v2 }
  0xa9   :  { %v265_v5 = vadd.f32 %v264_v58, %v216_v3 }
  0xaa   :  { %v297_v52 = vpop.f32.mrf.mxu3 }
  0xab   :  { %v474_v6 = vpack.c.bf16 %v265_v5, %v263_v4  ;;  %v274_v7 = vpop.f32.mrf.mxu1 }
  0xad   :  { %475 = vst [vmem:[%s727_s3] sm:$0xff] %v474_v6   ;;  %v235_v8 = vpop.f32.mrf.mxu2 }
  0xae   :  { %v218_v10 = vpop.f32.mrf.mxu0  ;;  %v236_v37 = vadd.f32 %v682_v62, %v235_v8 }
  0xaf   :  { %v219_v12 = vadd.f32 %v682_v62, %v218_v10 }
  0xb1   :  { %v268_v17 = vadd.f32 %v267_v59, %v219_v12 }
  0xb3   :  { %v277_v11 = vpop.f32.mrf.mxu1 }
  0xb5   :  { %v238_v13 = vpop.f32.mrf.mxu2 }
  0xb6   :  { %v220_v14 = vpop.f32.mrf.mxu0  ;;  %v239_v21 = vadd.f32 %v682_v62, %v238_v13 }
  0xb7   :  { %v221_v15 = vadd.f32 %v682_v62, %v220_v14 }
  0xb8   :  { %v288_v25 = vadd.f32 %v287_v9, %v239_v21 }
  0xb9   :  { %v270_v18 = vadd.f32 %v269_v60, %v221_v15 }
  0xbb   :  { %v479_v19 = vpack.c.bf16 %v270_v18, %v268_v17  ;;  %v279_v20 = vpop.f32.mrf.mxu1 }
  0xbd   :  { %511 = vst [vmem:[%s727_s3 + $0x8] sm:$0xff] %v479_v19   ;;  %v240_v22 = vpop.f32.mrf.mxu2 }
  0xbe   :  { %v241_v23 = vadd.f32 %v682_v62, %v240_v22  ;;  %v223_v24 = vpop.f32.mrf.mxu0 }
  0xbf   :  { %v224_v30 = vadd.f32 %v682_v62, %v223_v24 }
  0xc0   :  { %v290_v26 = vadd.f32 %v289_v16, %v241_v23 }
  0xc1   :  { %v273_v34 = vadd.f32 %v272_v63, %v224_v30  ;;  %v299_v63 = vpop.f32.mrf.mxu3 }
  0xc2   :  { %v499_v28 = vpack.c.bf16 %v290_v26, %v288_v25 }
  0xc3   :  { %v282_v29 = vpop.f32.mrf.mxu1 }
  0xc4   :  { %515 = vst [vmem:[%s727_s3 + $0x28] sm:$0xff] %v499_v28   ;;  %v283_v41 = vadd.f32 %v282_v29, %v234_v36 }
  0xc5   :  { %v243_v31 = vpop.f32.mrf.mxu2 }
  0xc6   :  { %v225_v32 = vpop.f32.mrf.mxu0  ;;  %v244_v42 = vadd.f32 %v682_v62, %v243_v31 }
  0xc7   :  { %v226_v33 = vadd.f32 %v682_v62, %v225_v32 }
  0xc8   :  { %v293_v48 = vadd.f32 %v292_v27, %v244_v42 }
  0xc9   :  { %v275_v35 = vadd.f32 %v274_v7, %v226_v33 }
  0xcb   :  { %v484_v38 = vpack.c.bf16 %v275_v35, %v273_v34  ;;  %v284_v40 = vpop.f32.mrf.mxu1 }
  0xcc   :  { %v285_v43 = vadd.f32 %v284_v40, %v236_v37 }
  0xcd   :  { %512 = vst [vmem:[%s727_s3 + $0x10] sm:$0xff] %v484_v38   ;;  %v245_v44 = vpop.f32.mrf.mxu2 }
  0xce   :  { %v494_v45 = vpack.c.bf16 %v285_v43, %v283_v41  ;;  %v246_v46 = vadd.f32 %v682_v62, %v245_v44  ;;  %v228_v47 = vpop.f32.mrf.mxu0 }
  0xcf   :  { %v229_v51 = vadd.f32 %v682_v62, %v228_v47 }
  0xd0   :  { %514 = vst [vmem:[%s727_s3 + $0x20] sm:$0xff] %v494_v45   ;;  %v295_v49 = vadd.f32 %v294_v39, %v246_v46 }
  0xd1   :  { %v278_v56 = vadd.f32 %v277_v11, %v229_v51 }
  0xd2   :  { %v504_v50 = vpack.c.bf16 %v295_v49, %v293_v48 }
  0xd4   :  { %516 = vst [vmem:[%s727_s3 + $0x30] sm:$0xff] %v504_v50  }
  0xd5   :  { %v248_v53 = vpop.f32.mrf.mxu2 }
  0xd6   :  { %v230_v54 = vpop.f32.mrf.mxu0  ;;  %v249_v59 = vadd.f32 %v682_v62, %v248_v53 }
  0xd7   :  { %v231_v55 = vadd.f32 %v682_v62, %v230_v54 }
  0xd8   :  { %v298_v0 = vadd.f32 %v297_v52, %v249_v59 }
  0xd9   :  { %v280_v57 = vadd.f32 %v279_v20, %v231_v55 }
  0xdb   :  { %v489_v58 = vpack.c.bf16 %v280_v57, %v278_v56 }
  0xdd   :  { %513 = vst [vmem:[%s727_s3 + $0x18] sm:$0xff] %v489_v58   ;;  %v250_v60 = vpop.f32.mrf.mxu2 }
  0xde   :  { %v251_v61 = vadd.f32 %v682_v62, %v250_v60 }
  0xe0   :  { %v300_v1 = vadd.f32 %v299_v63, %v251_v61 }
  0xe2   :  { %v509_v2 = vpack.c.bf16 %v300_v1, %v298_v0 }
  0xe4   :  { %517 = vst [vmem:[%s727_s3 + $0x38] sm:$0xff] %v509_v2  }

// kernel: generator_forward.31
= control target key start
LH: loop header
LB: loop body
LE: loop exit
PB: predicated region body
PF: predicated region fallthrough
CT: control target
= control target key end

     0   :  { %vm315_vm0 = vcmask 261120   ;;  %s1076_s1 = inlined_call_operand.vmem [shape: bf16[288,128], index: 1, kind: input, shape index: {}]   ;;  %s1077_s0 = inlined_call_operand.vmem [shape: bf16[128,288], index: 0, kind: input, shape index: {}]   ;;  %s1078_s2 = inlined_call_operand.vmem [shape: f32[1,128], index: 2, kind: input, shape index: {}]   ;;  %s1079_s3 = inlined_call_operand.vmem [shape: bf16[128,128], index: 3, kind: output, shape index: {}]  }
   0x1   :  { %v730_v0 = vld [vmem:[%s1076_s1 + $0x38] sm:$0xff]  ;;  %v740_v1 = vld [vmem:[%s1076_s1 + $0x88] sm:$0xff]  ;;  %v729_v3 = vld [vmem:[%s1076_s1 + $0x30] sm:$0xff] }
   0x2   :  { %v738_v2 = vld [vmem:[%s1076_s1 + $0x78] sm:$0xff]  ;;  %340 = vmatpush.bf16.msra.mxu0 %v730_v0  ;;  %788 = vmatpush.bf16.msra.mxu3 %v730_v0  ;;  %v739_v4 = vld [vmem:[%s1076_s1 + $0x80] sm:$0xff]  ;;  %v737_v5 = vld [vmem:[%s1076_s1 + $0x70] sm:$0xff] }
   0x3   :  { %444 = vmatpush.bf16.msra.mxu2 %v740_v1  ;;  %389 = vmatpush.bf16.msra.mxu1 %v738_v2  ;;  %v533_v6 = vld [vmem:[%s1077_s0 + $0x8] sm:$0xf]  ;;  %v701_v7 = vld [vmem:[%s1077_s0 + $0x10] sm:$0xf0]  ;;  %v727_v11 = vld [vmem:[%s1076_s1 + $0x20] sm:$0xff] }
   0x4   :  { %v534_v8 = vor.u32 %v701_v7, %v533_v6  ;;  %v728_v9 = vld [vmem:[%s1076_s1 + $0x28] sm:$0xff]  ;;  %v735_v12 = vld [vmem:[%s1076_s1 + $0x60] sm:$0xff]  ;;  %v726_v13 = vld [vmem:[%s1076_s1 + $0x18] sm:$0xff] }
   0x5   :  { %v736_v10 = vld [vmem:[%s1076_s1 + $0x68] sm:$0xff]  ;;  %v734_v14 = vld [vmem:[%s1076_s1 + $0x58] sm:$0xff]  ;;  %v725_v15 = vld [vmem:[%s1076_s1 + $0x10] sm:$0xff] }
   0x6   :  { %341 = vmatpush.bf16.msra.mxu0 %v729_v3  ;;  %789 = vmatpush.bf16.msra.mxu3 %v729_v3  ;;  %v733_v16 = vld [vmem:[%s1076_s1 + $0x50] sm:$0xff]  ;;  %v545_v17 = vld [vmem:[%s1077_s0 + $0x20] sm:$0xf]  ;;  %v704_v18 = vld [vmem:[%s1077_s0 + $0x28] sm:$0xf0] }
   0x7   :  { %445 = vmatpush.bf16.msra.mxu2 %v739_v4  ;;  %390 = vmatpush.bf16.msra.mxu1 %v737_v5  ;;  %v546_v19 = vor.u32 %v704_v18, %v545_v17  ;;  %v724_v20 = vld [vmem:[%s1076_s1 + $0x8] sm:$0xff]  ;;  %v723_v22 = vld [vmem:[%s1076_s1] sm:$0xff]  ;;  %v597_v26 = vld [vmem:[%s1077_s0 + $0x90] sm:$0xf] }
   0x8   :  { %v732_v21 = vld [vmem:[%s1076_s1 + $0x48] sm:$0xff]  ;;  %v731_v23 = vld [vmem:[%s1076_s1 + $0x40] sm:$0xff]  ;;  %v718_v27 = vld [vmem:[%s1077_s0 + $0x98] sm:$0xf0] }
   0x9   :  { %v525_v24 = vld [vmem:[%s1077_s0] sm:$0xf]  ;;  %v700_v25 = vld [vmem:[%s1077_s0 + $0x8] sm:$0xf0]  ;;  %v699_v28 = vld [vmem:[%s1077_s0 + $0x4] sm:$0xf]  ;;  %v598_v31 = vor.u32 %v718_v27, %v597_v26 }
   0xa   :  { %691 = vmatmul.msk.bf16.vlgmr.msra.gmra.mxu2 %vm315_vm0, %v534_v8  ;;  %342 = vmatpush.bf16.msra.mxu0 %v728_v9  ;;  %v527_v29 = vld [vmem:[%s1077_s0 + $0xc] sm:$0xf0]  ;;  %v526_v30 = vor.u32 %v700_v25, %v525_v24  ;;  %v557_v33 = vld [vmem:[%s1077_s0 + $0x38] sm:$0xf]  ;;  %v707_v34 = vld [vmem:[%s1077_s0 + $0x40] sm:$0xf0] }
   0xb   :  { %790 = vmatpush.bf16.msra.mxu3 %v728_v9  ;;  %391 = vmatpush.bf16.msra.mxu1 %v736_v10  ;;  %v530_v32 = vor.u32 %v699_v28, %v527_v29  ;;  %v558_v35 = vor.u32 %v707_v34, %v557_v33  ;;  %v537_v36 = vld [vmem:[%s1077_s0 + $0x18] sm:$0xf]  ;;  %v703_v37 = vld [vmem:[%s1077_s0 + $0x20] sm:$0xf0]  ;;  %v609_v38 = vld [vmem:[%s1077_s0 + $0xa8] sm:$0xf] }
   0xc   :  { %v721_v39 = vld [vmem:[%s1077_s0 + $0xb0] sm:$0xf0]  ;;  %v702_v40 = vld [vmem:[%s1077_s0 + $0x1c] sm:$0xf]  ;;  %v539_v41 = vld [vmem:[%s1077_s0 + $0x24] sm:$0xf0]  ;;  %v538_v42 = vor.u32 %v703_v37, %v537_v36 }
   0xd   :  { %v610_v43 = vor.u32 %v721_v39, %v609_v38  ;;  %v542_v44 = vor.u32 %v702_v40, %v539_v41  ;;  %v569_v45 = vld [vmem:[%s1077_s0 + $0x50] sm:$0xf]  ;;  %v710_v46 = vld [vmem:[%s1077_s0 + $0x58] sm:$0xf0]  ;;  %v717_v50 = vld [vmem:[%s1077_s0 + $0x94] sm:$0xf] }
   0xe   :  { %343 = vmatpush.bf16.msra.mxu0 %v727_v11  ;;  %v570_v47 = vor.u32 %v710_v46, %v569_v45  ;;  %v549_v48 = vld [vmem:[%s1077_s0 + $0x30] sm:$0xf]  ;;  %v706_v49 = vld [vmem:[%s1077_s0 + $0x38] sm:$0xf0]  ;;  %v599_v51 = vld [vmem:[%s1077_s0 + $0x9c] sm:$0xf0] }
   0xf   :  { %791 = vmatpush.bf16.msra.mxu3 %v727_v11  ;;  %392 = vmatpush.bf16.msra.mxu1 %v735_v12  ;;  %v705_v52 = vld [vmem:[%s1077_s0 + $0x34] sm:$0xf]  ;;  %v551_v53 = vld [vmem:[%s1077_s0 + $0x3c] sm:$0xf0]  ;;  %v550_v54 = vor.u32 %v706_v49, %v549_v48  ;;  %v602_v55 = vor.u32 %v717_v50, %v599_v51  ;;  %v581_v57 = vld [vmem:[%s1077_s0 + $0x68] sm:$0xf] }
  0x10   :  { %v554_v56 = vor.u32 %v705_v52, %v551_v53  ;;  %v713_v58 = vld [vmem:[%s1077_s0 + $0x70] sm:$0xf0]  ;;  %v561_v60 = vld [vmem:[%s1077_s0 + $0x48] sm:$0xf]  ;;  %v720_v62 = vld [vmem:[%s1077_s0 + $0xac] sm:$0xf] }
  0x11   :  { %v582_v59 = vor.u32 %v713_v58, %v581_v57  ;;  %v709_v61 = vld [vmem:[%s1077_s0 + $0x50] sm:$0xf0]  ;;  %v611_v63 = vld [vmem:[%s1077_s0 + $0xb4] sm:$0xf0]  ;;  %v708_v0 = vld [vmem:[%s1077_s0 + $0x4c] sm:$0xf] }
  0x12   :  { %344 = vmatpush.bf16.msra.mxu0 %v726_v13  ;;  %v563_v1 = vld [vmem:[%s1077_s0 + $0x54] sm:$0xf0]  ;;  %v614_v3 = vor.u32 %v720_v62, %v611_v63  ;;  %v716_v6 = vld [vmem:[%s1077_s0 + $0x88] sm:$0xf0]  ;;  %v573_v8 = vld [vmem:[%s1077_s0 + $0x60] sm:$0xf] }
  0x13   :  { %792 = vmatpush.bf16.msra.mxu3 %v726_v13  ;;  %393 = vmatpush.bf16.msra.mxu1 %v734_v14  ;;  %v566_v4 = vor.u32 %v708_v0, %v563_v1  ;;  %v712_v9 = vld [vmem:[%s1077_s0 + $0x68] sm:$0xf0]  ;;  %v575_v11 = vld [vmem:[%s1077_s0 + $0x6c] sm:$0xf0]  ;;  %v585_v17 = vld [vmem:[%s1077_s0 + $0x78] sm:$0xf] }
  0x14   :  { %v715_v18 = vld [vmem:[%s1077_s0 + $0x80] sm:$0xf0]  ;;  %v722_v24 = vld [vmem:[%s1077_s0 + $0xb8] sm:$0xf0] }
  0x16   :  { %345 = vmatpush.bf16.msra.mxu0 %v725_v15 }
  0x17   :  { %793 = vmatpush.bf16.msra.mxu3 %v725_v15  ;;  %394 = vmatpush.bf16.msra.mxu1 %v733_v16  ;;  %v719_v15 = vld [vmem:[%s1077_s0 + $0xa0] sm:$0xf0] }
  0x1a   :  { %692 = vmatmul.msk.bf16.gmra.mxu2 %vm315_vm0, %v546_v19  ;;  %346 = vmatpush.bf16.msra.mxu0 %v724_v20  ;;  %v714_v19 = vld [vmem:[%s1077_s0 + $0x7c] sm:$0xf] }
  0x1b   :  { %794 = vmatpush.bf16.msra.mxu3 %v724_v20  ;;  %395 = vmatpush.bf16.msra.mxu1 %v732_v21  ;;  %v587_v20 = vld [vmem:[%s1077_s0 + $0x84] sm:$0xf0] }
  0x1e   :  { %347 = vmatpush.bf16.msra.mxu0 %v723_v22 }
  0x1f   :  { %795 = vmatpush.bf16.msra.mxu3 %v723_v22  ;;  %396 = vmatpush.bf16.msra.mxu1 %v731_v23  ;;  %v590_v22 = vor.u32 %v714_v19, %v587_v20 }
  0x21   :  { %348 = vmatmul.bf16.vlgmr.msra.gmra.mxu0 %v526_v30  ;;  %v1034_v30 = vld [vmem:[%s1078_s2] ss:$0 sm:$0xff] }
  0x22   :  { %378 = vmatmul.bf16.vlgmr.msra.gmra.mxu3 %v598_v31  ;;  %397 = vmatmul.bf16.vlgmr.msra.gmra.mxu1 %v530_v32 }
  0x23   :  { %796 = vmatpush.bf16.msrb.mxu3 %v738_v2  ;;  %v562_v2 = vor.u32 %v709_v61, %v561_v60 }
  0x27   :  { %797 = vmatpush.bf16.msrb.mxu3 %v737_v5  ;;  %v593_v5 = vld [vmem:[%s1077_s0 + $0x80] sm:$0xf] }
  0x28   :  { %v594_v7 = vor.u32 %v716_v6, %v593_v5 }
  0x2a   :  { %693 = vmatmul.msk.bf16.gmra.mxu2 %vm315_vm0, %v558_v35 }
  0x2b   :  { %798 = vmatpush.bf16.msrb.mxu3 %v736_v10  ;;  %v711_v10 = vld [vmem:[%s1077_s0 + $0x64] sm:$0xf] }
  0x2c   :  { %v578_v13 = vor.u32 %v711_v10, %v575_v11 }
  0x2f   :  { %799 = vmatpush.bf16.msrb.mxu3 %v735_v12  ;;  %v574_v12 = vor.u32 %v712_v9, %v573_v8 }
  0x31   :  { %353 = vmatmul.bf16.gmra.mxu0 %v538_v42 }
  0x32   :  { %383 = vmatmul.bf16.gmra.mxu3 %v610_v43  ;;  %402 = vmatmul.bf16.gmra.mxu1 %v542_v44 }
  0x33   :  { %800 = vmatpush.bf16.msrb.mxu3 %v734_v14  ;;  %v605_v14 = vld [vmem:[%s1077_s0 + $0x98] sm:$0xf] }
  0x37   :  { %801 = vmatpush.bf16.msrb.mxu3 %v733_v16  ;;  %v606_v16 = vor.u32 %v719_v15, %v605_v14 }
  0x3a   :  { %694 = vmatmul.msk.bf16.gmra.mxu2 %vm315_vm0, %v570_v47 }
  0x3b   :  { %802 = vmatpush.bf16.msrb.mxu3 %v732_v21  ;;  %v586_v21 = vor.u32 %v715_v18, %v585_v17 }
  0x3f   :  { %803 = vmatpush.bf16.msrb.mxu3 %v731_v23  ;;  %v617_v23 = vld [vmem:[%s1077_s0 + $0xb0] sm:$0xf] }
  0x40   :  { %v618_v25 = vor.u32 %v722_v24, %v617_v23 }
  0x41   :  { %358 = vmatmul.bf16.gmra.mxu0 %v550_v54 }
  0x42   :  { %427 = vmatmul.bf16.vlgmr.msrb.gmra.mxu3 %v602_v55  ;;  %407 = vmatmul.bf16.gmra.mxu1 %v554_v56 }
  0x4a   :  { %695 = vmatmul.msk.bf16.gmra.mxu2 %vm315_vm0, %v582_v59 }
  0x51   :  { %363 = vmatmul.bf16.gmra.mxu0 %v562_v2 }
  0x52   :  { %432 = vmatmul.bf16.gmra.mxu3 %v614_v3  ;;  %412 = vmatmul.bf16.gmra.mxu1 %v566_v4 }
  0x5a   :  { %696 = vmatmul.msk.bf16.gmra.mxu2 %vm315_vm0, %v594_v7 }
  0x61   :  { %368 = vmatmul.bf16.gmra.mxu0 %v574_v12 }
  0x62   :  { %417 = vmatmul.bf16.gmra.mxu1 %v578_v13 }
  0x6a   :  { %697 = vmatmul.msk.bf16.gmra.mxu2 %vm315_vm0, %v606_v16 }
  0x71   :  { %373 = vmatmul.bf16.gmra.mxu0 %v586_v21 }
  0x72   :  { %422 = vmatmul.bf16.gmra.mxu1 %v590_v22 }
  0x7a   :  { %698 = vmatmul.msk.bf16.gmra.mxu2 %vm315_vm0, %v618_v25 }
  0x8d   :  { %v447_v26 = vpop.f32.mrf.mxu2 }
  0x95   :  { %v449_v27 = vpop.f32.mrf.mxu2 }
  0x9d   :  { %v452_v28 = vpop.f32.mrf.mxu2 }
  0x9e   :  { %v349_v29 = vpop.f32.mrf.mxu0 }
  0x9f   :  { %v398_v31 = vpop.f32.mrf.mxu1  ;;  %v350_v32 = vadd.f32 %v1034_v30, %v349_v29 }
  0xa1   :  { %v399_v35 = vadd.f32 %v398_v31, %v350_v32 }
  0xa3   :  { %v448_v39 = vadd.f32 %v447_v26, %v399_v35 }
  0xa5   :  { %v454_v33 = vpop.f32.mrf.mxu2  ;;  %v379_v52 = vpop.f32.mrf.mxu3 }
  0xa6   :  { %v351_v34 = vpop.f32.mrf.mxu0 }
  0xa7   :  { %v352_v36 = vadd.f32 %v1034_v30, %v351_v34  ;;  %v400_v37 = vpop.f32.mrf.mxu1 }
  0xa9   :  { %v401_v38 = vadd.f32 %v400_v37, %v352_v36 }
  0xab   :  { %v450_v40 = vadd.f32 %v449_v27, %v401_v38 }
  0xad   :  { %v744_v41 = vpack.c.bf16 %v450_v40, %v448_v39  ;;  %v457_v42 = vpop.f32.mrf.mxu2  ;;  %v381_v60 = vpop.f32.mrf.mxu3  ;;  %v380_v40 = vadd.f32 %v1034_v30, %v379_v52 }
  0xae   :  { %v354_v43 = vpop.f32.mrf.mxu0 }
  0xaf   :  { %745 = vst [vmem:[%s1079_s3] sm:$0xff] %v744_v41   ;;  %v403_v44 = vpop.f32.mrf.mxu1  ;;  %v355_v45 = vadd.f32 %v1034_v30, %v354_v43  ;;  %v382_v41 = vadd.f32 %v1034_v30, %v381_v60 }
  0xb1   :  { %v404_v48 = vadd.f32 %v403_v44, %v355_v45 }
  0xb3   :  { %v453_v53 = vadd.f32 %v452_v28, %v404_v48 }
  0xb5   :  { %v459_v46 = vpop.f32.mrf.mxu2  ;;  %v384_v8 = vpop.f32.mrf.mxu3 }
  0xb6   :  { %v356_v47 = vpop.f32.mrf.mxu0 }
  0xb7   :  { %v357_v49 = vadd.f32 %v1034_v30, %v356_v47  ;;  %v405_v50 = vpop.f32.mrf.mxu1 }
  0xb9   :  { %v406_v51 = vadd.f32 %v405_v50, %v357_v49 }
  0xbb   :  { %v455_v54 = vadd.f32 %v454_v33, %v406_v51 }
  0xbd   :  { %v749_v55 = vpack.c.bf16 %v455_v54, %v453_v53  ;;  %v462_v56 = vpop.f32.mrf.mxu2  ;;  %v386_v16 = vpop.f32.mrf.mxu3 }
  0xbe   :  { %v359_v57 = vpop.f32.mrf.mxu0  ;;  %v387_v60 = vadd.f32 %v1034_v30, %v386_v16 }
  0xbf   :  { %781 = vst [vmem:[%s1079_s3 + $0x8] sm:$0xff] %v749_v55   ;;  %v408_v58 = vpop.f32.mrf.mxu1  ;;  %v360_v59 = vadd.f32 %v1034_v30, %v359_v57 }
  0xc1   :  { %v409_v63 = vadd.f32 %v408_v58, %v360_v59  ;;  %v385_v59 = vadd.f32 %v1034_v30, %v384_v8 }
  0xc3   :  { %v458_v3 = vadd.f32 %v457_v42, %v409_v63 }
  0xc5   :  { %v464_v61 = vpop.f32.mrf.mxu2  ;;  %v428_v24 = vpop.f32.mrf.mxu3 }
  0xc6   :  { %v361_v62 = vpop.f32.mrf.mxu0  ;;  %v429_v43 = vadd.f32 %v428_v24, %v380_v40 }
  0xc7   :  { %v362_v0 = vadd.f32 %v1034_v30, %v361_v62  ;;  %v410_v1 = vpop.f32.mrf.mxu1 }
  0xc9   :  { %v411_v2 = vadd.f32 %v410_v1, %v362_v0 }
  0xcb   :  { %v460_v4 = vadd.f32 %v459_v46, %v411_v2 }
  0xcd   :  { %v754_v5 = vpack.c.bf16 %v460_v4, %v458_v3  ;;  %v467_v6 = vpop.f32.mrf.mxu2  ;;  %v430_v35 = vpop.f32.mrf.mxu3 }
  0xce   :  { %v364_v7 = vpop.f32.mrf.mxu0  ;;  %v431_v44 = vadd.f32 %v430_v35, %v382_v41 }
  0xcf   :  { %782 = vst [vmem:[%s1079_s3 + $0x10] sm:$0xff] %v754_v5   ;;  %v413_v9 = vpop.f32.mrf.mxu1  ;;  %v365_v10 = vadd.f32 %v1034_v30, %v364_v7 }
  0xd1   :  { %v414_v13 = vadd.f32 %v413_v9, %v365_v10 }
  0xd3   :  { %v463_v18 = vadd.f32 %v462_v56, %v414_v13 }
  0xd5   :  { %v469_v11 = vpop.f32.mrf.mxu2  ;;  %v433_v49 = vpop.f32.mrf.mxu3 }
  0xd6   :  { %v366_v12 = vpop.f32.mrf.mxu0  ;;  %v434_v62 = vadd.f32 %v433_v49, %v385_v59 }
  0xd7   :  { %v367_v14 = vadd.f32 %v1034_v30, %v366_v12  ;;  %v415_v15 = vpop.f32.mrf.mxu1 }
  0xd9   :  { %v416_v17 = vadd.f32 %v415_v15, %v367_v14 }
  0xdb   :  { %v465_v19 = vadd.f32 %v464_v61, %v416_v17 }
  0xdd   :  { %v759_v20 = vpack.c.bf16 %v465_v19, %v463_v18  ;;  %v472_v21 = vpop.f32.mrf.mxu2  ;;  %v435_v61 = vpop.f32.mrf.mxu3 }
  0xde   :  { %v369_v22 = vpop.f32.mrf.mxu0  ;;  %v436_v63 = vadd.f32 %v435_v61, %v387_v60 }
  0xdf   :  { %783 = vst [vmem:[%s1079_s3 + $0x18] sm:$0xff] %v759_v20   ;;  %v418_v23 = vpop.f32.mrf.mxu1  ;;  %v370_v25 = vadd.f32 %v1034_v30, %v369_v22 }
  0xe1   :  { %v419_v28 = vadd.f32 %v418_v23, %v370_v25 }
  0xe3   :  { %v468_v33 = vadd.f32 %v467_v6, %v419_v28 }
  0xe5   :  { %v474_v26 = vpop.f32.mrf.mxu2 }
  0xe6   :  { %v371_v27 = vpop.f32.mrf.mxu0 }
  0xe7   :  { %v372_v29 = vadd.f32 %v1034_v30, %v371_v27  ;;  %v420_v31 = vpop.f32.mrf.mxu1 }
  0xe9   :  { %v421_v32 = vadd.f32 %v420_v31, %v372_v29 }
  0xeb   :  { %v470_v34 = vadd.f32 %v469_v11, %v421_v32 }
  0xed   :  { %v764_v36 = vpack.c.bf16 %v470_v34, %v468_v33  ;;  %v477_v37 = vpop.f32.mrf.mxu2 }
  0xee   :  { %v374_v38 = vpop.f32.mrf.mxu0  ;;  %v478_v46 = vadd.f32 %v477_v37, %v429_v43 }
  0xef   :  { %784 = vst [vmem:[%s1079_s3 + $0x20] sm:$0xff] %v764_v36   ;;  %v423_v39 = vpop.f32.mrf.mxu1  ;;  %v375_v42 = vadd.f32 %v1034_v30, %v374_v38 }
  0xf1   :  { %v424_v50 = vadd.f32 %v423_v39, %v375_v42 }
  0xf3   :  { %v473_v52 = vadd.f32 %v472_v21, %v424_v50 }
  0xf5   :  { %v479_v45 = vpop.f32.mrf.mxu2 }
  0xf6   :  { %v480_v47 = vadd.f32 %v479_v45, %v431_v44  ;;  %v376_v48 = vpop.f32.mrf.mxu0 }
  0xf7   :  { %v377_v51 = vadd.f32 %v1034_v30, %v376_v48  ;;  %v425_v53 = vpop.f32.mrf.mxu1 }
  0xf8   :  { %v774_v54 = vpack.c.bf16 %v480_v47, %v478_v46 }
  0xf9   :  { %v426_v55 = vadd.f32 %v425_v53, %v377_v51 }
  0xfa   :  { %786 = vst [vmem:[%s1079_s3 + $0x30] sm:$0xff] %v774_v54  }
  0xfb   :  { %v475_v56 = vadd.f32 %v474_v26, %v426_v55 }
  0xfd   :  { %v769_v57 = vpack.c.bf16 %v475_v56, %v473_v52  ;;  %v482_v58 = vpop.f32.mrf.mxu2 }
  0xfe   :  { %v483_v1 = vadd.f32 %v482_v58, %v434_v62 }
  0xff   :  { %785 = vst [vmem:[%s1079_s3 + $0x28] sm:$0xff] %v769_v57  }
 0x105   :  { %v484_v0 = vpop.f32.mrf.mxu2 }
 0x106   :  { %v485_v2 = vadd.f32 %v484_v0, %v436_v63 }
 0x108   :  { %v779_v3 = vpack.c.bf16 %v485_v2, %v483_v1 }
 0x10a   :  { %787 = vst [vmem:[%s1079_s3 + $0x38] sm:$0xff] %v779_v3  }

// kernel: reverse.22
= control target key start
LH: loop header
LB: loop body
LE: loop exit
PB: predicated region body
PF: predicated region fallthrough
CT: control target
= control target key end

     0   :  { %s136_s0 = inlined_call_operand.vmem [shape: bf16[16,32,1,2], index: 0, kind: input, shape index: {}]   ;;  %s137_s1 = inlined_call_operand.vmem [shape: bf16[16,32,1,2], index: 1, kind: output, shape index: {}]  }
   0x1   :  { %v8_v0 = vld [vmem:[%s136_s0] sm:$0xff]   ;;  %v99_v1 = vld [vmem:[%s136_s0 + $0x10] sm:$0xff]  ;;  %v100_v2 = vld [vmem:[%s136_s0 + $0x18] sm:$0xff] }
   0x2   :  { %57 = vst [vmem:[%s137_s1 + $0x10] sm:$0xff] %v8_v0   ;;  %v101_v3 = vld [vmem:[%s136_s0 + $0x8] sm:$0xff] }
   0x3   :  { %74 = vst [vmem:[%s137_s1] sm:$0xff] %v99_v1  }
   0x4   :  { %93 = vst [vmem:[%s137_s1 + $0x8] sm:$0xff] %v100_v2  }
   0x5   :  { %98 = vst [vmem:[%s137_s1 + $0x18] sm:$0xff] %v101_v3  }

// kernel: generator_forward.40
= control target key start
LH: loop header
LB: loop body
LE: loop exit
PB: predicated region body
PF: predicated region fallthrough
CT: control target
= control target key end

     0   :  { %vm107_vm0 = vcmask 523264   ;;  %s436_s1 = inlined_call_operand.vmem [shape: bf16[64,128], index: 1, kind: input, shape index: {}]   ;;  %s437_s2 = inlined_call_operand.vmem [shape: f32[1,128], index: 2, kind: input, shape index: {}]   ;;  %s438_s0 = inlined_call_operand.vmem [shape: bf16[128,64], index: 0, kind: input, shape index: {}]   ;;  %s439_s3 = inlined_call_operand.vmem [shape: bf16[128,128], index: 3, kind: output, shape index: {}]  }
   0x1   :  { %v284_v0 = vld [vmem:[%s436_s1 + $0x18] sm:$0xff]  ;;  %v283_v1 = vld [vmem:[%s436_s1 + $0x10] sm:$0xff]  ;;  %v282_v2 = vld [vmem:[%s436_s1 + $0x8] sm:$0xff] }
   0x2   :  { %136 = vmatpush.bf16.msra.mxu0 %v284_v0  ;;  %332 = vmatpush.bf16.msra.mxu1 %v284_v0  ;;  %v281_v3 = vld [vmem:[%s436_s1] sm:$0xff]  ;;  %v275_v5 = vld [vmem:[%s438_s0 + $0x10] sm:$0xff]  ;;  %v274_v8 = vld [vmem:[%s438_s0 + $0x8] sm:$0xff] }
   0x3   :  { %333 = vmatpush.bf16.msra.mxu2 %v284_v0  ;;  %334 = vmatpush.bf16.msra.mxu3 %v284_v0  ;;  %v273_v4 = vld [vmem:[%s438_s0] sm:$0xff]  ;;  %v279_v7 = vld [vmem:[%s438_s0 + $0x30] sm:$0xff]  ;;  %v276_v9 = vld [vmem:[%s438_s0 + $0x18] sm:$0xff] }
   0x4   :  { %v277_v6 = vld [vmem:[%s438_s0 + $0x20] sm:$0xff]  ;;  %v278_v10 = vld [vmem:[%s438_s0 + $0x28] sm:$0xff]  ;;  %v280_v11 = vld [vmem:[%s438_s0 + $0x38] sm:$0xff] }
   0x5   :  { %v344_v14 = vld [vmem:[%s437_s2] ss:$0 sm:$0xff] }
   0x6   :  { %137 = vmatpush.bf16.msra.mxu0 %v283_v1  ;;  %335 = vmatpush.bf16.msra.mxu1 %v283_v1 }
   0x7   :  { %336 = vmatpush.bf16.msra.mxu2 %v283_v1  ;;  %337 = vmatpush.bf16.msra.mxu3 %v283_v1 }
   0xa   :  { %138 = vmatpush.bf16.msra.mxu0 %v282_v2  ;;  %338 = vmatpush.bf16.msra.mxu1 %v282_v2 }
   0xb   :  { %339 = vmatpush.bf16.msra.mxu2 %v282_v2  ;;  %340 = vmatpush.bf16.msra.mxu3 %v282_v2 }
   0xe   :  { %139 = vmatpush.bf16.msra.mxu0 %v281_v3  ;;  %341 = vmatpush.bf16.msra.mxu1 %v281_v3 }
   0xf   :  { %342 = vmatpush.bf16.msra.mxu2 %v281_v3  ;;  %343 = vmatpush.bf16.msra.mxu3 %v281_v3 }
  0x11   :  { %265 = vmatmul.msk.bf16.vlgmr.msra.gmra.mxu0 %vm107_vm0, %v273_v4  ;;  %267 = vmatmul.msk.bf16.vlgmr.msra.gmra.mxu1 %vm107_vm0, %v275_v5 }
  0x12   :  { %269 = vmatmul.msk.bf16.vlgmr.msra.gmra.mxu2 %vm107_vm0, %v277_v6  ;;  %271 = vmatmul.msk.bf16.vlgmr.msra.gmra.mxu3 %vm107_vm0, %v279_v7 }
  0x21   :  { %266 = vmatmul.msk.bf16.gmra.mxu0 %vm107_vm0, %v274_v8  ;;  %268 = vmatmul.msk.bf16.gmra.mxu1 %vm107_vm0, %v276_v9 }
  0x22   :  { %270 = vmatmul.msk.bf16.gmra.mxu2 %vm107_vm0, %v278_v10  ;;  %272 = vmatmul.msk.bf16.gmra.mxu3 %vm107_vm0, %v280_v11 }
  0x8e   :  { %v141_v12 = vpop.f32.mrf.mxu0  ;;  %v151_v13 = vpop.f32.mrf.mxu1 }
  0x8f   :  { %v142_v19 = vadd.f32 %v344_v14, %v141_v12  ;;  %v152_v20 = vadd.f32 %v344_v14, %v151_v13 }
  0x95   :  { %v161_v15 = vpop.f32.mrf.mxu2  ;;  %v171_v16 = vpop.f32.mrf.mxu3 }
  0x96   :  { %v143_v17 = vpop.f32.mrf.mxu0  ;;  %v153_v18 = vpop.f32.mrf.mxu1  ;;  %v162_v27 = vadd.f32 %v344_v14, %v161_v15  ;;  %v172_v28 = vadd.f32 %v344_v14, %v171_v16 }
  0x97   :  { %v144_v21 = vadd.f32 %v344_v14, %v143_v17  ;;  %v154_v22 = vadd.f32 %v344_v14, %v153_v18 }
  0x99   :  { %v288_v23 = vpack.c.bf16 %v144_v21, %v142_v19  ;;  %v298_v24 = vpack.c.bf16 %v154_v22, %v152_v20 }
  0x9b   :  { %289 = vst [vmem:[%s439_s3] sm:$0xff] %v288_v23  }
  0x9c   :  { %326 = vst [vmem:[%s439_s3 + $0x10] sm:$0xff] %v298_v24  }
  0x9d   :  { %v163_v25 = vpop.f32.mrf.mxu2  ;;  %v173_v26 = vpop.f32.mrf.mxu3 }
  0x9e   :  { %v164_v29 = vadd.f32 %v344_v14, %v163_v25  ;;  %v174_v30 = vadd.f32 %v344_v14, %v173_v26  ;;  %v146_v31 = vpop.f32.mrf.mxu0  ;;  %v156_v32 = vpop.f32.mrf.mxu1 }
  0x9f   :  { %v147_v39 = vadd.f32 %v344_v14, %v146_v31  ;;  %v157_v40 = vadd.f32 %v344_v14, %v156_v32 }
  0xa0   :  { %v308_v33 = vpack.c.bf16 %v164_v29, %v162_v27  ;;  %v318_v34 = vpack.c.bf16 %v174_v30, %v172_v28 }
  0xa2   :  { %328 = vst [vmem:[%s439_s3 + $0x20] sm:$0xff] %v308_v33  }
  0xa3   :  { %330 = vst [vmem:[%s439_s3 + $0x30] sm:$0xff] %v318_v34  }
  0xa5   :  { %v166_v35 = vpop.f32.mrf.mxu2  ;;  %v176_v36 = vpop.f32.mrf.mxu3 }
  0xa6   :  { %v148_v37 = vpop.f32.mrf.mxu0  ;;  %v158_v38 = vpop.f32.mrf.mxu1  ;;  %v167_v47 = vadd.f32 %v344_v14, %v166_v35  ;;  %v177_v48 = vadd.f32 %v344_v14, %v176_v36 }
  0xa7   :  { %v149_v41 = vadd.f32 %v344_v14, %v148_v37  ;;  %v159_v42 = vadd.f32 %v344_v14, %v158_v38 }
  0xa9   :  { %v293_v43 = vpack.c.bf16 %v149_v41, %v147_v39  ;;  %v303_v44 = vpack.c.bf16 %v159_v42, %v157_v40 }
  0xab   :  { %325 = vst [vmem:[%s439_s3 + $0x8] sm:$0xff] %v293_v43  }
  0xac   :  { %327 = vst [vmem:[%s439_s3 + $0x18] sm:$0xff] %v303_v44  }
  0xad   :  { %v168_v45 = vpop.f32.mrf.mxu2  ;;  %v178_v46 = vpop.f32.mrf.mxu3 }
  0xae   :  { %v169_v49 = vadd.f32 %v344_v14, %v168_v45  ;;  %v179_v50 = vadd.f32 %v344_v14, %v178_v46 }
  0xb0   :  { %v313_v51 = vpack.c.bf16 %v169_v49, %v167_v47  ;;  %v323_v52 = vpack.c.bf16 %v179_v50, %v177_v48 }
  0xb2   :  { %329 = vst [vmem:[%s439_s3 + $0x28] sm:$0xff] %v313_v51  }
  0xb3   :  { %331 = vst [vmem:[%s439_s3 + $0x38] sm:$0xff] %v323_v52  }

// kernel: generator_forward.39
= control target key start
LH: loop header
LB: loop body
LE: loop exit
PB: predicated region body
PF: predicated region fallthrough
CT: control target
= control target key end

     0   :  { %vm91_vm0 = vcmask 261120   ;;  %s398_s1 = inlined_call_operand.vmem [shape: bf16[32,128], index: 1, kind: input, shape index: {}]   ;;  %s399_s0 = inlined_call_operand.vmem [shape: bf16[128,32], index: 0, kind: input, shape index: {}]   ;;  %s400_s2 = inlined_call_operand.vmem [shape: f32[1,128], index: 2, kind: input, shape index: {}]   ;;  %s401_s3 = inlined_call_operand.vmem [shape: bf16[128,128], index: 3, kind: output, shape index: {}]  }
   0x1   :  { %v258_v0 = vld [vmem:[%s398_s1 + $0x8] sm:$0xff]  ;;  %v257_v1 = vld [vmem:[%s398_s1] sm:$0xff]  ;;  %v251_v3 = vld [vmem:[%s399_s0 + $0x10] sm:$0xff] }
   0x2   :  { %122 = vmatpush.bf16.msra.mxu0 %v258_v0  ;;  %306 = vmatpush.bf16.msra.mxu1 %v258_v0  ;;  %v249_v2 = vld [vmem:[%s399_s0] sm:$0xff]  ;;  %v255_v5 = vld [vmem:[%s399_s0 + $0x30] sm:$0xff]  ;;  %v250_v6 = vld [vmem:[%s399_s0 + $0x8] sm:$0xff] }
   0x3   :  { %307 = vmatpush.bf16.msra.mxu2 %v258_v0  ;;  %308 = vmatpush.bf16.msra.mxu3 %v258_v0  ;;  %v253_v4 = vld [vmem:[%s399_s0 + $0x20] sm:$0xff]  ;;  %v252_v7 = vld [vmem:[%s399_s0 + $0x18] sm:$0xff]  ;;  %v254_v8 = vld [vmem:[%s399_s0 + $0x28] sm:$0xff] }
   0x4   :  { %v256_v9 = vld [vmem:[%s399_s0 + $0x38] sm:$0xff]  ;;  %v312_v12 = vld [vmem:[%s400_s2] ss:$0 sm:$0xff] }
   0x6   :  { %123 = vmatpush.bf16.msra.mxu0 %v257_v1  ;;  %309 = vmatpush.bf16.msra.mxu1 %v257_v1 }
   0x7   :  { %310 = vmatpush.bf16.msra.mxu2 %v257_v1  ;;  %311 = vmatpush.bf16.msra.mxu3 %v257_v1 }
   0x9   :  { %241 = vmatmul.msk.bf16.vlgmr.msra.gmra.mxu0 %vm91_vm0, %v249_v2  ;;  %243 = vmatmul.msk.bf16.vlgmr.msra.gmra.mxu1 %vm91_vm0, %v251_v3 }
   0xa   :  { %245 = vmatmul.msk.bf16.vlgmr.msra.gmra.mxu2 %vm91_vm0, %v253_v4  ;;  %247 = vmatmul.msk.bf16.vlgmr.msra.gmra.mxu3 %vm91_vm0, %v255_v5 }
  0x19   :  { %242 = vmatmul.msk.bf16.gmra.mxu0 %vm91_vm0, %v250_v6  ;;  %244 = vmatmul.msk.bf16.gmra.mxu1 %vm91_vm0, %v252_v7 }
  0x1a   :  { %246 = vmatmul.msk.bf16.gmra.mxu2 %vm91_vm0, %v254_v8  ;;  %248 = vmatmul.msk.bf16.gmra.mxu3 %vm91_vm0, %v256_v9 }
  0x86   :  { %v125_v10 = vpop.f32.mrf.mxu0  ;;  %v135_v11 = vpop.f32.mrf.mxu1 }
  0x87   :  { %v126_v17 = vadd.f32 %v312_v12, %v125_v10  ;;  %v136_v18 = vadd.f32 %v312_v12, %v135_v11 }
  0x8d   :  { %v145_v13 = vpop.f32.mrf.mxu2  ;;  %v155_v14 = vpop.f32.mrf.mxu3 }
  0x8e   :  { %v127_v15 = vpop.f32.mrf.mxu0  ;;  %v137_v16 = vpop.f32.mrf.mxu1  ;;  %v146_v25 = vadd.f32 %v312_v12, %v145_v13  ;;  %v156_v26 = vadd.f32 %v312_v12, %v155_v14 }
  0x8f   :  { %v128_v19 = vadd.f32 %v312_v12, %v127_v15  ;;  %v138_v20 = vadd.f32 %v312_v12, %v137_v16 }
  0x91   :  { %v262_v21 = vpack.c.bf16 %v128_v19, %v126_v17  ;;  %v272_v22 = vpack.c.bf16 %v138_v20, %v136_v18 }
  0x93   :  { %263 = vst [vmem:[%s401_s3] sm:$0xff] %v262_v21  }
  0x94   :  { %300 = vst [vmem:[%s401_s3 + $0x10] sm:$0xff] %v272_v22  }
  0x95   :  { %v147_v23 = vpop.f32.mrf.mxu2  ;;  %v157_v24 = vpop.f32.mrf.mxu3 }
  0x96   :  { %v148_v27 = vadd.f32 %v312_v12, %v147_v23  ;;  %v158_v28 = vadd.f32 %v312_v12, %v157_v24  ;;  %v130_v29 = vpop.f32.mrf.mxu0  ;;  %v140_v30 = vpop.f32.mrf.mxu1 }
  0x97   :  { %v131_v37 = vadd.f32 %v312_v12, %v130_v29  ;;  %v141_v38 = vadd.f32 %v312_v12, %v140_v30 }
  0x98   :  { %v282_v31 = vpack.c.bf16 %v148_v27, %v146_v25  ;;  %v292_v32 = vpack.c.bf16 %v158_v28, %v156_v26 }
  0x9a   :  { %302 = vst [vmem:[%s401_s3 + $0x20] sm:$0xff] %v282_v31  }
  0x9b   :  { %304 = vst [vmem:[%s401_s3 + $0x30] sm:$0xff] %v292_v32  }
  0x9d   :  { %v150_v33 = vpop.f32.mrf.mxu2  ;;  %v160_v34 = vpop.f32.mrf.mxu3 }
  0x9e   :  { %v132_v35 = vpop.f32.mrf.mxu0  ;;  %v142_v36 = vpop.f32.mrf.mxu1  ;;  %v151_v45 = vadd.f32 %v312_v12, %v150_v33  ;;  %v161_v46 = vadd.f32 %v312_v12, %v160_v34 }
  0x9f   :  { %v133_v39 = vadd.f32 %v312_v12, %v132_v35  ;;  %v143_v40 = vadd.f32 %v312_v12, %v142_v36 }
  0xa1   :  { %v267_v41 = vpack.c.bf16 %v133_v39, %v131_v37  ;;  %v277_v42 = vpack.c.bf16 %v143_v40, %v141_v38 }
  0xa3   :  { %299 = vst [vmem:[%s401_s3 + $0x8] sm:$0xff] %v267_v41  }
  0xa4   :  { %301 = vst [vmem:[%s401_s3 + $0x18] sm:$0xff] %v277_v42  }
  0xa5   :  { %v152_v43 = vpop.f32.mrf.mxu2  ;;  %v162_v44 = vpop.f32.mrf.mxu3 }
  0xa6   :  { %v153_v47 = vadd.f32 %v312_v12, %v152_v43  ;;  %v163_v48 = vadd.f32 %v312_v12, %v162_v44 }
  0xa8   :  { %v287_v49 = vpack.c.bf16 %v153_v47, %v151_v45  ;;  %v297_v50 = vpack.c.bf16 %v163_v48, %v161_v46 }
  0xaa   :  { %303 = vst [vmem:[%s401_s3 + $0x28] sm:$0xff] %v287_v49  }
  0xab   :  { %305 = vst [vmem:[%s401_s3 + $0x38] sm:$0xff] %v297_v50  }

// kernel: generator_forward.34
= control target key start
LH: loop header
LB: loop body
LE: loop exit
PB: predicated region body
PF: predicated region fallthrough
CT: control target
= control target key end

     0   :  { %10 = vsyncpa [#allocation3], 0  ;;  %s1864_s18 = smov 0   ;;  %s2474_s0 = inlined_call_operand.vmem [shape: bf16[2,4,4,32], index: 0, kind: input, shape index: {}]   ;;  %s2475_s1 = inlined_call_operand.vmem [shape: bf16[2,4,4,32], index: 1, kind: input, shape index: {}]   ;;  %s2476_s2 = inlined_call_operand.vmem [shape: f32[32,2], index: 2, kind: input, shape index: {}]   ;;  %s2477_s3 = inlined_call_operand.vmem [shape: f32[2,32], index: 3, kind: input, shape index: {}]   ;;  %s2478_s4 = inlined_call_operand.vmem [shape: f32[2,49], index: 4, kind: input, shape index: {}]   ;;  %s2479_s5 = inlined_call_operand.vmem [shape: bf16[2,4,4,32], index: 5, kind: output, shape index: {}]  }
   0x1 LB: > { %s1630_s19 = sadd.s32 4294967295, %s1821_s18   ;;  %p1632_p0 = scmp.ge.s32.totalorder %s1821_s18, 1  ;;  %s1821_s18 = sphi %s1864_s18, %s16_s18  }
   0x2   : > { %p162_p1 = scmp.lt.s32.totalorder %s1821_s18, 3  ;;  %s180_s22 = sshll.u32 %s2478_s4, 4  ;;  %s181_s22 = int_to_ptr.vmem [resolvable:$true] %s180_s22 }
   0x3   : > { %p1758_p3 = scmp.eq.s32.totalorder %s1630_s19, 0  ;;  %s1823_s23 = smov [#allocation2]  }
   0x4   : > { %p163_p2 = pnand %p1632_p0, %p162_p1 }
   0x6   : > { %p1754_p4 = pneg %p163_p2  ;;  %209 = sbr.rel (%p163_p2) target bundleno = 1207 (0x4b7), region = 40 }
   0x8   : > { %p1755_p5 = pnand %p1758_p3, %p1754_p4 }
   0xa   : > { %1757 = dma.vmem_to_smem (!%p1755_p5), %s181_s22, 32, %s1823_s23, [#allocation3]  }
   0xb   : > { %1816 = dma.done.wait (%p1758_p3), [#allocation3], 32  }
   0xc   : > { %1818 = vsyncadd (%p1758_p3), [#allocation3], 4294967264 }
   0xd   : > { %216 = sfence }
   0xe   : > { %v358_v0 = vld [vmem:[%s2476_s2 + $0x18] sm:$0xff]  ;;  %v357_v1 = vld [vmem:[%s2476_s2 + $0x10] sm:$0xff]  ;;  %p244_p6 = scmp.lt.s32.totalorder %s1630_s19, 1  ;;  %v1824_v2 = vmov 16.0   ;;  %v356_v3 = vld [vmem:[%s2476_s2 + $0x8] sm:$0xff]  ;;  %vm267_vm0 = vcmask 257024  }
   0xf   : > { %375 = vmatpush.msra.mxu0 %v358_v0  ;;  %1782 = vrcp.f32 %v1824_v2  ;;  %v355_v4 = vld [vmem:[%s2476_s2] sm:$0xff]  ;;  %vm353_vm5 = vcmask 1040384   ;;  %vm359_vm6 = vcmask 261120   ;;  %vm389_vm7 = vcmask 1041408   ;;  %s1826_s13 = smov 3   ;;  %s1655_s14 = sld [smem:[#allocation2 + $0x84]] }
  0x10   : > { %s2481_s19 = smov (!%p244_p6, %s1630_s19), 1  ;;  %vm385_vm8 = vcmask 15360   ;;  %vm488_vm14 = vcmask 1045509   ;;  %vm486_vm15 = vcmask 1044484   ;;  %s1653_s15 = sld [smem:[#allocation2 + $0x83]] }
  0x11   : > { %376 = vmatpush.msra.mxu0 %v357_v1  ;;  %s1887_s7 = sshll.u32 %s2481_s19, 3  ;;  %s1649_s16 = sld [smem:[#allocation2 + $0x81]] }
  0x12   : > { %s248_s10 = scalar_lea.vmem %s2474_s0, %s1887_s7  ;;  %s1973_s17 = sld [smem:[#allocation2 + $0x1]] }
  0x13   : > { %377 = vmatpush.msra.mxu0 %v356_v3  ;;  %v259_v5 = vld [vmem:[%s248_s10] sm:$0x3]  ;;  %v260_v6 = vld [vmem:[%s248_s10 + $0x2] sm:$0x3]  ;;  %v261_v7 = vld [vmem:[%s248_s10 + $0x4] sm:$0x3] }
  0x14   : > { %v262_v9 = vld [vmem:[%s248_s10 + $0x6] sm:$0x3]  ;;  %v263_v10 = vunpack.c.l.bf16 %v259_v5  ;;  %v264_v11 = vunpack.c.l.bf16 %v260_v6  ;;  %v265_v12 = vunpack.c.l.bf16 %v261_v7  ;;  %s1975_s19 = sld [smem:[#allocation2]]  ;;  %s1827_s23 = smov 124  }
  0x15   : > { %v1783_v8 = vpop.eup %1782  ;;  %378 = vmatpush.msra.mxu0 %v355_v4  ;;  %v266_v13 = vunpack.c.l.bf16 %v262_v9  ;;  %s1659_s20 = sld [smem:[#allocation2 + $0x86]]  ;;  %s1828_s24 = smov 125  }
  0x16   : > { %v268_v14 = vsel %vm267_vm0, %v263_v10, 0.0  ;;  %v269_v15 = vsel %vm267_vm0, %v264_v11, 0.0  ;;  %v271_v16 = vsel %vm267_vm0, %v265_v12, 0.0  ;;  %v282_v17 = vmul.f32 16.0, %v1783_v8  ;;  %s1651_s21 = sld [smem:[#allocation2 + $0x82]]  ;;  %s1829_s25 = smov 127  }
  0x17   : > { %v270_v18 = vadd.f32 %v269_v15, %v268_v14  ;;  %v273_v19 = vsel %vm267_vm0, %v266_v13, 0.0  ;;  %vm286_vm1 = vweird.f32 %v1783_v8  ;;  %s1647_s22 = sld [smem:[#allocation2 + $0x80]]  ;;  %s1830_s29 = smov 122  }
  0x18   : > { %v283_v21 = vsub.f32 1.0, %v282_v17  ;;  %s1652_s26 = sld [smem:[#allocation2 + $0x3]]  ;;  %s1831_s30 = smov 126  }
  0x19   : > { %v272_v20 = vadd.f32 %v271_v16, %v270_v18  ;;  %s1650_s27 = sld [smem:[#allocation2 + $0x2]] }
  0x1a   : > { %v284_v24 = vmul.f32 %v1783_v8, %v283_v21  ;;  %s1657_s28 = sld [smem:[#allocation2 + $0x85]] }
  0x1b   : > { %v274_v22 = vadd.f32 %v273_v19, %v272_v20  ;;  %s1658_s6 = sld [smem:[#allocation2 + $0x6]] }
  0x1c   : > { %v285_v27 = vadd.f32 %v1783_v8, %v284_v24  ;;  %s1656_s8 = sld [smem:[#allocation2 + $0x5]] }
  0x1d   : > { %v275_v23 = vrot.slane %v274_v22, 4  ;;  %s1654_s9 = sld [smem:[#allocation2 + $0x4]] }
  0x1e   : > { %v1897_v30 = vsel %vm286_vm1, %v1783_v8, %v285_v27  ;;  %vm493_vm1 = vcmask 1042432   ;;  %s1663_s10 = sld [smem:[#allocation2 + $0x88]] }
  0x1f   : > { %v276_v25 = vadd.f32 %v275_v23, %v274_v22  ;;  %s1667_s11 = sld [smem:[#allocation2 + $0x8a]] }
  0x20   : > { %s1665_s12 = sld [smem:[#allocation2 + $0x89]] }
  0x21   : > { %v277_v26 = vrot.slane %v276_v25, 2 }
  0x23   : > { %v278_v28 = vadd.f32 %v277_v26, %v276_v25 }
  0x25   : > { %v279_v29 = vrot.slane %v278_v28, 1 }
  0x27   : > { %v280_v31 = vadd.f32 %v279_v29, %v278_v28 }
  0x29   : > { %v288_v32 = vmul.f32 %v1897_v30, %v280_v31 }
  0x2b   : > { %v289_v33 = vsub.f32 %v263_v10, %v288_v32  ;;  %v290_v34 = vsub.f32 %v264_v11, %v288_v32  ;;  %v291_v35 = vsub.f32 %v265_v12, %v288_v32  ;;  %v292_v36 = vsub.f32 %v266_v13, %v288_v32  ;;  %v384_v32 = vld [vmem:[%s2477_s3] sm:$0x3] }
  0x2c   : > { %1644 = vmatpush.msk.msra.mxu1 %vm389_vm7, %v384_v32 }
  0x2d   : > { %v293_v37 = vmul.f32 %v289_v33, %v289_v33  ;;  %v294_v38 = vmul.f32 %v290_v34, %v290_v34  ;;  %v295_v39 = vmul.f32 %v291_v35, %v291_v35  ;;  %v296_v40 = vmul.f32 %v292_v36, %v292_v36 }
  0x2f   : > { %v297_v41 = vsel %vm267_vm0, %v293_v37, 0.0  ;;  %v298_v42 = vsel %vm267_vm0, %v294_v38, 0.0  ;;  %v300_v43 = vsel %vm267_vm0, %v295_v39, 0.0  ;;  %v302_v45 = vsel %vm267_vm0, %v296_v40, 0.0 }
  0x30   : > { %v299_v44 = vadd.f32 %v298_v42, %v297_v41 }
  0x32   : > { %v301_v46 = vadd.f32 %v300_v43, %v299_v44 }
  0x34   : > { %v303_v47 = vadd.f32 %v302_v45, %v301_v46 }
  0x36   : > { %v304_v48 = vrot.slane %v303_v47, 4 }
  0x38   : > { %v305_v49 = vadd.f32 %v304_v48, %v303_v47 }
  0x3a   : > { %v306_v50 = vrot.slane %v305_v49, 2 }
  0x3c   : > { %v307_v51 = vadd.f32 %v306_v50, %v305_v49 }
  0x3e   : > { %v308_v52 = vrot.slane %v307_v51, 1 }
  0x40   : > { %v309_v53 = vadd.f32 %v308_v52, %v307_v51 }
  0x42   : > { %v310_v54 = vmul.f32 %v309_v53, %v1897_v30 }
  0x44   : > { %v311_v55 = vadd.f32 1e-05, %v310_v54 }
  0x46   : > { %1784 = vrsqrt.f32 %v311_v55  ;;  %vm318_vm2 = vweird.f32 %v311_v55 }
  0x4c   : > { %v1785_v56 = vpop.eup %1784 }
  0x4d   : > { %v313_v57 = vmul.f32 %v1785_v56, %v311_v55  ;;  %vm319_vm3 = vweird.f32 %v1785_v56 }
  0x4e   : > { %vm320_vm4 = vmor %vm318_vm2, %vm319_vm3  ;;  %vm495_vm2 = vcmask 1046528   ;;  %vm505_vm3 = vcmask 23552  }
  0x4f   : > { %v314_v58 = vmul.f32 %v1785_v56, %v313_v57 }
  0x51   : > { %v315_v59 = vmul.f32 0.5, %v314_v58 }
  0x53   : > { %v316_v60 = vsub.f32 1.5, %v315_v59 }
  0x55   : > { %v317_v61 = vmul.f32 %v1785_v56, %v316_v60 }
  0x57   : > { %v321_v62 = vsel %vm320_vm4, %v1785_v56, %v317_v61  ;;  %vm508_vm4 = vcmask 56320  }
  0x58   : > { %v1905_v63 = vmul.f32 %v321_v62, %v289_v33  ;;  %v1907_v0 = vmul.f32 %v321_v62, %v290_v34  ;;  %v1909_v1 = vmul.f32 %v321_v62, %v291_v35  ;;  %v1911_v2 = vmul.f32 %v321_v62, %v292_v36 }
  0x5a   : > { %v326_v3 = vsel %vm267_vm0, %v1905_v63, 0.0  ;;  %v327_v4 = vsel %vm267_vm0, %v1907_v0, 0.0  ;;  %v329_v5 = vsel %vm267_vm0, %v1909_v1, 0.0  ;;  %v340_v7 = vsel %vm267_vm0, %v1905_v63, -inf }
  0x5b   : > { %v328_v6 = vadd.f32 %v327_v4, %v326_v3  ;;  %v341_v8 = vsel %vm267_vm0, %v1907_v0, -inf  ;;  %v342_v9 = vsel %vm267_vm0, %v1909_v1, -inf  ;;  %v331_v10 = vsel %vm267_vm0, %v1911_v2, 0.0 }
  0x5c   : > { %v343_v11 = vsel %vm267_vm0, %v1911_v2, -inf  ;;  %v344_v12 = vmax.f32 %v340_v7, %v341_v8 }
  0x5d   : > { %v330_v13 = vadd.f32 %v329_v5, %v328_v6  ;;  %v345_v14 = vmax.f32 %v342_v9, %v343_v11  ;;  %v480_v9 = vlaneseq }
  0x5f   : > { %v332_v15 = vadd.f32 %v331_v10, %v330_v13  ;;  %v346_v16 = vmax.f32 %v344_v12, %v345_v14  ;;  %v481_v14 = vand.u32 127, %v480_v9 }
  0x61   : > { %v333_v17 = vrot.slane %v332_v15, 4  ;;  %v347_v18 = vrot.slane %v346_v16, 4 }
  0x63   : > { %v334_v19 = vadd.f32 %v333_v17, %v332_v15  ;;  %v348_v20 = vmax.f32 %v346_v16, %v347_v18 }
  0x65   : > { %v335_v21 = vrot.slane %v334_v19, 2  ;;  %v349_v22 = vrot.slane %v348_v20, 2 }
  0x67   : > { %v336_v23 = vadd.f32 %v335_v21, %v334_v19  ;;  %v350_v24 = vmax.f32 %v348_v20, %v349_v22 }
  0x69   : > { %v337_v25 = vrot.slane %v336_v23, 1  ;;  %v351_v26 = vrot.slane %v350_v24, 1 }
  0x6b   : > { %v338_v27 = vadd.f32 %v337_v25, %v336_v23  ;;  %v352_v28 = vmax.f32 %v350_v24, %v351_v26 }
  0x6d   : > { %v339_v29 = vmul.f32 %v338_v27, %v1897_v30 }
  0x6f   : > { %v354_v31 = vsel %vm353_vm5, %v339_v29, %v352_v28 }
  0x70   : > { %1643 = vmatmul.msk.f32.vlgmr.msra.gmra.mxu0 %vm359_vm6, %v354_v31 }
  0xed   : > { %v380_v33 = vpop.f32.mrf.mxu0 }
  0xee   : > { %v383_v34 = vmax.f32 %v380_v33, 0.0 }
  0xf0   : > { %1645 = vmatmul.msk.f32.vlgmr.msra.gmra.mxu1 %vm385_vm8, %v383_v34 }
 0x16d   : > { %v410_v35 = vpop.f32.mrf.mxu1 }
 0x16e   : > { %v414_v36 = vrot.slane %v410_v35, 1 }
 0x170   : > { %v416_v37 = vadd.f32 %v414_v36, %v410_v35 }
 0x172   : > { %v1646_v38 = vmul.f32 -1.442695, %v416_v37 }
 0x174   : > { %1786 = vpow2.f32 %v1646_v38 }
 0x17a   : > { %v1787_v30 = vpop.eup %1786 }
 0x17b   : > { %v420_v39 = vadd.f32 1.0, %v1787_v30 }
 0x17d   : > { %1788 = vrcp.f32 %v420_v39  ;;  %v432_v43 = vand.u32 2147483648, %v420_v39  ;;  %v430_v45 = vand.u32 2147483647, %v420_v39  ;;  %vm426_vm10 = vweird.f32 %v420_v39 }
 0x17f   : > { %v433_v47 = vor.u32 1.1754944e-38, %v432_v43  ;;  %vm431_vm12 = vcmp.eq.f32.partialorder %v430_v45, 8.507059e+37 }
 0x183   : > { %v1789_v40 = vpop.eup %1788 }
 0x184   : > { %v422_v41 = vmul.f32 %v1789_v40, %v420_v39  ;;  %vm427_vm9 = vweird.f32 %v1789_v40  ;;  %v596_v39 = vstv %s1655_s14  ;;  %s1832_s14 = smov 123  }
 0x185   : > { %vm428_vm11 = vmor %vm426_vm10, %vm427_vm9  ;;  %vm1546_vm9 = vcmask 254976  }
 0x186   : > { %v423_v42 = vsub.f32 1.0, %v422_v41  ;;  %v548_v41 = vstv %s1649_s16  ;;  %s1673_s16 = sld [smem:[#allocation2 + $0x8d]] }
 0x188   : > { %v424_v44 = vmul.f32 %v1789_v40, %v423_v42 }
 0x18a   : > { %v425_v46 = vadd.f32 %v1789_v40, %v424_v44 }
 0x18c   : > { %v429_v48 = vsel %vm428_vm11, %v1789_v40, %v425_v46  ;;  %v580_v40 = vstv %s1653_s15  ;;  %s1669_s15 = sld [smem:[#allocation2 + $0x8b]] }
 0x18d   : > { %v434_v49 = vsel %vm431_vm12, %v433_v47, %v429_v48 }
 0x18e   : > { %v436_v50 = vperm.slane %v434_v49, 0 }
 0x190   : > { %v1935_v51 = vmul.f32 %v436_v50, %v1909_v1  ;;  %v1938_v52 = vmul.f32 %v436_v50, %v1905_v63  ;;  %v1947_v56 = vmul.f32 %v436_v50, %v1911_v2  ;;  %v1950_v57 = vmul.f32 %v436_v50, %v1907_v0 }
 0x191   : > { %v1825_v63 = vmov 32.0   ;;  %v540_v50 = vstv %s1973_s17  ;;  %s1671_s17 = sld [smem:[#allocation2 + $0x8c]] }
 0x192   : > { %v447_v53 = vsel %vm267_vm0, %v1935_v51, 0.0  ;;  %v464_v54 = vsel %vm267_vm0, %v1938_v52, -inf  ;;  %v441_v55 = vsel %vm267_vm0, %v1938_v52, 0.0  ;;  %v450_v58 = vsel %vm267_vm0, %v1947_v56, 0.0 }
 0x193   : > { %448 = vadd.xlane.f32.xlu1 %v447_v53  ;;  %465 = vmax.xlane.f32.xlu2 %v464_v54  ;;  %v467_v59 = vsel %vm267_vm0, %v1950_v57, -inf  ;;  %v444_v60 = vsel %vm267_vm0, %v1950_v57, 0.0  ;;  %v473_v61 = vsel %vm267_vm0, %v1947_v56, -inf  ;;  %v470_v62 = vsel %vm267_vm0, %v1935_v51, -inf }
 0x194   : > { %442 = vadd.xlane.f32.xlu0 %v441_v55  ;;  %1790 = vrcp.f32 %v1825_v63  ;;  %vm490_vm0 = vcmask 1046534   ;;  %v628_v53 = vstv %s1659_s20  ;;  %v564_v54 = vstv %s1651_s21  ;;  %s1681_s20 = sld [smem:[#allocation2 + $0x91]] }
 0x195   : > { %v532_v55 = vstv %s1975_s19  ;;  %s1677_s19 = sld [smem:[#allocation2 + $0x8f]] }
 0x196   : > { %s1679_s21 = sld [smem:[#allocation2 + $0x90]] }
 0x19a   : > { %v1791_v0 = vpop.eup %1790 }
 0x19b   : > { %451 = vadd.xlane.f32.xlu1 %v450_v58  ;;  %468 = vmax.xlane.f32.xlu2 %v467_v59  ;;  %v454_v1 = vmul.f32 32.0, %v1791_v0  ;;  %vm458_vm13 = vweird.f32 %v1791_v0  ;;  %v536_v58 = vstv %s1647_s22  ;;  %s1664_s22 = sld [smem:[#allocation2 + $0x9]] }
 0x19c   : > { %445 = vadd.xlane.f32.xlu0 %v444_v60 }
 0x19d   : > { %v455_v2 = vsub.f32 1.0, %v454_v1  ;;  %v572_v1 = vstv %s1652_s26  ;;  %s1683_s26 = sld [smem:[#allocation2 + $0x92]] }
 0x19f   : > { %v456_v3 = vmul.f32 %v1791_v0, %v455_v2  ;;  %v556_v2 = vstv %s1650_s27  ;;  %s1662_s27 = sld [smem:[#allocation2 + $0x8]] }
 0x1a1   : > { %v457_v5 = vadd.f32 %v1791_v0, %v456_v3  ;;  %v612_v3 = vstv %s1657_s28  ;;  %s1666_s28 = sld [smem:[#allocation2 + $0xa]] }
 0x1a3   : > { %474 = vmax.xlane.f32.xlu1 %v473_v61  ;;  %v459_v8 = vsel %vm458_vm13, %v1791_v0, %v457_v5 }
 0x1a4   : > { %471 = vmax.xlane.f32.xlu0 %v470_v62 }
 0x206   : > { %v449_v4 = vpop.xlane.xlu1 %448  ;;  %v466_v7 = vpop.xlane.xlu2 %465 }
 0x207   : > { %v443_v6 = vpop.xlane.xlu0 %442  ;;  %v462_v12 = vmul.f32 %v459_v8, %v449_v4  ;;  %v515_v27 = vperm.slane %v466_v7, %v481_v14  ;;  %v620_v7 = vstv %s1658_s6  ;;  %s1687_s6 = sld [smem:[#allocation2 + $0x94]] }
 0x208   : > { %v460_v10 = vmul.f32 %v459_v8, %v443_v6 }
 0x209   : > { %v484_v20 = vperm.slane %v462_v12, %v481_v14 }
 0x20a   : > { %v482_v17 = vperm.slane %v460_v10, %v481_v14  ;;  %v588_v10 = vstv %s1654_s9  ;;  %s1672_s9 = sld [smem:[#allocation2 + $0xd]] }
 0x20e   : > { %v452_v11 = vpop.xlane.xlu1 %451  ;;  %v469_v18 = vpop.xlane.xlu2 %468 }
 0x20f   : > { %v446_v13 = vpop.xlane.xlu0 %445  ;;  %v463_v15 = vmul.f32 %v459_v8, %v452_v11  ;;  %v516_v23 = vperm.slane %v469_v18, %v481_v14 }
 0x210   : > { %v461_v16 = vmul.f32 %v459_v8, %v446_v13  ;;  %v604_v8 = vstv %s1656_s8  ;;  %s1685_s8 = sld [smem:[#allocation2 + $0x93]] }
 0x211   : > { %v485_v21 = vperm.slane %v463_v15, %v481_v14  ;;  %v519_v34 = vsel %vm486_vm15, %v516_v23, %v515_v27  ;;  %v695_v15 = vstv %s1667_s11  ;;  %v713_v23 = vstv %s1669_s15  ;;  %s1668_s11 = sld [smem:[#allocation2 + $0xb]] }
 0x212   : > { %v483_v19 = vperm.slane %v461_v16, %v481_v14  ;;  %v677_v16 = vstv %s1665_s12  ;;  %s1691_s12 = sld [smem:[#allocation2 + $0x96]] }
 0x213   : > { %s1693_s15 = sld [smem:[#allocation2 + $0x97]] }
 0x214   : > { %v487_v22 = vsel %vm486_vm15, %v483_v19, %v482_v17 }
 0x215   : > { %v489_v24 = vsel %vm488_vm14, %v484_v20, %v487_v22 }
 0x216   : > { %v475_v25 = vpop.xlane.xlu1 %474  ;;  %v491_v26 = vsel %vm490_vm0, %v485_v21, %v489_v24  ;;  %v749_v24 = vstv %s1673_s16  ;;  %s1680_s16 = sld [smem:[#allocation2 + $0x11]] }
 0x217   : > { %v518_v28 = vperm.slane %v475_v25, %v481_v14  ;;  %v472_v29 = vpop.xlane.xlu0 %471  ;;  %v494_v31 = vsel %vm493_vm1, 0.0, %v491_v26  ;;  %v731_v25 = vstv %s1671_s17  ;;  %s1678_s17 = sld [smem:[#allocation2 + $0x10]] }
 0x218   : > { %v517_v32 = vperm.slane %v472_v29, %v481_v14  ;;  %v496_v33 = vsel %vm495_vm2, %v494_v31, 0.0  ;;  %v659_v14 = vstv %s1663_s10  ;;  %s1670_s10 = sld [smem:[#allocation2 + $0xc]] }
 0x219   : > { %499 = vrot.lane.b32.xlu2 %v496_v33, %s1826_s13  ;;  %v781_v33 = vstv %s1677_s19  ;;  %s1676_s19 = sld [smem:[#allocation2 + $0xf]] }
 0x21a   : > { %v520_v35 = vsel %vm488_vm14, %v517_v32, %v519_v34  ;;  %v817_v34 = vstv %s1681_s20  ;;  %s1684_s20 = sld [smem:[#allocation2 + $0x13]] }
 0x21b   : > { %v521_v36 = vsel %vm490_vm0, %v518_v28, %v520_v35  ;;  %v799_v35 = vstv %s1679_s21  ;;  %s1699_s21 = sld [smem:[#allocation2 + $0x9a]] }
 0x21c   : > { %v523_v37 = vsel %vm493_vm1, 0.0, %v521_v36 }
 0x21d   : > { %v524_v38 = vsel %vm495_vm2, %v523_v37, 0.0 }
 0x21e   : > { %526 = vrot.lane.b32.xlu0 %v524_v38, %s1826_s13 }
 0x273   : > { %v500_v43 = vpop.permute.xlu2 %499 }
 0x274   : > { %v506_v48 = vsel %vm505_vm3, 0.0, %v500_v43  ;;  %v650_v43 = vstv %s1662_s27  ;;  %s1697_s27 = sld [smem:[#allocation2 + $0x99]] }
 0x275   : > { %v1989_v49 = vsel %vm508_vm4, %v506_v48, 0.0 }
 0x276   : > { %v541_v59 = vmul.f32 %v540_v50, %v1989_v49  ;;  %v533_v62 = vmul.f32 %v532_v55, %v1989_v49  ;;  %v573_v4 = vmul.f32 %v572_v1, %v1989_v49  ;;  %v557_v5 = vmul.f32 %v556_v2, %v1989_v49 }
 0x277   : > { %v621_v11 = vmul.f32 %v620_v7, %v1989_v49  ;;  %v605_v12 = vmul.f32 %v604_v8, %v1989_v49  ;;  %v589_v13 = vmul.f32 %v588_v10, %v1989_v49  ;;  %v871_v55 = vstv %s1687_s6  ;;  %s1692_s6 = sld [smem:[#allocation2 + $0x17]] }
 0x278   : > { %v740_v2 = vstv %s1672_s9  ;;  %s1696_s9 = sld [smem:[#allocation2 + $0x19]] }
 0x290   : > { %v527_v30 = vpop.permute.xlu0 %526 }
 0x291   : > { %v529_v42 = vsel %vm505_vm3, 0.0, %v527_v30 }
 0x292   : > { %v1979_v44 = vsel %vm508_vm4, %v529_v42, 0.0  ;;  %v668_v42 = vstv %s1664_s22  ;;  %s1682_s22 = sld [smem:[#allocation2 + $0x12]] }
 0x293   : > { %v597_v45 = vmul.f32 %v596_v39, %v1979_v44  ;;  %v581_v46 = vmul.f32 %v580_v40, %v1979_v44  ;;  %v549_v47 = vmul.f32 %v548_v41, %v1979_v44  ;;  %v629_v60 = vmul.f32 %v628_v53, %v1979_v44 }
 0x294   : > { %v565_v61 = vmul.f32 %v564_v54, %v1979_v44  ;;  %v537_v63 = vmul.f32 %v536_v58, %v1979_v44  ;;  %v613_v6 = vmul.f32 %v612_v3, %v1979_v44  ;;  %v660_v17 = vmul.f32 %v659_v14, %v1979_v44 }
 0x295   : > { %599 = vrot.lane.b32.xlu1 %v597_v45, %s1827_s23  ;;  %583 = vrot.lane.b32.xlu0 %v581_v46, %s1828_s24  ;;  %v696_v18 = vmul.f32 %v695_v15, %v1979_v44  ;;  %v678_v19 = vmul.f32 %v677_v16, %v1979_v44  ;;  %v714_v26 = vmul.f32 %v713_v23, %v1979_v44  ;;  %v835_v41 = vstv %s1683_s26  ;;  %s1686_s26 = sld [smem:[#allocation2 + $0x14]] }
 0x296   : > { %551 = vrot.lane.b32.xlu2 %v549_v47, %s1829_s25  ;;  %v2001_v0 = vadd.f32 %v537_v63, %v533_v62  ;;  %v662_v20 = vrot.slane %v660_v17, 1  ;;  %v750_v27 = vmul.f32 %v749_v24, %v1979_v44  ;;  %v732_v28 = vmul.f32 %v731_v25, %v1979_v44 }
 0x297   : > { %v698_v21 = vrot.slane %v696_v18, 1  ;;  %v680_v22 = vrot.slane %v678_v19, 1  ;;  %v716_v29 = vrot.slane %v714_v26, 1  ;;  %v782_v36 = vmul.f32 %v781_v33, %v1979_v44 }
 0x298   : > { %v752_v31 = vrot.slane %v750_v27, 1  ;;  %v734_v32 = vrot.slane %v732_v28, 1  ;;  %v818_v37 = vmul.f32 %v817_v34, %v1979_v44  ;;  %v800_v38 = vmul.f32 %v799_v35, %v1979_v44 }
 0x299   : > { %v784_v30 = vrot.slane %v782_v36, 2  ;;  %v836_v45 = vmul.f32 %v835_v41, %v1979_v44  ;;  %v669_v46 = vmul.f32 %v668_v42, %v1989_v49  ;;  %v651_v47 = vmul.f32 %v650_v43, %v1989_v49 }
 0x29a   : > { %v820_v39 = vrot.slane %v818_v37, 2  ;;  %v802_v40 = vrot.slane %v800_v38, 2  ;;  %v686_v54 = vstv %s1666_s28  ;;  %v853_v58 = vstv %s1685_s8  ;;  %s1694_s28 = sld [smem:[#allocation2 + $0x18]] }
 0x29b   : > { %v838_v48 = vrot.slane %v836_v45, 2  ;;  %v671_v50 = vrot.slane %v669_v46, 1  ;;  %v653_v53 = vrot.slane %v651_v47, 1  ;;  %v722_v3 = vstv %s1670_s10  ;;  %s1690_s8 = sld [smem:[#allocation2 + $0x16]] }
 0x29c   : > { %v808_v18 = vstv %s1680_s16  ;;  %v790_v19 = vstv %s1678_s17  ;;  %v975_v28 = vstv %s1699_s21  ;;  %s1705_s10 = sld [smem:[#allocation2 + $0x9d]] }
 0x29d   : > { %543 = vrot.lane.b32.xlu1 %v541_v59, %s1829_s25  ;;  %631 = vrot.lane.b32.xlu0 %v629_v60, %s1830_s29  ;;  %v687_v59 = vmul.f32 %v686_v54, %v1989_v49  ;;  %v872_v60 = vmul.f32 %v871_v55, %v1979_v44  ;;  %v791_v23 = vmul.f32 %v790_v19, %v1989_v49  ;;  %s1698_s16 = sld [smem:[#allocation2 + $0x1a]] }
 0x29e   : > { %567 = vrot.lane.b32.xlu2 %v565_v61, %s1831_s30  ;;  %v854_v61 = vmul.f32 %v853_v58, %v1979_v44  ;;  %s2093_s17 = sld [smem:[#allocation2 + $0x1d]] }
 0x29f   : > { %v689_v62 = vrot.slane %v687_v59, 1  ;;  %v874_v63 = vrot.slane %v872_v60, 2  ;;  %v793_v26 = vrot.slane %v791_v23, 2  ;;  %s2107_s21 = sld [smem:[#allocation2 + $0x1f]] }
 0x2a0   : > { %v856_v1 = vrot.slane %v854_v61, 2 }
 0x2a1   : > { %v894_v54 = vstv %s1690_s8  ;;  %s1712_s8 = sld [smem:[#allocation2 + $0x21]] }
 0x2a2   : > { %v895_v60 = vmul.f32 %v894_v54, %v1989_v49 }
 0x2a5   : > { %575 = vrot.lane.b32.xlu1 %v573_v4, %s1828_s24  ;;  %559 = vrot.lane.b32.xlu0 %v557_v5, %s1831_s30  ;;  %v704_v4 = vstv %s1668_s11  ;;  %v741_v5 = vmul.f32 %v740_v2, %v1989_v49  ;;  %s1701_s11 = sld [smem:[#allocation2 + $0x9b]]  ;;  %v1025_v2 = vstv %s1705_s10 }
 0x2a6   : > { %615 = vrot.lane.b32.xlu2 %v613_v6, %s1832_s14  ;;  %v723_v6 = vmul.f32 %v722_v3, %v1989_v49  ;;  %v705_v7 = vmul.f32 %v704_v4, %v1989_v49  ;;  %s1675_s10 = sld [smem:[#allocation2 + $0x8e]] }
 0x2a7   : > { %v743_v8 = vrot.slane %v741_v5, 1 }
 0x2a8   : > { %v725_v10 = vrot.slane %v723_v6, 1 }
 0x2ab   : > { %v993_v3 = vstv %s1701_s11  ;;  %s2171_s11 = sld [smem:[#allocation2 + $0xa5]] }
 0x2ad   : > { %623 = vrot.lane.b32.xlu1 %v621_v11, %s1830_s29  ;;  %607 = vrot.lane.b32.xlu0 %v605_v12, %s1832_s14  ;;  %v707_v11 = vrot.slane %v705_v7, 1  ;;  %v903_v12 = vstv %s1691_s12  ;;  %s2083_s12 = sld [smem:[#allocation2 + $0x1b]]  ;;  %v1026_v7 = vmul.f32 %v1025_v2, %v1979_v44 }
 0x2ae   : > { %591 = vrot.lane.b32.xlu2 %v589_v13, %s1827_s23  ;;  %v921_v13 = vstv %s1693_s15  ;;  %v904_v14 = vmul.f32 %v903_v12, %v1979_v44  ;;  %s1707_s15 = sld [smem:[#allocation2 + $0x9e]] }
 0x2af   : > { %v922_v15 = vmul.f32 %v921_v13, %v1979_v44  ;;  %v1028_v12 = vrot.slane %v1026_v7, 4 }
 0x2b0   : > { %v906_v16 = vrot.slane %v904_v14, 3 }
 0x2b1   : > { %v924_v17 = vrot.slane %v922_v15, 3 }
 0x2b3   : > { %v984_v15 = vstv %s2083_s12  ;;  %s2173_s12 = sld [smem:[#allocation2 + $0xa4]] }
 0x2b4   : > { %v1043_v14 = vstv %s1707_s15  ;;  %s2175_s15 = sld [smem:[#allocation2 + $0xa6]] }
 0x2b5   : > { %663 = vrot.lane.b32.xlu1 %v662_v20, %s1829_s25  ;;  %699 = vrot.lane.b32.xlu0 %v698_v21, %s1828_s24  ;;  %v1833_v20 = vmov 0.0   ;;  %v772_v21 = vstv %s1676_s19  ;;  %s1711_s19 = sld [smem:[#allocation2 + $0xa0]]  ;;  %v1044_v19 = vmul.f32 %v1043_v14, %v1979_v44 }
 0x2b6   : > { %681 = vrot.lane.b32.xlu2 %v680_v22, %s1831_s30  ;;  %v809_v22 = vmul.f32 %v808_v18, %v1989_v49  ;;  %v773_v24 = vmul.f32 %v772_v21, %v1989_v49 }
 0x2b8   : > { %v811_v25 = vrot.slane %v809_v22, 2  ;;  %v775_v27 = vrot.slane %v773_v24, 2  ;;  %v1046_v24 = vrot.slane %v1044_v19, 4 }
 0x2bd   : > { %717 = vrot.lane.b32.xlu1 %v716_v29, %s1827_s23  ;;  %753 = vrot.lane.b32.xlu0 %v752_v31, %s1830_s29  ;;  %v844_v29 = vstv %s1684_s20  ;;  %v826_v31 = vstv %s1682_s22  ;;  %s1709_s20 = sld [smem:[#allocation2 + $0x9f]] }
 0x2be   : > { %735 = vrot.lane.b32.xlu2 %v734_v32, %s1832_s14  ;;  %v976_v32 = vmul.f32 %v975_v28, %v1979_v44  ;;  %v845_v33 = vmul.f32 %v844_v29, %v1989_v49  ;;  %v827_v35 = vmul.f32 %v826_v31, %v1989_v49  ;;  %v1079_v28 = vstv %s1711_s19  ;;  %s2110_s22 = sld [smem:[#allocation2 + $0xa1]] }
 0x2bf   : > { %s2181_s19 = sld [smem:[#allocation2 + $0x25]] }
 0x2c0   : > { %v978_v36 = vrot.slane %v976_v32, 3  ;;  %v847_v37 = vrot.slane %v845_v33, 2  ;;  %v829_v38 = vrot.slane %v827_v35, 2  ;;  %v1080_v35 = vmul.f32 %v1079_v28, %v1979_v44 }
 0x2c3   : > { %v1061_v29 = vstv %s1709_s20  ;;  %s2183_s20 = sld [smem:[#allocation2 + $0x15]] }
 0x2c5   : > { %785 = vrot.lane.b32.xlu1 %v784_v30, %s1829_s25  ;;  %821 = vrot.lane.b32.xlu0 %v820_v39, %s1828_s24  ;;  %v862_v30 = vstv %s1686_s26  ;;  %v957_v39 = vstv %s1697_s27  ;;  %s2114_s26 = sld [smem:[#allocation2 + $0x1e]] }
 0x2c6   : > { %803 = vrot.lane.b32.xlu2 %v802_v40, %s1831_s30  ;;  %v863_v41 = vmul.f32 %v862_v30, %v1989_v49  ;;  %v958_v42 = vmul.f32 %v957_v39, %v1979_v44  ;;  %s2124_s27 = sld [smem:[#allocation2 + $0x7]] }
 0x2c8   : > { %v865_v46 = vrot.slane %v863_v41, 2  ;;  %v960_v47 = vrot.slane %v958_v42, 3  ;;  %v1097_v42 = vstv %s2110_s22  ;;  %s2193_s22 = sld [smem:[#allocation2 + $0xa7]] }
 0x2cd   : > { %839 = vrot.lane.b32.xlu1 %v838_v48, %s1827_s23  ;;  %672 = vrot.lane.b32.xlu0 %v671_v50, %s1831_s30  ;;  %v930_v50 = vstv %s1694_s28  ;;  %s2130_s28 = sld [smem:[#allocation2 + $0x20]] }
 0x2ce   : > { %654 = vrot.lane.b32.xlu2 %v653_v53, %s1829_s25  ;;  %v912_v53 = vstv %s1692_s6  ;;  %v931_v55 = vmul.f32 %v930_v50, %v1989_v49  ;;  %s1715_s6 = sld [smem:[#allocation2 + $0xa2]]  ;;  %v1098_v50 = vmul.f32 %v1097_v42, %v1979_v44 }
 0x2cf   : > { %v913_v58 = vmul.f32 %v912_v53, %v1989_v49 }
 0x2d0   : > { %v933_v61 = vrot.slane %v931_v55, 3 }
 0x2d5   : > { %690 = vrot.lane.b32.xlu1 %v689_v62, %s1828_s24  ;;  %875 = vrot.lane.b32.xlu0 %v874_v63, %s1830_s29  ;;  %v915_v62 = vrot.slane %v913_v58, 3  ;;  %v897_v63 = vrot.slane %v895_v60, 3 }
 0x2d6   : > { %857 = vrot.lane.b32.xlu2 %v856_v1, %s1832_s14  ;;  %v948_v1 = vstv %s1696_s9  ;;  %s1674_s9 = sld [smem:[#allocation2 + $0xe]] }
 0x2d7   : > { %v949_v6 = vmul.f32 %v948_v1, %v1989_v49 }
 0x2dd   : > { %744 = vrot.lane.b32.xlu1 %v743_v8, %s1830_s29  ;;  %726 = vrot.lane.b32.xlu0 %v725_v10, %s1832_s14  ;;  %v994_v10 = vmul.f32 %v993_v3, %v1979_v44  ;;  %v1070_v3 = vstv %s2130_s28  ;;  %s2208_s28 = sld [smem:[#allocation2 + $0x2b]] }
 0x2de   : > { %708 = vrot.lane.b32.xlu2 %v707_v11, %s1827_s23  ;;  %v951_v11 = vrot.slane %v949_v6, 3  ;;  %v1115_v6 = vstv %s1715_s6  ;;  %s2216_s6 = sld [smem:[#allocation2 + $0x2c]] }
 0x2df   : > { %v996_v13 = vrot.slane %v994_v10, 3  ;;  %v1116_v14 = vmul.f32 %v1115_v6, %v1979_v44 }
 0x2e5   : > { %907 = vrot.lane.b32.xlu1 %v906_v16, %s1829_s25  ;;  %501 = vrot.lane.b32.xlu0 %v1833_v20, %s1826_s13  ;;  %s1695_s13 = sld [smem:[#allocation2 + $0x98]]  ;;  %v966_v16 = vstv %s1698_s16  ;;  %v985_v20 = vmul.f32 %v984_v15, %v1989_v49 }
 0x2e6   : > { %925 = vrot.lane.b32.xlu2 %v924_v17, %s1831_s30  ;;  %v967_v22 = vmul.f32 %v966_v16, %v1989_v49  ;;  %s2177_s16 = sld [smem:[#allocation2 + $0x22]] }
 0x2eb   : > { %v939_v40 = vstv %s1695_s13  ;;  %s2126_s13 = sld [smem:[#allocation2 + $0x87]] }
 0x2ec   : > { %v940_v45 = vmul.f32 %v939_v40, %v1979_v44  ;;  %v1082_v40 = vrot.slane %v1080_v35, 4 }
 0x2ed   : > { %812 = vrot.lane.b32.xlu1 %v811_v25, %s1828_s24  ;;  %794 = vrot.lane.b32.xlu0 %v793_v26, %s1831_s30  ;;  %v987_v25 = vrot.slane %v985_v20, 3  ;;  %v969_v26 = vrot.slane %v967_v22, 3  ;;  %v1118_v22 = vrot.slane %v1116_v14, 4 }
 0x2ee   : > { %776 = vrot.lane.b32.xlu2 %v775_v27, %s1829_s25  ;;  %v942_v48 = vrot.slane %v940_v45, 3  ;;  %v1016_v27 = vstv %s2093_s17  ;;  %v1052_v45 = vstv %s2107_s21  ;;  %s2179_s17 = sld [smem:[#allocation2 + $0x24]] }
 0x2ef   : > { %v1017_v33 = vmul.f32 %v1016_v27, %v1989_v49  ;;  %v1053_v53 = vmul.f32 %v1052_v45, %v1989_v49  ;;  %s2188_s21 = sld [smem:[#allocation2 + $0x27]] }
 0x2f0   : > { %v2064_v34 = vpop.permute.xlu2 %551 }
 0x2f1   : > { %v1019_v39 = vrot.slane %v1017_v33, 4 }
 0x2f4   : > { %v1146_v14 = vstv %s2179_s17  ;;  %s2260_s17 = sld [smem:[#allocation2 + $0xaa]] }
 0x2f5   : > { %979 = vrot.lane.b32.xlu1 %v978_v36, %s1832_s14  ;;  %848 = vrot.lane.b32.xlu0 %v847_v37, %s1832_s14 }
 0x2f6   : > { %830 = vrot.lane.b32.xlu2 %v829_v38, %s1827_s23  ;;  %v1062_v38 = vmul.f32 %v1061_v29, %v1979_v44 }
 0x2f8   : > { %v2072_v43 = vpop.permute.xlu2 %567  ;;  %v1064_v41 = vrot.slane %v1062_v38, 4 }
 0x2fd   : > { %866 = vrot.lane.b32.xlu1 %v865_v46, %s1830_s29  ;;  %961 = vrot.lane.b32.xlu0 %v960_v47, %s1827_s23  ;;  %v1034_v46 = vstv %s2114_s26  ;;  %s2195_s26 = sld [smem:[#allocation2 + $0x28]] }
 0x2fe   : > { %943 = vrot.lane.b32.xlu2 %v942_v48, %s1828_s24  ;;  %v1035_v55 = vmul.f32 %v1034_v46, %v1989_v49 }
 0x300   : > { %v2080_v59 = vpop.permute.xlu2 %615  ;;  %v1037_v2 = vrot.slane %v1035_v55, 4  ;;  %v1185_v55 = vstv %s2171_s11  ;;  %s2232_s11 = sld [smem:[#allocation2 + $0x30]] }
 0x301   : > { %v1186_v6 = vmul.f32 %v1185_v55, %v1979_v44 }
 0x305   : > { %934 = vrot.lane.b32.xlu1 %v933_v61, %s1828_s24  ;;  %916 = vrot.lane.b32.xlu0 %v915_v62, %s1831_s30  ;;  %v1100_v61 = vrot.slane %v1098_v50, 4  ;;  %v1055_v62 = vrot.slane %v1053_v53, 4  ;;  %v765_v50 = vstv %s1675_s10  ;;  %s2226_s10 = sld [smem:[#allocation2 + $0xa9]] }
 0x306   : > { %898 = vrot.lane.b32.xlu2 %v897_v63, %s1829_s25  ;;  %v636_v63 = vstv %s2124_s27  ;;  %s2197_s27 = sld [smem:[#allocation2 + $0x26]] }
 0x307   : > { %v2088_v4 = vpop.permute.xlu1 %599  ;;  %v584_v5 = vpop.permute.xlu0 %583 }
 0x308   : > { %v592_v8 = vpop.permute.xlu2 %591 }
 0x30d   : > { %952 = vrot.lane.b32.xlu1 %v951_v11, %s1827_s23  ;;  %1029 = vrot.lane.b32.xlu0 %v1028_v12, %s1829_s25  ;;  %v1071_v11 = vmul.f32 %v1070_v3, %v1989_v49 }
 0x30e   : > { %997 = vrot.lane.b32.xlu2 %v996_v13, %s1830_s29 }
 0x30f   : > { %v544_v17 = vpop.permute.xlu1 %543  ;;  %v2099_v18 = vpop.permute.xlu0 %631 }
 0x310   : > { %v2103_v21 = vpop.permute.xlu2 %681  ;;  %v546_v23 = vadd.f32 %v544_v17, %v2001_v0  ;;  %v1073_v17 = vrot.slane %v1071_v11, 4 }
 0x312   : > { %v554_v0 = vadd.f32 %v2064_v34, %v546_v23  ;;  %v1088_v23 = vstv %s1712_s8  ;;  %s2221_s8 = sld [smem:[#allocation2 + $0xa8]] }
 0x313   : > { %v1089_v27 = vmul.f32 %v1088_v23, %v1989_v49 }
 0x315   : > { %1047 = vrot.lane.b32.xlu1 %v1046_v24, %s1831_s30  ;;  %988 = vrot.lane.b32.xlu0 %v987_v25, %s1830_s29  ;;  %v1091_v28 = vrot.slane %v1089_v27, 4 }
 0x316   : > { %970 = vrot.lane.b32.xlu2 %v969_v26, %s1832_s14 }
 0x317   : > { %v576_v31 = vpop.permute.xlu1 %575  ;;  %v560_v32 = vpop.permute.xlu0 %559 }
 0x318   : > { %v562_v36 = vadd.f32 %v560_v32, %v554_v0  ;;  %v2120_v37 = vpop.permute.xlu2 %735 }
 0x31a   : > { %v570_v30 = vadd.f32 %v2072_v43, %v562_v36 }
 0x31c   : > { %v578_v34 = vadd.f32 %v576_v31, %v570_v30 }
 0x31d   : > { %1020 = vrot.lane.b32.xlu1 %v1019_v39, %s1829_s25  ;;  %1083 = vrot.lane.b32.xlu0 %v1082_v40, %s1827_s23 }
 0x31e   : > { %1065 = vrot.lane.b32.xlu2 %v1064_v41, %s1828_s24  ;;  %v586_v43 = vadd.f32 %v584_v5, %v578_v34  ;;  %v643_v5 = vstv %s2126_s13  ;;  %s2204_s13 = sld [smem:[#allocation2 + $0x29]] }
 0x31f   : > { %v624_v47 = vpop.permute.xlu1 %623  ;;  %v608_v48 = vpop.permute.xlu0 %607  ;;  %v644_v13 = vmul.f32 %v643_v5, %v1979_v44 }
 0x320   : > { %v594_v54 = vadd.f32 %v592_v8, %v586_v43  ;;  %v2140_v60 = vpop.permute.xlu2 %803 }
 0x321   : > { %v646_v19 = vrot.slane %v644_v13, 1 }
 0x322   : > { %v602_v58 = vadd.f32 %v2088_v4, %v594_v54  ;;  %v637_v4 = vmul.f32 %v636_v63, %v1989_v49  ;;  %v766_v63 = vmul.f32 %v765_v50, %v1979_v44 }
 0x324   : > { %v610_v1 = vadd.f32 %v608_v48, %v602_v58  ;;  %v639_v15 = vrot.slane %v637_v4, 1 }
 0x325   : > { %1101 = vrot.lane.b32.xlu1 %v1100_v61, %s1832_s14  ;;  %1056 = vrot.lane.b32.xlu0 %v1055_v62, %s1828_s24  ;;  %v1159_v62 = vstv %s2173_s12  ;;  %s2238_s12 = sld [smem:[#allocation2 + $0x23]] }
 0x326   : > { %v618_v7 = vadd.f32 %v2080_v59, %v610_v1  ;;  %1038 = vrot.lane.b32.xlu2 %v1037_v2, %s1831_s30  ;;  %v1211_v1 = vstv %s2175_s15  ;;  %s2247_s15 = sld [smem:[#allocation2 + $0xa3]] }
 0x327   : > { %v664_v8 = vpop.permute.xlu1 %663  ;;  %v700_v10 = vpop.permute.xlu0 %699  ;;  %v1212_v4 = vmul.f32 %v1211_v1, %v1979_v44 }
 0x328   : > { %v626_v12 = vadd.f32 %v624_v47, %v618_v7  ;;  %v655_v20 = vpop.permute.xlu2 %654  ;;  %v758_v47 = vstv %s1674_s9  ;;  %v1160_v7 = vmul.f32 %v1159_v62, %v1979_v44  ;;  %s2224_s9 = sld [smem:[#allocation2 + $0x95]] }
 0x329   : > { %v759_v54 = vmul.f32 %v758_v47, %v1989_v49 }
 0x32a   : > { %v634_v16 = vadd.f32 %v2099_v18, %v626_v12  ;;  %v1106_v12 = vstv %s2177_s16  ;;  %v1164_v23 = vrot.slane %v1160_v7, 5  ;;  %s2254_s16 = sld [smem:[#allocation2 + $0x2a]] }
 0x32c   : > { %v641_v59 = vadd.f32 %v639_v15, %v634_v16  ;;  %v1172_v15 = vstv %s2181_s19  ;;  %v880_v16 = vstv %s2183_s20  ;;  %s2322_s19 = sld [smem:[#allocation2 + $0xab]] }
 0x32d   : > { %1074 = vrot.lane.b32.xlu1 %v1073_v17, %s1827_s23  ;;  %s2329_s20 = sld [smem:[#allocation2 + $0xac]] }
 0x32e   : > { %v648_v24 = vadd.f32 %v646_v19, %v641_v59  ;;  %1119 = vrot.lane.b32.xlu2 %v1118_v22, %s1830_s29  ;;  %v1190_v22 = vrot.slane %v1186_v6, 5 }
 0x32f   : > { %v718_v25 = vpop.permute.xlu1 %717  ;;  %v754_v26 = vpop.permute.xlu0 %753 }
 0x330   : > { %v2157_v29 = vpop.permute.xlu2 %857  ;;  %v657_v31 = vadd.f32 %v655_v20, %v648_v24  ;;  %v1216_v24 = vrot.slane %v1212_v4, 5 }
 0x332   : > { %v666_v36 = vadd.f32 %v664_v8, %v657_v31 }
 0x336   : > { %1092 = vrot.lane.b32.xlu2 %v1091_v28, %s1832_s14 }
 0x337   : > { %v2160_v18 = vpop.permute.xlu1 %785  ;;  %v2162_v0 = vpop.permute.xlu0 %821 }
 0x338   : > { %v709_v35 = vpop.permute.xlu2 %708 }
 0x33f   : > { %v2164_v32 = vpop.permute.xlu1 %839  ;;  %v673_v33 = vpop.permute.xlu0 %672 }
 0x340   : > { %v675_v38 = vadd.f32 %v673_v33, %v666_v36  ;;  %v2169_v41 = vpop.permute.xlu2 %925  ;;  %v1107_v33 = vmul.f32 %v1106_v12, %v1989_v49 }
 0x342   : > { %v684_v30 = vadd.f32 %v2103_v21, %v675_v38  ;;  %v1250_v38 = vstv %s2195_s26  ;;  %s2369_s26 = sld [smem:[#allocation2 + $0x2d]] }
 0x347   : > { %v691_v39 = vpop.permute.xlu1 %690  ;;  %v2167_v40 = vpop.permute.xlu0 %875 }
 0x348   : > { %v693_v34 = vadd.f32 %v691_v39, %v684_v30  ;;  %v777_v58 = vpop.permute.xlu2 %776 }
 0x34a   : > { %v702_v42 = vadd.f32 %v700_v10, %v693_v34  ;;  %v768_v10 = vrot.slane %v766_v63, 2  ;;  %v1109_v63 = vrot.slane %v1107_v33, 4 }
 0x34c   : > { %v711_v45 = vadd.f32 %v709_v35, %v702_v42  ;;  %v1147_v35 = vmul.f32 %v1146_v14, %v1989_v49 }
 0x34e   : > { %v720_v46 = vadd.f32 %v718_v25, %v711_v45  ;;  %v1224_v25 = vstv %s2188_s21  ;;  %s2334_s21 = sld [smem:[#allocation2 + $0xad]] }
 0x34f   : > { %v745_v21 = vpop.permute.xlu1 %744  ;;  %v727_v43 = vpop.permute.xlu0 %726  ;;  %v1225_v50 = vmul.f32 %v1224_v25, %v1989_v49 }
 0x350   : > { %v729_v48 = vadd.f32 %v727_v43, %v720_v46  ;;  %v831_v30 = vpop.permute.xlu2 %830  ;;  %v1173_v43 = vmul.f32 %v1172_v15, %v1989_v49 }
 0x352   : > { %v738_v53 = vadd.f32 %v2120_v37, %v729_v48  ;;  %v761_v37 = vrot.slane %v759_v54, 2  ;;  %v1198_v54 = vstv %s2197_s27  ;;  %s2372_s27 = sld [smem:[#allocation2 + $0x2e]] }
 0x354   : > { %v747_v61 = vadd.f32 %v745_v21, %v738_v53  ;;  %v2252_v53 = vmul.f32 %v1250_v38, %v1989_v49 }
 0x356   : > { %v756_v2 = vadd.f32 %v754_v26, %v747_v61  ;;  %v1350_v61 = vstv %s2216_s6  ;;  %s2400_s6 = sld [smem:[#allocation2 + $0xae]] }
 0x357   : > { %v2199_v3 = vpop.permute.xlu1 %907  ;;  %v502_v5 = vpop.permute.xlu0 %501 }
 0x358   : > { %v507_v8 = vsel %vm505_vm3, 0.0, %v502_v5  ;;  %v763_v11 = vadd.f32 %v761_v37, %v756_v2  ;;  %v1237_v2 = vstv %s2193_s22  ;;  %v1151_v37 = vrot.slane %v1147_v35, 5  ;;  %v2289_v33 = vpop.permute.xlu2 %943  ;;  %s2367_s22 = sld [smem:[#allocation2 + $0x1c]] }
 0x359   : > { %v2211_v13 = vsel %vm508_vm4, %v507_v8, 0.0  ;;  %v1177_v5 = vrot.slane %v1173_v43, 5  ;;  %v1229_v8 = vrot.slane %v1225_v50, 5 }
 0x35a   : > { %v1187_v17 = vmul.f32 %v1185_v55, %v2211_v13  ;;  %v1161_v19 = vmul.f32 %v1159_v62, %v2211_v13  ;;  %v770_v20 = vadd.f32 %v768_v10, %v763_v11  ;;  %v1213_v59 = vmul.f32 %v1211_v1, %v2211_v13 }
 0x35b   : > { %v1148_v36 = vmul.f32 %v1146_v14, %v2211_v13  ;;  %v1174_v47 = vmul.f32 %v1172_v15, %v2211_v13  ;;  %v1276_v55 = vstv %s2204_s13  ;;  %v1255_v10 = vrot.slane %v2252_v53, 5  ;;  %s2379_s13 = sld [smem:[#allocation2 + $0x2f]] }
 0x35c   : > { %v1191_v26 = vrot.slane %v1187_v17, 5  ;;  %v1165_v27 = vrot.slane %v1161_v19, 5  ;;  %v779_v28 = vadd.f32 %v777_v58, %v770_v20  ;;  %v1217_v31 = vrot.slane %v1213_v59, 5 }
 0x35d   : > { %v1324_v58 = vstv %s2208_s28  ;;  %v1152_v1 = vrot.slane %v1148_v36, 5  ;;  %v1178_v6 = vrot.slane %v1174_v47, 5  ;;  %v2267_v11 = vmul.f32 %v1198_v54, %v1989_v49  ;;  %s2395_s28 = sld [smem:[#allocation2 + $0x9c]] }
 0x35e   : > { %v1192_v39 = vsel %vm493_vm1, %v1190_v22, %v1191_v26  ;;  %v1166_v34 = vsel %vm493_vm1, %v1164_v23, %v1165_v27  ;;  %v788_v42 = vadd.f32 %v2160_v18, %v779_v28  ;;  %v1218_v45 = vsel %vm493_vm1, %v1216_v24, %v1217_v31 }
 0x35f   : > { %v813_v46 = vpop.permute.xlu1 %812  ;;  %1193 = vrot.lane.b32.xlu1 %v1192_v39, %s1831_s30  ;;  %1167 = vrot.lane.b32.xlu0 %v1166_v34, %s1829_s25  ;;  %v795_v21 = vpop.permute.xlu0 %794  ;;  %v2245_v18 = vmul.f32 %v880_v16, %v1989_v49  ;;  %v1226_v12 = vmul.f32 %v1224_v25, %v2211_v13  ;;  %v1263_v14 = vstv %s2221_s8  ;;  %v1454_v15 = vstv %s2232_s11  ;;  %s2403_s8 = sld [smem:[#allocation2 + $0xaf]] }
 0x360   : > { %v797_v48 = vadd.f32 %v795_v21, %v788_v42  ;;  %1219 = vrot.lane.b32.xlu2 %v1218_v45, %s1828_s24  ;;  %v1153_v16 = vsel %vm493_vm1, %v1151_v37, %v1152_v1  ;;  %v1238_v19 = vmul.f32 %v1237_v2, %v1979_v44  ;;  %v1124_v20 = vstv %s2238_s12 }
 0x361   : > { %v883_v7 = vrot.slane %v2245_v18, 3  ;;  %v1179_v23 = vsel %vm493_vm1, %v1177_v5, %v1178_v6  ;;  %v1252_v24 = vmul.f32 %v1250_v38, %v2211_v13  ;;  %v887_v25 = vstv %s2224_s9  ;;  %s2408_s9 = sld [smem:[#allocation2 + $0xb0]] }
 0x362   : > { %v806_v62 = vadd.f32 %v2140_v60, %v797_v48  ;;  %v1239_v60 = vmul.f32 %v1237_v2, %v2211_v13  ;;  %v1289_v26 = vstv %s2226_s10  ;;  %v1135_v28 = vstv %s2247_s15 }
 0x363   : > { %v1302_v31 = vstv %s2254_s16  ;;  %v1230_v36 = vrot.slane %v1226_v12, 5  ;;  %v1125_v39 = vmul.f32 %v1124_v20, %v1989_v49  ;;  %v1313_v34 = vstv %s2260_s17 }
 0x364   : > { %v815_v4 = vadd.f32 %v813_v46, %v806_v62  ;;  %v1243_v35 = vrot.slane %v1239_v60, 5  ;;  %v1242_v45 = vrot.slane %v1238_v19, 5  ;;  %v1203_v38 = vrot.slane %v2267_v11, 5 }
 0x365   : > { %v1256_v46 = vrot.slane %v1252_v24, 5  ;;  %v888_v21 = vmul.f32 %v887_v25, %v1979_v44  ;;  %v1136_v43 = vmul.f32 %v1135_v28, %v1979_v44  ;;  %v1303_v47 = vmul.f32 %v1302_v31, %v1989_v49 }
 0x366   : > { %v824_v17 = vadd.f32 %v2162_v0, %v815_v4  ;;  %v1455_v0 = vmul.f32 %v1454_v15, %v1989_v49  ;;  %v1200_v50 = vmul.f32 %v1198_v54, %v2211_v13  ;;  %v1290_v53 = vmul.f32 %v1289_v26, %v1979_v44 }
 0x367   : > { %v2277_v59 = vpop.permute.xlu1 %979  ;;  %1110 = vrot.lane.b32.xlu0 %v1109_v63, %s1830_s29  ;;  %1154 = vrot.lane.b32.xlu1 %v1153_v16, %s1829_s25  ;;  %v849_v22 = vpop.permute.xlu0 %848  ;;  %v1314_v62 = vmul.f32 %v1313_v34, %v1979_v44  ;;  %v1231_v63 = vsel %vm493_vm1, %v1229_v8, %v1230_v36  ;;  %v1129_v2 = vrot.slane %v1125_v39, 5  ;;  %v1265_v5 = vmul.f32 %v1263_v14, %v2211_v13 }
 0x368   : > { %v833_v27 = vadd.f32 %v831_v30, %v824_v17  ;;  %1180 = vrot.lane.b32.xlu2 %v1179_v23, %s1831_s30  ;;  %v1264_v30 = vmul.f32 %v1263_v14, %v1979_v44  ;;  %v1459_v1 = vrot.slane %v1455_v0, 6  ;;  %v1291_v6 = vmul.f32 %v1289_v26, %v2211_v13 }
 0x369   : > { %v1456_v4 = vmul.f32 %v1454_v15, %v2211_v13  ;;  %v1257_v60 = vsel %vm493_vm1, %v1255_v10, %v1256_v46  ;;  %v1126_v8 = vmul.f32 %v1124_v20, %v2211_v13  ;;  %v1140_v12 = vrot.slane %v1136_v43, 5 }
 0x36a   : > { %v842_v42 = vadd.f32 %v2164_v32, %v833_v27  ;;  %v1244_v32 = vsel %vm493_vm1, %v1242_v45, %v1243_v35  ;;  %v1307_v16 = vrot.slane %v1303_v47, 6  ;;  %v1204_v14 = vrot.slane %v1200_v50, 5  ;;  %v899_v27 = vpop.permute.xlu2 %898 }
 0x36b   : > { %v1460_v17 = vrot.slane %v1456_v4, 6  ;;  %v1318_v19 = vrot.slane %v1314_v62, 6  ;;  %v1130_v15 = vrot.slane %v1126_v8, 5  ;;  %v1304_v23 = vmul.f32 %v1302_v31, %v2211_v13 }
 0x36c   : > { %v851_v48 = vadd.f32 %v849_v22, %v842_v42  ;;  %v1137_v22 = vmul.f32 %v1135_v28, %v2211_v13  ;;  %v1315_v24 = vmul.f32 %v1313_v34, %v2211_v13  ;;  %v1269_v25 = vrot.slane %v1265_v5, 5 }
 0x36d   : > { %v1295_v20 = vrot.slane %v1291_v6, 5  ;;  %v2320_v26 = vsel %vm389_vm7, %v1459_v1, %v1460_v17  ;;  %v2325_v0 = vsel %vm493_vm1, %v1129_v2, %v1130_v15  ;;  %v1308_v28 = vrot.slane %v1304_v23, 6 }
 0x36e   : > { %v860_v37 = vadd.f32 %v2157_v29, %v851_v48  ;;  %v1141_v35 = vrot.slane %v1137_v22, 5  ;;  %v1319_v31 = vrot.slane %v1315_v24, 6  ;;  %v1268_v39 = vrot.slane %v1264_v30, 5 }
 0x36f   : > { %v867_v11 = vpop.permute.xlu1 %866  ;;  %1245 = vrot.lane.b32.xlu0 %v1244_v32, %s1827_s23  ;;  %1232 = vrot.lane.b32.xlu1 %v1231_v63, %s1827_s23  ;;  %v2310_v54 = vpop.permute.xlu0 %961  ;;  %v1294_v34 = vrot.slane %v1290_v53, 5  ;;  %v1278_v42 = vmul.f32 %v1276_v55, %v2211_v13  ;;  %v2340_v46 = vsel %vm389_vm7, %v1307_v16, %v1308_v28  ;;  %v1326_v43 = vmul.f32 %v1324_v58, %v2211_v13 }
 0x370   : > { %v869_v29 = vadd.f32 %v867_v11, %v860_v37  ;;  %1258 = vrot.lane.b32.xlu2 %v1257_v60, %s1832_s14  ;;  %v2337_v45 = vsel %vm493_vm1, %v1140_v12, %v1141_v35  ;;  %v2343_v18 = vsel %vm389_vm7, %v1318_v19, %v1319_v31  ;;  %v1270_v30 = vsel %vm493_vm1, %v1268_v39, %v1269_v25 }
 0x371   : > { %v1296_v48 = vsel %vm493_vm1, %v1294_v34, %v1295_v20  ;;  %v1277_v50 = vmul.f32 %v1276_v55, %v1989_v49  ;;  %v1325_v62 = vmul.f32 %v1324_v58, %v1989_v49  ;;  %v1282_v63 = vrot.slane %v1278_v42, 5 }
 0x372   : > { %v878_v10 = vadd.f32 %v2167_v40, %v869_v29  ;;  %v890_v40 = vrot.slane %v888_v21, 3  ;;  %v1351_v1 = vmul.f32 %v1350_v61, %v1989_v49  ;;  %v1330_v55 = vrot.slane %v1326_v43, 6  ;;  %v2374_v58 = vpop.permute.xlu2 %997 }
 0x373   : > { %v1281_v37 = vrot.slane %v1277_v50, 5  ;;  %v1329_v4 = vrot.slane %v1325_v62, 6  ;;  %v1337_v11 = vstv %s2322_s19  ;;  %v1389_v12 = vstv %s2334_s21 }
 0x374   : > { %v885_v36 = vadd.f32 %v883_v7, %v878_v10  ;;  %v1205_v7 = vsel %vm493_vm1, %v1203_v38, %v1204_v14  ;;  %v1352_v38 = vmul.f32 %v1350_v61, %v2211_v13  ;;  %v1355_v8 = vrot.slane %v1351_v1, 6 }
 0x375   : > { %v1283_v60 = vsel %vm493_vm1, %v1281_v37, %v1282_v63  ;;  %v1363_v61 = vstv %s2329_s20  ;;  %v1331_v16 = vsel %vm389_vm7, %v1329_v4, %v1330_v55  ;;  %v1339_v29 = vmul.f32 %v1337_v11, %v2211_v13 }
 0x376   : > { %v892_v21 = vadd.f32 %v890_v40, %v885_v36  ;;  %v1356_v5 = vrot.slane %v1352_v38, 6  ;;  %v1365_v14 = vmul.f32 %v1363_v61, %v2211_v13  ;;  %v1391_v19 = vmul.f32 %v1389_v12, %v2211_v13 }
 0x377   : > { %1206 = vrot.lane.b32.xlu0 %v1205_v7, %s1828_s24  ;;  %1271 = vrot.lane.b32.xlu1 %v1270_v30, %s1832_s14  ;;  %v917_v47 = vpop.permute.xlu0 %916  ;;  %v935_v32 = vpop.permute.xlu1 %934  ;;  %v1364_v22 = vmul.f32 %v1363_v61, %v1979_v44  ;;  %v1390_v24 = vmul.f32 %v1389_v12, %v1979_v44  ;;  %v1343_v25 = vrot.slane %v1339_v29, 6  ;;  %v1376_v31 = vstv %s2369_s26 }
 0x378   : > { %v901_v53 = vadd.f32 %v899_v27, %v892_v21  ;;  %1297 = vrot.lane.b32.xlu2 %v1296_v48, %s1830_s29  ;;  %v1357_v17 = vsel %vm389_vm7, %v1355_v8, %v1356_v5  ;;  %v1369_v20 = vrot.slane %v1365_v14, 6  ;;  %v1002_v27 = vstv %s2367_s22 }
 0x379   : > { %v1395_v28 = vrot.slane %v1391_v19, 6  ;;  %v1368_v40 = vrot.slane %v1364_v22, 6  ;;  %v1402_v34 = vstv %s2372_s27  ;;  %v1394_v42 = vrot.slane %v1390_v24, 6 }
 0x37a   : > { %v910_v2 = vadd.f32 %v2199_v3, %v901_v53  ;;  %v1003_v7 = vmul.f32 %v1002_v27, %v1989_v49  ;;  %v1428_v30 = vstv %s2379_s13  ;;  %v1404_v48 = vmul.f32 %v1402_v34, %v2211_v13  ;;  %v971_v50 = vpop.permute.xlu2 %970 }
 0x37b   : > { %v1396_v38 = vsel %vm389_vm7, %v1394_v42, %v1395_v28  ;;  %v1377_v53 = vmul.f32 %v1376_v31, %v1989_v49  ;;  %v1430_v62 = vmul.f32 %v1428_v30, %v2211_v13  ;;  %v1009_v63 = vstv %s2395_s28 }
 0x37c   : > { %v919_v6 = vadd.f32 %v917_v47, %v910_v2  ;;  %v1370_v47 = vsel %vm389_vm7, %v1368_v40, %v1369_v20  ;;  %v1429_v2 = vmul.f32 %v1428_v30, %v1989_v49  ;;  %v1408_v37 = vrot.slane %v1404_v48, 6 }
 0x37d   : > { %v1381_v4 = vrot.slane %v1377_v53, 6  ;;  %v1010_v8 = vmul.f32 %v1009_v63, %v1979_v44  ;;  %v1415_v12 = vstv %s2400_s6  ;;  %v1441_v29 = vstv %s2403_s8 }
 0x37e   : > { %v928_v3 = vadd.f32 %v2169_v41, %v919_v6  ;;  %v1338_v41 = vmul.f32 %v1337_v11, %v1979_v44  ;;  %v1005_v6 = vrot.slane %v1003_v7, 4  ;;  %v1434_v11 = vrot.slane %v1430_v62, 6 }
 0x37f   : > { %1284 = vrot.lane.b32.xlu0 %v1283_v60, %s1830_s29  ;;  %1332 = vrot.lane.b32.xlu1 %v1331_v16, %s1829_s25  ;;  %v2392_v23 = vpop.permute.xlu0 %1029  ;;  %v953_v35 = vpop.permute.xlu1 %952  ;;  %v1433_v16 = vrot.slane %v1429_v2, 6  ;;  %v1467_v14 = vstv %s2408_s9  ;;  %v1443_v19 = vmul.f32 %v1441_v29, %v2211_v13  ;;  %v1012_v22 = vrot.slane %v1010_v8, 4 }
 0x380   : > { %v937_v15 = vadd.f32 %v935_v32, %v928_v3  ;;  %1358 = vrot.lane.b32.xlu2 %v1357_v17, %s1831_s30  ;;  %v1342_v39 = vrot.slane %v1338_v41, 6  ;;  %v1469_v41 = vmul.f32 %v1467_v14, %v2211_v13 }
 0x382   : > { %v946_v10 = vadd.f32 %v2289_v33, %v937_v15  ;;  %v1378_v33 = vmul.f32 %v1376_v31, %v2211_v13  ;;  %v1344_v43 = vsel %vm389_vm7, %v1342_v39, %v1343_v25  ;;  %v1435_v15 = vsel %vm389_vm7, %v1433_v16, %v1434_v11 }
 0x383   : > { %v1468_v25 = vmul.f32 %v1467_v14, %v1979_v44  ;;  %v1473_v28 = vrot.slane %v1469_v41, 6 }
 0x384   : > { %v955_v36 = vadd.f32 %v953_v35, %v946_v10  ;;  %v1382_v1 = vrot.slane %v1378_v33, 6  ;;  %v1442_v10 = vmul.f32 %v1441_v29, %v1979_v44  ;;  %v1447_v35 = vrot.slane %v1443_v19, 6 }
 0x385   : > { %v1472_v39 = vrot.slane %v1468_v25, 6 }
 0x386   : > { %v964_v21 = vadd.f32 %v2310_v54, %v955_v36  ;;  %v1403_v54 = vmul.f32 %v1402_v34, %v1989_v49  ;;  %v1383_v3 = vsel %vm389_vm7, %v1381_v4, %v1382_v1  ;;  %v1446_v36 = vrot.slane %v1442_v10, 6 }
 0x387   : > { %1345 = vrot.lane.b32.xlu0 %v1344_v43, %s1829_s25  ;;  %1371 = vrot.lane.b32.xlu1 %v1370_v47, %s1831_s30  ;;  %v989_v5 = vpop.permute.xlu0 %988  ;;  %v1474_v34 = vsel %vm389_vm7, %v1472_v39, %v1473_v28  ;;  %v1048_v42 = vpop.permute.xlu1 %1047  ;;  %s253_s25 = scalar_lea.vmem %s2475_s1, %s1887_s7 }
 0x388   : > { %v973_v32 = vadd.f32 %v971_v50, %v964_v21  ;;  %1397 = vrot.lane.b32.xlu2 %v1396_v38, %s1828_s24  ;;  %v1407_v61 = vrot.slane %v1403_v54, 6 }
 0x38a   : > { %v982_v55 = vadd.f32 %v2277_v59, %v973_v32  ;;  %v1409_v49 = vsel %vm389_vm7, %v1407_v61, %v1408_v37  ;;  %v1417_v59 = vmul.f32 %v1415_v12, %v2211_v13  ;;  %v1448_v13 = vsel %vm389_vm7, %v1446_v36, %v1447_v35 }
 0x38c   : > { %v991_v60 = vadd.f32 %v989_v5, %v982_v55  ;;  %v1421_v27 = vrot.slane %v1417_v59, 6 }
 0x38e   : > { %v1000_v17 = vadd.f32 %v2374_v58, %v991_v60  ;;  %v1416_v58 = vmul.f32 %v1415_v12, %v1979_v44  ;;  %v1066_v44 = vpop.permute.xlu2 %1065 }
 0x38f   : > { %1384 = vrot.lane.b32.xlu0 %v1383_v3, %s1828_s24  ;;  %1410 = vrot.lane.b32.xlu1 %v1409_v49, %s1827_s23  ;;  %v1021_v33 = vpop.permute.xlu1 %1020  ;;  %v1084_v43 = vpop.permute.xlu0 %1083 }
 0x390   : > { %v1007_v24 = vadd.f32 %v1005_v6, %v1000_v17  ;;  %1436 = vrot.lane.b32.xlu2 %v1435_v15, %s1832_s14  ;;  %v1420_v31 = vrot.slane %v1416_v58, 6 }
 0x392   : > { %v1014_v20 = vadd.f32 %v1012_v22, %v1007_v24  ;;  %v1422_v40 = vsel %vm389_vm7, %v1420_v31, %v1421_v27 }
 0x394   : > { %v1023_v30 = vadd.f32 %v1021_v33, %v1014_v20 }
 0x396   : > { %v1039_v7 = vpop.permute.xlu2 %1038  ;;  %v1032_v21 = vadd.f32 %v2392_v23, %v1023_v30 }
 0x397   : > { %1423 = vrot.lane.b32.xlu0 %v1422_v40, %s1827_s23  ;;  %1449 = vrot.lane.b32.xlu1 %v1448_v13, %s1832_s14  ;;  %v1102_v50 = vpop.permute.xlu1 %1101  ;;  %v1057_v53 = vpop.permute.xlu0 %1056  ;;  %s258_s14 = scalar_lea.vmem %s2479_s5, %s1887_s7 }
 0x398   : > { %1475 = vrot.lane.b32.xlu2 %v1474_v34, %s1830_s29  ;;  %v1041_v48 = vadd.f32 %v1039_v7, %v1032_v21 }
 0x39a   : > { %v1050_v38 = vadd.f32 %v1048_v42, %v1041_v48 }
 0x39c   : > { %v1059_v32 = vadd.f32 %v1057_v53, %v1050_v38  ;;  %v1500_v38 = vshrl.u32 %v480_v9, 7 }
 0x39e   : > { %v1120_v47 = vpop.permute.xlu2 %1119  ;;  %v1068_v54 = vadd.f32 %v1066_v44, %v1059_v32  ;;  %1781 = vset.pattern.permute.xlu2 %v1500_v38  ;;  %1780 = vset.pattern.permute.xlu0 %v1500_v38 }
 0x39f   : > { %1462 = vrot.lane.b32.xlu0 %v2320_v26, %s1830_s29  ;;  %v1075_v63 = vpop.permute.xlu1 %1074  ;;  %1779 = vset.pattern.permute.xlu1 %v1500_v38 }
 0x3a0   : > { %v1077_v1 = vadd.f32 %v1075_v63, %v1068_v54 }
 0x3a2   : > { %v1086_v26 = vadd.f32 %v1084_v43, %v1077_v1 }
 0x3a6   : > { %v1093_v62 = vpop.permute.xlu2 %1092 }
 0x3a7   : > { %v1095_v5 = vadd.f32 %v1093_v62, %v1086_v26 }
 0x3a9   : > { %v1104_v4 = vadd.f32 %v1102_v50, %v1095_v5 }
 0x3ba   : > { %v1220_v2 = vpop.permute.xlu2 %1219 }
 0x3c2   : > { %v1181_v6 = vpop.permute.xlu2 %1180 }
 0x3ca   : > { %v1259_v12 = vpop.permute.xlu2 %1258 }
 0x3d1   : > { %v1194_v55 = vpop.permute.xlu1 %1193  ;;  %v1168_v37 = vpop.permute.xlu0 %1167 }
 0x3d2   : > { %v1298_v22 = vpop.permute.xlu2 %1297 }
 0x3d9   : > { %v1155_v11 = vpop.permute.xlu1 %1154  ;;  %v1111_v23 = vpop.permute.xlu0 %1110 }
 0x3da   : > { %v1113_v60 = vadd.f32 %v1111_v23, %v1104_v4  ;;  %v1359_v35 = vpop.permute.xlu2 %1358 }
 0x3dc   : > { %v1122_v8 = vadd.f32 %v1120_v47, %v1113_v60 }
 0x3de   : > { %v1133_v61 = vadd.f32 %v2325_v0, %v1122_v8 }
 0x3e0   : > { %v1144_v3 = vadd.f32 %v2337_v45, %v1133_v61 }
 0x3e1   : > { %v1233_v16 = vpop.permute.xlu1 %1232  ;;  %v1246_v29 = vpop.permute.xlu0 %1245 }
 0x3e2   : > { %v1157_v14 = vadd.f32 %v1155_v11, %v1144_v3  ;;  %v1398_v34 = vpop.permute.xlu2 %1397 }
 0x3e4   : > { %v1170_v17 = vadd.f32 %v1168_v37, %v1157_v14  ;;  %v1528_v14 = vld [vmem:[%s253_s25 + $0x4] sm:$0x3] }
 0x3e6   : > { %v1183_v49 = vadd.f32 %v1181_v6, %v1170_v17  ;;  %v1532_v17 = vunpack.c.l.bf16 %v1528_v14 }
 0x3e8   : > { %v1196_v59 = vadd.f32 %v1194_v55, %v1183_v49 }
 0x3e9   : > { %v1272_v19 = vpop.permute.xlu1 %1271  ;;  %v1207_v15 = vpop.permute.xlu0 %1206 }
 0x3ea   : > { %v1209_v41 = vadd.f32 %v1207_v15, %v1196_v59  ;;  %v1437_v47 = vpop.permute.xlu2 %1436 }
 0x3ec   : > { %v1222_v24 = vadd.f32 %v1220_v2, %v1209_v41  ;;  %v1527_v41 = vld [vmem:[%s253_s25 + $0x2] sm:$0x3] }
 0x3ee   : > { %v1235_v58 = vadd.f32 %v1233_v16, %v1222_v24  ;;  %v1531_v24 = vunpack.c.l.bf16 %v1527_v41 }
 0x3f0   : > { %v1248_v10 = vadd.f32 %v1246_v29, %v1235_v58 }
 0x3f1   : > { %v1333_v25 = vpop.permute.xlu1 %1332  ;;  %v1285_v20 = vpop.permute.xlu0 %1284 }
 0x3f2   : > { %v1261_v27 = vadd.f32 %v1259_v12, %v1248_v10  ;;  %v1476_v63 = vpop.permute.xlu2 %1475 }
 0x3f4   : > { %v1274_v0 = vadd.f32 %v1272_v19, %v1261_v27 }
 0x3f6   : > { %v1287_v28 = vadd.f32 %v1285_v20, %v1274_v0 }
 0x3f8   : > { %v1300_v45 = vadd.f32 %v1298_v22, %v1287_v28  ;;  %v1526_v22 = vld [vmem:[%s253_s25] sm:$0x3]  ;;  %v1529_v28 = vld [vmem:[%s253_s25 + $0x6] sm:$0x3] }
 0x3f9   : > { %v1346_v31 = vpop.permute.xlu0 %1345  ;;  %v1372_v39 = vpop.permute.xlu1 %1371  ;;  %v1530_v10 = vunpack.c.l.bf16 %v1526_v22 }
 0x3fa   : > { %v1311_v36 = vadd.f32 %v2340_v46, %v1300_v45 }
 0x3fc   : > { %v1322_v40 = vadd.f32 %v2343_v18, %v1311_v36 }
 0x3fe   : > { %v1335_v13 = vadd.f32 %v1333_v25, %v1322_v40 }
 0x400   : > { %v1348_v44 = vadd.f32 %v1346_v31, %v1335_v13  ;;  %v1533_v31 = vunpack.c.l.bf16 %v1529_v28 }
 0x401   : > { %v1385_v42 = vpop.permute.xlu0 %1384  ;;  %v1411_v30 = vpop.permute.xlu1 %1410 }
 0x402   : > { %v1361_v7 = vadd.f32 %v1359_v35, %v1348_v44 }
 0x404   : > { %v1374_v33 = vadd.f32 %v1372_v39, %v1361_v7 }
 0x406   : > { %v1387_v21 = vadd.f32 %v1385_v42, %v1374_v33 }
 0x408   : > { %v1400_v43 = vadd.f32 %v1398_v34, %v1387_v21 }
 0x409   : > { %v1424_v48 = vpop.permute.xlu0 %1423  ;;  %v1450_v18 = vpop.permute.xlu1 %1449 }
 0x40a   : > { %v1413_v50 = vadd.f32 %v1411_v30, %v1400_v43 }
 0x40c   : > { %v1426_v53 = vadd.f32 %v1424_v48, %v1413_v50 }
 0x40e   : > { %v1439_v46 = vadd.f32 %v1437_v47, %v1426_v53 }
 0x410   : > { %v1452_v62 = vadd.f32 %v1450_v18, %v1439_v46 }
 0x411   : > { %v1463_v32 = vpop.permute.xlu0 %1462 }
 0x412   : > { %v1465_v54 = vadd.f32 %v1463_v32, %v1452_v62 }
 0x414   : > { %v1478_v1 = vadd.f32 %v1476_v63, %v1465_v54 }
 0x416   : > { %v1744_v2 = vmul.f32 -1.442695, %v1478_v1 }
 0x418   : > { %1792 = vpow2.f32 %v1744_v2 }
 0x41e   : > { %v1793_v26 = vpop.eup %1792 }
 0x41f   : > { %v1482_v55 = vadd.f32 1.0, %v1793_v26 }
 0x421   : > { %1794 = vrcp.f32 %v1482_v55  ;;  %v1494_v9 = vand.u32 2147483648, %v1482_v55  ;;  %v1492_v11 = vand.u32 2147483647, %v1482_v55  ;;  %vm1488_vm6 = vweird.f32 %v1482_v55 }
 0x423   : > { %v1495_v60 = vor.u32 1.1754944e-38, %v1494_v9  ;;  %vm1493_vm8 = vcmp.eq.f32.partialorder %v1492_v11, 8.507059e+37 }
 0x427   : > { %v1795_v37 = vpop.eup %1794 }
 0x428   : > { %v1484_v5 = vmul.f32 %v1795_v37, %v1482_v55  ;;  %vm1489_vm5 = vweird.f32 %v1795_v37 }
 0x429   : > { %vm1490_vm7 = vmor %vm1488_vm6, %vm1489_vm5 }
 0x42a   : > { %v1485_v6 = vsub.f32 1.0, %v1484_v5 }
 0x42c   : > { %v1486_v4 = vmul.f32 %v1795_v37, %v1485_v6 }
 0x42e   : > { %v1487_v23 = vadd.f32 %v1795_v37, %v1486_v4 }
 0x430   : > { %v1491_v8 = vsel %vm1490_vm7, %v1795_v37, %v1487_v23 }
 0x431   : > { %v1496_v61 = vsel %vm1493_vm8, %v1495_v60, %v1491_v8 }
 0x432   : > { %v1512_v12 = vperm.slane %v1496_v61, 2  ;;  %v1505_v3 = vperm.slane %v1496_v61, 1  ;;  %v1498_v16 = vperm.slane %v1496_v61, 0  ;;  %v1519_v29 = vperm.slane %v1496_v61, 3 }
 0x434   : > { %1517 = vperm.xlu2 %1781, %v1512_v12   ;;  %1510 = vperm.xlu0 %1780, %v1505_v3  }
 0x435   : > { %1503 = vperm.xlu1 %1779, %v1498_v16  }
 0x43d   : > { %1524 = vperm.xlu1 %1779, %v1519_v29  }
 0x48e   : > { %v1518_v49 = vpop.permute.xlu2 %1517 }
 0x48f   : > { %v1536_v59 = vmul.f32 %v1518_v49, %v1935_v51 }
 0x491   : > { %v1540_v19 = vadd.f32 %v1536_v59, %v1532_v17 }
 0x493   : > { %v1544_v15 = vpack.c.bf16 %v1540_v19, %v1540_v19 }
 0x495   : > { %1549 = vst.msk [vmem:[%s258_s14 + $0x4] sm:$0x3] %vm1546_vm9, %v1544_v15 }
 0x4a6   : > { %v1511_v58 = vpop.permute.xlu0 %1510 }
 0x4a7   : > { %v1535_v25 = vmul.f32 %v1511_v58, %v1950_v57  ;;  %v1504_v20 = vpop.permute.xlu1 %1503 }
 0x4a8   : > { %v1534_v27 = vmul.f32 %v1504_v20, %v1938_v52 }
 0x4a9   : > { %v1539_v51 = vadd.f32 %v1535_v25, %v1531_v24 }
 0x4aa   : > { %v1538_v0 = vadd.f32 %v1534_v27, %v1530_v10 }
 0x4ab   : > { %v1543_v35 = vpack.c.bf16 %v1539_v51, %v1539_v51 }
 0x4ac   : > { %v1542_v45 = vpack.c.bf16 %v1538_v0, %v1538_v0 }
 0x4ad   : > { %1548 = vst.msk [vmem:[%s258_s14 + $0x2] sm:$0x3] %vm1546_vm9, %v1543_v35 }
 0x4ae   : > { %1547 = vst.msk [vmem:[%s258_s14] sm:$0x3] %vm1546_vm9, %v1542_v45 }
 0x4af   : > { %v1525_v36 = vpop.permute.xlu1 %1524 }
 0x4b0   : > { %v1537_v39 = vmul.f32 %v1525_v36, %v1947_v56 }
 0x4b2   : > { %v1541_v40 = vadd.f32 %v1537_v39, %v1533_v31 }
 0x4b4   : > { %v1545_v13 = vpack.c.bf16 %v1541_v40, %v1541_v40 }
 0x4b6   : > { %1550 = vst.msk [vmem:[%s258_s14 + $0x6] sm:$0x3] %vm1546_vm9, %v1545_v13 }
 0x4b7 PF: > { %s16_s18 = sadd.s32 1, %s1821_s18  }
 0x4b8   : > { %p13_p7 = scmp.ge.s32.totalorder %s16_s18, 4  }
 0x4ba   :  { %15 = sbr.rel (!%p13_p7) target bundleno = 1 (0x1), region = 78 }
 0x4bf   :  { %1572 = vsyncpa [#allocation3], 1 }
 0x4c0   :  { %1574 = vsyncpa [#allocation3 + $0x1], 1 }

// kernel: reverse.21
= control target key start
LH: loop header
LB: loop body
LE: loop exit
PB: predicated region body
PF: predicated region fallthrough
CT: control target
= control target key end

     0   :  { %s136_s0 = inlined_call_operand.vmem [shape: bf16[16,32,2,1], index: 0, kind: input, shape index: {}]   ;;  %s137_s1 = inlined_call_operand.vmem [shape: bf16[16,32,2,1], index: 1, kind: output, shape index: {}]  }
   0x1   :  { %v8_v0 = vld [vmem:[%s136_s0] sm:$0xff]   ;;  %v99_v1 = vld [vmem:[%s136_s0 + $0x10] sm:$0xff]  ;;  %v100_v2 = vld [vmem:[%s136_s0 + $0x18] sm:$0xff] }
   0x2   :  { %57 = vst [vmem:[%s137_s1 + $0x10] sm:$0xff] %v8_v0   ;;  %v101_v3 = vld [vmem:[%s136_s0 + $0x8] sm:$0xff] }
   0x3   :  { %74 = vst [vmem:[%s137_s1] sm:$0xff] %v99_v1  }
   0x4   :  { %93 = vst [vmem:[%s137_s1 + $0x8] sm:$0xff] %v100_v2  }
   0x5   :  { %98 = vst [vmem:[%s137_s1 + $0x18] sm:$0xff] %v101_v3  }

// kernel: reverse.20
= control target key start
LH: loop header
LB: loop body
LE: loop exit
PB: predicated region body
PF: predicated region fallthrough
CT: control target
= control target key end

     0   :  { %s200_s0 = inlined_call_operand.vmem [shape: bf16[16,32,2,2], index: 0, kind: input, shape index: {}]   ;;  %s201_s1 = inlined_call_operand.vmem [shape: bf16[16,32,2,2], index: 1, kind: output, shape index: {}]  }
   0x1   :  { %v112_v0 = vld [vmem:[%s200_s0 + $0x30] sm:$0xff]   ;;  %v115_v2 = vld [vmem:[%s200_s0 + $0x20] sm:$0xff]   ;;  %v126_v4 = vld [vmem:[%s200_s0 + $0x38] sm:$0xff]  }
   0x2   :  { %v113_v1 = vld [vmem:[%s200_s0 + $0x10] sm:$0xff]   ;;  %7 = vst [vmem:[%s201_s1] sm:$0xff] %v112_v0   ;;  %v22_v3 = vld [vmem:[%s200_s0] sm:$0xff]   ;;  %v128_v5 = vld [vmem:[%s200_s0 + $0x18] sm:$0xff]  }
   0x3   :  { %114 = vst [vmem:[%s201_s1 + $0x20] sm:$0xff] %v113_v1   ;;  %v130_v6 = vld [vmem:[%s200_s0 + $0x28] sm:$0xff]  }
   0x4   :  { %116 = vst [vmem:[%s201_s1 + $0x10] sm:$0xff] %v115_v2   ;;  %v132_v7 = vld [vmem:[%s200_s0 + $0x8] sm:$0xff]  }
   0x5   :  { %117 = vst [vmem:[%s201_s1 + $0x30] sm:$0xff] %v22_v3  }
   0x6   :  { %127 = vst [vmem:[%s201_s1 + $0x8] sm:$0xff] %v126_v4  }
   0x7   :  { %129 = vst [vmem:[%s201_s1 + $0x28] sm:$0xff] %v128_v5  }
   0x8   :  { %131 = vst [vmem:[%s201_s1 + $0x18] sm:$0xff] %v130_v6  }
   0x9   :  { %133 = vst [vmem:[%s201_s1 + $0x38] sm:$0xff] %v132_v7  }

// kernel: generator_forward.42
= control target key start
LH: loop header
LB: loop body
LE: loop exit
PB: predicated region body
PF: predicated region fallthrough
CT: control target
= control target key end

     0   :  { %s478_s1 = inlined_call_operand.vmem [shape: bf16[128,128], index: 1, kind: input, shape index: {}]   ;;  %s479_s2 = inlined_call_operand.vmem [shape: f32[1,128], index: 2, kind: input, shape index: {}]   ;;  %s480_s0 = inlined_call_operand.vmem [shape: bf16[128,128], index: 0, kind: input, shape index: {}]   ;;  %s481_s3 = inlined_call_operand.vmem [shape: bf16[128,128], index: 3, kind: output, shape index: {}]  }
   0x1   :  { %v310_v0 = vld [vmem:[%s478_s1 + $0x38] sm:$0xff]  ;;  %v309_v1 = vld [vmem:[%s478_s1 + $0x30] sm:$0xff]  ;;  %v308_v2 = vld [vmem:[%s478_s1 + $0x28] sm:$0xff] }
   0x2   :  { %146 = vmatpush.bf16.msra.mxu0 %v310_v0  ;;  %358 = vmatpush.bf16.msra.mxu1 %v310_v0  ;;  %v307_v3 = vld [vmem:[%s478_s1 + $0x20] sm:$0xff]  ;;  %v306_v4 = vld [vmem:[%s478_s1 + $0x18] sm:$0xff]  ;;  %v305_v5 = vld [vmem:[%s478_s1 + $0x10] sm:$0xff] }
   0x3   :  { %359 = vmatpush.bf16.msra.mxu2 %v310_v0  ;;  %360 = vmatpush.bf16.msra.mxu3 %v310_v0  ;;  %v304_v6 = vld [vmem:[%s478_s1 + $0x8] sm:$0xff]  ;;  %v303_v7 = vld [vmem:[%s478_s1] sm:$0xff]  ;;  %v297_v9 = vld [vmem:[%s480_s0 + $0x10] sm:$0xff] }
   0x4   :  { %v295_v8 = vld [vmem:[%s480_s0] sm:$0xff]  ;;  %v301_v11 = vld [vmem:[%s480_s0 + $0x30] sm:$0xff]  ;;  %v296_v12 = vld [vmem:[%s480_s0 + $0x8] sm:$0xff] }
   0x5   :  { %v299_v10 = vld [vmem:[%s480_s0 + $0x20] sm:$0xff]  ;;  %v298_v13 = vld [vmem:[%s480_s0 + $0x18] sm:$0xff]  ;;  %v300_v14 = vld [vmem:[%s480_s0 + $0x28] sm:$0xff] }
   0x6   :  { %147 = vmatpush.bf16.msra.mxu0 %v309_v1  ;;  %361 = vmatpush.bf16.msra.mxu1 %v309_v1  ;;  %v302_v15 = vld [vmem:[%s480_s0 + $0x38] sm:$0xff]  ;;  %v382_v18 = vld [vmem:[%s479_s2] ss:$0 sm:$0xff] }
   0x7   :  { %362 = vmatpush.bf16.msra.mxu2 %v309_v1  ;;  %363 = vmatpush.bf16.msra.mxu3 %v309_v1 }
   0xa   :  { %148 = vmatpush.bf16.msra.mxu0 %v308_v2  ;;  %364 = vmatpush.bf16.msra.mxu1 %v308_v2 }
   0xb   :  { %365 = vmatpush.bf16.msra.mxu2 %v308_v2  ;;  %366 = vmatpush.bf16.msra.mxu3 %v308_v2 }
   0xe   :  { %149 = vmatpush.bf16.msra.mxu0 %v307_v3  ;;  %367 = vmatpush.bf16.msra.mxu1 %v307_v3 }
   0xf   :  { %368 = vmatpush.bf16.msra.mxu2 %v307_v3  ;;  %369 = vmatpush.bf16.msra.mxu3 %v307_v3 }
  0x12   :  { %150 = vmatpush.bf16.msra.mxu0 %v306_v4  ;;  %370 = vmatpush.bf16.msra.mxu1 %v306_v4 }
  0x13   :  { %371 = vmatpush.bf16.msra.mxu2 %v306_v4  ;;  %372 = vmatpush.bf16.msra.mxu3 %v306_v4 }
  0x16   :  { %151 = vmatpush.bf16.msra.mxu0 %v305_v5  ;;  %373 = vmatpush.bf16.msra.mxu1 %v305_v5 }
  0x17   :  { %374 = vmatpush.bf16.msra.mxu2 %v305_v5  ;;  %375 = vmatpush.bf16.msra.mxu3 %v305_v5 }
  0x1a   :  { %152 = vmatpush.bf16.msra.mxu0 %v304_v6  ;;  %376 = vmatpush.bf16.msra.mxu1 %v304_v6 }
  0x1b   :  { %377 = vmatpush.bf16.msra.mxu2 %v304_v6  ;;  %378 = vmatpush.bf16.msra.mxu3 %v304_v6 }
  0x1e   :  { %153 = vmatpush.bf16.msra.mxu0 %v303_v7  ;;  %379 = vmatpush.bf16.msra.mxu1 %v303_v7 }
  0x1f   :  { %380 = vmatpush.bf16.msra.mxu2 %v303_v7  ;;  %381 = vmatpush.bf16.msra.mxu3 %v303_v7 }
  0x21   :  { %154 = vmatmul.bf16.vlgmr.msra.gmra.mxu0 %v295_v8  ;;  %164 = vmatmul.bf16.vlgmr.msra.gmra.mxu1 %v297_v9 }
  0x22   :  { %174 = vmatmul.bf16.vlgmr.msra.gmra.mxu2 %v299_v10  ;;  %184 = vmatmul.bf16.vlgmr.msra.gmra.mxu3 %v301_v11 }
  0x31   :  { %159 = vmatmul.bf16.gmra.mxu0 %v296_v12  ;;  %169 = vmatmul.bf16.gmra.mxu1 %v298_v13 }
  0x32   :  { %179 = vmatmul.bf16.gmra.mxu2 %v300_v14  ;;  %189 = vmatmul.bf16.gmra.mxu3 %v302_v15 }
  0x9e   :  { %v155_v16 = vpop.f32.mrf.mxu0  ;;  %v165_v17 = vpop.f32.mrf.mxu1 }
  0x9f   :  { %v156_v23 = vadd.f32 %v382_v18, %v155_v16  ;;  %v166_v24 = vadd.f32 %v382_v18, %v165_v17 }
  0xa5   :  { %v175_v19 = vpop.f32.mrf.mxu2  ;;  %v185_v20 = vpop.f32.mrf.mxu3 }
  0xa6   :  { %v157_v21 = vpop.f32.mrf.mxu0  ;;  %v167_v22 = vpop.f32.mrf.mxu1  ;;  %v176_v31 = vadd.f32 %v382_v18, %v175_v19  ;;  %v186_v32 = vadd.f32 %v382_v18, %v185_v20 }
  0xa7   :  { %v158_v25 = vadd.f32 %v382_v18, %v157_v21  ;;  %v168_v26 = vadd.f32 %v382_v18, %v167_v22 }
  0xa9   :  { %v314_v27 = vpack.c.bf16 %v158_v25, %v156_v23  ;;  %v324_v28 = vpack.c.bf16 %v168_v26, %v166_v24 }
  0xab   :  { %315 = vst [vmem:[%s481_s3] sm:$0xff] %v314_v27  }
  0xac   :  { %352 = vst [vmem:[%s481_s3 + $0x10] sm:$0xff] %v324_v28  }
  0xad   :  { %v177_v29 = vpop.f32.mrf.mxu2  ;;  %v187_v30 = vpop.f32.mrf.mxu3 }
  0xae   :  { %v178_v33 = vadd.f32 %v382_v18, %v177_v29  ;;  %v188_v34 = vadd.f32 %v382_v18, %v187_v30  ;;  %v160_v35 = vpop.f32.mrf.mxu0  ;;  %v170_v36 = vpop.f32.mrf.mxu1 }
  0xaf   :  { %v161_v43 = vadd.f32 %v382_v18, %v160_v35  ;;  %v171_v44 = vadd.f32 %v382_v18, %v170_v36 }
  0xb0   :  { %v334_v37 = vpack.c.bf16 %v178_v33, %v176_v31  ;;  %v344_v38 = vpack.c.bf16 %v188_v34, %v186_v32 }
  0xb2   :  { %354 = vst [vmem:[%s481_s3 + $0x20] sm:$0xff] %v334_v37  }
  0xb3   :  { %356 = vst [vmem:[%s481_s3 + $0x30] sm:$0xff] %v344_v38  }
  0xb5   :  { %v180_v39 = vpop.f32.mrf.mxu2  ;;  %v190_v40 = vpop.f32.mrf.mxu3 }
  0xb6   :  { %v162_v41 = vpop.f32.mrf.mxu0  ;;  %v172_v42 = vpop.f32.mrf.mxu1  ;;  %v181_v51 = vadd.f32 %v382_v18, %v180_v39  ;;  %v191_v52 = vadd.f32 %v382_v18, %v190_v40 }
  0xb7   :  { %v163_v45 = vadd.f32 %v382_v18, %v162_v41  ;;  %v173_v46 = vadd.f32 %v382_v18, %v172_v42 }
  0xb9   :  { %v319_v47 = vpack.c.bf16 %v163_v45, %v161_v43  ;;  %v329_v48 = vpack.c.bf16 %v173_v46, %v171_v44 }
  0xbb   :  { %351 = vst [vmem:[%s481_s3 + $0x8] sm:$0xff] %v319_v47  }
  0xbc   :  { %353 = vst [vmem:[%s481_s3 + $0x18] sm:$0xff] %v329_v48  }
  0xbd   :  { %v182_v49 = vpop.f32.mrf.mxu2  ;;  %v192_v50 = vpop.f32.mrf.mxu3 }
  0xbe   :  { %v183_v53 = vadd.f32 %v382_v18, %v182_v49  ;;  %v193_v54 = vadd.f32 %v382_v18, %v192_v50 }
  0xc0   :  { %v339_v55 = vpack.c.bf16 %v183_v53, %v181_v51  ;;  %v349_v56 = vpack.c.bf16 %v193_v54, %v191_v52 }
  0xc2   :  { %355 = vst [vmem:[%s481_s3 + $0x28] sm:$0xff] %v339_v55  }
  0xc3   :  { %357 = vst [vmem:[%s481_s3 + $0x38] sm:$0xff] %v349_v56  }

// kernel: generator_forward.44
= control target key start
LH: loop header
LB: loop body
LE: loop exit
PB: predicated region body
PF: predicated region fallthrough
CT: control target
= control target key end

     0   :  { %vm83_vm0 = vcmask 130048   ;;  %s379_s1 = inlined_call_operand.vmem [shape: bf16[16,128], index: 1, kind: input, shape index: {}]   ;;  %s380_s0 = inlined_call_operand.vmem [shape: bf16[128,16], index: 0, kind: input, shape index: {}]   ;;  %s381_s2 = inlined_call_operand.vmem [shape: f32[1,128], index: 2, kind: input, shape index: {}]   ;;  %s382_s3 = inlined_call_operand.vmem [shape: bf16[128,128], index: 3, kind: output, shape index: {}]  }
   0x1   :  { %v245_v0 = vld [vmem:[%s379_s1] sm:$0xff]  ;;  %v239_v2 = vld [vmem:[%s380_s0 + $0x10] sm:$0xff]  ;;  %v238_v5 = vld [vmem:[%s380_s0 + $0x8] sm:$0xff] }
   0x2   :  { %v237_v1 = vld [vmem:[%s380_s0] sm:$0xff]  ;;  %115 = vmatpush.bf16.msra.mxu0 %v245_v0  ;;  %293 = vmatpush.bf16.msra.mxu1 %v245_v0  ;;  %v243_v4 = vld [vmem:[%s380_s0 + $0x30] sm:$0xff]  ;;  %v240_v6 = vld [vmem:[%s380_s0 + $0x18] sm:$0xff] }
   0x3   :  { %v241_v3 = vld [vmem:[%s380_s0 + $0x20] sm:$0xff]  ;;  %294 = vmatpush.bf16.msra.mxu2 %v245_v0  ;;  %295 = vmatpush.bf16.msra.mxu3 %v245_v0  ;;  %v242_v7 = vld [vmem:[%s380_s0 + $0x28] sm:$0xff]  ;;  %v244_v8 = vld [vmem:[%s380_s0 + $0x38] sm:$0xff] }
   0x4   :  { %v296_v11 = vld [vmem:[%s381_s2] ss:$0 sm:$0xff] }
   0x5   :  { %229 = vmatmul.msk.bf16.vlgmr.msra.gmra.mxu0 %vm83_vm0, %v237_v1  ;;  %231 = vmatmul.msk.bf16.vlgmr.msra.gmra.mxu1 %vm83_vm0, %v239_v2 }
   0x6   :  { %233 = vmatmul.msk.bf16.vlgmr.msra.gmra.mxu2 %vm83_vm0, %v241_v3  ;;  %235 = vmatmul.msk.bf16.vlgmr.msra.gmra.mxu3 %vm83_vm0, %v243_v4 }
  0x15   :  { %230 = vmatmul.msk.bf16.gmra.mxu0 %vm83_vm0, %v238_v5  ;;  %232 = vmatmul.msk.bf16.gmra.mxu1 %vm83_vm0, %v240_v6 }
  0x16   :  { %234 = vmatmul.msk.bf16.gmra.mxu2 %vm83_vm0, %v242_v7  ;;  %236 = vmatmul.msk.bf16.gmra.mxu3 %vm83_vm0, %v244_v8 }
  0x82   :  { %v117_v9 = vpop.f32.mrf.mxu0  ;;  %v127_v10 = vpop.f32.mrf.mxu1 }
  0x83   :  { %v118_v16 = vadd.f32 %v296_v11, %v117_v9  ;;  %v128_v17 = vadd.f32 %v296_v11, %v127_v10 }
  0x89   :  { %v137_v12 = vpop.f32.mrf.mxu2  ;;  %v147_v13 = vpop.f32.mrf.mxu3 }
  0x8a   :  { %v119_v14 = vpop.f32.mrf.mxu0  ;;  %v129_v15 = vpop.f32.mrf.mxu1  ;;  %v138_v24 = vadd.f32 %v296_v11, %v137_v12  ;;  %v148_v25 = vadd.f32 %v296_v11, %v147_v13 }
  0x8b   :  { %v120_v18 = vadd.f32 %v296_v11, %v119_v14  ;;  %v130_v19 = vadd.f32 %v296_v11, %v129_v15 }
  0x8d   :  { %v249_v20 = vpack.c.bf16 %v120_v18, %v118_v16  ;;  %v259_v21 = vpack.c.bf16 %v130_v19, %v128_v17 }
  0x8f   :  { %250 = vst [vmem:[%s382_s3] sm:$0xff] %v249_v20  }
  0x90   :  { %287 = vst [vmem:[%s382_s3 + $0x10] sm:$0xff] %v259_v21  }
  0x91   :  { %v139_v22 = vpop.f32.mrf.mxu2  ;;  %v149_v23 = vpop.f32.mrf.mxu3 }
  0x92   :  { %v140_v26 = vadd.f32 %v296_v11, %v139_v22  ;;  %v150_v27 = vadd.f32 %v296_v11, %v149_v23  ;;  %v122_v28 = vpop.f32.mrf.mxu0  ;;  %v132_v29 = vpop.f32.mrf.mxu1 }
  0x93   :  { %v123_v36 = vadd.f32 %v296_v11, %v122_v28  ;;  %v133_v37 = vadd.f32 %v296_v11, %v132_v29 }
  0x94   :  { %v269_v30 = vpack.c.bf16 %v140_v26, %v138_v24  ;;  %v279_v31 = vpack.c.bf16 %v150_v27, %v148_v25 }
  0x96   :  { %289 = vst [vmem:[%s382_s3 + $0x20] sm:$0xff] %v269_v30  }
  0x97   :  { %291 = vst [vmem:[%s382_s3 + $0x30] sm:$0xff] %v279_v31  }
  0x99   :  { %v142_v32 = vpop.f32.mrf.mxu2  ;;  %v152_v33 = vpop.f32.mrf.mxu3 }
  0x9a   :  { %v124_v34 = vpop.f32.mrf.mxu0  ;;  %v134_v35 = vpop.f32.mrf.mxu1  ;;  %v143_v44 = vadd.f32 %v296_v11, %v142_v32  ;;  %v153_v45 = vadd.f32 %v296_v11, %v152_v33 }
  0x9b   :  { %v125_v38 = vadd.f32 %v296_v11, %v124_v34  ;;  %v135_v39 = vadd.f32 %v296_v11, %v134_v35 }
  0x9d   :  { %v254_v40 = vpack.c.bf16 %v125_v38, %v123_v36  ;;  %v264_v41 = vpack.c.bf16 %v135_v39, %v133_v37 }
  0x9f   :  { %286 = vst [vmem:[%s382_s3 + $0x8] sm:$0xff] %v254_v40  }
  0xa0   :  { %288 = vst [vmem:[%s382_s3 + $0x18] sm:$0xff] %v264_v41  }
  0xa1   :  { %v144_v42 = vpop.f32.mrf.mxu2  ;;  %v154_v43 = vpop.f32.mrf.mxu3 }
  0xa2   :  { %v145_v46 = vadd.f32 %v296_v11, %v144_v42  ;;  %v155_v47 = vadd.f32 %v296_v11, %v154_v43 }
  0xa4   :  { %v274_v48 = vpack.c.bf16 %v145_v46, %v143_v44  ;;  %v284_v49 = vpack.c.bf16 %v155_v47, %v153_v45 }
  0xa6   :  { %290 = vst [vmem:[%s382_s3 + $0x28] sm:$0xff] %v274_v48  }
  0xa7   :  { %292 = vst [vmem:[%s382_s3 + $0x38] sm:$0xff] %v284_v49  }

// kernel: generator_forward.49
= control target key start
LH: loop header
LB: loop body
LE: loop exit
PB: predicated region body
PF: predicated region fallthrough
CT: control target
= control target key end

     0   :  { %s1976_s12 = smov 0   ;;  %s1978_s13 = smov 0   ;;  %s2305_s0 = inlined_call_operand.vmem [shape: bf16[512,392], index: 0, kind: input, shape index: {}]   ;;  %s2306_s1 = inlined_call_operand.vmem [shape: bf16[392,128], index: 1, kind: input, shape index: {}]   ;;  %s2307_s2 = inlined_call_operand.vmem [shape: f32[1,128], index: 2, kind: input, shape index: {}]   ;;  %s2308_s3 = inlined_call_operand.vmem [shape: f32[512,128], index: 3, kind: output, shape index: {}]  }
   0x1   :  { %s1980_s14 = smov 0  }
   0x2 LB: > { %s25_s15 = sadd.s32 1, %s1950_s13  ;;  %p1378_p0 = scmp.ge.s32.totalorder %s1954_s14, 1  ;;  %s1954_s14 = sphi %s1980_s14, %s13_s14   ;;  %s1950_s13 = sphi %s1978_s13, %s2310_s13   ;;  %s1946_s12 = sphi %s1976_s12, %s2309_s12  }
   0x3   : > { %p27_p1 = scmp.ge.s32.totalorder %s25_s15, 2  ;;  %p170_p2 = scmp.lt.s32.totalorder %s1954_s14, 3 }
   0x5   : > { %s2312_s15 = smov (%p27_p1, %s25_s15), 0  ;;  %p171_p3 = pnand %p1378_p0, %p170_p2 }
   0x6   : > { %s1379_s22 = sshll.u32 (!%p171_p3), %s1946_s12, 5 }
   0x7   : > { %174 = sbr.rel (%p171_p3) target bundleno = 438 (0x1b6), region = 32  ;;  %p206_p4 = scmp.lt.s32.totalorder (!%p171_p3), %s1379_s22, 63 }
   0xc   : > { %v1826_v0 = vld [vmem:[%s2306_s1 + $0x38] sm:$0xff]  ;;  %v1825_v3 = vld [vmem:[%s2306_s1 + $0x30] sm:$0xff]  ;;  %s2314_s22 = smov (!%p206_p4, %s1379_s22), 63  ;;  %v1824_v6 = vld [vmem:[%s2306_s1 + $0x28] sm:$0xff]  ;;  %vm846_vm0 = vcmask 1043456   ;;  %vm797_vm1 = vcmask 64512  }
   0xd   : > { %v1834_v1 = vld [vmem:[%s2306_s1 + $0x78] sm:$0xff]  ;;  %850 = vmatpush.bf16.msra.mxu0 %v1826_v0  ;;  %v1833_v4 = vld [vmem:[%s2306_s1 + $0x70] sm:$0xff]  ;;  %s1754_s29 = sshll.u32 %s2314_s22, 4  ;;  %v1832_v7 = vld [vmem:[%s2306_s1 + $0x68] sm:$0xff]  ;;  %s1383_s28 = sshll.u32 %s2314_s22, 3 }
   0xe   : > { %v1842_v2 = vld [vmem:[%s2306_s1 + $0xb8] sm:$0xff]  ;;  %939 = vmatpush.bf16.msra.mxu1 %v1834_v1  ;;  %v1841_v5 = vld [vmem:[%s2306_s1 + $0xb0] sm:$0xff]  ;;  %v341_v8 = vld [vmem:[%s2306_s1 + $0xc0] sm:$0xf]  ;;  %s2027_s11 = scalar_lea.vmem %s2305_s0, %s1754_s29  ;;  %s2180_s4 = scalar_lea.vmem %s2308_s3, %s1383_s28 }
   0xf   : > { %1028 = vmatpush.bf16.msra.mxu2 %v1842_v2  ;;  %v1840_v9 = vld [vmem:[%s2306_s1 + $0xa8] sm:$0xff]  ;;  %v747_v10 = vunpack.c.l.b16 %v341_v8  ;;  %v1396_v12 = vld [vmem:[%s2027_s11 + $0x18] sm:$0xf0]  ;;  %v1823_v14 = vld [vmem:[%s2306_s1 + $0x20] sm:$0xff] }
  0x10   : > { %v1756_v11 = vld [vmem:[%s2027_s11 + $0xc] sm:$0xf]  ;;  %v1831_v15 = vld [vmem:[%s2306_s1 + $0x60] sm:$0xff]  ;;  %v1822_v19 = vld [vmem:[%s2306_s1 + $0x18] sm:$0xff] }
  0x11   : > { %851 = vmatpush.bf16.msra.mxu0 %v1825_v3  ;;  %v772_v13 = vpack.c.b16 %v747_v10, %v747_v10  ;;  %v1839_v16 = vld [vmem:[%s2306_s1 + $0xa0] sm:$0xff]  ;;  %v1399_v18 = vor.u32 %v1756_v11, %v1396_v12  ;;  %v1830_v20 = vld [vmem:[%s2306_s1 + $0x58] sm:$0xff]  ;;  %v1821_v22 = vld [vmem:[%s2306_s1 + $0x10] sm:$0xff] }
  0x12   : > { %940 = vmatpush.bf16.msra.mxu1 %v1833_v4  ;;  %v1838_v21 = vld [vmem:[%s2306_s1 + $0x98] sm:$0xff]  ;;  %v1829_v23 = vld [vmem:[%s2306_s1 + $0x50] sm:$0xff]  ;;  %v1820_v25 = vld [vmem:[%s2306_s1 + $0x8] sm:$0xff] }
  0x13   : > { %1029 = vmatpush.bf16.msra.mxu2 %v1841_v5  ;;  %v848_v17 = vsel %vm846_vm0, %v772_v13, 0  ;;  %v1837_v24 = vld [vmem:[%s2306_s1 + $0x90] sm:$0xff]  ;;  %v1828_v26 = vld [vmem:[%s2306_s1 + $0x48] sm:$0xff]  ;;  %v1412_v29 = vld [vmem:[%s2027_s11 + $0x38] sm:$0xf0] }
  0x14   : > { %1124 = vmatpush.bf16.msra.mxu3 %v848_v17  ;;  %v1836_v27 = vld [vmem:[%s2306_s1 + $0x88] sm:$0xff]  ;;  %v1819_v30 = vld [vmem:[%s2306_s1] sm:$0xff]  ;;  %v1757_v33 = vld [vmem:[%s2027_s11 + $0xc] sm:$0xf0] }
  0x15   : > { %852 = vmatpush.bf16.msra.mxu0 %v1824_v6  ;;  %v1760_v28 = vld [vmem:[%s2027_s11 + $0x2c] sm:$0xf]  ;;  %v1827_v31 = vld [vmem:[%s2306_s1 + $0x40] sm:$0xff]  ;;  %v1388_v35 = vld [vmem:[%s2027_s11 + $0x10] sm:$0xf0] }
  0x16   : > { %941 = vmatpush.bf16.msra.mxu1 %v1832_v7  ;;  %v1386_v32 = vld [vmem:[%s2027_s11] sm:$0xf]  ;;  %v1755_v34 = vld [vmem:[%s2027_s11 + $0x4] sm:$0xf]  ;;  %v1394_v37 = vld [vmem:[%s2027_s11 + $0x8] sm:$0xf]  ;;  %v1415_v39 = vor.u32 %v1760_v28, %v1412_v29 }
  0x17   : > { %1030 = vmatpush.bf16.msra.mxu2 %v1840_v9  ;;  %1736 = vmatmul.msk.bf16.vlgmr.msra.gmra.mxu3 %vm797_vm1, %v1399_v18  ;;  %v1835_v36 = vld [vmem:[%s2306_s1 + $0x80] sm:$0xff]  ;;  %v1758_v38 = vld [vmem:[%s2027_s11 + $0x14] sm:$0xf0]  ;;  %v1387_v40 = vor.u32 %v1757_v33, %v1386_v32  ;;  %v1391_v41 = vor.u32 %v1755_v34, %v1388_v35  ;;  %v1764_v43 = vld [vmem:[%s2027_s11 + $0x4c] sm:$0xf] }
  0x18   : > { %v1395_v42 = vor.u32 %v1758_v38, %v1394_v37  ;;  %v1428_v44 = vld [vmem:[%s2027_s11 + $0x58] sm:$0xf0]  ;;  %v1402_v45 = vld [vmem:[%s2027_s11 + $0x20] sm:$0xf]  ;;  %v1761_v46 = vld [vmem:[%s2027_s11 + $0x2c] sm:$0xf0] }
  0x19   : > { %853 = vmatpush.bf16.msra.mxu0 %v1823_v14  ;;  %v1759_v47 = vld [vmem:[%s2027_s11 + $0x24] sm:$0xf]  ;;  %v1404_v48 = vld [vmem:[%s2027_s11 + $0x30] sm:$0xf0]  ;;  %v1410_v49 = vld [vmem:[%s2027_s11 + $0x28] sm:$0xf]  ;;  %v1431_v51 = vor.u32 %v1764_v43, %v1428_v44  ;;  %v1403_v52 = vor.u32 %v1761_v46, %v1402_v45 }
  0x1a   : > { %942 = vmatpush.bf16.msra.mxu1 %v1831_v15  ;;  %v1762_v50 = vld [vmem:[%s2027_s11 + $0x34] sm:$0xf0]  ;;  %v1407_v53 = vor.u32 %v1759_v47, %v1404_v48  ;;  %v1768_v55 = vld [vmem:[%s2027_s11 + $0x6c] sm:$0xf]  ;;  %v1444_v56 = vld [vmem:[%s2027_s11 + $0x78] sm:$0xf0] }
  0x1b   : > { %1031 = vmatpush.bf16.msra.mxu2 %v1839_v16  ;;  %v1411_v54 = vor.u32 %v1762_v50, %v1410_v49  ;;  %v1418_v57 = vld [vmem:[%s2027_s11 + $0x40] sm:$0xf]  ;;  %v1765_v58 = vld [vmem:[%s2027_s11 + $0x4c] sm:$0xf0]  ;;  %v1763_v59 = vld [vmem:[%s2027_s11 + $0x44] sm:$0xf]  ;;  %v1447_v63 = vor.u32 %v1768_v55, %v1444_v56 }
  0x1c   : > { %v1420_v60 = vld [vmem:[%s2027_s11 + $0x50] sm:$0xf0]  ;;  %v1426_v61 = vld [vmem:[%s2027_s11 + $0x48] sm:$0xf]  ;;  %v1766_v62 = vld [vmem:[%s2027_s11 + $0x54] sm:$0xf0]  ;;  %v1419_v0 = vor.u32 %v1765_v58, %v1418_v57 }
  0x1d   : > { %854 = vmatpush.bf16.msra.mxu0 %v1822_v19  ;;  %v1423_v1 = vor.u32 %v1763_v59, %v1420_v60  ;;  %v1427_v2 = vor.u32 %v1766_v62, %v1426_v61  ;;  %v1772_v3 = vld [vmem:[%s2027_s11 + $0x8c] sm:$0xf]  ;;  %v1460_v4 = vld [vmem:[%s2027_s11 + $0x98] sm:$0xf0]  ;;  %v1434_v5 = vld [vmem:[%s2027_s11 + $0x60] sm:$0xf] }
  0x1e   : > { %943 = vmatpush.bf16.msra.mxu1 %v1830_v20  ;;  %v1769_v6 = vld [vmem:[%s2027_s11 + $0x6c] sm:$0xf0]  ;;  %v1767_v7 = vld [vmem:[%s2027_s11 + $0x64] sm:$0xf]  ;;  %v1436_v8 = vld [vmem:[%s2027_s11 + $0x70] sm:$0xf0]  ;;  %v1463_v11 = vor.u32 %v1772_v3, %v1460_v4 }
  0x1f   : > { %1032 = vmatpush.bf16.msra.mxu2 %v1838_v21  ;;  %v1442_v9 = vld [vmem:[%s2027_s11 + $0x68] sm:$0xf]  ;;  %v1770_v10 = vld [vmem:[%s2027_s11 + $0x74] sm:$0xf0]  ;;  %v1435_v12 = vor.u32 %v1769_v6, %v1434_v5  ;;  %v1439_v13 = vor.u32 %v1767_v7, %v1436_v8  ;;  %v1776_v15 = vld [vmem:[%s2027_s11 + $0xac] sm:$0xf] }
  0x20   : > { %v1443_v14 = vor.u32 %v1770_v10, %v1442_v9  ;;  %v1476_v16 = vld [vmem:[%s2027_s11 + $0xb8] sm:$0xf0]  ;;  %v1450_v17 = vld [vmem:[%s2027_s11 + $0x80] sm:$0xf]  ;;  %v1773_v18 = vld [vmem:[%s2027_s11 + $0x8c] sm:$0xf0] }
  0x21   : > { %855 = vmatpush.bf16.msra.mxu0 %v1821_v22  ;;  %v1771_v19 = vld [vmem:[%s2027_s11 + $0x84] sm:$0xf]  ;;  %v1452_v20 = vld [vmem:[%s2027_s11 + $0x90] sm:$0xf0]  ;;  %v1458_v21 = vld [vmem:[%s2027_s11 + $0x88] sm:$0xf] }
  0x22   : > { %944 = vmatpush.bf16.msra.mxu1 %v1829_v23  ;;  %v1774_v22 = vld [vmem:[%s2027_s11 + $0x94] sm:$0xf0]  ;;  %v1479_v23 = vor.u32 %v1776_v15, %v1476_v16  ;;  %v1492_v28 = vld [vmem:[%s2027_s11 + $0xd8] sm:$0xf0]  ;;  %v1466_v29 = vld [vmem:[%s2027_s11 + $0xa0] sm:$0xf] }
  0x23   : > { %1033 = vmatpush.bf16.msra.mxu2 %v1837_v24  ;;  %v1451_v24 = vor.u32 %v1773_v18, %v1450_v17  ;;  %v1468_v32 = vld [vmem:[%s2027_s11 + $0xb0] sm:$0xf0]  ;;  %v1474_v33 = vld [vmem:[%s2027_s11 + $0xa8] sm:$0xf]  ;;  %v1778_v34 = vld [vmem:[%s2027_s11 + $0xb4] sm:$0xf0] }
  0x24   : > { %v1475_v38 = vor.u32 %v1778_v34, %v1474_v33  ;;  %v1779_v43 = vld [vmem:[%s2027_s11 + $0xc4] sm:$0xf]  ;;  %v1484_v44 = vld [vmem:[%s2027_s11 + $0xd0] sm:$0xf0]  ;;  %v1490_v45 = vld [vmem:[%s2027_s11 + $0xc8] sm:$0xf] }
  0x25   : > { %856 = vmatpush.bf16.msra.mxu0 %v1820_v25  ;;  %v1455_v25 = vor.u32 %v1771_v19, %v1452_v20  ;;  %v1782_v46 = vld [vmem:[%s2027_s11 + $0xd4] sm:$0xf0]  ;;  %v1487_v49 = vor.u32 %v1779_v43, %v1484_v44  ;;  %v1783_v55 = vld [vmem:[%s2027_s11 + $0xe4] sm:$0xf]  ;;  %v1500_v56 = vld [vmem:[%s2027_s11 + $0xf0] sm:$0xf0] }
  0x26   : > { %945 = vmatpush.bf16.msra.mxu1 %v1828_v26  ;;  %v1459_v26 = vor.u32 %v1774_v22, %v1458_v21  ;;  %v1491_v50 = vor.u32 %v1782_v46, %v1490_v45  ;;  %v1506_v57 = vld [vmem:[%s2027_s11 + $0xe8] sm:$0xf]  ;;  %v1786_v58 = vld [vmem:[%s2027_s11 + $0xf4] sm:$0xf0]  ;;  %v1503_v61 = vor.u32 %v1783_v55, %v1500_v56  ;;  %v1789_v3 = vld [vmem:[%s2027_s11 + $0x10c] sm:$0xf0] }
  0x27   : > { %1034 = vmatpush.bf16.msra.mxu2 %v1836_v27  ;;  %1737 = vmatmul.msk.bf16.gmra.mxu3 %vm797_vm1, %v1415_v39  ;;  %v1780_v27 = vld [vmem:[%s2027_s11 + $0xcc] sm:$0xf]  ;;  %v1507_v62 = vor.u32 %v1786_v58, %v1506_v57  ;;  %v1787_v4 = vld [vmem:[%s2027_s11 + $0x104] sm:$0xf]  ;;  %v1516_v5 = vld [vmem:[%s2027_s11 + $0x110] sm:$0xf0] }
  0x28   : > { %v1495_v35 = vor.u32 %v1780_v27, %v1492_v28  ;;  %v1784_v39 = vld [vmem:[%s2027_s11 + $0xec] sm:$0xf]  ;;  %v2161_v7 = vld [vmem:[%s2307_s2] ss:$0 sm:$0xff]  ;;  %v1522_v8 = vld [vmem:[%s2027_s11 + $0x108] sm:$0xf] }
  0x29   : > { %857 = vmatpush.bf16.msra.mxu0 %v1819_v30  ;;  %v1777_v30 = vld [vmem:[%s2027_s11 + $0xac] sm:$0xf0]  ;;  %v1790_v9 = vld [vmem:[%s2027_s11 + $0x114] sm:$0xf0]  ;;  %v1530_v27 = vld [vmem:[%s2027_s11 + $0x120] sm:$0xf] }
  0x2a   : > { %946 = vmatpush.bf16.msra.mxu1 %v1827_v31  ;;  %v1775_v31 = vld [vmem:[%s2027_s11 + $0xa4] sm:$0xf]  ;;  %v1523_v15 = vor.u32 %v1790_v9, %v1522_v8  ;;  %v1793_v28 = vld [vmem:[%s2027_s11 + $0x12c] sm:$0xf0]  ;;  %v1794_v33 = vld [vmem:[%s2027_s11 + $0x134] sm:$0xf0] }
  0x2b   : > { %1035 = vmatpush.bf16.msra.mxu2 %v1835_v36  ;;  %v1467_v36 = vor.u32 %v1777_v30, %v1466_v29  ;;  %v1471_v37 = vor.u32 %v1775_v31, %v1468_v32  ;;  %v1791_v29 = vld [vmem:[%s2027_s11 + $0x124] sm:$0xf]  ;;  %v1532_v30 = vld [vmem:[%s2027_s11 + $0x130] sm:$0xf0]  ;;  %v1538_v32 = vld [vmem:[%s2027_s11 + $0x128] sm:$0xf] }
  0x2c   : > { %858 = vmatmul.bf16.vlgmr.msra.gmra.mxu0 %v1387_v40  ;;  %v1508_v40 = vld [vmem:[%s2027_s11 + $0xf8] sm:$0xf0]  ;;  %v1800_v55 = vld [vmem:[%s2027_s11 + $0x16c] sm:$0xf]  ;;  %v1546_v57 = vld [vmem:[%s2027_s11 + $0x140] sm:$0xf] }
  0x2d   : > { %947 = vmatmul.bf16.vlgmr.msra.gmra.mxu1 %v1391_v41  ;;  %v1482_v41 = vld [vmem:[%s2027_s11 + $0xc0] sm:$0xf]  ;;  %v1511_v47 = vor.u32 %v1784_v39, %v1508_v40  ;;  %v1572_v56 = vld [vmem:[%s2027_s11 + $0x178] sm:$0xf0]  ;;  %v1797_v58 = vld [vmem:[%s2027_s11 + $0x14c] sm:$0xf0] }
  0x2e   : > { %1036 = vmatmul.bf16.vlgmr.msra.gmra.mxu2 %v1395_v42  ;;  %v1781_v42 = vld [vmem:[%s2027_s11 + $0xcc] sm:$0xf0] }
  0x2f   : > { %v1483_v48 = vor.u32 %v1781_v42, %v1482_v41  ;;  %v1539_v42 = vor.u32 %v1794_v33, %v1538_v32 }
  0x37   : > { %1738 = vmatmul.msk.bf16.gmra.mxu3 %vm797_vm1, %v1431_v51  ;;  %v1788_v51 = vld [vmem:[%s2027_s11 + $0x10c] sm:$0xf] }
  0x3c   : > { %863 = vmatmul.bf16.gmra.mxu0 %v1403_v52  ;;  %v1524_v52 = vld [vmem:[%s2027_s11 + $0x118] sm:$0xf0] }
  0x3d   : > { %952 = vmatmul.bf16.gmra.mxu1 %v1407_v53  ;;  %v1498_v53 = vld [vmem:[%s2027_s11 + $0xe0] sm:$0xf]  ;;  %v1527_v59 = vor.u32 %v1788_v51, %v1524_v52 }
  0x3e   : > { %1041 = vmatmul.bf16.gmra.mxu2 %v1411_v54  ;;  %v1785_v54 = vld [vmem:[%s2027_s11 + $0xec] sm:$0xf0] }
  0x3f   : > { %v1499_v60 = vor.u32 %v1785_v54, %v1498_v53 }
  0x47   : > { %1739 = vmatmul.msk.bf16.gmra.mxu3 %vm797_vm1, %v1447_v63 }
  0x4c   : > { %868 = vmatmul.bf16.gmra.mxu0 %v1419_v0  ;;  %v1792_v0 = vld [vmem:[%s2027_s11 + $0x12c] sm:$0xf] }
  0x4d   : > { %957 = vmatmul.bf16.gmra.mxu1 %v1423_v1  ;;  %v1540_v1 = vld [vmem:[%s2027_s11 + $0x138] sm:$0xf0] }
  0x4e   : > { %1046 = vmatmul.bf16.gmra.mxu2 %v1427_v2  ;;  %v1514_v2 = vld [vmem:[%s2027_s11 + $0x100] sm:$0xf]  ;;  %v1543_v10 = vor.u32 %v1792_v0, %v1540_v1  ;;  %v1575_v0 = vor.u32 %v1800_v55, %v1572_v56  ;;  %v1805_v55 = vld [vmem:[%s2027_s11 + $0x18c] sm:$0xf0]  ;;  %v1803_v56 = vld [vmem:[%s2027_s11 + $0x184] sm:$0xf] }
  0x57   : > { %1740 = vmatmul.msk.bf16.gmra.mxu3 %vm797_vm1, %v1463_v11  ;;  %v1515_v11 = vor.u32 %v1789_v3, %v1514_v2  ;;  %v1547_v3 = vor.u32 %v1797_v58, %v1546_v57  ;;  %v1580_v57 = vld [vmem:[%s2027_s11 + $0x190] sm:$0xf0] }
  0x5c   : > { %873 = vmatmul.bf16.gmra.mxu0 %v1435_v12  ;;  %v1519_v12 = vor.u32 %v1787_v4, %v1516_v5 }
  0x5d   : > { %962 = vmatmul.bf16.gmra.mxu1 %v1439_v13 }
  0x5e   : > { %1051 = vmatmul.bf16.gmra.mxu2 %v1443_v14 }
  0x67   : > { %1741 = vmatmul.msk.bf16.gmra.mxu3 %vm797_vm1, %v1479_v23 }
  0x6c   : > { %878 = vmatmul.bf16.gmra.mxu0 %v1451_v24 }
  0x6d   : > { %967 = vmatmul.bf16.gmra.mxu1 %v1455_v25  ;;  %v1796_v25 = vld [vmem:[%s2027_s11 + $0x14c] sm:$0xf] }
  0x6e   : > { %1056 = vmatmul.bf16.gmra.mxu2 %v1459_v26  ;;  %v1556_v26 = vld [vmem:[%s2027_s11 + $0x158] sm:$0xf0] }
  0x6f   : > { %v1559_v34 = vor.u32 %v1796_v25, %v1556_v26  ;;  %v1801_v25 = vld [vmem:[%s2027_s11 + $0x16c] sm:$0xf0]  ;;  %v1799_v26 = vld [vmem:[%s2027_s11 + $0x164] sm:$0xf] }
  0x77   : > { %1742 = vmatmul.msk.bf16.gmra.mxu3 %vm797_vm1, %v1495_v35 }
  0x7c   : > { %883 = vmatmul.bf16.gmra.mxu0 %v1467_v36 }
  0x7d   : > { %972 = vmatmul.bf16.gmra.mxu1 %v1471_v37  ;;  %v1531_v37 = vor.u32 %v1793_v28, %v1530_v27  ;;  %v1564_v27 = vld [vmem:[%s2027_s11 + $0x170] sm:$0xf0] }
  0x7e   : > { %1061 = vmatmul.bf16.gmra.mxu2 %v1475_v38  ;;  %v1535_v38 = vor.u32 %v1791_v29, %v1532_v30  ;;  %v1570_v29 = vld [vmem:[%s2027_s11 + $0x168] sm:$0xf]  ;;  %v1802_v30 = vld [vmem:[%s2027_s11 + $0x174] sm:$0xf0] }
  0x87   : > { %1743 = vmatmul.msk.bf16.gmra.mxu3 %vm797_vm1, %v1511_v47 }
  0x8c   : > { %888 = vmatmul.bf16.gmra.mxu0 %v1483_v48 }
  0x8d   : > { %977 = vmatmul.bf16.gmra.mxu1 %v1487_v49 }
  0x8e   : > { %1066 = vmatmul.bf16.gmra.mxu2 %v1491_v50 }
  0x97   : > { %1744 = vmatmul.msk.bf16.gmra.mxu3 %vm797_vm1, %v1527_v59  ;;  %v1795_v59 = vld [vmem:[%s2027_s11 + $0x144] sm:$0xf] }
  0x9a   : > { %v1126_v63 = vpop.f32.mrf.mxu3 }
  0x9c   : > { %893 = vmatmul.bf16.gmra.mxu0 %v1499_v60  ;;  %v1548_v60 = vld [vmem:[%s2027_s11 + $0x150] sm:$0xf0] }
  0x9d   : > { %982 = vmatmul.bf16.gmra.mxu1 %v1503_v61  ;;  %v1551_v4 = vor.u32 %v1795_v59, %v1548_v60  ;;  %v1586_v59 = vld [vmem:[%s2027_s11 + $0x188] sm:$0xf]  ;;  %v1806_v60 = vld [vmem:[%s2027_s11 + $0x194] sm:$0xf0] }
  0x9e   : > { %1071 = vmatmul.bf16.gmra.mxu2 %v1507_v62  ;;  %v1554_v62 = vld [vmem:[%s2027_s11 + $0x148] sm:$0xf] }
  0xa2   : > { %v1128_v6 = vpop.f32.mrf.mxu3 }
  0xa7   : > { %1745 = vmatmul.msk.bf16.gmra.mxu3 %vm797_vm1, %v1543_v10 }
  0xa9   : > { %v859_v13 = vpop.f32.mrf.mxu0 }
  0xaa   : > { %v948_v14 = vpop.f32.mrf.mxu1  ;;  %v860_v16 = vadd.f32 %v2161_v7, %v859_v13  ;;  %v1131_v18 = vpop.f32.mrf.mxu3 }
  0xac   : > { %898 = vmatmul.bf16.gmra.mxu0 %v1515_v11  ;;  %v949_v17 = vadd.f32 %v948_v14, %v860_v16 }
  0xad   : > { %987 = vmatmul.bf16.gmra.mxu1 %v1519_v12 }
  0xae   : > { %1076 = vmatmul.bf16.gmra.mxu2 %v1523_v15 }
  0xb1   : > { %v1037_v19 = vpop.f32.mrf.mxu2  ;;  %v861_v21 = vpop.f32.mrf.mxu0 }
  0xb2   : > { %v1038_v20 = vadd.f32 %v1037_v19, %v949_v17  ;;  %v950_v22 = vpop.f32.mrf.mxu1  ;;  %v862_v24 = vadd.f32 %v2161_v7, %v861_v21  ;;  %v1133_v31 = vpop.f32.mrf.mxu3 }
  0xb4   : > { %v1127_v23 = vadd.f32 %v1126_v63, %v1038_v20  ;;  %v951_v35 = vadd.f32 %v950_v22, %v862_v24  ;;  %v1798_v63 = vld [vmem:[%s2027_s11 + $0x154] sm:$0xf0]  ;;  %v1804_v22 = vld [vmem:[%s2027_s11 + $0x18c] sm:$0xf]  ;;  %v1562_v24 = vld [vmem:[%s2027_s11 + $0x160] sm:$0xf] }
  0xb5   : > { %v1555_v9 = vor.u32 %v1798_v63, %v1554_v62 }
  0xb6   : > { %1868 = vtanh.f32 %v1127_v23  ;;  %v1588_v23 = vld [vmem:[%s2027_s11 + $0x198] sm:$0xf0] }
  0xb7   : > { %1746 = vmatmul.msk.bf16.gmra.mxu3 %vm797_vm1, %v1559_v34  ;;  %v1563_v34 = vor.u32 %v1801_v25, %v1562_v24  ;;  %v1596_v24 = vld [vmem:[%s2027_s11 + $0x1b0] sm:$0xf0] }
  0xb9   : > { %v1039_v36 = vpop.f32.mrf.mxu2  ;;  %v864_v40 = vpop.f32.mrf.mxu0 }
  0xba   : > { %v1040_v39 = vadd.f32 %v1039_v36, %v951_v35  ;;  %v953_v41 = vpop.f32.mrf.mxu1  ;;  %v865_v43 = vadd.f32 %v2161_v7, %v864_v40  ;;  %v1136_v47 = vpop.f32.mrf.mxu3  ;;  %v1567_v35 = vor.u32 %v1799_v26, %v1564_v27  ;;  %v1602_v26 = vld [vmem:[%s2027_s11 + $0x1a8] sm:$0xf]  ;;  %v1810_v27 = vld [vmem:[%s2027_s11 + $0x1b4] sm:$0xf0] }
  0xbc   : > { %v1869_v44 = vpop.eup %1868  ;;  %v1129_v45 = vadd.f32 %v1128_v6, %v1040_v39  ;;  %903 = vmatmul.bf16.gmra.mxu0 %v1531_v37  ;;  %v954_v46 = vadd.f32 %v953_v41, %v865_v43  ;;  %v1571_v39 = vor.u32 %v1802_v30, %v1570_v29 }
  0xbd   : > { %1238 = vst [vmem:[%s2180_s4] sm:$0xff] %v1869_v44  ;;  %992 = vmatmul.bf16.gmra.mxu1 %v1535_v38 }
  0xbe   : > { %1870 = vtanh.f32 %v1129_v45  ;;  %1081 = vmatmul.bf16.gmra.mxu2 %v1539_v42 }
  0xc1   : > { %v1042_v48 = vpop.f32.mrf.mxu2  ;;  %v866_v50 = vpop.f32.mrf.mxu0 }
  0xc2   : > { %v1043_v49 = vadd.f32 %v1042_v48, %v954_v46  ;;  %v955_v51 = vpop.f32.mrf.mxu1  ;;  %v867_v54 = vadd.f32 %v2161_v7, %v866_v50  ;;  %v1138_v61 = vpop.f32.mrf.mxu3 }
  0xc4   : > { %v1871_v52 = vpop.eup %1870  ;;  %v1132_v53 = vadd.f32 %v1131_v18, %v1043_v49  ;;  %v956_v1 = vadd.f32 %v955_v51, %v867_v54  ;;  %v1578_v54 = vld [vmem:[%s2027_s11 + $0x180] sm:$0xf] }
  0xc5   : > { %1239 = vst [vmem:[%s2180_s4 + $0x8] sm:$0xff] %v1871_v52  ;;  %v1808_v52 = vld [vmem:[%s2027_s11 + $0x1ac] sm:$0xf] }
  0xc6   : > { %1872 = vtanh.f32 %v1132_v53  ;;  %v1604_v53 = vld [vmem:[%s2027_s11 + $0x1b8] sm:$0xf0] }
  0xc7   : > { %1747 = vmatmul.msk.bf16.gmra.mxu3 %vm797_vm1, %v1575_v0  ;;  %v1579_v0 = vor.u32 %v1805_v55, %v1578_v54  ;;  %v1612_v54 = vld [vmem:[%s2027_s11 + $0x1d0] sm:$0xf0] }
  0xc9   : > { %v1044_v2 = vpop.f32.mrf.mxu2  ;;  %v869_v6 = vpop.f32.mrf.mxu0 }
  0xca   : > { %v1045_v5 = vadd.f32 %v1044_v2, %v956_v1  ;;  %v958_v8 = vpop.f32.mrf.mxu1  ;;  %v870_v10 = vadd.f32 %v2161_v7, %v869_v6  ;;  %v1141_v14 = vpop.f32.mrf.mxu3  ;;  %v1583_v1 = vor.u32 %v1803_v56, %v1580_v57  ;;  %v1618_v56 = vld [vmem:[%s2027_s11 + $0x1c8] sm:$0xf]  ;;  %v1814_v57 = vld [vmem:[%s2027_s11 + $0x1d4] sm:$0xf0] }
  0xcc   : > { %v1873_v11 = vpop.eup %1872  ;;  %v1134_v12 = vadd.f32 %v1133_v31, %v1045_v5  ;;  %908 = vmatmul.bf16.gmra.mxu0 %v1547_v3  ;;  %v959_v13 = vadd.f32 %v958_v8, %v870_v10  ;;  %v1591_v31 = vor.u32 %v1804_v22, %v1588_v23  ;;  %v1587_v5 = vor.u32 %v1806_v60, %v1586_v59  ;;  %v1809_v22 = vld [vmem:[%s2027_s11 + $0x1ac] sm:$0xf0]  ;;  %v1807_v23 = vld [vmem:[%s2027_s11 + $0x1a4] sm:$0xf] }
  0xcd   : > { %1240 = vst [vmem:[%s2180_s4 + $0x10] sm:$0xff] %v1873_v11  ;;  %997 = vmatmul.bf16.gmra.mxu1 %v1551_v4 }
  0xce   : > { %1874 = vtanh.f32 %v1134_v12  ;;  %1086 = vmatmul.bf16.gmra.mxu2 %v1555_v9 }
  0xd1   : > { %v1047_v15 = vpop.f32.mrf.mxu2  ;;  %v871_v17 = vpop.f32.mrf.mxu0 }
  0xd2   : > { %v1048_v16 = vadd.f32 %v1047_v15, %v959_v13  ;;  %v960_v18 = vpop.f32.mrf.mxu1  ;;  %v872_v21 = vadd.f32 %v2161_v7, %v871_v17  ;;  %v1143_v28 = vpop.f32.mrf.mxu3 }
  0xd4   : > { %v1875_v19 = vpop.eup %1874  ;;  %v1137_v20 = vadd.f32 %v1136_v47, %v1048_v16  ;;  %v961_v32 = vadd.f32 %v960_v18, %v872_v21  ;;  %v1594_v21 = vld [vmem:[%s2027_s11 + $0x1a0] sm:$0xf] }
  0xd5   : > { %1241 = vst [vmem:[%s2180_s4 + $0x18] sm:$0xff] %v1875_v19  ;;  %v1812_v19 = vld [vmem:[%s2027_s11 + $0x1cc] sm:$0xf] }
  0xd6   : > { %1876 = vtanh.f32 %v1137_v20  ;;  %v1620_v20 = vld [vmem:[%s2027_s11 + $0x1d8] sm:$0xf0] }
  0xd7   : > { %1748 = vmatmul.msk.bf16.gmra.mxu3 %vm797_vm1, %v1591_v31  ;;  %v1595_v31 = vor.u32 %v1809_v22, %v1594_v21  ;;  %v1634_v21 = vld [vmem:[%s2027_s11 + $0x1e8] sm:$0xf]  ;;  %v1818_v22 = vld [vmem:[%s2027_s11 + $0x1f4] sm:$0xf0] }
  0xd9   : > { %v1049_v33 = vpop.f32.mrf.mxu2  ;;  %v874_v37 = vpop.f32.mrf.mxu0 }
  0xda   : > { %v1050_v36 = vadd.f32 %v1049_v33, %v961_v32  ;;  %v963_v38 = vpop.f32.mrf.mxu1  ;;  %v875_v40 = vadd.f32 %v2161_v7, %v874_v37  ;;  %v1146_v44 = vpop.f32.mrf.mxu3  ;;  %v1599_v32 = vor.u32 %v1807_v23, %v1596_v24 }
  0xdc   : > { %v1877_v41 = vpop.eup %1876  ;;  %v1139_v42 = vadd.f32 %v1138_v61, %v1050_v36  ;;  %913 = vmatmul.bf16.gmra.mxu0 %v1563_v34  ;;  %v964_v43 = vadd.f32 %v963_v38, %v875_v40  ;;  %v1607_v61 = vor.u32 %v1808_v52, %v1604_v53  ;;  %v1603_v36 = vor.u32 %v1810_v27, %v1602_v26  ;;  %v1813_v52 = vld [vmem:[%s2027_s11 + $0x1cc] sm:$0xf0]  ;;  %v1811_v53 = vld [vmem:[%s2027_s11 + $0x1c4] sm:$0xf] }
  0xdd   : > { %1242 = vst [vmem:[%s2180_s4 + $0x20] sm:$0xff] %v1877_v41  ;;  %1002 = vmatmul.bf16.gmra.mxu1 %v1567_v35 }
  0xde   : > { %1878 = vtanh.f32 %v1139_v42  ;;  %1091 = vmatmul.bf16.gmra.mxu2 %v1571_v39 }
  0xe1   : > { %v1052_v45 = vpop.f32.mrf.mxu2  ;;  %v876_v47 = vpop.f32.mrf.mxu0 }
  0xe2   : > { %v1053_v46 = vadd.f32 %v1052_v45, %v964_v43  ;;  %v965_v48 = vpop.f32.mrf.mxu1  ;;  %v877_v51 = vadd.f32 %v2161_v7, %v876_v47  ;;  %v1148_v58 = vpop.f32.mrf.mxu3 }
  0xe4   : > { %v1879_v49 = vpop.eup %1878  ;;  %v1142_v50 = vadd.f32 %v1141_v14, %v1053_v46  ;;  %v966_v62 = vadd.f32 %v965_v48, %v877_v51  ;;  %v1610_v51 = vld [vmem:[%s2027_s11 + $0x1c0] sm:$0xf] }
  0xe5   : > { %1243 = vst [vmem:[%s2180_s4 + $0x28] sm:$0xff] %v1879_v49  ;;  %v1816_v49 = vld [vmem:[%s2027_s11 + $0x1ec] sm:$0xf] }
  0xe6   : > { %1880 = vtanh.f32 %v1142_v50  ;;  %v1636_v50 = vld [vmem:[%s2027_s11 + $0x1f8] sm:$0xf0] }
  0xe7   : > { %1749 = vmatmul.msk.bf16.gmra.mxu3 %vm797_vm1, %v1607_v61  ;;  %v1611_v61 = vor.u32 %v1813_v52, %v1610_v51 }
  0xe9   : > { %v1054_v63 = vpop.f32.mrf.mxu2  ;;  %v879_v3 = vpop.f32.mrf.mxu0 }
  0xea   : > { %v1055_v2 = vadd.f32 %v1054_v63, %v966_v62  ;;  %v968_v4 = vpop.f32.mrf.mxu1  ;;  %v880_v6 = vadd.f32 %v2161_v7, %v879_v3  ;;  %v1151_v11 = vpop.f32.mrf.mxu3  ;;  %v1615_v62 = vor.u32 %v1811_v53, %v1612_v54 }
  0xec   : > { %v1881_v8 = vpop.eup %1880  ;;  %v1144_v9 = vadd.f32 %v1143_v28, %v1055_v2  ;;  %918 = vmatmul.bf16.gmra.mxu0 %v1579_v0  ;;  %v969_v10 = vadd.f32 %v968_v4, %v880_v6  ;;  %v1623_v28 = vor.u32 %v1812_v19, %v1620_v20  ;;  %v1619_v2 = vor.u32 %v1814_v57, %v1618_v56  ;;  %v1628_v19 = vld [vmem:[%s2027_s11 + $0x1f0] sm:$0xf0] }
  0xed   : > { %1244 = vst [vmem:[%s2180_s4 + $0x30] sm:$0xff] %v1881_v8  ;;  %1007 = vmatmul.bf16.gmra.mxu1 %v1583_v1 }
  0xee   : > { %1882 = vtanh.f32 %v1144_v9  ;;  %1096 = vmatmul.bf16.gmra.mxu2 %v1587_v5 }
  0xf1   : > { %v1057_v12 = vpop.f32.mrf.mxu2  ;;  %v881_v14 = vpop.f32.mrf.mxu0 }
  0xf2   : > { %v1058_v13 = vadd.f32 %v1057_v12, %v969_v10  ;;  %v970_v15 = vpop.f32.mrf.mxu1  ;;  %v882_v18 = vadd.f32 %v2161_v7, %v881_v14  ;;  %v1153_v25 = vpop.f32.mrf.mxu3 }
  0xf4   : > { %v1883_v16 = vpop.eup %1882  ;;  %v1147_v17 = vadd.f32 %v1146_v44, %v1058_v13  ;;  %v971_v29 = vadd.f32 %v970_v15, %v882_v18  ;;  %v1815_v18 = vld [vmem:[%s2027_s11 + $0x1e4] sm:$0xf] }
  0xf5   : > { %1245 = vst [vmem:[%s2180_s4 + $0x38] sm:$0xff] %v1883_v16  ;;  %v1626_v16 = vld [vmem:[%s2027_s11 + $0x1e0] sm:$0xf]  ;;  %v1631_v26 = vor.u32 %v1815_v18, %v1628_v19 }
  0xf6   : > { %1884 = vtanh.f32 %v1147_v17  ;;  %v1817_v17 = vld [vmem:[%s2027_s11 + $0x1ec] sm:$0xf0] }
  0xf7   : > { %1750 = vmatmul.msk.bf16.gmra.mxu3 %vm797_vm1, %v1623_v28 }
  0xf9   : > { %v1059_v30 = vpop.f32.mrf.mxu2  ;;  %v884_v34 = vpop.f32.mrf.mxu0 }
  0xfa   : > { %v1060_v33 = vadd.f32 %v1059_v30, %v971_v29  ;;  %v973_v35 = vpop.f32.mrf.mxu1  ;;  %v885_v37 = vadd.f32 %v2161_v7, %v884_v34  ;;  %v1156_v41 = vpop.f32.mrf.mxu3  ;;  %v1635_v30 = vor.u32 %v1818_v22, %v1634_v21 }
  0xfc   : > { %v1885_v38 = vpop.eup %1884  ;;  %v1149_v39 = vadd.f32 %v1148_v58, %v1060_v33  ;;  %923 = vmatmul.bf16.gmra.mxu0 %v1595_v31  ;;  %v974_v40 = vadd.f32 %v973_v35, %v885_v37  ;;  %v1639_v58 = vor.u32 %v1816_v49, %v1636_v50 }
  0xfd   : > { %1246 = vst [vmem:[%s2180_s4 + $0x40] sm:$0xff] %v1885_v38  ;;  %1012 = vmatmul.bf16.gmra.mxu1 %v1599_v32 }
  0xfe   : > { %1886 = vtanh.f32 %v1149_v39  ;;  %1101 = vmatmul.bf16.gmra.mxu2 %v1603_v36 }
 0x101   : > { %v1062_v42 = vpop.f32.mrf.mxu2  ;;  %v886_v44 = vpop.f32.mrf.mxu0 }
 0x102   : > { %v1063_v43 = vadd.f32 %v1062_v42, %v974_v40  ;;  %v975_v45 = vpop.f32.mrf.mxu1  ;;  %v887_v48 = vadd.f32 %v2161_v7, %v886_v44  ;;  %v1158_v55 = vpop.f32.mrf.mxu3 }
 0x104   : > { %v1887_v46 = vpop.eup %1886  ;;  %v1152_v47 = vadd.f32 %v1151_v11, %v1063_v43  ;;  %v976_v59 = vadd.f32 %v975_v45, %v887_v48 }
 0x105   : > { %1247 = vst [vmem:[%s2180_s4 + $0x48] sm:$0xff] %v1887_v46 }
 0x106   : > { %1888 = vtanh.f32 %v1152_v47 }
 0x107   : > { %1751 = vmatmul.msk.bf16.gmra.mxu3 %vm797_vm1, %v1639_v58 }
 0x109   : > { %v1064_v60 = vpop.f32.mrf.mxu2  ;;  %v889_v0 = vpop.f32.mrf.mxu0 }
 0x10a   : > { %v1065_v63 = vadd.f32 %v1064_v60, %v976_v59  ;;  %v978_v1 = vpop.f32.mrf.mxu1  ;;  %v890_v3 = vadd.f32 %v2161_v7, %v889_v0  ;;  %v1161_v8 = vpop.f32.mrf.mxu3 }
 0x10c   : > { %v1889_v4 = vpop.eup %1888  ;;  %v1154_v5 = vadd.f32 %v1153_v25, %v1065_v63  ;;  %928 = vmatmul.bf16.gmra.mxu0 %v1611_v61  ;;  %v979_v6 = vadd.f32 %v978_v1, %v890_v3  ;;  %v1627_v25 = vor.u32 %v1817_v17, %v1626_v16 }
 0x10d   : > { %1248 = vst [vmem:[%s2180_s4 + $0x50] sm:$0xff] %v1889_v4  ;;  %1017 = vmatmul.bf16.gmra.mxu1 %v1615_v62 }
 0x10e   : > { %1890 = vtanh.f32 %v1154_v5  ;;  %1106 = vmatmul.bf16.gmra.mxu2 %v1619_v2 }
 0x111   : > { %v1067_v9 = vpop.f32.mrf.mxu2  ;;  %v891_v11 = vpop.f32.mrf.mxu0 }
 0x112   : > { %v1068_v10 = vadd.f32 %v1067_v9, %v979_v6  ;;  %v980_v12 = vpop.f32.mrf.mxu1  ;;  %v892_v15 = vadd.f32 %v2161_v7, %v891_v11  ;;  %v1163_v20 = vpop.f32.mrf.mxu3 }
 0x114   : > { %v1891_v13 = vpop.eup %1890  ;;  %v1157_v14 = vadd.f32 %v1156_v41, %v1068_v10  ;;  %v981_v23 = vadd.f32 %v980_v12, %v892_v15 }
 0x115   : > { %1249 = vst [vmem:[%s2180_s4 + $0x58] sm:$0xff] %v1891_v13 }
 0x116   : > { %1892 = vtanh.f32 %v1157_v14 }
 0x119   : > { %v1069_v24 = vpop.f32.mrf.mxu2  ;;  %v894_v28 = vpop.f32.mrf.mxu0 }
 0x11a   : > { %v1070_v27 = vadd.f32 %v1069_v24, %v981_v23  ;;  %v983_v29 = vpop.f32.mrf.mxu1  ;;  %v895_v31 = vadd.f32 %v2161_v7, %v894_v28  ;;  %v1166_v35 = vpop.f32.mrf.mxu3 }
 0x11c   : > { %v1893_v32 = vpop.eup %1892  ;;  %v1159_v33 = vadd.f32 %v1158_v55, %v1070_v27  ;;  %933 = vmatmul.bf16.gmra.mxu0 %v1627_v25  ;;  %v984_v34 = vadd.f32 %v983_v29, %v895_v31 }
 0x11d   : > { %1250 = vst [vmem:[%s2180_s4 + $0x60] sm:$0xff] %v1893_v32  ;;  %1022 = vmatmul.bf16.gmra.mxu1 %v1631_v26 }
 0x11e   : > { %1894 = vtanh.f32 %v1159_v33  ;;  %1111 = vmatmul.bf16.gmra.mxu2 %v1635_v30 }
 0x121   : > { %v1072_v36 = vpop.f32.mrf.mxu2  ;;  %v896_v38 = vpop.f32.mrf.mxu0 }
 0x122   : > { %v1073_v37 = vadd.f32 %v1072_v36, %v984_v34  ;;  %v985_v39 = vpop.f32.mrf.mxu1  ;;  %v897_v42 = vadd.f32 %v2161_v7, %v896_v38  ;;  %v1168_v43 = vpop.f32.mrf.mxu3 }
 0x124   : > { %v1895_v40 = vpop.eup %1894  ;;  %v1162_v41 = vadd.f32 %v1161_v8, %v1073_v37  ;;  %v986_v44 = vadd.f32 %v985_v39, %v897_v42 }
 0x125   : > { %1251 = vst [vmem:[%s2180_s4 + $0x68] sm:$0xff] %v1895_v40 }
 0x126   : > { %1896 = vtanh.f32 %v1162_v41 }
 0x129   : > { %v1074_v45 = vpop.f32.mrf.mxu2  ;;  %v899_v47 = vpop.f32.mrf.mxu0 }
 0x12a   : > { %v1075_v46 = vadd.f32 %v1074_v45, %v986_v44  ;;  %v988_v48 = vpop.f32.mrf.mxu1  ;;  %v900_v49 = vadd.f32 %v2161_v7, %v899_v47  ;;  %v1171_v53 = vpop.f32.mrf.mxu3 }
 0x12c   : > { %v1897_v50 = vpop.eup %1896  ;;  %v1164_v51 = vadd.f32 %v1163_v20, %v1075_v46  ;;  %v989_v52 = vadd.f32 %v988_v48, %v900_v49 }
 0x12d   : > { %1252 = vst [vmem:[%s2180_s4 + $0x70] sm:$0xff] %v1897_v50 }
 0x12e   : > { %1898 = vtanh.f32 %v1164_v51 }
 0x131   : > { %v1077_v54 = vpop.f32.mrf.mxu2  ;;  %v901_v56 = vpop.f32.mrf.mxu0 }
 0x132   : > { %v1078_v55 = vadd.f32 %v1077_v54, %v989_v52  ;;  %v990_v57 = vpop.f32.mrf.mxu1  ;;  %v902_v60 = vadd.f32 %v2161_v7, %v901_v56  ;;  %v1173_v61 = vpop.f32.mrf.mxu3 }
 0x134   : > { %v1899_v58 = vpop.eup %1898  ;;  %v1167_v59 = vadd.f32 %v1166_v35, %v1078_v55  ;;  %v991_v62 = vadd.f32 %v990_v57, %v902_v60 }
 0x135   : > { %1253 = vst [vmem:[%s2180_s4 + $0x78] sm:$0xff] %v1899_v58 }
 0x136   : > { %1900 = vtanh.f32 %v1167_v59 }
 0x139   : > { %v1079_v63 = vpop.f32.mrf.mxu2  ;;  %v904_v1 = vpop.f32.mrf.mxu0 }
 0x13a   : > { %v1080_v0 = vadd.f32 %v1079_v63, %v991_v62  ;;  %v993_v2 = vpop.f32.mrf.mxu1  ;;  %v905_v3 = vadd.f32 %v2161_v7, %v904_v1  ;;  %v1176_v8 = vpop.f32.mrf.mxu3 }
 0x13c   : > { %v1901_v4 = vpop.eup %1900  ;;  %v1169_v5 = vadd.f32 %v1168_v43, %v1080_v0  ;;  %v994_v6 = vadd.f32 %v993_v2, %v905_v3 }
 0x13d   : > { %1254 = vst [vmem:[%s2180_s4 + $0x80] sm:$0xff] %v1901_v4 }
 0x13e   : > { %1902 = vtanh.f32 %v1169_v5 }
 0x141   : > { %v1082_v9 = vpop.f32.mrf.mxu2  ;;  %v906_v11 = vpop.f32.mrf.mxu0 }
 0x142   : > { %v1083_v10 = vadd.f32 %v1082_v9, %v994_v6  ;;  %v995_v12 = vpop.f32.mrf.mxu1  ;;  %v907_v15 = vadd.f32 %v2161_v7, %v906_v11  ;;  %v1178_v16 = vpop.f32.mrf.mxu3 }
 0x144   : > { %v1903_v13 = vpop.eup %1902  ;;  %v1172_v14 = vadd.f32 %v1171_v53, %v1083_v10  ;;  %v996_v17 = vadd.f32 %v995_v12, %v907_v15 }
 0x145   : > { %1255 = vst [vmem:[%s2180_s4 + $0x88] sm:$0xff] %v1903_v13 }
 0x146   : > { %1904 = vtanh.f32 %v1172_v14 }
 0x149   : > { %v1084_v18 = vpop.f32.mrf.mxu2  ;;  %v909_v20 = vpop.f32.mrf.mxu0 }
 0x14a   : > { %v1085_v19 = vadd.f32 %v1084_v18, %v996_v17  ;;  %v998_v21 = vpop.f32.mrf.mxu1  ;;  %v910_v22 = vadd.f32 %v2161_v7, %v909_v20  ;;  %v1181_v27 = vpop.f32.mrf.mxu3 }
 0x14c   : > { %v1905_v23 = vpop.eup %1904  ;;  %v1174_v24 = vadd.f32 %v1173_v61, %v1085_v19  ;;  %v999_v25 = vadd.f32 %v998_v21, %v910_v22 }
 0x14d   : > { %1256 = vst [vmem:[%s2180_s4 + $0x90] sm:$0xff] %v1905_v23 }
 0x14e   : > { %1906 = vtanh.f32 %v1174_v24 }
 0x151   : > { %v1087_v26 = vpop.f32.mrf.mxu2  ;;  %v911_v29 = vpop.f32.mrf.mxu0 }
 0x152   : > { %v1088_v28 = vadd.f32 %v1087_v26, %v999_v25  ;;  %v1000_v30 = vpop.f32.mrf.mxu1  ;;  %v912_v33 = vadd.f32 %v2161_v7, %v911_v29  ;;  %v1183_v40 = vpop.f32.mrf.mxu3 }
 0x154   : > { %v1907_v31 = vpop.eup %1906  ;;  %v1177_v32 = vadd.f32 %v1176_v8, %v1088_v28  ;;  %v1001_v34 = vadd.f32 %v1000_v30, %v912_v33 }
 0x155   : > { %1257 = vst [vmem:[%s2180_s4 + $0x98] sm:$0xff] %v1907_v31 }
 0x156   : > { %1908 = vtanh.f32 %v1177_v32 }
 0x159   : > { %v1089_v35 = vpop.f32.mrf.mxu2  ;;  %v914_v37 = vpop.f32.mrf.mxu0 }
 0x15a   : > { %v1090_v36 = vadd.f32 %v1089_v35, %v1001_v34  ;;  %v1003_v38 = vpop.f32.mrf.mxu1  ;;  %v915_v39 = vadd.f32 %v2161_v7, %v914_v37  ;;  %v1186_v51 = vpop.f32.mrf.mxu3 }
 0x15c   : > { %v1909_v41 = vpop.eup %1908  ;;  %v1179_v42 = vadd.f32 %v1178_v16, %v1090_v36  ;;  %v1004_v43 = vadd.f32 %v1003_v38, %v915_v39 }
 0x15d   : > { %1258 = vst [vmem:[%s2180_s4 + $0xa0] sm:$0xff] %v1909_v41 }
 0x15e   : > { %1910 = vtanh.f32 %v1179_v42 }
 0x161   : > { %v1092_v44 = vpop.f32.mrf.mxu2  ;;  %v916_v46 = vpop.f32.mrf.mxu0 }
 0x162   : > { %v1093_v45 = vadd.f32 %v1092_v44, %v1004_v43  ;;  %v1005_v47 = vpop.f32.mrf.mxu1  ;;  %v917_v50 = vadd.f32 %v2161_v7, %v916_v46  ;;  %v1188_v61 = vpop.f32.mrf.mxu3 }
 0x164   : > { %v1911_v48 = vpop.eup %1910  ;;  %v1182_v49 = vadd.f32 %v1181_v27, %v1093_v45  ;;  %v1006_v52 = vadd.f32 %v1005_v47, %v917_v50 }
 0x165   : > { %1259 = vst [vmem:[%s2180_s4 + $0xa8] sm:$0xff] %v1911_v48 }
 0x166   : > { %1912 = vtanh.f32 %v1182_v49 }
 0x169   : > { %v1094_v53 = vpop.f32.mrf.mxu2  ;;  %v919_v55 = vpop.f32.mrf.mxu0 }
 0x16a   : > { %v1095_v54 = vadd.f32 %v1094_v53, %v1006_v52  ;;  %v1008_v56 = vpop.f32.mrf.mxu1  ;;  %v920_v57 = vadd.f32 %v2161_v7, %v919_v55  ;;  %v1191_v8 = vpop.f32.mrf.mxu3 }
 0x16c   : > { %v1913_v58 = vpop.eup %1912  ;;  %v1184_v59 = vadd.f32 %v1183_v40, %v1095_v54  ;;  %v1009_v60 = vadd.f32 %v1008_v56, %v920_v57 }
 0x16d   : > { %1260 = vst [vmem:[%s2180_s4 + $0xb0] sm:$0xff] %v1913_v58 }
 0x16e   : > { %1914 = vtanh.f32 %v1184_v59 }
 0x171   : > { %v1097_v62 = vpop.f32.mrf.mxu2  ;;  %v921_v0 = vpop.f32.mrf.mxu0 }
 0x172   : > { %v1098_v63 = vadd.f32 %v1097_v62, %v1009_v60  ;;  %v1010_v1 = vpop.f32.mrf.mxu1  ;;  %v922_v4 = vadd.f32 %v2161_v7, %v921_v0  ;;  %v1193_v20 = vpop.f32.mrf.mxu3 }
 0x174   : > { %v1915_v2 = vpop.eup %1914  ;;  %v1187_v3 = vadd.f32 %v1186_v51, %v1098_v63  ;;  %v1011_v5 = vadd.f32 %v1010_v1, %v922_v4 }
 0x175   : > { %1261 = vst [vmem:[%s2180_s4 + $0xb8] sm:$0xff] %v1915_v2 }
 0x176   : > { %1916 = vtanh.f32 %v1187_v3 }
 0x179   : > { %v1099_v6 = vpop.f32.mrf.mxu2  ;;  %v924_v10 = vpop.f32.mrf.mxu0 }
 0x17a   : > { %v1100_v9 = vadd.f32 %v1099_v6, %v1011_v5  ;;  %v1013_v11 = vpop.f32.mrf.mxu1  ;;  %v925_v12 = vadd.f32 %v2161_v7, %v924_v10  ;;  %v1196_v32 = vpop.f32.mrf.mxu3 }
 0x17c   : > { %v1917_v13 = vpop.eup %1916  ;;  %v1189_v14 = vadd.f32 %v1188_v61, %v1100_v9  ;;  %v1014_v15 = vadd.f32 %v1013_v11, %v925_v12 }
 0x17d   : > { %1262 = vst [vmem:[%s2180_s4 + $0xc0] sm:$0xff] %v1917_v13 }
 0x17e   : > { %1918 = vtanh.f32 %v1189_v14 }
 0x181   : > { %v1102_v16 = vpop.f32.mrf.mxu2  ;;  %v926_v18 = vpop.f32.mrf.mxu0 }
 0x182   : > { %v1103_v17 = vadd.f32 %v1102_v16, %v1014_v15  ;;  %v1015_v19 = vpop.f32.mrf.mxu1  ;;  %v927_v23 = vadd.f32 %v2161_v7, %v926_v18  ;;  %v1198_v41 = vpop.f32.mrf.mxu3 }
 0x184   : > { %v1919_v21 = vpop.eup %1918  ;;  %v1192_v22 = vadd.f32 %v1191_v8, %v1103_v17  ;;  %v1016_v24 = vadd.f32 %v1015_v19, %v927_v23 }
 0x185   : > { %1263 = vst [vmem:[%s2180_s4 + $0xc8] sm:$0xff] %v1919_v21 }
 0x186   : > { %1920 = vtanh.f32 %v1192_v22 }
 0x189   : > { %v1104_v25 = vpop.f32.mrf.mxu2  ;;  %v929_v27 = vpop.f32.mrf.mxu0 }
 0x18a   : > { %v1105_v26 = vadd.f32 %v1104_v25, %v1016_v24  ;;  %v1018_v28 = vpop.f32.mrf.mxu1  ;;  %v930_v29 = vadd.f32 %v2161_v7, %v929_v27  ;;  %v1201_v51 = vpop.f32.mrf.mxu3 }
 0x18c   : > { %v1921_v30 = vpop.eup %1920  ;;  %v1194_v31 = vadd.f32 %v1193_v20, %v1105_v26  ;;  %v1019_v33 = vadd.f32 %v1018_v28, %v930_v29 }
 0x18d   : > { %1264 = vst [vmem:[%s2180_s4 + $0xd0] sm:$0xff] %v1921_v30 }
 0x18e   : > { %1922 = vtanh.f32 %v1194_v31 }
 0x191   : > { %v1107_v34 = vpop.f32.mrf.mxu2  ;;  %v931_v36 = vpop.f32.mrf.mxu0 }
 0x192   : > { %v1108_v35 = vadd.f32 %v1107_v34, %v1019_v33  ;;  %v1020_v37 = vpop.f32.mrf.mxu1  ;;  %v932_v40 = vadd.f32 %v2161_v7, %v931_v36  ;;  %v1203_v62 = vpop.f32.mrf.mxu3 }
 0x194   : > { %v1923_v38 = vpop.eup %1922  ;;  %v1197_v39 = vadd.f32 %v1196_v32, %v1108_v35  ;;  %v1021_v42 = vadd.f32 %v1020_v37, %v932_v40 }
 0x195   : > { %1265 = vst [vmem:[%s2180_s4 + $0xd8] sm:$0xff] %v1923_v38 }
 0x196   : > { %1924 = vtanh.f32 %v1197_v39 }
 0x199   : > { %v1109_v43 = vpop.f32.mrf.mxu2  ;;  %v934_v45 = vpop.f32.mrf.mxu0 }
 0x19a   : > { %v1110_v44 = vadd.f32 %v1109_v43, %v1021_v42  ;;  %v935_v46 = vadd.f32 %v2161_v7, %v934_v45  ;;  %v1023_v49 = vpop.f32.mrf.mxu1 }
 0x19c   : > { %v1925_v47 = vpop.eup %1924  ;;  %v1199_v48 = vadd.f32 %v1198_v41, %v1110_v44  ;;  %v1024_v50 = vadd.f32 %v1023_v49, %v935_v46 }
 0x19d   : > { %1266 = vst [vmem:[%s2180_s4 + $0xe0] sm:$0xff] %v1925_v47 }
 0x19e   : > { %1926 = vtanh.f32 %v1199_v48 }
 0x1a1   : > { %v1112_v52 = vpop.f32.mrf.mxu2  ;;  %v936_v54 = vpop.f32.mrf.mxu0 }
 0x1a2   : > { %v1113_v53 = vadd.f32 %v1112_v52, %v1024_v50  ;;  %v937_v57 = vadd.f32 %v2161_v7, %v936_v54  ;;  %v1025_v58 = vpop.f32.mrf.mxu1 }
 0x1a4   : > { %v1927_v55 = vpop.eup %1926  ;;  %v1202_v56 = vadd.f32 %v1201_v51, %v1113_v53  ;;  %v1026_v59 = vadd.f32 %v1025_v58, %v937_v57 }
 0x1a5   : > { %1267 = vst [vmem:[%s2180_s4 + $0xe8] sm:$0xff] %v1927_v55 }
 0x1a6   : > { %1928 = vtanh.f32 %v1202_v56 }
 0x1a9   : > { %v1114_v60 = vpop.f32.mrf.mxu2 }
 0x1aa   : > { %v1115_v61 = vadd.f32 %v1114_v60, %v1026_v59 }
 0x1ac   : > { %v1929_v63 = vpop.eup %1928  ;;  %v1204_v0 = vadd.f32 %v1203_v62, %v1115_v61 }
 0x1ad   : > { %1268 = vst [vmem:[%s2180_s4 + $0xf0] sm:$0xff] %v1929_v63 }
 0x1ae   : > { %1930 = vtanh.f32 %v1204_v0 }
 0x1b4   : > { %v1931_v1 = vpop.eup %1930 }
 0x1b5   : > { %1269 = vst [vmem:[%s2180_s4 + $0xf8] sm:$0xff] %v1931_v1 }
 0x1b6 PF: > { %s13_s14 = sadd.s32 1, %s1954_s14   ;;  %s2309_s12 = smov %s1950_s13 }
 0x1b7   : > { %p10_p5 = scmp.ge.s32.totalorder %s13_s14, 4   ;;  %s2310_s13 = smov %s2312_s15 }
 0x1b9   :  { %12 = sbr.rel (!%p10_p5) target bundleno = 2 (0x2), region = 68 }

</bundles_post_ra>
